<compile_context>
chip_gen: v7x
topology: tpu7x:2x2x1
jax: 0.10.0
libtpu: 0.0.40
codegen_flags: <defaults>
</compile_context>

<pallas_src>
import math
from functools import partial

import jax
import jax.numpy as jnp
from jax import lax
from jax.experimental import pallas as pl
from jax.experimental.pallas import tpu as pltpu

DTYPE = jnp.float32        # residual stream / LayerNorm / softmax math
ADTYPE = jnp.bfloat16      # inter-kernel activations that only feed matmuls
WDTYPE = jnp.bfloat16      # weight storage -> bf16 MXU operands, f32 accumulate

NEG_INF = -1e30

# --------------------------------------------------------------------------
# single-buffering (pipeline_mode=pl.Buffered(1)) feature probe
# --------------------------------------------------------------------------
_SINGLE_BUF = False


def probe_single_buffering():
    """Check once (eagerly, outside any jit) whether this JAX/Pallas build
    accepts pipeline_mode=pl.Buffered(1) for grid-invariant blocks."""
    global _SINGLE_BUF
    try:
        def _k(x_ref, b_ref, o_ref):
            o_ref[...] = x_ref[...] + b_ref[...]

        x = jnp.zeros((16, 128), jnp.float32)
        bias = jnp.zeros((1, 128), jnp.float32)
        r = pl.pallas_call(
            _k,
            out_shape=jax.ShapeDtypeStruct((16, 128), jnp.float32),
            grid=(2,),
            in_specs=[pl.BlockSpec((8, 128), lambda i: (i, 0)),
                      pl.BlockSpec((1, 128), lambda i: (0, 0),
                                   pipeline_mode=pl.Buffered(1))],
            out_specs=pl.BlockSpec((8, 128), lambda i: (i, 0)),
        )(x, bias)
        jax.block_until_ready(r)
        _SINGLE_BUF = True
    except Exception:
        _SINGLE_BUF = False
    return _SINGLE_BUF


def _const_spec(shape, grid_rank):
    """BlockSpec for a grid-invariant operand; single-buffered if supported."""
    zeros = (0,) * len(shape)
    imap = {1: (lambda i: zeros),
            2: (lambda i, j: zeros),
            3: (lambda i, j, k: zeros)}[grid_rank]
    if _SINGLE_BUF:
        return pl.BlockSpec(shape, imap, pipeline_mode=pl.Buffered(1))
    return pl.BlockSpec(shape, imap)


def _wbufs():
    """Buffer copies used for grid-invariant blocks in the VMEM budget."""
    return 1 if _SINGLE_BUF else 2


# --------------------------------------------------------------------------
# tiling / compiler-params helpers
# --------------------------------------------------------------------------
def _pick_tile(n, cands):
    for t in cands:
        if n % t == 0:
            return t
    return n                       # fall back to the full (untiled) dim


def _m_tile(M, cap=512):
    """Token tile: capped at 512 (v7x VMEM headroom); prefer >=4 grid steps so
    both v7x TensorCores get multiple pipeline iterations, else >=2."""
    cands = [t for t in (512, 256, 128, 64, 32, 16) if t <= cap and M % t == 0]
    for min_steps in (4, 2, 1):
        for t in cands:
            if M // t >= min_steps:
                return t
    return M


def _seq_tile(S):
    return _pick_tile(S, (256, 128, 64, 32, 16))


def _hd_tile(Hd):
    # FFN hidden chunk (512-1024 lanes keeps v7x well under 64 MiB VMEM).
    return _pick_tile(Hd, (1024, 512, 256, 128))


def _v_tile(V):
    # TODO(synk): vocab sizes not divisible by any candidate fall back to the
    # full width; pad the vocab to a multiple of 128 for production sizes.
    return _pick_tile(V, (2048, 1024, 512, 256, 128))


def _nbytes(shape, dtype):
    return int(math.prod(shape)) * jnp.dtype(dtype).itemsize


def _cparams(sems, bufs):
    """CompilerParams with vmem_limit_bytes derived from the actual blocks.
    `bufs` is a list of (shape, dtype, n_copies)."""
    total = sum(_nbytes(s, d) * n for (s, d, n) in bufs) + (2 << 20)
    total = int(min(max(total, 4 << 20), 64 << 20))
    return pltpu.CompilerParams(dimension_semantics=sems,
                                vmem_limit_bytes=total)


# --------------------------------------------------------------------------
# dense / fused projection kernels
# --------------------------------------------------------------------------
def _qkv_kernel(x_ref, w_ref, b_ref, q_ref, k_ref, v_ref, *, kq):
    y = jnp.dot(x_ref[...].astype(WDTYPE), w_ref[...],
                preferred_element_type=jnp.float32) + b_ref[...]
    q_ref[...] = y[:, :kq].astype(q_ref.dtype)
    k_ref[...] = y[:, kq:2 * kq].astype(k_ref.dtype)
    v_ref[...] = y[:, 2 * kq:].astype(v_ref.dtype)


def qkv_project(x, w, b, kq_dim, out_dim):
    """Fused Q|K|V projection (one matmul); outputs stored bf16."""
    M, K = x.shape
    N = w.shape[1]
    tm = _m_tile(M)
    wb = _wbufs()
    cp = _cparams(("parallel",),
                  [((tm, K), x.dtype, 2), ((K, N), WDTYPE, wb),
                   ((1, N), DTYPE, wb), ((tm, N), DTYPE, 1),
                   ((tm, kq_dim), ADTYPE, 4), ((tm, out_dim), ADTYPE, 2)])
    return pl.pallas_call(
        partial(_qkv_kernel, kq=kq_dim),
        out_shape=(jax.ShapeDtypeStruct((M, kq_dim), ADTYPE),
                   jax.ShapeDtypeStruct((M, kq_dim), ADTYPE),
                   jax.ShapeDtypeStruct((M, out_dim), ADTYPE)),
        grid=(M // tm,),
        in_specs=[pl.BlockSpec((tm, K), lambda i: (i, 0)),
                  _const_spec((K, N), 1),
                  _const_spec((1, N), 1)],
        out_specs=[pl.BlockSpec((tm, kq_dim), lambda i: (i, 0)),
                   pl.BlockSpec((tm, kq_dim), lambda i: (i, 0)),
                   pl.BlockSpec((tm, out_dim), lambda i: (i, 0))],
        compiler_params=cp,
    )(x, w, b.reshape(1, N))


def _kv_kernel(x_ref, w_ref, b_ref, k_ref, v_ref, *, kq):
    y = jnp.dot(x_ref[...].astype(WDTYPE), w_ref[...],
                preferred_element_type=jnp.float32) + b_ref[...]
    k_ref[...] = y[:, :kq].astype(k_ref.dtype)
    v_ref[...] = y[:, kq:].astype(v_ref.dtype)


def kv_project(x, w, b, kq_dim, out_dim):
    """Fused K|V projection from the encoder output; outputs stored bf16."""
    M, K = x.shape
    N = w.shape[1]
    tm = _m_tile(M)
    wb = _wbufs()
    cp = _cparams(("parallel",),
                  [((tm, K), x.dtype, 2), ((K, N), WDTYPE, wb),
                   ((1, N), DTYPE, wb), ((tm, N), DTYPE, 1),
                   ((tm, kq_dim), ADTYPE, 2), ((tm, out_dim), ADTYPE, 2)])
    return pl.pallas_call(
        partial(_kv_kernel, kq=kq_dim),
        out_shape=(jax.ShapeDtypeStruct((M, kq_dim), ADTYPE),
                   jax.ShapeDtypeStruct((M, out_dim), ADTYPE)),
        grid=(M // tm,),
        in_specs=[pl.BlockSpec((tm, K), lambda i: (i, 0)),
                  _const_spec((K, N), 1),
                  _const_spec((1, N), 1)],
        out_specs=[pl.BlockSpec((tm, kq_dim), lambda i: (i, 0)),
                   pl.BlockSpec((tm, out_dim), lambda i: (i, 0))],
        compiler_params=cp,
    )(x, w, b.reshape(1, N))


def _wo_ln_q_kernel(x_ref, wo_ref, bo_ref, r_ref, g_ref, bt_ref,
                    wq_ref, bq_ref, y_ref, q_ref, *, eps):
    # output projection + residual + LayerNorm, then the cross-attention Q
    # projection fused on top (its input is exactly the LN output).
    y = jnp.dot(x_ref[...].astype(WDTYPE), wo_ref[...],
                preferred_element_type=jnp.float32) + bo_ref[...]
    h = y + r_ref[...].astype(jnp.float32)
    mu = jnp.mean(h, axis=-1, keepdims=True)
    var = jnp.mean(jnp.square(h - mu), axis=-1, keepdims=True)
    yn = (h - mu) * lax.rsqrt(var + eps) * g_ref[...] + bt_ref[...]
    y_ref[...] = yn.astype(y_ref.dtype)
    qc = jnp.dot(yn.astype(WDTYPE), wq_ref[...],
                 preferred_element_type=jnp.float32) + bq_ref[...]
    q_ref[...] = qc.astype(q_ref.dtype)


def wo_ln_crossq(x, wo, bo, res, gamma, beta, wq, bq, eps=1e-5):
    M, K = x.shape
    D = wo.shape[1]
    KQ = wq.shape[1]
    tm = _m_tile(M)
    wb = _wbufs()
    cp = _cparams(("parallel",),
                  [((tm, K), x.dtype, 2), ((K, D), WDTYPE, wb),
                   ((D, KQ), WDTYPE, wb), ((1, D), DTYPE, 3 * wb),
                   ((1, KQ), DTYPE, wb), ((tm, D), DTYPE, 4),
                   ((tm, KQ), ADTYPE, 2)])
    return pl.pallas_call(
        partial(_wo_ln_q_kernel, eps=eps),
        out_shape=(jax.ShapeDtypeStruct((M, D), DTYPE),
                   jax.ShapeDtypeStruct((M, KQ), ADTYPE)),
        grid=(M // tm,),
        in_specs=[pl.BlockSpec((tm, K), lambda i: (i, 0)),
                  _const_spec((K, D), 1),
                  _const_spec((1, D), 1),
                  pl.BlockSpec((tm, D), lambda i: (i, 0)),
                  _const_spec((1, D), 1),
                  _const_spec((1, D), 1),
                  _const_spec((D, KQ), 1),
                  _const_spec((1, KQ), 1)],
        out_specs=[pl.BlockSpec((tm, D), lambda i: (i, 0)),
                   pl.BlockSpec((tm, KQ), lambda i: (i, 0))],
        compiler_params=cp,
    )(x, wo, bo.reshape(1, D), res, gamma.reshape(1, D), beta.reshape(1, D),
      wq, bq.reshape(1, KQ))


def _wo_ln_kernel(x_ref, w_ref, b_ref, r_ref, g_ref, bt_ref, o_ref, *, eps):
    y = jnp.dot(x_ref[...].astype(WDTYPE), w_ref[...],
                preferred_element_type=jnp.float32) + b_ref[...]
    h = y + r_ref[...].astype(jnp.float32)
    mu = jnp.mean(h, axis=-1, keepdims=True)
    var = jnp.mean(jnp.square(h - mu), axis=-1, keepdims=True)
    o_ref[...] = ((h - mu) * lax.rsqrt(var + eps) * g_ref[...]
                  + bt_ref[...]).astype(o_ref.dtype)


def linear_add_ln(x, w, b, res, gamma, beta, eps=1e-5):
    """Output projection fused with residual add + LayerNorm."""
    M, K = x.shape
    N = w.shape[1]
    tm = _m_tile(M)
    wb = _wbufs()
    cp = _cparams(("parallel",),
                  [((tm, K), x.dtype, 2), ((K, N), WDTYPE, wb),
                   ((1, N), DTYPE, 3 * wb), ((tm, N), DTYPE, 4)])
    return pl.pallas_call(
        partial(_wo_ln_kernel, eps=eps),
        out_shape=jax.ShapeDtypeStruct((M, N), DTYPE),
        grid=(M // tm,),
        in_specs=[pl.BlockSpec((tm, K), lambda i: (i, 0)),
                  _const_spec((K, N), 1),
                  _const_spec((1, N), 1),
                  pl.BlockSpec((tm, N), lambda i: (i, 0)),
                  _const_spec((1, N), 1),
                  _const_spec((1, N), 1)],
        out_specs=pl.BlockSpec((tm, N), lambda i: (i, 0)),
        compiler_params=cp,
    )(x, w, b.reshape(1, N), res, gamma.reshape(1, N), beta.reshape(1, N))


# --------------------------------------------------------------------------
# FFN with the hidden dim chunked across a grid axis (VMEM-bounded)
# --------------------------------------------------------------------------
def _ffn_kernel(x_ref, w1_ref, b1_ref, w2_ref, b2_ref, g_ref, bt_ref,
                o_ref, acc_ref, *, eps):
    j = pl.program_id(1)

    @pl.when(j == 0)
    def _():
        acc_ref[...] = jnp.zeros(acc_ref.shape, acc_ref.dtype)

    x = x_ref[...].astype(jnp.float32)
    h = jnp.dot(x.astype(WDTYPE), w1_ref[...],
                preferred_element_type=jnp.float32) + b1_ref[...]
    h = jnp.maximum(h, 0.0)
    acc_ref[...] += jnp.dot(h.astype(WDTYPE), w2_ref[...],
                            preferred_element_type=jnp.float32)

    @pl.when(j == pl.num_programs(1) - 1)
    def _():
        z = acc_ref[...] + b2_ref[...] + x          # residual == kernel input
        mu = jnp.mean(z, axis=-1, keepdims=True)
        var = jnp.mean(jnp.square(z - mu), axis=-1, keepdims=True)
        o_ref[...] = ((z - mu) * lax.rsqrt(var + eps) * g_ref[...]
                      + bt_ref[...]).astype(o_ref.dtype)


def ffn_add_ln(x, w1, b1, w2, b2, gamma, beta, eps=1e-5):
    """ff1 + ReLU + ff2 + residual + LayerNorm; the hidden activation is
    processed in <= 1024-lane chunks so it never needs to be fully resident."""
    M, D = x.shape
    Hd = w1.shape[1]
    tm = _m_tile(M)
    th = _hd_tile(Hd)
    wb = _wbufs()
    cp = _cparams(("parallel", "arbitrary"),
                  [((tm, D), DTYPE, 2), ((D, th), WDTYPE, 2),
                   ((1, th), DTYPE, 2), ((th, D), WDTYPE, 2),
                   ((1, D), DTYPE, 3 * wb), ((tm, D), DTYPE, 2),
                   ((tm, th), DTYPE, 1), ((tm, D), DTYPE, 1)])
    return pl.pallas_call(
        partial(_ffn_kernel, eps=eps),
        out_shape=jax.ShapeDtypeStruct((M, D), DTYPE),
        grid=(M // tm, Hd // th),
        in_specs=[pl.BlockSpec((tm, D), lambda i, j: (i, 0)),
                  pl.BlockSpec((D, th), lambda i, j: (0, j)),
                  pl.BlockSpec((1, th), lambda i, j: (0, j)),
                  pl.BlockSpec((th, D), lambda i, j: (j, 0)),
                  _const_spec((1, D), 2),
                  _const_spec((1, D), 2),
                  _const_spec((1, D), 2)],
        out_specs=pl.BlockSpec((tm, D), lambda i, j: (i, 0)),
        scratch_shapes=[pltpu.VMEM((tm, D), jnp.float32)],
        compiler_params=cp,
    )(x, w1, b1.reshape(1, Hd), w2, b2.reshape(1, D),
      gamma.reshape(1, D), beta.reshape(1, D))


# --------------------------------------------------------------------------
# flash-style attention: grid (B, Sq tiles, Sk tiles), online softmax scratch
# --------------------------------------------------------------------------
def _attention_kernel(q_ref, k_ref, v_ref, o_ref, m_sc, l_sc, acc_sc,
                      *, causal, scale, H, tq, tk):
    iq = pl.program_id(1)
    ik = pl.program_id(2)

    @pl.when(ik == 0)
    def _():
        m_sc[...] = jnp.full(m_sc.shape, NEG_INF, m_sc.dtype)
        l_sc[...] = jnp.zeros(l_sc.shape, l_sc.dtype)
        acc_sc[...] = jnp.zeros(acc_sc.shape, acc_sc.dtype)

    q = q_ref[0]                                  # (tq, H*dk) bf16
    k = k_ref[0]                                  # (tk, H*dk) bf16
    v = v_ref[0]                                  # (tk, H*dv) bf16
    dk = q.shape[1] // H
    dv = v.shape[1] // H

    if causal:
        row = iq * tq + lax.broadcasted_iota(jnp.int32, (tq, tk), 0)
        col = ik * tk + lax.broadcasted_iota(jnp.int32, (tq, tk), 1)
        mask = col <= row

    def compute():
        # TODO(synk): per-head dims (kq_dim/H) are << 128 lanes, so the MXU
        # runs well below peak; the spec fixes head dims, so attention here is
        # VPU/EUP-bound rather than MXU-bound.
        for h in range(H):                        # static unroll over heads
            qh = q[:, h * dk:(h + 1) * dk]
            kh = k[:, h * dk:(h + 1) * dk]
            vh = v[:, h * dv:(h + 1) * dv]
            # contract dim 1 with dim 1 -> no in-kernel transpose of K
            s = lax.dot_general(qh, kh, (((1,), (1,)), ((), ())),
                                preferred_element_type=jnp.float32) * scale
            if causal:
                s = jnp.where(mask, s, NEG_INF)
            m_prev = m_sc[h]                      # (tq, 1)
            l_prev = l_sc[h]
            m_new = jnp.maximum(m_prev, jnp.max(s, axis=-1, keepdims=True))
            alpha = jnp.exp(m_prev - m_new)
            p = jnp.exp(s - m_new)
            l_sc[h] = alpha * l_prev + jnp.sum(p, axis=-1, keepdims=True)
            m_sc[h] = m_new
            pv = jnp.dot(p.astype(WDTYPE), vh,
                         preferred_element_type=jnp.float32)
            acc_sc[:, h * dv:(h + 1) * dv] = (
                alpha * acc_sc[:, h * dv:(h + 1) * dv] + pv)

    if causal:
        # skip key tiles that are entirely above the diagonal
        pl.when(ik * tk <= iq * tq + (tq - 1))(compute)
    else:
        compute()

    @pl.when(ik == pl.num_programs(2) - 1)
    def _():
        for h in range(H):
            acc_sc[:, h * dv:(h + 1) * dv] = (
                acc_sc[:, h * dv:(h + 1) * dv]
                * pl.reciprocal(l_sc[h], approx=True))
        o_ref[0] = acc_sc[...].astype(o_ref.dtype)


def attention(q, k, v, causal, num_heads):
    B, Sq, QK = q.shape
    _, Sk, VD = v.shape
    dk = QK // num_heads
    scale = 1.0 / math.sqrt(dk)
    tq = _seq_tile(Sq)
    tk = _seq_tile(Sk)
    cp = _cparams(("parallel", "parallel", "arbitrary"),
                  [((tq, QK), ADTYPE, 2), ((tk, QK), ADTYPE, 2),
                   ((tk, VD), ADTYPE, 2), ((tq, VD), ADTYPE, 2),
                   ((num_heads, tq, 1), DTYPE, 2), ((tq, VD), DTYPE, 1),
                   ((tq, tk), DTYPE, 4)])
    return pl.pallas_call(
        partial(_attention_kernel, causal=causal, scale=scale,
                H=num_heads, tq=tq, tk=tk),
        out_shape=jax.ShapeDtypeStruct((B, Sq, VD), ADTYPE),
        grid=(B, Sq // tq, Sk // tk),
        in_specs=[pl.BlockSpec((1, tq, QK), lambda b, i, j: (b, i, 0)),
                  pl.BlockSpec((1, tk, QK), lambda b, i, j: (b, j, 0)),
                  pl.BlockSpec((1, tk, VD), lambda b, i, j: (b, j, 0))],
        out_specs=pl.BlockSpec((1, tq, VD), lambda b, i, j: (b, i, 0)),
        scratch_shapes=[pltpu.VMEM((num_heads, tq, 1), jnp.float32),
                        pltpu.VMEM((num_heads, tq, 1), jnp.float32),
                        pltpu.VMEM((tq, VD), jnp.float32)],
        compiler_params=cp,
    )(q, k, v)


# --------------------------------------------------------------------------
# final projection + softmax: vocab-tiled two-pass (online stats + normalize)
# --------------------------------------------------------------------------
def _logit_stats_kernel(x_ref, w_ref, b_ref, m_ref, l_ref, m_sc, l_sc):
    j = pl.program_id(1)

    @pl.when(j == 0)
    def _():
        m_sc[...] = jnp.full(m_sc.shape, NEG_INF, m_sc.dtype)
        l_sc[...] = jnp.zeros(l_sc.shape, l_sc.dtype)

    y = jnp.dot(x_ref[...].astype(WDTYPE), w_ref[...],
                preferred_element_type=jnp.float32) + b_ref[...]
    m_prev = m_sc[...]
    m_new = jnp.maximum(m_prev, jnp.max(y, axis=-1, keepdims=True))
    l_sc[...] = (l_sc[...] * jnp.exp(m_prev - m_new)
                 + jnp.sum(jnp.exp(y - m_new), axis=-1, keepdims=True))
    m_sc[...] = m_new

    @pl.when(j == pl.num_programs(1) - 1)
    def _():
        m_ref[...] = m_sc[...]
        l_ref[...] = l_sc[...]


def _softmax_norm_kernel(x_ref, w_ref, b_ref, m_ref, l_ref, o_ref):
    y = jnp.dot(x_ref[...].astype(WDTYPE), w_ref[...],
                preferred_element_type=jnp.float32) + b_ref[...]
    # exact division so the output rows are properly normalised probabilities
    o_ref[...] = (jnp.exp(y - m_ref[...]) / l_ref[...]).astype(o_ref.dtype)


def linear_softmax(x, w, b):
    M, K = x.shape
    V = w.shape[1]
    tm = _m_tile(M)
    tv = _v_tile(V)
    nv = V // tv
    b2 = b.reshape(1, V)
    common = [((tm, K), x.dtype, 2), ((K, tv), WDTYPE, 2),
              ((1, tv), DTYPE, 2), ((tm, tv), DTYPE, 4)]

    m, l = pl.pallas_call(
        _logit_stats_kernel,
        out_shape=(jax.ShapeDtypeStruct((M, 1), DTYPE),
                   jax.ShapeDtypeStruct((M, 1), DTYPE)),
        grid=(M // tm, nv),
        in_specs=[pl.BlockSpec((tm, K), lambda i, j: (i, 0)),
                  pl.BlockSpec((K, tv), lambda i, j: (0, j)),
                  pl.BlockSpec((1, tv), lambda i, j: (0, j))],
        out_specs=[pl.BlockSpec((tm, 1), lambda i, j: (i, 0)),
                   pl.BlockSpec((tm, 1), lambda i, j: (i, 0))],
        scratch_shapes=[pltpu.VMEM((tm, 1), jnp.float32),
                        pltpu.VMEM((tm, 1), jnp.float32)],
        compiler_params=_cparams(("parallel", "arbitrary"),
                                 common + [((tm, 1), DTYPE, 8)]),
    )(x, w, b2)

    return pl.pallas_call(
        _softmax_norm_kernel,
        out_shape=jax.ShapeDtypeStruct((M, V), DTYPE),
        grid=(M // tm, nv),
        in_specs=[pl.BlockSpec((tm, K), lambda i, j: (i, 0)),
                  pl.BlockSpec((K, tv), lambda i, j: (0, j)),
                  pl.BlockSpec((1, tv), lambda i, j: (0, j)),
                  pl.BlockSpec((tm, 1), lambda i, j: (i, 0)),
                  pl.BlockSpec((tm, 1), lambda i, j: (i, 0))],
        out_specs=pl.BlockSpec((tm, tv), lambda i, j: (i, j)),
        compiler_params=_cparams(("parallel", "parallel"),
                                 common + [((tm, 1), DTYPE, 4),
                                           ((tm, tv), DTYPE, 2)]),
    )(x, w, b2, m, l)


# --------------------------------------------------------------------------
# model wiring
# --------------------------------------------------------------------------
def decoder_layer_forward(x2d, e2d, p, B, S, S_enc, H, kq_dim, dec_dim):
    # TODO(synk): nn.Dropout layers run in eval mode (identity) — no RNG dropout.
    residual = x2d

    # masked self-attention: fused QKV, flash attention, fused WO+res+LN that
    # also emits the cross-attention query projection (saves an HBM round trip)
    q, k, v = qkv_project(x2d, p["self"]["w_qkv"], p["self"]["b_qkv"],
                          kq_dim, dec_dim)
    attn = attention(q.reshape(B, S, kq_dim), k.reshape(B, S, kq_dim),
                     v.reshape(B, S, dec_dim), causal=True, num_heads=H)
    y, qc = wo_ln_crossq(attn.reshape(B * S, dec_dim),
                         p["self"]["wo"], p["self"]["bo"], residual,
                         p["ln1_g"], p["ln1_b"],
                         p["cross"]["wq"], p["cross"]["bq"])
    residual = y

    # cross attention
    kc, vc = kv_project(e2d, p["cross"]["w_kv"], p["cross"]["b_kv"],
                        kq_dim, dec_dim)
    attn = attention(qc.reshape(B, S, kq_dim), kc.reshape(B, S_enc, kq_dim),
                     vc.reshape(B, S_enc, dec_dim), causal=False, num_heads=H)
    z = linear_add_ln(attn.reshape(B * S, dec_dim),
                      p["cross"]["wo"], p["cross"]["bo"],
                      residual, p["ln2_g"], p["ln2_b"])

    # FFN: ff1 + ReLU + ff2 + residual + LN (hidden dim chunked)
    return ffn_add_ln(z, p["ff1_w"], p["ff1_b"], p["ff2_w"], p["ff2_b"],
                      p["ln3_g"], p["ln3_b"])


def positional_encoding(max_seq_len, d):
    pos = jnp.arange(max_seq_len, dtype=DTYPE)[:, None]
    div = jnp.exp(jnp.arange(0, d, 2, dtype=DTYPE) * (-math.log(10000.0) / d))
    ang = pos * div
    return jnp.stack([jnp.sin(ang), jnp.cos(ang)], axis=-1).reshape(max_seq_len, d)


def decoder_forward(tokens, encoder_output, params, *, dec_dim, kq_dim,
                    max_seq_len, num_heads, use_pos_enc=True):
    B, S = tokens.shape
    _, S_enc, E = encoder_output.shape
    emb = jnp.take(params["embed"], tokens, axis=0)
    z = emb * jnp.sqrt(jnp.asarray(dec_dim, DTYPE))
    if use_pos_enc:
        pe = positional_encoding(max_seq_len, dec_dim)
        z = z + pe[None, :S, :]
    z2d = z.reshape(B * S, dec_dim)
    e2d = encoder_output.reshape(B * S_enc, E)
    for lp in params["layers"]:
        z2d = decoder_layer_forward(z2d, e2d, lp, B, S, S_enc,
                                    num_heads, kq_dim, dec_dim)
    y = linear_softmax(z2d, params["final_w"], params["final_b"])
    return y.reshape(B, S, -1)


# --------------------------------------------------------------------------
# parameter init (matches the PyTorch module's layer structure)
# --------------------------------------------------------------------------
def _init_linear(key, fan_in, fan_out):
    kw, kb = jax.random.split(key)
    bound = 1.0 / math.sqrt(fan_in)
    w = jax.random.uniform(kw, (fan_in, fan_out), DTYPE, -bound, bound)
    b = jax.random.uniform(kb, (fan_out,), DTYPE, -bound, bound)
    return w, b


def _init_self_mha(key, in_dim, out_dim, kq_dim):
    ks = jax.random.split(key, 4)
    wq, bq = _init_linear(ks[0], in_dim, kq_dim)
    wk, bk = _init_linear(ks[1], in_dim, kq_dim)
    wv, bv = _init_linear(ks[2], in_dim, out_dim)
    wo, bo = _init_linear(ks[3], out_dim, out_dim)
    return dict(
        w_qkv=jnp.concatenate([wq, wk, wv], axis=1).astype(WDTYPE),
        b_qkv=jnp.concatenate([bq, bk, bv]),
        wo=wo.astype(WDTYPE), bo=bo)


def _init_cross_mha(key, q_in, kv_in, out_dim, kq_dim):
    ks = jax.random.split(key, 4)
    wq, bq = _init_linear(ks[0], q_in, kq_dim)
    wk, bk = _init_linear(ks[1], kv_in, kq_dim)
    wv, bv = _init_linear(ks[2], kv_in, out_dim)
    wo, bo = _init_linear(ks[3], out_dim, out_dim)
    return dict(
        wq=wq.astype(WDTYPE), bq=bq,
        w_kv=jnp.concatenate([wk, wv], axis=1).astype(WDTYPE),
        b_kv=jnp.concatenate([bk, bv]),
        wo=wo.astype(WDTYPE), bo=bo)


def init_decoder_params(key, *, dec_dim, enc_dim, kq_dim, vocab_size,
                        num_layers, linear_stretch, padding_index=0):
    keys = jax.random.split(key, num_layers + 2)
    embed = jax.random.normal(keys[0], (vocab_size, dec_dim), DTYPE)
    embed = embed.at[padding_index].set(0.0)          # padding_idx row is zero
    layers = []
    for li in range(num_layers):
        ks = jax.random.split(keys[1 + li], 4)
        lp = dict(
            self=_init_self_mha(ks[0], dec_dim, dec_dim, kq_dim),
            cross=_init_cross_mha(ks[1], dec_dim, enc_dim, dec_dim, kq_dim),
        )
        w1, b1 = _init_linear(ks[2], dec_dim, linear_stretch * dec_dim)
        w2, b2 = _init_linear(ks[3], linear_stretch * dec_dim, dec_dim)
        lp["ff1_w"], lp["ff1_b"] = w1.astype(WDTYPE), b1
        lp["ff2_w"], lp["ff2_b"] = w2.astype(WDTYPE), b2
        for n in ("1", "2", "3"):
            lp[f"ln{n}_g"] = jnp.ones((dec_dim,), DTYPE)
            lp[f"ln{n}_b"] = jnp.zeros((dec_dim,), DTYPE)
        layers.append(lp)
    fw, fb = _init_linear(keys[-1], dec_dim, vocab_size)
    return dict(embed=embed, layers=layers,
                final_w=fw.astype(WDTYPE), final_b=fb)


# --------------------------------------------------------------------------
# demo
# --------------------------------------------------------------------------
if __name__ == "__main__":
    probe_single_buffering()   # enable Buffered(1) for constant blocks if supported

    B, S, S_ENC = 2, 16, 16
    DEC_DIM = 128
    ENC_DIM = 128
    KQ_DIM = 128
    VOCAB = 256
    MAX_SEQ = 32
    NUM_HEADS = 8
    NUM_LAYERS = 2
    STRETCH = 2

    root = jax.random.PRNGKey(0)
    k_par, k_tok, k_enc = jax.random.split(root, 3)

    params = init_decoder_params(
        k_par, dec_dim=DEC_DIM, enc_dim=ENC_DIM, kq_dim=KQ_DIM,
        vocab_size=VOCAB, num_layers=NUM_LAYERS, linear_stretch=STRETCH)

    tokens = jax.random.randint(k_tok, (B, S), 0, VOCAB, dtype=jnp.int32)
    encoder_output = jax.random.normal(k_enc, (B, S_ENC, ENC_DIM), DTYPE)

    fwd = jax.jit(partial(decoder_forward, dec_dim=DEC_DIM, kq_dim=KQ_DIM,
                          max_seq_len=MAX_SEQ, num_heads=NUM_HEADS,
                          use_pos_enc=True))
    out = fwd(tokens, encoder_output, params)
    out = jax.block_until_ready(out)

    assert out.shape == (B, S, VOCAB)
    assert bool(jnp.all(jnp.isfinite(out)))
    # exact-division softmax epilogue -> rows sum to 1 tightly
    assert bool(jnp.allclose(jnp.sum(out, axis=-1), 1.0, atol=1e-3))
    print("KERNEL_OK")
</pallas_src>

<mosaic_0001>
module attributes {stable_mosaic.version = 11 : i64} {
  func.func @_k(%arg0: i32, %arg1: memref<8x128xf32, #tpu.memory_space<vmem>>, %arg2: memref<1x128xf32, #tpu.memory_space<vmem>>, %arg3: memref<8x128xf32, #tpu.memory_space<vmem>>) attributes {dimension_semantics = [#tpu.dimension_semantics<arbitrary>], iteration_bounds = array<i64: 2>, scalar_prefetch = 0 : i64, scratch_operands = 0 : i64, tpu.core_type = #tpu.core_type<tc>, window_params = [{transform_indices = @transform_0, window_bounds = array<i64: 8, 128>}, {pipeline_mode = #tpu.pipeline_mode<synchronous>, transform_indices = @transform_1, window_bounds = array<i64: 1, 128>}, {transform_indices = @transform_2, window_bounds = array<i64: 8, 128>}]} {
    %c0 = arith.constant 0 : index
    %c0_0 = arith.constant 0 : index
    %0 = vector.load %arg1[%c0, %c0_0] : memref<8x128xf32, #tpu.memory_space<vmem>>, vector<8x128xf32>
    %c0_1 = arith.constant 0 : index
    %c0_2 = arith.constant 0 : index
    %1 = vector.load %arg2[%c0_1, %c0_2] : memref<1x128xf32, #tpu.memory_space<vmem>>, vector<1x128xf32>
    %2 = vector.broadcast %1 : vector<1x128xf32> to vector<8x128xf32>
    %3 = arith.addf %0, %2 : vector<8x128xf32>
    %c0_3 = arith.constant 0 : index
    %c0_4 = arith.constant 0 : index
    %4 = vector.load %arg3[%c0_3, %c0_4] : memref<8x128xf32, #tpu.memory_space<vmem>>, vector<8x128xf32>
    tpu.vector_store %arg3[%c0_3, %c0_4], %3 {strides = array<i32>} : memref<8x128xf32, #tpu.memory_space<vmem>>, vector<8x128xf32>,
    return
  }
  func.func @transform_0(%arg0: i32) -> (i32, i32) {
    %c0_i32 = arith.constant 0 : i32
    %c0_i32_0 = arith.constant 0 : i32
    return %arg0, %c0_i32 : i32, i32
  }
  func.func @transform_1(%arg0: i32) -> (i32, i32) {
    %c0_i32 = arith.constant 0 : i32
    %c0_i32_0 = arith.constant 0 : i32
    %c0_i32_1 = arith.constant 0 : i32
    return %c0_i32, %c0_i32_0 : i32, i32
  }
  func.func @transform_2(%arg0: i32) -> (i32, i32) {
    %c0_i32 = arith.constant 0 : i32
    %c0_i32_0 = arith.constant 0 : i32
    return %arg0, %c0_i32 : i32, i32
  }
}

module attributes {stable_mosaic.version = 11 : i64} {
  func.func @_qkv_kernel(%arg0: i32, %arg1: memref<16x128xf32, #tpu.memory_space<vmem>>, %arg2: memref<128x384xbf16, #tpu.memory_space<vmem>>, %arg3: memref<1x384xf32, #tpu.memory_space<vmem>>, %arg4: memref<16x128xbf16, #tpu.memory_space<vmem>>, %arg5: memref<16x128xbf16, #tpu.memory_space<vmem>>, %arg6: memref<16x128xbf16, #tpu.memory_space<vmem>>) attributes {dimension_semantics = [#tpu.dimension_semantics<parallel>], iteration_bounds = array<i64: 2>, scalar_prefetch = 0 : i64, scratch_operands = 0 : i64, tpu.core_type = #tpu.core_type<tc>, window_params = [{transform_indices = @transform_0, window_bounds = array<i64: 16, 128>}, {pipeline_mode = #tpu.pipeline_mode<synchronous>, transform_indices = @transform_1, window_bounds = array<i64: 128, 384>}, {pipeline_mode = #tpu.pipeline_mode<synchronous>, transform_indices = @transform_2, window_bounds = array<i64: 1, 384>}, {transform_indices = @transform_3, window_bounds = array<i64: 16, 128>}, {transform_indices = @transform_4, window_bounds = array<i64: 16, 128>}, {transform_indices = @transform_5, window_bounds = array<i64: 16, 128>}]} {
    %c0 = arith.constant 0 : index
    %c0_0 = arith.constant 0 : index
    %0 = vector.load %arg1[%c0, %c0_0] : memref<16x128xf32, #tpu.memory_space<vmem>>, vector<16x128xf32>
    %1 = arith.truncf %0 : vector<16x128xf32> to vector<16x128xbf16>
    %c0_1 = arith.constant 0 : index
    %c0_2 = arith.constant 0 : index
    %2 = vector.load %arg2[%c0_1, %c0_2] : memref<128x384xbf16, #tpu.memory_space<vmem>>, vector<128x384xbf16>
    %cst = arith.constant dense<0.000000e+00> : vector<16x384xf32>
    %3 = tpu.matmul %1, %2, %cst {dimension_numbers = #tpu.dot_dimension_numbers<[1], [0], [0], [1], [0, 0, 1, 1], [], []>} : vector<16x128xbf16>, vector<128x384xbf16>, vector<16x384xf32> -> vector<16x384xf32>
    %c0_3 = arith.constant 0 : index
    %c0_4 = arith.constant 0 : index
    %4 = vector.load %arg3[%c0_3, %c0_4] : memref<1x384xf32, #tpu.memory_space<vmem>>, vector<1x384xf32>
    %5 = vector.broadcast %4 : vector<1x384xf32> to vector<16x384xf32>
    %6 = arith.addf %3, %5 : vector<16x384xf32>
    %7 = vector.extract_strided_slice %6 {offsets = [0, 0], sizes = [16, 128], strides = [1, 1]} : vector<16x384xf32> to vector<16x128xf32>
    %8 = arith.truncf %7 : vector<16x128xf32> to vector<16x128xbf16>
    %c0_5 = arith.constant 0 : index
    %c0_6 = arith.constant 0 : index
    %9 = vector.load %arg4[%c0_5, %c0_6] : memref<16x128xbf16, #tpu.memory_space<vmem>>, vector<16x128xbf16>
    tpu.vector_store %arg4[%c0_5, %c0_6], %8 {strides = array<i32>} : memref<16x128xbf16, #tpu.memory_space<vmem>>, vector<16x128xbf16>,
    %10 = vector.extract_strided_slice %6 {offsets = [0, 128], sizes = [16, 128], strides = [1, 1]} : vector<16x384xf32> to vector<16x128xf32>
    %11 = arith.truncf %10 : vector<16x128xf32> to vector<16x128xbf16>
    %c0_7 = arith.constant 0 : index
    %c0_8 = arith.constant 0 : index
    %12 = vector.load %arg5[%c0_7, %c0_8] : memref<16x128xbf16, #tpu.memory_space<vmem>>, vector<16x128xbf16>
    tpu.vector_store %arg5[%c0_7, %c0_8], %11 {strides = array<i32>} : memref<16x128xbf16, #tpu.memory_space<vmem>>, vector<16x128xbf16>,
    %13 = vector.extract_strided_slice %6 {offsets = [0, 256], sizes = [16, 128], strides = [1, 1]} : vector<16x384xf32> to vector<16x128xf32>
    %14 = arith.truncf %13 : vector<16x128xf32> to vector<16x128xbf16>
    %c0_9 = arith.constant 0 : index
    %c0_10 = arith.constant 0 : index
    %15 = vector.load %arg6[%c0_9, %c0_10] : memref<16x128xbf16, #tpu.memory_space<vmem>>, vector<16x128xbf16>
    tpu.vector_store %arg6[%c0_9, %c0_10], %14 {strides = array<i32>} : memref<16x128xbf16, #tpu.memory_space<vmem>>, vector<16x128xbf16>,
    return
  }
  func.func @transform_0(%arg0: i32) -> (i32, i32) {
    %c0_i32 = arith.constant 0 : i32
    %c0_i32_0 = arith.constant 0 : i32
    return %arg0, %c0_i32 : i32, i32
  }
  func.func @transform_1(%arg0: i32) -> (i32, i32) {
    %c0_i32 = arith.constant 0 : i32
    %c0_i32_0 = arith.constant 0 : i32
    %c0_i32_1 = arith.constant 0 : i32
    return %c0_i32, %c0_i32_0 : i32, i32
  }
  func.func @transform_2(%arg0: i32) -> (i32, i32) {
    %c0_i32 = arith.constant 0 : i32
    %c0_i32_0 = arith.constant 0 : i32
    %c0_i32_1 = arith.constant 0 : i32
    return %c0_i32, %c0_i32_0 : i32, i32
  }
  func.func @transform_3(%arg0: i32) -> (i32, i32) {
    %c0_i32 = arith.constant 0 : i32
    %c0_i32_0 = arith.constant 0 : i32
    return %arg0, %c0_i32 : i32, i32
  }
  func.func @transform_4(%arg0: i32) -> (i32, i32) {
    %c0_i32 = arith.constant 0 : i32
    %c0_i32_0 = arith.constant 0 : i32
    return %arg0, %c0_i32 : i32, i32
  }
  func.func @transform_5(%arg0: i32) -> (i32, i32) {
    %c0_i32 = arith.constant 0 : i32
    %c0_i32_0 = arith.constant 0 : i32
    return %arg0, %c0_i32 : i32, i32
  }
}

module attributes {stable_mosaic.version = 11 : i64} {
  func.func @_attention_kernel(%arg0: i32, %arg1: i32, %arg2: i32, %arg3: memref<1x16x128xbf16, #tpu.memory_space<vmem>>, %arg4: memref<1x16x128xbf16, #tpu.memory_space<vmem>>, %arg5: memref<1x16x128xbf16, #tpu.memory_space<vmem>>, %arg6: memref<1x16x128xbf16, #tpu.memory_space<vmem>>, %arg7: memref<8x16x1xf32, #tpu.memory_space<vmem>>, %arg8: memref<8x16x1xf32, #tpu.memory_space<vmem>>, %arg9: memref<16x128xf32, #tpu.memory_space<vmem>>) attributes {dimension_semantics = [#tpu.dimension_semantics<parallel>, #tpu.dimension_semantics<parallel>, #tpu.dimension_semantics<arbitrary>], iteration_bounds = array<i64: 2, 1, 1>, scalar_prefetch = 0 : i64, scratch_operands = 3 : i64, tpu.core_type = #tpu.core_type<tc>, window_params = [{transform_indices = @transform_0, window_bounds = array<i64: 1, 16, 128>}, {transform_indices = @transform_1, window_bounds = array<i64: 1, 16, 128>}, {transform_indices = @transform_2, window_bounds = array<i64: 1, 16, 128>}, {transform_indices = @transform_3, window_bounds = array<i64: 1, 16, 128>}]} {
    %c0_i32 = arith.constant 0 : i32
    %0 = arith.cmpi eq, %arg2, %c0_i32 : i32
    %1 = arith.extui %0 : i1 to i32
    %c0_i32_0 = arith.constant 0 : i32
    %2 = arith.cmpi ne, %1, %c0_i32_0 : i32
    scf.if %2 {
      %cst = arith.constant -1.000000e+30 : f32
      %27 = vector.broadcast %cst : f32 to vector<8x16x1xf32>
      %c0_15 = arith.constant 0 : index
      %c0_16 = arith.constant 0 : index
      %c0_17 = arith.constant 0 : index
      %28 = vector.load %arg7[%c0_15, %c0_16, %c0_17] : memref<8x16x1xf32, #tpu.memory_space<vmem>>, vector<8x16x1xf32>
      tpu.vector_store %arg7[%c0_15, %c0_16, %c0_17], %27 {strides = array<i32>} : memref<8x16x1xf32, #tpu.memory_space<vmem>>, vector<8x16x1xf32>,
      %cst_18 = arith.constant 0.000000e+00 : f32
      %29 = vector.broadcast %cst_18 : f32 to vector<8x16x1xf32>
      %c0_19 = arith.constant 0 : index
      %c0_20 = arith.constant 0 : index
      %c0_21 = arith.constant 0 : index
      %30 = vector.load %arg8[%c0_19, %c0_20, %c0_21] : memref<8x16x1xf32, #tpu.memory_space<vmem>>, vector<8x16x1xf32>
      tpu.vector_store %arg8[%c0_19, %c0_20, %c0_21], %29 {strides = array<i32>} : memref<8x16x1xf32, #tpu.memory_space<vmem>>, vector<8x16x1xf32>,
      %cst_22 = arith.constant 0.000000e+00 : f32
      %31 = vector.broadcast %cst_22 : f32 to vector<16x128xf32>
      %c0_23 = arith.constant 0 : index
      %c0_24 = arith.constant 0 : index
      %32 = vector.load %arg9[%c0_23, %c0_24] : memref<16x128xf32, #tpu.memory_space<vmem>>, vector<16x128xf32>
      tpu.vector_store %arg9[%c0_23, %c0_24], %31 {strides = array<i32>} : memref<16x128xf32, #tpu.memory_space<vmem>>, vector<16x128xf32>,
    } else {
    }
    %c0 = arith.constant 0 : index
    %c0_1 = arith.constant 0 : index
    %c0_2 = arith.constant 0 : index
    %3 = vector.load %arg3[%c0, %c0_1, %c0_2] : memref<1x16x128xbf16, #tpu.memory_space<vmem>>, vector<1x16x128xbf16>
    %4 = vector.shape_cast %3 : vector<1x16x128xbf16> to vector<16x128xbf16>
    %c0_3 = arith.constant 0 : index
    %c0_4 = arith.constant 0 : index
    %c0_5 = arith.constant 0 : index
    %5 = vector.load %arg4[%c0_3, %c0_4, %c0_5] : memref<1x16x128xbf16, #tpu.memory_space<vmem>>, vector<1x16x128xbf16>
    %6 = vector.shape_cast %5 : vector<1x16x128xbf16> to vector<16x128xbf16>
    %c0_6 = arith.constant 0 : index
    %c0_7 = arith.constant 0 : index
    %c0_8 = arith.constant 0 : index
    %7 = vector.load %arg5[%c0_6, %c0_7, %c0_8] : memref<1x16x128xbf16, #tpu.memory_space<vmem>>, vector<1x16x128xbf16>
    %8 = vector.shape_cast %7 : vector<1x16x128xbf16> to vector<16x128xbf16>
    %c16_i32 = arith.constant 16 : i32
    %9 = arith.muli %arg1, %c16_i32 : i32
    %10 = tpu.iota {dimensions = array<i32: 0>} : vector<16x16xi32>
    %11 = vector.broadcast %9 : i32 to vector<16x16xi32>
    %12 = arith.addi %11, %10 : vector<16x16xi32>
    %c16_i32_9 = arith.constant 16 : i32
    %13 = arith.muli %arg2, %c16_i32_9 : i32
    %14 = tpu.iota {dimensions = array<i32: 1>} : vector<16x16xi32>
    %15 = vector.broadcast %13 : i32 to vector<16x16xi32>
    %16 = arith.addi %15, %14 : vector<16x16xi32>
    %17 = arith.cmpi sle, %16, %12 : vector<16x16xi32>
    %c16_i32_10 = arith.constant 16 : i32
    %18 = arith.muli %arg2, %c16_i32_10 : i32
    %c16_i32_11 = arith.constant 16 : i32
    %19 = arith.muli %arg1, %c16_i32_11 : i32
    %c15_i32 = arith.constant 15 : i32
    %20 = arith.addi %19, %c15_i32 : i32
    %21 = arith.cmpi sle, %18, %20 : i32
    %22 = arith.extui %21 : i1 to i32
    %c0_i32_12 = arith.constant 0 : i32
    %23 = arith.cmpi ne, %22, %c0_i32_12 : i32
    scf.if %23 {
      %27 = vector.extract_strided_slice %4 {offsets = [0, 0], sizes = [16, 16], strides = [1, 1]} : vector<16x128xbf16> to vector<16x16xbf16>
      %28 = vector.extract_strided_slice %6 {offsets = [0, 0], sizes = [16, 16], strides = [1, 1]} : vector<16x128xbf16> to vector<16x16xbf16>
      %29 = vector.extract_strided_slice %8 {offsets = [0, 0], sizes = [16, 16], strides = [1, 1]} : vector<16x128xbf16> to vector<16x16xbf16>
      %cst = arith.constant dense<0.000000e+00> : vector<16x16xf32>
      %30 = tpu.matmul %27, %28, %cst {dimension_numbers = #tpu.dot_dimension_numbers<[1], [1], [0], [0], [0, 0, 1, 0], [], []>} : vector<16x16xbf16>, vector<16x16xbf16>, vector<16x16xf32> -> vector<16x16xf32>
      %cst_15 = arith.constant 2.500000e-01 : f32
      %31 = vector.broadcast %cst_15 : f32 to vector<16x16xf32>
      %32 = arith.mulf %30, %31 : vector<16x16xf32>
      %cst_16 = arith.constant -1.000000e+30 : f32
      %33 = vector.broadcast %cst_16 : f32 to vector<16x16xf32>
      %34 = arith.select %17, %32, %33 : vector<16x16xi1>, vector<16x16xf32>
      %c0_17 = arith.constant 0 : index
      %c0_18 = arith.constant 0 : index
      %c0_19 = arith.constant 0 : index
      %35 = vector.load %arg7[%c0_17, %c0_18, %c0_19] : memref<8x16x1xf32, #tpu.memory_space<vmem>>, vector<1x16x1xf32>
      %36 = vector.shape_cast %35 : vector<1x16x1xf32> to vector<16x1xf32>
      %c0_20 = arith.constant 0 : index
      %c0_21 = arith.constant 0 : index
      %c0_22 = arith.constant 0 : index
      %37 = vector.load %arg8[%c0_20, %c0_21, %c0_22] : memref<8x16x1xf32, #tpu.memory_space<vmem>>, vector<1x16x1xf32>
      %38 = vector.shape_cast %37 : vector<1x16x1xf32> to vector<16x1xf32>
      %cst_23 = arith.constant dense<0xFF800000> : vector<16xf32>
      %39 = vector.multi_reduction <maximumf>, %34, %cst_23 [1] : vector<16x16xf32> to vector<16xf32>
      %40 = vector.shape_cast %39 : vector<16xf32> to vector<16x1xf32>
      %41 = arith.maximumf %36, %40 : vector<16x1xf32>
      %42 = arith.subf %36, %41 : vector<16x1xf32>
      %43 = math.exp %42 : vector<16x1xf32>
      %44 = vector.broadcast %41 : vector<16x1xf32> to vector<16x16xf32>
      %45 = arith.subf %34, %44 : vector<16x16xf32>
      %46 = math.exp %45 : vector<16x16xf32>
      %47 = arith.mulf %43, %38 : vector<16x1xf32>
      %cst_24 = arith.constant dense<0.000000e+00> : vector<16xf32>
      %48 = vector.multi_reduction <add>, %46, %cst_24 [1] : vector<16x16xf32> to vector<16xf32>
      %49 = vector.shape_cast %48 : vector<16xf32> to vector<16x1xf32>
      %50 = arith.addf %47, %49 : vector<16x1xf32>
      %c0_25 = arith.constant 0 : index
      %c0_26 = arith.constant 0 : index
      %c0_27 = arith.constant 0 : index
      %51 = vector.load %arg8[%c0_25, %c0_26, %c0_27] : memref<8x16x1xf32, #tpu.memory_space<vmem>>, vector<1x16x1xf32>
      %52 = vector.shape_cast %51 : vector<1x16x1xf32> to vector<16x1xf32>
      %53 = vector.shape_cast %50 : vector<16x1xf32> to vector<1x16x1xf32>
      tpu.vector_store %arg8[%c0_25, %c0_26, %c0_27], %53 {strides = array<i32>} : memref<8x16x1xf32, #tpu.memory_space<vmem>>, vector<1x16x1xf32>,
      %c0_28 = arith.constant 0 : index
      %c0_29 = arith.constant 0 : index
      %c0_30 = arith.constant 0 : index
      %54 = vector.load %arg7[%c0_28, %c0_29, %c0_30] : memref<8x16x1xf32, #tpu.memory_space<vmem>>, vector<1x16x1xf32>
      %55 = vector.shape_cast %54 : vector<1x16x1xf32> to vector<16x1xf32>
      %56 = vector.shape_cast %41 : vector<16x1xf32> to vector<1x16x1xf32>
      tpu.vector_store %arg7[%c0_28, %c0_29, %c0_30], %56 {strides = array<i32>} : memref<8x16x1xf32, #tpu.memory_space<vmem>>, vector<1x16x1xf32>,
      %57 = arith.truncf %46 : vector<16x16xf32> to vector<16x16xbf16>
      %cst_31 = arith.constant dense<0.000000e+00> : vector<16x16xf32>
      %58 = tpu.matmul %57, %29, %cst_31 {dimension_numbers = #tpu.dot_dimension_numbers<[1], [0], [0], [1], [0, 0, 1, 1], [], []>} : vector<16x16xbf16>, vector<16x16xbf16>, vector<16x16xf32> -> vector<16x16xf32>
      %c0_32 = arith.constant 0 : index
      %c0_33 = arith.constant 0 : index
      %59 = vector.load %arg9[%c0_32, %c0_33] : memref<16x128xf32, #tpu.memory_space<vmem>>, vector<16x16xf32>
      %60 = vector.broadcast %43 : vector<16x1xf32> to vector<16x16xf32>
      %61 = arith.mulf %60, %59 : vector<16x16xf32>
      %62 = arith.addf %61, %58 : vector<16x16xf32>
      %c0_34 = arith.constant 0 : index
      %c0_35 = arith.constant 0 : index
      %63 = vector.load %arg9[%c0_34, %c0_35] : memref<16x128xf32, #tpu.memory_space<vmem>>, vector<16x16xf32>
      tpu.vector_store %arg9[%c0_34, %c0_35], %62 {strides = array<i32>} : memref<16x128xf32, #tpu.memory_space<vmem>>, vector<16x16xf32>,
      %64 = vector.extract_strided_slice %4 {offsets = [0, 16], sizes = [16, 16], strides = [1, 1]} : vector<16x128xbf16> to vector<16x16xbf16>
      %65 = vector.extract_strided_slice %6 {offsets = [0, 16], sizes = [16, 16], strides = [1, 1]} : vector<16x128xbf16> to vector<16x16xbf16>
      %66 = vector.extract_strided_slice %8 {offsets = [0, 16], sizes = [16, 16], strides = [1, 1]} : vector<16x128xbf16> to vector<16x16xbf16>
      %cst_36 = arith.constant dense<0.000000e+00> : vector<16x16xf32>
      %67 = tpu.matmul %64, %65, %cst_36 {dimension_numbers = #tpu.dot_dimension_numbers<[1], [1], [0], [0], [0, 0, 1, 0], [], []>} : vector<16x16xbf16>, vector<16x16xbf16>, vector<16x16xf32> -> vector<16x16xf32>
      %cst_37 = arith.constant 2.500000e-01 : f32
      %68 = vector.broadcast %cst_37 : f32 to vector<16x16xf32>
      %69 = arith.mulf %67, %68 : vector<16x16xf32>
      %cst_38 = arith.constant -1.000000e+30 : f32
      %70 = vector.broadcast %cst_38 : f32 to vector<16x16xf32>
      %71 = arith.select %17, %69, %70 : vector<16x16xi1>, vector<16x16xf32>
      %c1 = arith.constant 1 : index
      %c0_39 = arith.constant 0 : index
      %c0_40 = arith.constant 0 : index
      %72 = vector.load %arg7[%c1, %c0_39, %c0_40] : memref<8x16x1xf32, #tpu.memory_space<vmem>>, vector<1x16x1xf32>
      %73 = vector.shape_cast %72 : vector<1x16x1xf32> to vector<16x1xf32>
      %c1_41 = arith.constant 1 : index
      %c0_42 = arith.constant 0 : index
      %c0_43 = arith.constant 0 : index
      %74 = vector.load %arg8[%c1_41, %c0_42, %c0_43] : memref<8x16x1xf32, #tpu.memory_space<vmem>>, vector<1x16x1xf32>
      %75 = vector.shape_cast %74 : vector<1x16x1xf32> to vector<16x1xf32>
      %cst_44 = arith.constant dense<0xFF800000> : vector<16xf32>
      %76 = vector.multi_reduction <maximumf>, %71, %cst_44 [1] : vector<16x16xf32> to vector<16xf32>
      %77 = vector.shape_cast %76 : vector<16xf32> to vector<16x1xf32>
      %78 = arith.maximumf %73, %77 : vector<16x1xf32>
      %79 = arith.subf %73, %78 : vector<16x1xf32>
      %80 = math.exp %79 : vector<16x1xf32>
      %81 = vector.broadcast %78 : vector<16x1xf32> to vector<16x16xf32>
      %82 = arith.subf %71, %81 : vector<16x16xf32>
      %83 = math.exp %82 : vector<16x16xf32>
      %84 = arith.mulf %80, %75 : vector<16x1xf32>
      %cst_45 = arith.constant dense<0.000000e+00> : vector<16xf32>
      %85 = vector.multi_reduction <add>, %83, %cst_45 [1] : vector<16x16xf32> to vector<16xf32>
      %86 = vector.shape_cast %85 : vector<16xf32> to vector<16x1xf32>
      %87 = arith.addf %84, %86 : vector<16x1xf32>
      %c1_46 = arith.constant 1 : index
      %c0_47 = arith.constant 0 : index
      %c0_48 = arith.constant 0 : index
      %88 = vector.load %arg8[%c1_46, %c0_47, %c0_48] : memref<8x16x1xf32, #tpu.memory_space<vmem>>, vector<1x16x1xf32>
      %89 = vector.shape_cast %88 : vector<1x16x1xf32> to vector<16x1xf32>
      %90 = vector.shape_cast %87 : vector<16x1xf32> to vector<1x16x1xf32>
      tpu.vector_store %arg8[%c1_46, %c0_47, %c0_48], %90 {strides = array<i32>} : memref<8x16x1xf32, #tpu.memory_space<vmem>>, vector<1x16x1xf32>,
      %c1_49 = arith.constant 1 : index
      %c0_50 = arith.constant 0 : index
      %c0_51 = arith.constant 0 : index
      %91 = vector.load %arg7[%c1_49, %c0_50, %c0_51] : memref<8x16x1xf32, #tpu.memory_space<vmem>>, vector<1x16x1xf32>
      %92 = vector.shape_cast %91 : vector<1x16x1xf32> to vector<16x1xf32>
      %93 = vector.shape_cast %78 : vector<16x1xf32> to vector<1x16x1xf32>
      tpu.vector_store %arg7[%c1_49, %c0_50, %c0_51], %93 {strides = array<i32>} : memref<8x16x1xf32, #tpu.memory_space<vmem>>, vector<1x16x1xf32>,
      %94 = arith.truncf %83 : vector<16x16xf32> to vector<16x16xbf16>
      %cst_52 = arith.constant dense<0.000000e+00> : vector<16x16xf32>
      %95 = tpu.matmul %94, %66, %cst_52 {dimension_numbers = #tpu.dot_dimension_numbers<[1], [0], [0], [1], [0, 0, 1, 1], [], []>} : vector<16x16xbf16>, vector<16x16xbf16>, vector<16x16xf32> -> vector<16x16xf32>
      %c0_53 = arith.constant 0 : index
      %c16 = arith.constant 16 : index
      %96 = vector.load %arg9[%c0_53, %c16] : memref<16x128xf32, #tpu.memory_space<vmem>>, vector<16x16xf32>
      %97 = vector.broadcast %80 : vector<16x1xf32> to vector<16x16xf32>
      %98 = arith.mulf %97, %96 : vector<16x16xf32>
      %99 = arith.addf %98, %95 : vector<16x16xf32>
      %c0_54 = arith.constant 0 : index
      %c16_55 = arith.constant 16 : index
      %100 = vector.load %arg9[%c0_54, %c16_55] : memref<16x128xf32, #tpu.memory_space<vmem>>, vector<16x16xf32>
      tpu.vector_store %arg9[%c0_54, %c16_55], %99 {strides = array<i32>} : memref<16x128xf32, #tpu.memory_space<vmem>>, vector<16x16xf32>,
      %101 = vector.extract_strided_slice %4 {offsets = [0, 32], sizes = [16, 16], strides = [1, 1]} : vector<16x128xbf16> to vector<16x16xbf16>
      %102 = vector.extract_strided_slice %6 {offsets = [0, 32], sizes = [16, 16], strides = [1, 1]} : vector<16x128xbf16> to vector<16x16xbf16>
      %103 = vector.extract_strided_slice %8 {offsets = [0, 32], sizes = [16, 16], strides = [1, 1]} : vector<16x128xbf16> to vector<16x16xbf16>
      %cst_56 = arith.constant dense<0.000000e+00> : vector<16x16xf32>
      %104 = tpu.matmul %101, %102, %cst_56 {dimension_numbers = #tpu.dot_dimension_numbers<[1], [1], [0], [0], [0, 0, 1, 0], [], []>} : vector<16x16xbf16>, vector<16x16xbf16>, vector<16x16xf32> -> vector<16x16xf32>
      %cst_57 = arith.constant 2.500000e-01 : f32
      %105 = vector.broadcast %cst_57 : f32 to vector<16x16xf32>
      %106 = arith.mulf %104, %105 : vector<16x16xf32>
      %cst_58 = arith.constant -1.000000e+30 : f32
      %107 = vector.broadcast %cst_58 : f32 to vector<16x16xf32>
      %108 = arith.select %17, %106, %107 : vector<16x16xi1>, vector<16x16xf32>
      %c2 = arith.constant 2 : index
      %c0_59 = arith.constant 0 : index
      %c0_60 = arith.constant 0 : index
      %109 = vector.load %arg7[%c2, %c0_59, %c0_60] : memref<8x16x1xf32, #tpu.memory_space<vmem>>, vector<1x16x1xf32>
      %110 = vector.shape_cast %109 : vector<1x16x1xf32> to vector<16x1xf32>
      %c2_61 = arith.constant 2 : index
      %c0_62 = arith.constant 0 : index
      %c0_63 = arith.constant 0 : index
      %111 = vector.load %arg8[%c2_61, %c0_62, %c0_63] : memref<8x16x1xf32, #tpu.memory_space<vmem>>, vector<1x16x1xf32>
      %112 = vector.shape_cast %111 : vector<1x16x1xf32> to vector<16x1xf32>
      %cst_64 = arith.constant dense<0xFF800000> : vector<16xf32>
      %113 = vector.multi_reduction <maximumf>, %108, %cst_64 [1] : vector<16x16xf32> to vector<16xf32>
      %114 = vector.shape_cast %113 : vector<16xf32> to vector<16x1xf32>
      %115 = arith.maximumf %110, %114 : vector<16x1xf32>
      %116 = arith.subf %110, %115 : vector<16x1xf32>
      %117 = math.exp %116 : vector<16x1xf32>
      %118 = vector.broadcast %115 : vector<16x1xf32> to vector<16x16xf32>
      %119 = arith.subf %108, %118 : vector<16x16xf32>
      %120 = math.exp %119 : vector<16x16xf32>
      %121 = arith.mulf %117, %112 : vector<16x1xf32>
      %cst_65 = arith.constant dense<0.000000e+00> : vector<16xf32>
      %122 = vector.multi_reduction <add>, %120, %cst_65 [1] : vector<16x16xf32> to vector<16xf32>
      %123 = vector.shape_cast %122 : vector<16xf32> to vector<16x1xf32>
      %124 = arith.addf %121, %123 : vector<16x1xf32>
      %c2_66 = arith.constant 2 : index
      %c0_67 = arith.constant 0 : index
      %c0_68 = arith.constant 0 : index
      %125 = vector.load %arg8[%c2_66, %c0_67, %c0_68] : memref<8x16x1xf32, #tpu.memory_space<vmem>>, vector<1x16x1xf32>
      %126 = vector.shape_cast %125 : vector<1x16x1xf32> to vector<16x1xf32>
      %127 = vector.shape_cast %124 : vector<16x1xf32> to vector<1x16x1xf32>
      tpu.vector_store %arg8[%c2_66, %c0_67, %c0_68], %127 {strides = array<i32>} : memref<8x16x1xf32, #tpu.memory_space<vmem>>, vector<1x16x1xf32>,
      %c2_69 = arith.constant 2 : index
      %c0_70 = arith.constant 0 : index
      %c0_71 = arith.constant 0 : index
      %128 = vector.load %arg7[%c2_69, %c0_70, %c0_71] : memref<8x16x1xf32, #tpu.memory_space<vmem>>, vector<1x16x1xf32>
      %129 = vector.shape_cast %128 : vector<1x16x1xf32> to vector<16x1xf32>
      %130 = vector.shape_cast %115 : vector<16x1xf32> to vector<1x16x1xf32>
      tpu.vector_store %arg7[%c2_69, %c0_70, %c0_71], %130 {strides = array<i32>} : memref<8x16x1xf32, #tpu.memory_space<vmem>>, vector<1x16x1xf32>,
      %131 = arith.truncf %120 : vector<16x16xf32> to vector<16x16xbf16>
      %cst_72 = arith.constant dense<0.000000e+00> : vector<16x16xf32>
      %132 = tpu.matmul %131, %103, %cst_72 {dimension_numbers = #tpu.dot_dimension_numbers<[1], [0], [0], [1], [0, 0, 1, 1], [], []>} : vector<16x16xbf16>, vector<16x16xbf16>, vector<16x16xf32> -> vector<16x16xf32>
      %c0_73 = arith.constant 0 : index
      %c32 = arith.constant 32 : index
      %133 = vector.load %arg9[%c0_73, %c32] : memref<16x128xf32, #tpu.memory_space<vmem>>, vector<16x16xf32>
      %134 = vector.broadcast %117 : vector<16x1xf32> to vector<16x16xf32>
      %135 = arith.mulf %134, %133 : vector<16x16xf32>
      %136 = arith.addf %135, %132 : vector<16x16xf32>
      %c0_74 = arith.constant 0 : index
      %c32_75 = arith.constant 32 : index
      %137 = vector.load %arg9[%c0_74, %c32_75] : memref<16x128xf32, #tpu.memory_space<vmem>>, vector<16x16xf32>
      tpu.vector_store %arg9[%c0_74, %c32_75], %136 {strides = array<i32>} : memref<16x128xf32, #tpu.memory_space<vmem>>, vector<16x16xf32>,
      %138 = vector.extract_strided_slice %4 {offsets = [0, 48], sizes = [16, 16], strides = [1, 1]} : vector<16x128xbf16> to vector<16x16xbf16>
      %139 = vector.extract_strided_slice %6 {offsets = [0, 48], sizes = [16, 16], strides = [1, 1]} : vector<16x128xbf16> to vector<16x16xbf16>
      %140 = vector.extract_strided_slice %8 {offsets = [0, 48], sizes = [16, 16], strides = [1, 1]} : vector<16x128xbf16> to vector<16x16xbf16>
      %cst_76 = arith.constant dense<0.000000e+00> : vector<16x16xf32>
      %141 = tpu.matmul %138, %139, %cst_76 {dimension_numbers = #tpu.dot_dimension_numbers<[1], [1], [0], [0], [0, 0, 1, 0], [], []>} : vector<16x16xbf16>, vector<16x16xbf16>, vector<16x16xf32> -> vector<16x16xf32>
      %cst_77 = arith.constant 2.500000e-01 : f32
      %142 = vector.broadcast %cst_77 : f32 to vector<16x16xf32>
      %143 = arith.mulf %141, %142 : vector<16x16xf32>
      %cst_78 = arith.constant -1.000000e+30 : f32
      %144 = vector.broadcast %cst_78 : f32 to vector<16x16xf32>
      %145 = arith.select %17, %143, %144 : vector<16x16xi1>, vector<16x16xf32>
      %c3 = arith.constant 3 : index
      %c0_79 = arith.constant 0 : index
      %c0_80 = arith.constant 0 : index
      %146 = vector.load %arg7[%c3, %c0_79, %c0_80] : memref<8x16x1xf32, #tpu.memory_space<vmem>>, vector<1x16x1xf32>
      %147 = vector.shape_cast %146 : vector<1x16x1xf32> to vector<16x1xf32>
      %c3_81 = arith.constant 3 : index
      %c0_82 = arith.constant 0 : index
      %c0_83 = arith.constant 0 : index
      %148 = vector.load %arg8[%c3_81, %c0_82, %c0_83] : memref<8x16x1xf32, #tpu.memory_space<vmem>>, vector<1x16x1xf32>
      %149 = vector.shape_cast %148 : vector<1x16x1xf32> to vector<16x1xf32>
      %cst_84 = arith.constant dense<0xFF800000> : vector<16xf32>
      %150 = vector.multi_reduction <maximumf>, %145, %cst_84 [1] : vector<16x16xf32> to vector<16xf32>
      %151 = vector.shape_cast %150 : vector<16xf32> to vector<16x1xf32>
      %152 = arith.maximumf %147, %151 : vector<16x1xf32>
      %153 = arith.subf %147, %152 : vector<16x1xf32>
      %154 = math.exp %153 : vector<16x1xf32>
      %155 = vector.broadcast %152 : vector<16x1xf32> to vector<16x16xf32>
      %156 = arith.subf %145, %155 : vector<16x16xf32>
      %157 = math.exp %156 : vector<16x16xf32>
      %158 = arith.mulf %154, %149 : vector<16x1xf32>
      %cst_85 = arith.constant dense<0.000000e+00> : vector<16xf32>
      %159 = vector.multi_reduction <add>, %157, %cst_85 [1] : vector<16x16xf32> to vector<16xf32>
      %160 = vector.shape_cast %159 : vector<16xf32> to vector<16x1xf32>
      %161 = arith.addf %158, %160 : vector<16x1xf32>
      %c3_86 = arith.constant 3 : index
      %c0_87 = arith.constant 0 : index
      %c0_88 = arith.constant 0 : index
      %162 = vector.load %arg8[%c3_86, %c0_87, %c0_88] : memref<8x16x1xf32, #tpu.memory_space<vmem>>, vector<1x16x1xf32>
      %163 = vector.shape_cast %162 : vector<1x16x1xf32> to vector<16x1xf32>
      %164 = vector.shape_cast %161 : vector<16x1xf32> to vector<1x16x1xf32>
      tpu.vector_store %arg8[%c3_86, %c0_87, %c0_88], %164 {strides = array<i32>} : memref<8x16x1xf32, #tpu.memory_space<vmem>>, vector<1x16x1xf32>,
      %c3_89 = arith.constant 3 : index
      %c0_90 = arith.constant 0 : index
      %c0_91 = arith.constant 0 : index
      %165 = vector.load %arg7[%c3_89, %c0_90, %c0_91] : memref<8x16x1xf32, #tpu.memory_space<vmem>>, vector<1x16x1xf32>
      %166 = vector.shape_cast %165 : vector<1x16x1xf32> to vector<16x1xf32>
      %167 = vector.shape_cast %152 : vector<16x1xf32> to vector<1x16x1xf32>
      tpu.vector_store %arg7[%c3_89, %c0_90, %c0_91], %167 {strides = array<i32>} : memref<8x16x1xf32, #tpu.memory_space<vmem>>, vector<1x16x1xf32>,
      %168 = arith.truncf %157 : vector<16x16xf32> to vector<16x16xbf16>
      %cst_92 = arith.constant dense<0.000000e+00> : vector<16x16xf32>
      %169 = tpu.matmul %168, %140, %cst_92 {dimension_numbers = #tpu.dot_dimension_numbers<[1], [0], [0], [1], [0, 0, 1, 1], [], []>} : vector<16x16xbf16>, vector<16x16xbf16>, vector<16x16xf32> -> vector<16x16xf32>
      %c0_93 = arith.constant 0 : index
      %c48 = arith.constant 48 : index
      %170 = vector.load %arg9[%c0_93, %c48] : memref<16x128xf32, #tpu.memory_space<vmem>>, vector<16x16xf32>
      %171 = vector.broadcast %154 : vector<16x1xf32> to vector<16x16xf32>
      %172 = arith.mulf %171, %170 : vector<16x16xf32>
      %173 = arith.addf %172, %169 : vector<16x16xf32>
      %c0_94 = arith.constant 0 : index
      %c48_95 = arith.constant 48 : index
      %174 = vector.load %arg9[%c0_94, %c48_95] : memref<16x128xf32, #tpu.memory_space<vmem>>, vector<16x16xf32>
      tpu.vector_store %arg9[%c0_94, %c48_95], %173 {strides = array<i32>} : memref<16x128xf32, #tpu.memory_space<vmem>>, vector<16x16xf32>,
      %175 = vector.extract_strided_slice %4 {offsets = [0, 64], sizes = [16, 16], strides = [1, 1]} : vector<16x128xbf16> to vector<16x16xbf16>
      %176 = vector.extract_strided_slice %6 {offsets = [0, 64], sizes = [16, 16], strides = [1, 1]} : vector<16x128xbf16> to vector<16x16xbf16>
      %177 = vector.extract_strided_slice %8 {offsets = [0, 64], sizes = [16, 16], strides = [1, 1]} : vector<16x128xbf16> to vector<16x16xbf16>
      %cst_96 = arith.constant dense<0.000000e+00> : vector<16x16xf32>
      %178 = tpu.matmul %175, %176, %cst_96 {dimension_numbers = #tpu.dot_dimension_numbers<[1], [1], [0], [0], [0, 0, 1, 0], [], []>} : vector<16x16xbf16>, vector<16x16xbf16>, vector<16x16xf32> -> vector<16x16xf32>
      %cst_97 = arith.constant 2.500000e-01 : f32
      %179 = vector.broadcast %cst_97 : f32 to vector<16x16xf32>
      %180 = arith.mulf %178, %179 : vector<16x16xf32>
      %cst_98 = arith.constant -1.000000e+30 : f32
      %181 = vector.broadcast %cst_98 : f32 to vector<16x16xf32>
      %182 = arith.select %17, %180, %181 : vector<16x16xi1>, vector<16x16xf32>
      %c4 = arith.constant 4 : index
      %c0_99 = arith.constant 0 : index
      %c0_100 = arith.constant 0 : index
      %183 = vector.load %arg7[%c4, %c0_99, %c0_100] : memref<8x16x1xf32, #tpu.memory_space<vmem>>, vector<1x16x1xf32>
      %184 = vector.shape_cast %183 : vector<1x16x1xf32> to vector<16x1xf32>
      %c4_101 = arith.constant 4 : index
      %c0_102 = arith.constant 0 : index
      %c0_103 = arith.constant 0 : index
      %185 = vector.load %arg8[%c4_101, %c0_102, %c0_103] : memref<8x16x1xf32, #tpu.memory_space<vmem>>, vector<1x16x1xf32>
      %186 = vector.shape_cast %185 : vector<1x16x1xf32> to vector<16x1xf32>
      %cst_104 = arith.constant dense<0xFF800000> : vector<16xf32>
      %187 = vector.multi_reduction <maximumf>, %182, %cst_104 [1] : vector<16x16xf32> to vector<16xf32>
      %188 = vector.shape_cast %187 : vector<16xf32> to vector<16x1xf32>
      %189 = arith.maximumf %184, %188 : vector<16x1xf32>
      %190 = arith.subf %184, %189 : vector<16x1xf32>
      %191 = math.exp %190 : vector<16x1xf32>
      %192 = vector.broadcast %189 : vector<16x1xf32> to vector<16x16xf32>
      %193 = arith.subf %182, %192 : vector<16x16xf32>
      %194 = math.exp %193 : vector<16x16xf32>
      %195 = arith.mulf %191, %186 : vector<16x1xf32>
      %cst_105 = arith.constant dense<0.000000e+00> : vector<16xf32>
      %196 = vector.multi_reduction <add>, %194, %cst_105 [1] : vector<16x16xf32> to vector<16xf32>
      %197 = vector.shape_cast %196 : vector<16xf32> to vector<16x1xf32>
      %198 = arith.addf %195, %197 : vector<16x1xf32>
      %c4_106 = arith.constant 4 : index
      %c0_107 = arith.constant 0 : index
      %c0_108 = arith.constant 0 : index
      %199 = vector.load %arg8[%c4_106, %c0_107, %c0_108] : memref<8x16x1xf32, #tpu.memory_space<vmem>>, vector<1x16x1xf32>
      %200 = vector.shape_cast %199 : vector<1x16x1xf32> to vector<16x1xf32>
      %201 = vector.shape_cast %198 : vector<16x1xf32> to vector<1x16x1xf32>
      tpu.vector_store %arg8[%c4_106, %c0_107, %c0_108], %201 {strides = array<i32>} : memref<8x16x1xf32, #tpu.memory_space<vmem>>, vector<1x16x1xf32>,
      %c4_109 = arith.constant 4 : index
      %c0_110 = arith.constant 0 : index
      %c0_111 = arith.constant 0 : index
      %202 = vector.load %arg7[%c4_109, %c0_110, %c0_111] : memref<8x16x1xf32, #tpu.memory_space<vmem>>, vector<1x16x1xf32>
      %203 = vector.shape_cast %202 : vector<1x16x1xf32> to vector<16x1xf32>
      %204 = vector.shape_cast %189 : vector<16x1xf32> to vector<1x16x1xf32>
      tpu.vector_store %arg7[%c4_109, %c0_110, %c0_111], %204 {strides = array<i32>} : memref<8x16x1xf32, #tpu.memory_space<vmem>>, vector<1x16x1xf32>,
      %205 = arith.truncf %194 : vector<16x16xf32> to vector<16x16xbf16>
      %cst_112 = arith.constant dense<0.000000e+00> : vector<16x16xf32>
      %206 = tpu.matmul %205, %177, %cst_112 {dimension_numbers = #tpu.dot_dimension_numbers<[1], [0], [0], [1], [0, 0, 1, 1], [], []>} : vector<16x16xbf16>, vector<16x16xbf16>, vector<16x16xf32> -> vector<16x16xf32>
      %c0_113 = arith.constant 0 : index
      %c64 = arith.constant 64 : index
      %207 = vector.load %arg9[%c0_113, %c64] : memref<16x128xf32, #tpu.memory_space<vmem>>, vector<16x16xf32>
      %208 = vector.broadcast %191 : vector<16x1xf32> to vector<16x16xf32>
      %209 = arith.mulf %208, %207 : vector<16x16xf32>
      %210 = arith.addf %209, %206 : vector<16x16xf32>
      %c0_114 = arith.constant 0 : index
      %c64_115 = arith.constant 64 : index
      %211 = vector.load %arg9[%c0_114, %c64_115] : memref<16x128xf32, #tpu.memory_space<vmem>>, vector<16x16xf32>
      tpu.vector_store %arg9[%c0_114, %c64_115], %210 {strides = array<i32>} : memref<16x128xf32, #tpu.memory_space<vmem>>, vector<16x16xf32>,
      %212 = vector.extract_strided_slice %4 {offsets = [0, 80], sizes = [16, 16], strides = [1, 1]} : vector<16x128xbf16> to vector<16x16xbf16>
      %213 = vector.extract_strided_slice %6 {offsets = [0, 80], sizes = [16, 16], strides = [1, 1]} : vector<16x128xbf16> to vector<16x16xbf16>
      %214 = vector.extract_strided_slice %8 {offsets = [0, 80], sizes = [16, 16], strides = [1, 1]} : vector<16x128xbf16> to vector<16x16xbf16>
      %cst_116 = arith.constant dense<0.000000e+00> : vector<16x16xf32>
      %215 = tpu.matmul %212, %213, %cst_116 {dimension_numbers = #tpu.dot_dimension_numbers<[1], [1], [0], [0], [0, 0, 1, 0], [], []>} : vector<16x16xbf16>, vector<16x16xbf16>, vector<16x16xf32> -> vector<16x16xf32>
      %cst_117 = arith.constant 2.500000e-01 : f32
      %216 = vector.broadcast %cst_117 : f32 to vector<16x16xf32>
      %217 = arith.mulf %215, %216 : vector<16x16xf32>
      %cst_118 = arith.constant -1.000000e+30 : f32
      %218 = vector.broadcast %cst_118 : f32 to vector<16x16xf32>
      %219 = arith.select %17, %217, %218 : vector<16x16xi1>, vector<16x16xf32>
      %c5 = arith.constant 5 : index
      %c0_119 = arith.constant 0 : index
      %c0_120 = arith.constant 0 : index
      %220 = vector.load %arg7[%c5, %c0_119, %c0_120] : memref<8x16x1xf32, #tpu.memory_space<vmem>>, vector<1x16x1xf32>
      %221 = vector.shape_cast %220 : vector<1x16x1xf32> to vector<16x1xf32>
      %c5_121 = arith.constant 5 : index
      %c0_122 = arith.constant 0 : index
      %c0_123 = arith.constant 0 : index
      %222 = vector.load %arg8[%c5_121, %c0_122, %c0_123] : memref<8x16x1xf32, #tpu.memory_space<vmem>>, vector<1x16x1xf32>
      %223 = vector.shape_cast %222 : vector<1x16x1xf32> to vector<16x1xf32>
      %cst_124 = arith.constant dense<0xFF800000> : vector<16xf32>
      %224 = vector.multi_reduction <maximumf>, %219, %cst_124 [1] : vector<16x16xf32> to vector<16xf32>
      %225 = vector.shape_cast %224 : vector<16xf32> to vector<16x1xf32>
      %226 = arith.maximumf %221, %225 : vector<16x1xf32>
      %227 = arith.subf %221, %226 : vector<16x1xf32>
      %228 = math.exp %227 : vector<16x1xf32>
      %229 = vector.broadcast %226 : vector<16x1xf32> to vector<16x16xf32>
      %230 = arith.subf %219, %229 : vector<16x16xf32>
      %231 = math.exp %230 : vector<16x16xf32>
      %232 = arith.mulf %228, %223 : vector<16x1xf32>
      %cst_125 = arith.constant dense<0.000000e+00> : vector<16xf32>
      %233 = vector.multi_reduction <add>, %231, %cst_125 [1] : vector<16x16xf32> to vector<16xf32>
      %234 = vector.shape_cast %233 : vector<16xf32> to vector<16x1xf32>
      %235 = arith.addf %232, %234 : vector<16x1xf32>
      %c5_126 = arith.constant 5 : index
      %c0_127 = arith.constant 0 : index
      %c0_128 = arith.constant 0 : index
      %236 = vector.load %arg8[%c5_126, %c0_127, %c0_128] : memref<8x16x1xf32, #tpu.memory_space<vmem>>, vector<1x16x1xf32>
      %237 = vector.shape_cast %236 : vector<1x16x1xf32> to vector<16x1xf32>
      %238 = vector.shape_cast %235 : vector<16x1xf32> to vector<1x16x1xf32>
      tpu.vector_store %arg8[%c5_126, %c0_127, %c0_128], %238 {strides = array<i32>} : memref<8x16x1xf32, #tpu.memory_space<vmem>>, vector<1x16x1xf32>,
      %c5_129 = arith.constant 5 : index
      %c0_130 = arith.constant 0 : index
      %c0_131 = arith.constant 0 : index
      %239 = vector.load %arg7[%c5_129, %c0_130, %c0_131] : memref<8x16x1xf32, #tpu.memory_space<vmem>>, vector<1x16x1xf32>
      %240 = vector.shape_cast %239 : vector<1x16x1xf32> to vector<16x1xf32>
      %241 = vector.shape_cast %226 : vector<16x1xf32> to vector<1x16x1xf32>
      tpu.vector_store %arg7[%c5_129, %c0_130, %c0_131], %241 {strides = array<i32>} : memref<8x16x1xf32, #tpu.memory_space<vmem>>, vector<1x16x1xf32>,
      %242 = arith.truncf %231 : vector<16x16xf32> to vector<16x16xbf16>
      %cst_132 = arith.constant dense<0.000000e+00> : vector<16x16xf32>
      %243 = tpu.matmul %242, %214, %cst_132 {dimension_numbers = #tpu.dot_dimension_numbers<[1], [0], [0], [1], [0, 0, 1, 1], [], []>} : vector<16x16xbf16>, vector<16x16xbf16>, vector<16x16xf32> -> vector<16x16xf32>
      %c0_133 = arith.constant 0 : index
      %c80 = arith.constant 80 : index
      %244 = vector.load %arg9[%c0_133, %c80] : memref<16x128xf32, #tpu.memory_space<vmem>>, vector<16x16xf32>
      %245 = vector.broadcast %228 : vector<16x1xf32> to vector<16x16xf32>
      %246 = arith.mulf %245, %244 : vector<16x16xf32>
      %247 = arith.addf %246, %243 : vector<16x16xf32>
      %c0_134 = arith.constant 0 : index
      %c80_135 = arith.constant 80 : index
      %248 = vector.load %arg9[%c0_134, %c80_135] : memref<16x128xf32, #tpu.memory_space<vmem>>, vector<16x16xf32>
      tpu.vector_store %arg9[%c0_134, %c80_135], %247 {strides = array<i32>} : memref<16x128xf32, #tpu.memory_space<vmem>>, vector<16x16xf32>,
      %249 = vector.extract_strided_slice %4 {offsets = [0, 96], sizes = [16, 16], strides = [1, 1]} : vector<16x128xbf16> to vector<16x16xbf16>
      %250 = vector.extract_strided_slice %6 {offsets = [0, 96], sizes = [16, 16], strides = [1, 1]} : vector<16x128xbf16> to vector<16x16xbf16>
      %251 = vector.extract_strided_slice %8 {offsets = [0, 96], sizes = [16, 16], strides = [1, 1]} : vector<16x128xbf16> to vector<16x16xbf16>
      %cst_136 = arith.constant dense<0.000000e+00> : vector<16x16xf32>
      %252 = tpu.matmul %249, %250, %cst_136 {dimension_numbers = #tpu.dot_dimension_numbers<[1], [1], [0], [0], [0, 0, 1, 0], [], []>} : vector<16x16xbf16>, vector<16x16xbf16>, vector<16x16xf32> -> vector<16x16xf32>
      %cst_137 = arith.constant 2.500000e-01 : f32
      %253 = vector.broadcast %cst_137 : f32 to vector<16x16xf32>
      %254 = arith.mulf %252, %253 : vector<16x16xf32>
      %cst_138 = arith.constant -1.000000e+30 : f32
      %255 = vector.broadcast %cst_138 : f32 to vector<16x16xf32>
      %256 = arith.select %17, %254, %255 : vector<16x16xi1>, vector<16x16xf32>
      %c6 = arith.constant 6 : index
      %c0_139 = arith.constant 0 : index
      %c0_140 = arith.constant 0 : index
      %257 = vector.load %arg7[%c6, %c0_139, %c0_140] : memref<8x16x1xf32, #tpu.memory_space<vmem>>, vector<1x16x1xf32>
      %258 = vector.shape_cast %257 : vector<1x16x1xf32> to vector<16x1xf32>
      %c6_141 = arith.constant 6 : index
      %c0_142 = arith.constant 0 : index
      %c0_143 = arith.constant 0 : index
      %259 = vector.load %arg8[%c6_141, %c0_142, %c0_143] : memref<8x16x1xf32, #tpu.memory_space<vmem>>, vector<1x16x1xf32>
      %260 = vector.shape_cast %259 : vector<1x16x1xf32> to vector<16x1xf32>
      %cst_144 = arith.constant dense<0xFF800000> : vector<16xf32>
      %261 = vector.multi_reduction <maximumf>, %256, %cst_144 [1] : vector<16x16xf32> to vector<16xf32>
      %262 = vector.shape_cast %261 : vector<16xf32> to vector<16x1xf32>
      %263 = arith.maximumf %258, %262 : vector<16x1xf32>
      %264 = arith.subf %258, %263 : vector<16x1xf32>
      %265 = math.exp %264 : vector<16x1xf32>
      %266 = vector.broadcast %263 : vector<16x1xf32> to vector<16x16xf32>
      %267 = arith.subf %256, %266 : vector<16x16xf32>
      %268 = math.exp %267 : vector<16x16xf32>
      %269 = arith.mulf %265, %260 : vector<16x1xf32>
      %cst_145 = arith.constant dense<0.000000e+00> : vector<16xf32>
      %270 = vector.multi_reduction <add>, %268, %cst_145 [1] : vector<16x16xf32> to vector<16xf32>
      %271 = vector.shape_cast %270 : vector<16xf32> to vector<16x1xf32>
      %272 = arith.addf %269, %271 : vector<16x1xf32>
      %c6_146 = arith.constant 6 : index
      %c0_147 = arith.constant 0 : index
      %c0_148 = arith.constant 0 : index
      %273 = vector.load %arg8[%c6_146, %c0_147, %c0_148] : memref<8x16x1xf32, #tpu.memory_space<vmem>>, vector<1x16x1xf32>
      %274 = vector.shape_cast %273 : vector<1x16x1xf32> to vector<16x1xf32>
      %275 = vector.shape_cast %272 : vector<16x1xf32> to vector<1x16x1xf32>
      tpu.vector_store %arg8[%c6_146, %c0_147, %c0_148], %275 {strides = array<i32>} : memref<8x16x1xf32, #tpu.memory_space<vmem>>, vector<1x16x1xf32>,
      %c6_149 = arith.constant 6 : index
      %c0_150 = arith.constant 0 : index
      %c0_151 = arith.constant 0 : index
      %276 = vector.load %arg7[%c6_149, %c0_150, %c0_151] : memref<8x16x1xf32, #tpu.memory_space<vmem>>, vector<1x16x1xf32>
      %277 = vector.shape_cast %276 : vector<1x16x1xf32> to vector<16x1xf32>
      %278 = vector.shape_cast %263 : vector<16x1xf32> to vector<1x16x1xf32>
      tpu.vector_store %arg7[%c6_149, %c0_150, %c0_151], %278 {strides = array<i32>} : memref<8x16x1xf32, #tpu.memory_space<vmem>>, vector<1x16x1xf32>,
      %279 = arith.truncf %268 : vector<16x16xf32> to vector<16x16xbf16>
      %cst_152 = arith.constant dense<0.000000e+00> : vector<16x16xf32>
      %280 = tpu.matmul %279, %251, %cst_152 {dimension_numbers = #tpu.dot_dimension_numbers<[1], [0], [0], [1], [0, 0, 1, 1], [], []>} : vector<16x16xbf16>, vector<16x16xbf16>, vector<16x16xf32> -> vector<16x16xf32>
      %c0_153 = arith.constant 0 : index
      %c96 = arith.constant 96 : index
      %281 = vector.load %arg9[%c0_153, %c96] : memref<16x128xf32, #tpu.memory_space<vmem>>, vector<16x16xf32>
      %282 = vector.broadcast %265 : vector<16x1xf32> to vector<16x16xf32>
      %283 = arith.mulf %282, %281 : vector<16x16xf32>
      %284 = arith.addf %283, %280 : vector<16x16xf32>
      %c0_154 = arith.constant 0 : index
      %c96_155 = arith.constant 96 : index
      %285 = vector.load %arg9[%c0_154, %c96_155] : memref<16x128xf32, #tpu.memory_space<vmem>>, vector<16x16xf32>
      tpu.vector_store %arg9[%c0_154, %c96_155], %284 {strides = array<i32>} : memref<16x128xf32, #tpu.memory_space<vmem>>, vector<16x16xf32>,
      %286 = vector.extract_strided_slice %4 {offsets = [0, 112], sizes = [16, 16], strides = [1, 1]} : vector<16x128xbf16> to vector<16x16xbf16>
      %287 = vector.extract_strided_slice %6 {offsets = [0, 112], sizes = [16, 16], strides = [1, 1]} : vector<16x128xbf16> to vector<16x16xbf16>
      %288 = vector.extract_strided_slice %8 {offsets = [0, 112], sizes = [16, 16], strides = [1, 1]} : vector<16x128xbf16> to vector<16x16xbf16>
      %cst_156 = arith.constant dense<0.000000e+00> : vector<16x16xf32>
      %289 = tpu.matmul %286, %287, %cst_156 {dimension_numbers = #tpu.dot_dimension_numbers<[1], [1], [0], [0], [0, 0, 1, 0], [], []>} : vector<16x16xbf16>, vector<16x16xbf16>, vector<16x16xf32> -> vector<16x16xf32>
      %cst_157 = arith.constant 2.500000e-01 : f32
      %290 = vector.broadcast %cst_157 : f32 to vector<16x16xf32>
      %291 = arith.mulf %289, %290 : vector<16x16xf32>
      %cst_158 = arith.constant -1.000000e+30 : f32
      %292 = vector.broadcast %cst_158 : f32 to vector<16x16xf32>
      %293 = arith.select %17, %291, %292 : vector<16x16xi1>, vector<16x16xf32>
      %c7 = arith.constant 7 : index
      %c0_159 = arith.constant 0 : index
      %c0_160 = arith.constant 0 : index
      %294 = vector.load %arg7[%c7, %c0_159, %c0_160] : memref<8x16x1xf32, #tpu.memory_space<vmem>>, vector<1x16x1xf32>
      %295 = vector.shape_cast %294 : vector<1x16x1xf32> to vector<16x1xf32>
      %c7_161 = arith.constant 7 : index
      %c0_162 = arith.constant 0 : index
      %c0_163 = arith.constant 0 : index
      %296 = vector.load %arg8[%c7_161, %c0_162, %c0_163] : memref<8x16x1xf32, #tpu.memory_space<vmem>>, vector<1x16x1xf32>
      %297 = vector.shape_cast %296 : vector<1x16x1xf32> to vector<16x1xf32>
      %cst_164 = arith.constant dense<0xFF800000> : vector<16xf32>
      %298 = vector.multi_reduction <maximumf>, %293, %cst_164 [1] : vector<16x16xf32> to vector<16xf32>
      %299 = vector.shape_cast %298 : vector<16xf32> to vector<16x1xf32>
      %300 = arith.maximumf %295, %299 : vector<16x1xf32>
      %301 = arith.subf %295, %300 : vector<16x1xf32>
      %302 = math.exp %301 : vector<16x1xf32>
      %303 = vector.broadcast %300 : vector<16x1xf32> to vector<16x16xf32>
      %304 = arith.subf %293, %303 : vector<16x16xf32>
      %305 = math.exp %304 : vector<16x16xf32>
      %306 = arith.mulf %302, %297 : vector<16x1xf32>
      %cst_165 = arith.constant dense<0.000000e+00> : vector<16xf32>
      %307 = vector.multi_reduction <add>, %305, %cst_165 [1] : vector<16x16xf32> to vector<16xf32>
      %308 = vector.shape_cast %307 : vector<16xf32> to vector<16x1xf32>
      %309 = arith.addf %306, %308 : vector<16x1xf32>
      %c7_166 = arith.constant 7 : index
      %c0_167 = arith.constant 0 : index
      %c0_168 = arith.constant 0 : index
      %310 = vector.load %arg8[%c7_166, %c0_167, %c0_168] : memref<8x16x1xf32, #tpu.memory_space<vmem>>, vector<1x16x1xf32>
      %311 = vector.shape_cast %310 : vector<1x16x1xf32> to vector<16x1xf32>
      %312 = vector.shape_cast %309 : vector<16x1xf32> to vector<1x16x1xf32>
      tpu.vector_store %arg8[%c7_166, %c0_167, %c0_168], %312 {strides = array<i32>} : memref<8x16x1xf32, #tpu.memory_space<vmem>>, vector<1x16x1xf32>,
      %c7_169 = arith.constant 7 : index
      %c0_170 = arith.constant 0 : index
      %c0_171 = arith.constant 0 : index
      %313 = vector.load %arg7[%c7_169, %c0_170, %c0_171] : memref<8x16x1xf32, #tpu.memory_space<vmem>>, vector<1x16x1xf32>
      %314 = vector.shape_cast %313 : vector<1x16x1xf32> to vector<16x1xf32>
      %315 = vector.shape_cast %300 : vector<16x1xf32> to vector<1x16x1xf32>
      tpu.vector_store %arg7[%c7_169, %c0_170, %c0_171], %315 {strides = array<i32>} : memref<8x16x1xf32, #tpu.memory_space<vmem>>, vector<1x16x1xf32>,
      %316 = arith.truncf %305 : vector<16x16xf32> to vector<16x16xbf16>
      %cst_172 = arith.constant dense<0.000000e+00> : vector<16x16xf32>
      %317 = tpu.matmul %316, %288, %cst_172 {dimension_numbers = #tpu.dot_dimension_numbers<[1], [0], [0], [1], [0, 0, 1, 1], [], []>} : vector<16x16xbf16>, vector<16x16xbf16>, vector<16x16xf32> -> vector<16x16xf32>
      %c0_173 = arith.constant 0 : index
      %c112 = arith.constant 112 : index
      %318 = vector.load %arg9[%c0_173, %c112] : memref<16x128xf32, #tpu.memory_space<vmem>>, vector<16x16xf32>
      %319 = vector.broadcast %302 : vector<16x1xf32> to vector<16x16xf32>
      %320 = arith.mulf %319, %318 : vector<16x16xf32>
      %321 = arith.addf %320, %317 : vector<16x16xf32>
      %c0_174 = arith.constant 0 : index
      %c112_175 = arith.constant 112 : index
      %322 = vector.load %arg9[%c0_174, %c112_175] : memref<16x128xf32, #tpu.memory_space<vmem>>, vector<16x16xf32>
      tpu.vector_store %arg9[%c0_174, %c112_175], %321 {strides = array<i32>} : memref<16x128xf32, #tpu.memory_space<vmem>>, vector<16x16xf32>,
    } else {
    }
    %c0_i32_13 = arith.constant 0 : i32
    %24 = arith.cmpi eq, %arg2, %c0_i32_13 : i32
    %25 = arith.extui %24 : i1 to i32
    %c0_i32_14 = arith.constant 0 : i32
    %26 = arith.cmpi ne, %25, %c0_i32_14 : i32
    scf.if %26 {
      %c0_15 = arith.constant 0 : index
      %c0_16 = arith.constant 0 : index
      %27 = vector.load %arg9[%c0_15, %c0_16] : memref<16x128xf32, #tpu.memory_space<vmem>>, vector<16x16xf32>
      %c0_17 = arith.constant 0 : index
      %c0_18 = arith.constant 0 : index
      %c0_19 = arith.constant 0 : index
      %28 = vector.load %arg8[%c0_17, %c0_18, %c0_19] : memref<8x16x1xf32, #tpu.memory_space<vmem>>, vector<1x16x1xf32>
      %29 = vector.shape_cast %28 : vector<1x16x1xf32> to vector<16x1xf32>
      %30 = tpu.reciprocal %29 {approx = true} : vector<16x1xf32> -> vector<16x1xf32>
      %31 = vector.broadcast %30 : vector<16x1xf32> to vector<16x16xf32>
      %32 = arith.mulf %27, %31 : vector<16x16xf32>
      %c0_20 = arith.constant 0 : index
      %c0_21 = arith.constant 0 : index
      %33 = vector.load %arg9[%c0_20, %c0_21] : memref<16x128xf32, #tpu.memory_space<vmem>>, vector<16x16xf32>
      tpu.vector_store %arg9[%c0_20, %c0_21], %32 {strides = array<i32>} : memref<16x128xf32, #tpu.memory_space<vmem>>, vector<16x16xf32>,
      %c0_22 = arith.constant 0 : index
      %c16 = arith.constant 16 : index
      %34 = vector.load %arg9[%c0_22, %c16] : memref<16x128xf32, #tpu.memory_space<vmem>>, vector<16x16xf32>
      %c1 = arith.constant 1 : index
      %c0_23 = arith.constant 0 : index
      %c0_24 = arith.constant 0 : index
      %35 = vector.load %arg8[%c1, %c0_23, %c0_24] : memref<8x16x1xf32, #tpu.memory_space<vmem>>, vector<1x16x1xf32>
      %36 = vector.shape_cast %35 : vector<1x16x1xf32> to vector<16x1xf32>
      %37 = tpu.reciprocal %36 {approx = true} : vector<16x1xf32> -> vector<16x1xf32>
      %38 = vector.broadcast %37 : vector<16x1xf32> to vector<16x16xf32>
      %39 = arith.mulf %34, %38 : vector<16x16xf32>
      %c0_25 = arith.constant 0 : index
      %c16_26 = arith.constant 16 : index
      %40 = vector.load %arg9[%c0_25, %c16_26] : memref<16x128xf32, #tpu.memory_space<vmem>>, vector<16x16xf32>
      tpu.vector_store %arg9[%c0_25, %c16_26], %39 {strides = array<i32>} : memref<16x128xf32, #tpu.memory_space<vmem>>, vector<16x16xf32>,
      %c0_27 = arith.constant 0 : index
      %c32 = arith.constant 32 : index
      %41 = vector.load %arg9[%c0_27, %c32] : memref<16x128xf32, #tpu.memory_space<vmem>>, vector<16x16xf32>
      %c2 = arith.constant 2 : index
      %c0_28 = arith.constant 0 : index
      %c0_29 = arith.constant 0 : index
      %42 = vector.load %arg8[%c2, %c0_28, %c0_29] : memref<8x16x1xf32, #tpu.memory_space<vmem>>, vector<1x16x1xf32>
      %43 = vector.shape_cast %42 : vector<1x16x1xf32> to vector<16x1xf32>
      %44 = tpu.reciprocal %43 {approx = true} : vector<16x1xf32> -> vector<16x1xf32>
      %45 = vector.broadcast %44 : vector<16x1xf32> to vector<16x16xf32>
      %46 = arith.mulf %41, %45 : vector<16x16xf32>
      %c0_30 = arith.constant 0 : index
      %c32_31 = arith.constant 32 : index
      %47 = vector.load %arg9[%c0_30, %c32_31] : memref<16x128xf32, #tpu.memory_space<vmem>>, vector<16x16xf32>
      tpu.vector_store %arg9[%c0_30, %c32_31], %46 {strides = array<i32>} : memref<16x128xf32, #tpu.memory_space<vmem>>, vector<16x16xf32>,
      %c0_32 = arith.constant 0 : index
      %c48 = arith.constant 48 : index
      %48 = vector.load %arg9[%c0_32, %c48] : memref<16x128xf32, #tpu.memory_space<vmem>>, vector<16x16xf32>
      %c3 = arith.constant 3 : index
      %c0_33 = arith.constant 0 : index
      %c0_34 = arith.constant 0 : index
      %49 = vector.load %arg8[%c3, %c0_33, %c0_34] : memref<8x16x1xf32, #tpu.memory_space<vmem>>, vector<1x16x1xf32>
      %50 = vector.shape_cast %49 : vector<1x16x1xf32> to vector<16x1xf32>
      %51 = tpu.reciprocal %50 {approx = true} : vector<16x1xf32> -> vector<16x1xf32>
      %52 = vector.broadcast %51 : vector<16x1xf32> to vector<16x16xf32>
      %53 = arith.mulf %48, %52 : vector<16x16xf32>
      %c0_35 = arith.constant 0 : index
      %c48_36 = arith.constant 48 : index
      %54 = vector.load %arg9[%c0_35, %c48_36] : memref<16x128xf32, #tpu.memory_space<vmem>>, vector<16x16xf32>
      tpu.vector_store %arg9[%c0_35, %c48_36], %53 {strides = array<i32>} : memref<16x128xf32, #tpu.memory_space<vmem>>, vector<16x16xf32>,
      %c0_37 = arith.constant 0 : index
      %c64 = arith.constant 64 : index
      %55 = vector.load %arg9[%c0_37, %c64] : memref<16x128xf32, #tpu.memory_space<vmem>>, vector<16x16xf32>
      %c4 = arith.constant 4 : index
      %c0_38 = arith.constant 0 : index
      %c0_39 = arith.constant 0 : index
      %56 = vector.load %arg8[%c4, %c0_38, %c0_39] : memref<8x16x1xf32, #tpu.memory_space<vmem>>, vector<1x16x1xf32>
      %57 = vector.shape_cast %56 : vector<1x16x1xf32> to vector<16x1xf32>
      %58 = tpu.reciprocal %57 {approx = true} : vector<16x1xf32> -> vector<16x1xf32>
      %59 = vector.broadcast %58 : vector<16x1xf32> to vector<16x16xf32>
      %60 = arith.mulf %55, %59 : vector<16x16xf32>
      %c0_40 = arith.constant 0 : index
      %c64_41 = arith.constant 64 : index
      %61 = vector.load %arg9[%c0_40, %c64_41] : memref<16x128xf32, #tpu.memory_space<vmem>>, vector<16x16xf32>
      tpu.vector_store %arg9[%c0_40, %c64_41], %60 {strides = array<i32>} : memref<16x128xf32, #tpu.memory_space<vmem>>, vector<16x16xf32>,
      %c0_42 = arith.constant 0 : index
      %c80 = arith.constant 80 : index
      %62 = vector.load %arg9[%c0_42, %c80] : memref<16x128xf32, #tpu.memory_space<vmem>>, vector<16x16xf32>
      %c5 = arith.constant 5 : index
      %c0_43 = arith.constant 0 : index
      %c0_44 = arith.constant 0 : index
      %63 = vector.load %arg8[%c5, %c0_43, %c0_44] : memref<8x16x1xf32, #tpu.memory_space<vmem>>, vector<1x16x1xf32>
      %64 = vector.shape_cast %63 : vector<1x16x1xf32> to vector<16x1xf32>
      %65 = tpu.reciprocal %64 {approx = true} : vector<16x1xf32> -> vector<16x1xf32>
      %66 = vector.broadcast %65 : vector<16x1xf32> to vector<16x16xf32>
      %67 = arith.mulf %62, %66 : vector<16x16xf32>
      %c0_45 = arith.constant 0 : index
      %c80_46 = arith.constant 80 : index
      %68 = vector.load %arg9[%c0_45, %c80_46] : memref<16x128xf32, #tpu.memory_space<vmem>>, vector<16x16xf32>
      tpu.vector_store %arg9[%c0_45, %c80_46], %67 {strides = array<i32>} : memref<16x128xf32, #tpu.memory_space<vmem>>, vector<16x16xf32>,
      %c0_47 = arith.constant 0 : index
      %c96 = arith.constant 96 : index
      %69 = vector.load %arg9[%c0_47, %c96] : memref<16x128xf32, #tpu.memory_space<vmem>>, vector<16x16xf32>
      %c6 = arith.constant 6 : index
      %c0_48 = arith.constant 0 : index
      %c0_49 = arith.constant 0 : index
      %70 = vector.load %arg8[%c6, %c0_48, %c0_49] : memref<8x16x1xf32, #tpu.memory_space<vmem>>, vector<1x16x1xf32>
      %71 = vector.shape_cast %70 : vector<1x16x1xf32> to vector<16x1xf32>
      %72 = tpu.reciprocal %71 {approx = true} : vector<16x1xf32> -> vector<16x1xf32>
      %73 = vector.broadcast %72 : vector<16x1xf32> to vector<16x16xf32>
      %74 = arith.mulf %69, %73 : vector<16x16xf32>
      %c0_50 = arith.constant 0 : index
      %c96_51 = arith.constant 96 : index
      %75 = vector.load %arg9[%c0_50, %c96_51] : memref<16x128xf32, #tpu.memory_space<vmem>>, vector<16x16xf32>
      tpu.vector_store %arg9[%c0_50, %c96_51], %74 {strides = array<i32>} : memref<16x128xf32, #tpu.memory_space<vmem>>, vector<16x16xf32>,
      %c0_52 = arith.constant 0 : index
      %c112 = arith.constant 112 : index
      %76 = vector.load %arg9[%c0_52, %c112] : memref<16x128xf32, #tpu.memory_space<vmem>>, vector<16x16xf32>
      %c7 = arith.constant 7 : index
      %c0_53 = arith.constant 0 : index
      %c0_54 = arith.constant 0 : index
      %77 = vector.load %arg8[%c7, %c0_53, %c0_54] : memref<8x16x1xf32, #tpu.memory_space<vmem>>, vector<1x16x1xf32>
      %78 = vector.shape_cast %77 : vector<1x16x1xf32> to vector<16x1xf32>
      %79 = tpu.reciprocal %78 {approx = true} : vector<16x1xf32> -> vector<16x1xf32>
      %80 = vector.broadcast %79 : vector<16x1xf32> to vector<16x16xf32>
      %81 = arith.mulf %76, %80 : vector<16x16xf32>
      %c0_55 = arith.constant 0 : index
      %c112_56 = arith.constant 112 : index
      %82 = vector.load %arg9[%c0_55, %c112_56] : memref<16x128xf32, #tpu.memory_space<vmem>>, vector<16x16xf32>
      tpu.vector_store %arg9[%c0_55, %c112_56], %81 {strides = array<i32>} : memref<16x128xf32, #tpu.memory_space<vmem>>, vector<16x16xf32>,
      %c0_57 = arith.constant 0 : index
      %c0_58 = arith.constant 0 : index
      %83 = vector.load %arg9[%c0_57, %c0_58] : memref<16x128xf32, #tpu.memory_space<vmem>>, vector<16x128xf32>
      %84 = arith.truncf %83 : vector<16x128xf32> to vector<16x128xbf16>
      %c0_59 = arith.constant 0 : index
      %c0_60 = arith.constant 0 : index
      %c0_61 = arith.constant 0 : index
      %85 = vector.load %arg6[%c0_59, %c0_60, %c0_61] : memref<1x16x128xbf16, #tpu.memory_space<vmem>>, vector<1x16x128xbf16>
      %86 = vector.shape_cast %85 : vector<1x16x128xbf16> to vector<16x128xbf16>
      %87 = vector.shape_cast %84 : vector<16x128xbf16> to vector<1x16x128xbf16>
      tpu.vector_store %arg6[%c0_59, %c0_60, %c0_61], %87 {strides = array<i32>} : memref<1x16x128xbf16, #tpu.memory_space<vmem>>, vector<1x16x128xbf16>,
    } else {
    }
    return
  }
  func.func @transform_0(%arg0: i32, %arg1: i32, %arg2: i32) -> (i32, i32, i32) {
    %c0_i32 = arith.constant 0 : i32
    %c0_i32_0 = arith.constant 0 : i32
    return %arg0, %arg1, %c0_i32 : i32, i32, i32
  }
  func.func @transform_1(%arg0: i32, %arg1: i32, %arg2: i32) -> (i32, i32, i32) {
    %c0_i32 = arith.constant 0 : i32
    %c0_i32_0 = arith.constant 0 : i32
    return %arg0, %arg2, %c0_i32 : i32, i32, i32
  }
  func.func @transform_2(%arg0: i32, %arg1: i32, %arg2: i32) -> (i32, i32, i32) {
    %c0_i32 = arith.constant 0 : i32
    %c0_i32_0 = arith.constant 0 : i32
    return %arg0, %arg2, %c0_i32 : i32, i32, i32
  }
  func.func @transform_3(%arg0: i32, %arg1: i32, %arg2: i32) -> (i32, i32, i32) {
    %c0_i32 = arith.constant 0 : i32
    %c0_i32_0 = arith.constant 0 : i32
    return %arg0, %arg1, %c0_i32 : i32, i32, i32
  }
}

module attributes {stable_mosaic.version = 11 : i64} {
  func.func @_wo_ln_q_kernel(%arg0: i32, %arg1: memref<16x128xbf16, #tpu.memory_space<vmem>>, %arg2: memref<128x128xbf16, #tpu.memory_space<vmem>>, %arg3: memref<1x128xf32, #tpu.memory_space<vmem>>, %arg4: memref<16x128xf32, #tpu.memory_space<vmem>>, %arg5: memref<1x128xf32, #tpu.memory_space<vmem>>, %arg6: memref<1x128xf32, #tpu.memory_space<vmem>>, %arg7: memref<128x128xbf16, #tpu.memory_space<vmem>>, %arg8: memref<1x128xf32, #tpu.memory_space<vmem>>, %arg9: memref<16x128xf32, #tpu.memory_space<vmem>>, %arg10: memref<16x128xbf16, #tpu.memory_space<vmem>>) attributes {dimension_semantics = [#tpu.dimension_semantics<parallel>], iteration_bounds = array<i64: 2>, scalar_prefetch = 0 : i64, scratch_operands = 0 : i64, tpu.core_type = #tpu.core_type<tc>, window_params = [{transform_indices = @transform_0, window_bounds = array<i64: 16, 128>}, {pipeline_mode = #tpu.pipeline_mode<synchronous>, transform_indices = @transform_1, window_bounds = array<i64: 128, 128>}, {pipeline_mode = #tpu.pipeline_mode<synchronous>, transform_indices = @transform_2, window_bounds = array<i64: 1, 128>}, {transform_indices = @transform_3, window_bounds = array<i64: 16, 128>}, {pipeline_mode = #tpu.pipeline_mode<synchronous>, transform_indices = @transform_4, window_bounds = array<i64: 1, 128>}, {pipeline_mode = #tpu.pipeline_mode<synchronous>, transform_indices = @transform_5, window_bounds = array<i64: 1, 128>}, {pipeline_mode = #tpu.pipeline_mode<synchronous>, transform_indices = @transform_6, window_bounds = array<i64: 128, 128>}, {pipeline_mode = #tpu.pipeline_mode<synchronous>, transform_indices = @transform_7, window_bounds = array<i64: 1, 128>}, {transform_indices = @transform_8, window_bounds = array<i64: 16, 128>}, {transform_indices = @transform_9, window_bounds = array<i64: 16, 128>}]} {
    %c0 = arith.constant 0 : index
    %c0_0 = arith.constant 0 : index
    %0 = vector.load %arg1[%c0, %c0_0] : memref<16x128xbf16, #tpu.memory_space<vmem>>, vector<16x128xbf16>
    %c0_1 = arith.constant 0 : index
    %c0_2 = arith.constant 0 : index
    %1 = vector.load %arg2[%c0_1, %c0_2] : memref<128x128xbf16, #tpu.memory_space<vmem>>, vector<128x128xbf16>
    %cst = arith.constant dense<0.000000e+00> : vector<16x128xf32>
    %2 = tpu.matmul %0, %1, %cst {dimension_numbers = #tpu.dot_dimension_numbers<[1], [0], [0], [1], [0, 0, 1, 1], [], []>} : vector<16x128xbf16>, vector<128x128xbf16>, vector<16x128xf32> -> vector<16x128xf32>
    %c0_3 = arith.constant 0 : index
    %c0_4 = arith.constant 0 : index
    %3 = vector.load %arg3[%c0_3, %c0_4] : memref<1x128xf32, #tpu.memory_space<vmem>>, vector<1x128xf32>
    %4 = vector.broadcast %3 : vector<1x128xf32> to vector<16x128xf32>
    %5 = arith.addf %2, %4 : vector<16x128xf32>
    %c0_5 = arith.constant 0 : index
    %c0_6 = arith.constant 0 : index
    %6 = vector.load %arg4[%c0_5, %c0_6] : memref<16x128xf32, #tpu.memory_space<vmem>>, vector<16x128xf32>
    %7 = arith.addf %5, %6 : vector<16x128xf32>
    %cst_7 = arith.constant dense<0.000000e+00> : vector<16xf32>
    %8 = vector.multi_reduction <add>, %7, %cst_7 [1] : vector<16x128xf32> to vector<16xf32>
    %9 = vector.shape_cast %8 : vector<16xf32> to vector<16x1xf32>
    %cst_8 = arith.constant 1.280000e+02 : f32
    %10 = vector.broadcast %cst_8 : f32 to vector<16x1xf32>
    %11 = arith.divf %9, %10 : vector<16x1xf32>
    %12 = vector.broadcast %11 : vector<16x1xf32> to vector<16x128xf32>
    %13 = arith.subf %7, %12 : vector<16x128xf32>
    %14 = arith.mulf %13, %13 : vector<16x128xf32>
    %cst_9 = arith.constant dense<0.000000e+00> : vector<16xf32>
    %15 = vector.multi_reduction <add>, %14, %cst_9 [1] : vector<16x128xf32> to vector<16xf32>
    %16 = vector.shape_cast %15 : vector<16xf32> to vector<16x1xf32>
    %cst_10 = arith.constant 1.280000e+02 : f32
    %17 = vector.broadcast %cst_10 : f32 to vector<16x1xf32>
    %18 = arith.divf %16, %17 : vector<16x1xf32>
    %19 = vector.broadcast %11 : vector<16x1xf32> to vector<16x128xf32>
    %20 = arith.subf %7, %19 : vector<16x128xf32>
    %cst_11 = arith.constant 9.99999974E-6 : f32
    %21 = vector.broadcast %cst_11 : f32 to vector<16x1xf32>
    %22 = arith.addf %18, %21 : vector<16x1xf32>
    %23 = math.rsqrt %22 : vector<16x1xf32>
    %24 = vector.broadcast %23 : vector<16x1xf32> to vector<16x128xf32>
    %25 = arith.mulf %20, %24 : vector<16x128xf32>
    %c0_12 = arith.constant 0 : index
    %c0_13 = arith.constant 0 : index
    %26 = vector.load %arg5[%c0_12, %c0_13] : memref<1x128xf32, #tpu.memory_space<vmem>>, vector<1x128xf32>
    %27 = vector.broadcast %26 : vector<1x128xf32> to vector<16x128xf32>
    %28 = arith.mulf %25, %27 : vector<16x128xf32>
    %c0_14 = arith.constant 0 : index
    %c0_15 = arith.constant 0 : index
    %29 = vector.load %arg6[%c0_14, %c0_15] : memref<1x128xf32, #tpu.memory_space<vmem>>, vector<1x128xf32>
    %30 = vector.broadcast %29 : vector<1x128xf32> to vector<16x128xf32>
    %31 = arith.addf %28, %30 : vector<16x128xf32>
    %c0_16 = arith.constant 0 : index
    %c0_17 = arith.constant 0 : index
    %32 = vector.load %arg9[%c0_16, %c0_17] : memref<16x128xf32, #tpu.memory_space<vmem>>, vector<16x128xf32>
    tpu.vector_store %arg9[%c0_16, %c0_17], %31 {strides = array<i32>} : memref<16x128xf32, #tpu.memory_space<vmem>>, vector<16x128xf32>,
    %33 = arith.truncf %31 : vector<16x128xf32> to vector<16x128xbf16>
    %c0_18 = arith.constant 0 : index
    %c0_19 = arith.constant 0 : index
    %34 = vector.load %arg7[%c0_18, %c0_19] : memref<128x128xbf16, #tpu.memory_space<vmem>>, vector<128x128xbf16>
    %cst_20 = arith.constant dense<0.000000e+00> : vector<16x128xf32>
    %35 = tpu.matmul %33, %34, %cst_20 {dimension_numbers = #tpu.dot_dimension_numbers<[1], [0], [0], [1], [0, 0, 1, 1], [], []>} : vector<16x128xbf16>, vector<128x128xbf16>, vector<16x128xf32> -> vector<16x128xf32>
    %c0_21 = arith.constant 0 : index
    %c0_22 = arith.constant 0 : index
    %36 = vector.load %arg8[%c0_21, %c0_22] : memref<1x128xf32, #tpu.memory_space<vmem>>, vector<1x128xf32>
    %37 = vector.broadcast %36 : vector<1x128xf32> to vector<16x128xf32>
    %38 = arith.addf %35, %37 : vector<16x128xf32>
    %39 = arith.truncf %38 : vector<16x128xf32> to vector<16x128xbf16>
    %c0_23 = arith.constant 0 : index
    %c0_24 = arith.constant 0 : index
    %40 = vector.load %arg10[%c0_23, %c0_24] : memref<16x128xbf16, #tpu.memory_space<vmem>>, vector<16x128xbf16>
    tpu.vector_store %arg10[%c0_23, %c0_24], %39 {strides = array<i32>} : memref<16x128xbf16, #tpu.memory_space<vmem>>, vector<16x128xbf16>,
    return
  }
  func.func @transform_0(%arg0: i32) -> (i32, i32) {
    %c0_i32 = arith.constant 0 : i32
    %c0_i32_0 = arith.constant 0 : i32
    return %arg0, %c0_i32 : i32, i32
  }
  func.func @transform_1(%arg0: i32) -> (i32, i32) {
    %c0_i32 = arith.constant 0 : i32
    %c0_i32_0 = arith.constant 0 : i32
    %c0_i32_1 = arith.constant 0 : i32
    return %c0_i32, %c0_i32_0 : i32, i32
  }
  func.func @transform_2(%arg0: i32) -> (i32, i32) {
    %c0_i32 = arith.constant 0 : i32
    %c0_i32_0 = arith.constant 0 : i32
    %c0_i32_1 = arith.constant 0 : i32
    return %c0_i32, %c0_i32_0 : i32, i32
  }
  func.func @transform_3(%arg0: i32) -> (i32, i32) {
    %c0_i32 = arith.constant 0 : i32
    %c0_i32_0 = arith.constant 0 : i32
    return %arg0, %c0_i32 : i32, i32
  }
  func.func @transform_4(%arg0: i32) -> (i32, i32) {
    %c0_i32 = arith.constant 0 : i32
    %c0_i32_0 = arith.constant 0 : i32
    %c0_i32_1 = arith.constant 0 : i32
    return %c0_i32, %c0_i32_0 : i32, i32
  }
  func.func @transform_5(%arg0: i32) -> (i32, i32) {
    %c0_i32 = arith.constant 0 : i32
    %c0_i32_0 = arith.constant 0 : i32
    %c0_i32_1 = arith.constant 0 : i32
    return %c0_i32, %c0_i32_0 : i32, i32
  }
  func.func @transform_6(%arg0: i32) -> (i32, i32) {
    %c0_i32 = arith.constant 0 : i32
    %c0_i32_0 = arith.constant 0 : i32
    %c0_i32_1 = arith.constant 0 : i32
    return %c0_i32, %c0_i32_0 : i32, i32
  }
  func.func @transform_7(%arg0: i32) -> (i32, i32) {
    %c0_i32 = arith.constant 0 : i32
    %c0_i32_0 = arith.constant 0 : i32
    %c0_i32_1 = arith.constant 0 : i32
    return %c0_i32, %c0_i32_0 : i32, i32
  }
  func.func @transform_8(%arg0: i32) -> (i32, i32) {
    %c0_i32 = arith.constant 0 : i32
    %c0_i32_0 = arith.constant 0 : i32
    return %arg0, %c0_i32 : i32, i32
  }
  func.func @transform_9(%arg0: i32) -> (i32, i32) {
    %c0_i32 = arith.constant 0 : i32
    %c0_i32_0 = arith.constant 0 : i32
    return %arg0, %c0_i32 : i32, i32
  }
}

module attributes {stable_mosaic.version = 11 : i64} {
  func.func @_kv_kernel(%arg0: i32, %arg1: memref<16x128xf32, #tpu.memory_space<vmem>>, %arg2: memref<128x256xbf16, #tpu.memory_space<vmem>>, %arg3: memref<1x256xf32, #tpu.memory_space<vmem>>, %arg4: memref<16x128xbf16, #tpu.memory_space<vmem>>, %arg5: memref<16x128xbf16, #tpu.memory_space<vmem>>) attributes {dimension_semantics = [#tpu.dimension_semantics<parallel>], iteration_bounds = array<i64: 2>, scalar_prefetch = 0 : i64, scratch_operands = 0 : i64, tpu.core_type = #tpu.core_type<tc>, window_params = [{transform_indices = @transform_0, window_bounds = array<i64: 16, 128>}, {pipeline_mode = #tpu.pipeline_mode<synchronous>, transform_indices = @transform_1, window_bounds = array<i64: 128, 256>}, {pipeline_mode = #tpu.pipeline_mode<synchronous>, transform_indices = @transform_2, window_bounds = array<i64: 1, 256>}, {transform_indices = @transform_3, window_bounds = array<i64: 16, 128>}, {transform_indices = @transform_4, window_bounds = array<i64: 16, 128>}]} {
    %c0 = arith.constant 0 : index
    %c0_0 = arith.constant 0 : index
    %0 = vector.load %arg1[%c0, %c0_0] : memref<16x128xf32, #tpu.memory_space<vmem>>, vector<16x128xf32>
    %1 = arith.truncf %0 : vector<16x128xf32> to vector<16x128xbf16>
    %c0_1 = arith.constant 0 : index
    %c0_2 = arith.constant 0 : index
    %2 = vector.load %arg2[%c0_1, %c0_2] : memref<128x256xbf16, #tpu.memory_space<vmem>>, vector<128x256xbf16>
    %cst = arith.constant dense<0.000000e+00> : vector<16x256xf32>
    %3 = tpu.matmul %1, %2, %cst {dimension_numbers = #tpu.dot_dimension_numbers<[1], [0], [0], [1], [0, 0, 1, 1], [], []>} : vector<16x128xbf16>, vector<128x256xbf16>, vector<16x256xf32> -> vector<16x256xf32>
    %c0_3 = arith.constant 0 : index
    %c0_4 = arith.constant 0 : index
    %4 = vector.load %arg3[%c0_3, %c0_4] : memref<1x256xf32, #tpu.memory_space<vmem>>, vector<1x256xf32>
    %5 = vector.broadcast %4 : vector<1x256xf32> to vector<16x256xf32>
    %6 = arith.addf %3, %5 : vector<16x256xf32>
    %7 = vector.extract_strided_slice %6 {offsets = [0, 0], sizes = [16, 128], strides = [1, 1]} : vector<16x256xf32> to vector<16x128xf32>
    %8 = arith.truncf %7 : vector<16x128xf32> to vector<16x128xbf16>
    %c0_5 = arith.constant 0 : index
    %c0_6 = arith.constant 0 : index
    %9 = vector.load %arg4[%c0_5, %c0_6] : memref<16x128xbf16, #tpu.memory_space<vmem>>, vector<16x128xbf16>
    tpu.vector_store %arg4[%c0_5, %c0_6], %8 {strides = array<i32>} : memref<16x128xbf16, #tpu.memory_space<vmem>>, vector<16x128xbf16>,
    %10 = vector.extract_strided_slice %6 {offsets = [0, 128], sizes = [16, 128], strides = [1, 1]} : vector<16x256xf32> to vector<16x128xf32>
    %11 = arith.truncf %10 : vector<16x128xf32> to vector<16x128xbf16>
    %c0_7 = arith.constant 0 : index
    %c0_8 = arith.constant 0 : index
    %12 = vector.load %arg5[%c0_7, %c0_8] : memref<16x128xbf16, #tpu.memory_space<vmem>>, vector<16x128xbf16>
    tpu.vector_store %arg5[%c0_7, %c0_8], %11 {strides = array<i32>} : memref<16x128xbf16, #tpu.memory_space<vmem>>, vector<16x128xbf16>,
    return
  }
  func.func @transform_0(%arg0: i32) -> (i32, i32) {
    %c0_i32 = arith.constant 0 : i32
    %c0_i32_0 = arith.constant 0 : i32
    return %arg0, %c0_i32 : i32, i32
  }
  func.func @transform_1(%arg0: i32) -> (i32, i32) {
    %c0_i32 = arith.constant 0 : i32
    %c0_i32_0 = arith.constant 0 : i32
    %c0_i32_1 = arith.constant 0 : i32
    return %c0_i32, %c0_i32_0 : i32, i32
  }
  func.func @transform_2(%arg0: i32) -> (i32, i32) {
    %c0_i32 = arith.constant 0 : i32
    %c0_i32_0 = arith.constant 0 : i32
    %c0_i32_1 = arith.constant 0 : i32
    return %c0_i32, %c0_i32_0 : i32, i32
  }
  func.func @transform_3(%arg0: i32) -> (i32, i32) {
    %c0_i32 = arith.constant 0 : i32
    %c0_i32_0 = arith.constant 0 : i32
    return %arg0, %c0_i32 : i32, i32
  }
  func.func @transform_4(%arg0: i32) -> (i32, i32) {
    %c0_i32 = arith.constant 0 : i32
    %c0_i32_0 = arith.constant 0 : i32
    return %arg0, %c0_i32 : i32, i32
  }
}

module attributes {stable_mosaic.version = 11 : i64} {
  func.func @_attention_kernel(%arg0: i32, %arg1: i32, %arg2: i32, %arg3: memref<1x16x128xbf16, #tpu.memory_space<vmem>>, %arg4: memref<1x16x128xbf16, #tpu.memory_space<vmem>>, %arg5: memref<1x16x128xbf16, #tpu.memory_space<vmem>>, %arg6: memref<1x16x128xbf16, #tpu.memory_space<vmem>>, %arg7: memref<8x16x1xf32, #tpu.memory_space<vmem>>, %arg8: memref<8x16x1xf32, #tpu.memory_space<vmem>>, %arg9: memref<16x128xf32, #tpu.memory_space<vmem>>) attributes {dimension_semantics = [#tpu.dimension_semantics<parallel>, #tpu.dimension_semantics<parallel>, #tpu.dimension_semantics<arbitrary>], iteration_bounds = array<i64: 2, 1, 1>, scalar_prefetch = 0 : i64, scratch_operands = 3 : i64, tpu.core_type = #tpu.core_type<tc>, window_params = [{transform_indices = @transform_0, window_bounds = array<i64: 1, 16, 128>}, {transform_indices = @transform_1, window_bounds = array<i64: 1, 16, 128>}, {transform_indices = @transform_2, window_bounds = array<i64: 1, 16, 128>}, {transform_indices = @transform_3, window_bounds = array<i64: 1, 16, 128>}]} {
    %c0_i32 = arith.constant 0 : i32
    %0 = arith.cmpi eq, %arg2, %c0_i32 : i32
    %1 = arith.extui %0 : i1 to i32
    %c0_i32_0 = arith.constant 0 : i32
    %2 = arith.cmpi ne, %1, %c0_i32_0 : i32
    scf.if %2 {
      %cst_164 = arith.constant -1.000000e+30 : f32
      %292 = vector.broadcast %cst_164 : f32 to vector<8x16x1xf32>
      %c0_165 = arith.constant 0 : index
      %c0_166 = arith.constant 0 : index
      %c0_167 = arith.constant 0 : index
      %293 = vector.load %arg7[%c0_165, %c0_166, %c0_167] : memref<8x16x1xf32, #tpu.memory_space<vmem>>, vector<8x16x1xf32>
      tpu.vector_store %arg7[%c0_165, %c0_166, %c0_167], %292 {strides = array<i32>} : memref<8x16x1xf32, #tpu.memory_space<vmem>>, vector<8x16x1xf32>,
      %cst_168 = arith.constant 0.000000e+00 : f32
      %294 = vector.broadcast %cst_168 : f32 to vector<8x16x1xf32>
      %c0_169 = arith.constant 0 : index
      %c0_170 = arith.constant 0 : index
      %c0_171 = arith.constant 0 : index
      %295 = vector.load %arg8[%c0_169, %c0_170, %c0_171] : memref<8x16x1xf32, #tpu.memory_space<vmem>>, vector<8x16x1xf32>
      tpu.vector_store %arg8[%c0_169, %c0_170, %c0_171], %294 {strides = array<i32>} : memref<8x16x1xf32, #tpu.memory_space<vmem>>, vector<8x16x1xf32>,
      %cst_172 = arith.constant 0.000000e+00 : f32
      %296 = vector.broadcast %cst_172 : f32 to vector<16x128xf32>
      %c0_173 = arith.constant 0 : index
      %c0_174 = arith.constant 0 : index
      %297 = vector.load %arg9[%c0_173, %c0_174] : memref<16x128xf32, #tpu.memory_space<vmem>>, vector<16x128xf32>
      tpu.vector_store %arg9[%c0_173, %c0_174], %296 {strides = array<i32>} : memref<16x128xf32, #tpu.memory_space<vmem>>, vector<16x128xf32>,
    } else {
    }
    %c0 = arith.constant 0 : index
    %c0_1 = arith.constant 0 : index
    %c0_2 = arith.constant 0 : index
    %3 = vector.load %arg3[%c0, %c0_1, %c0_2] : memref<1x16x128xbf16, #tpu.memory_space<vmem>>, vector<1x16x128xbf16>
    %4 = vector.shape_cast %3 : vector<1x16x128xbf16> to vector<16x128xbf16>
    %c0_3 = arith.constant 0 : index
    %c0_4 = arith.constant 0 : index
    %c0_5 = arith.constant 0 : index
    %5 = vector.load %arg4[%c0_3, %c0_4, %c0_5] : memref<1x16x128xbf16, #tpu.memory_space<vmem>>, vector<1x16x128xbf16>
    %6 = vector.shape_cast %5 : vector<1x16x128xbf16> to vector<16x128xbf16>
    %c0_6 = arith.constant 0 : index
    %c0_7 = arith.constant 0 : index
    %c0_8 = arith.constant 0 : index
    %7 = vector.load %arg5[%c0_6, %c0_7, %c0_8] : memref<1x16x128xbf16, #tpu.memory_space<vmem>>, vector<1x16x128xbf16>
    %8 = vector.shape_cast %7 : vector<1x16x128xbf16> to vector<16x128xbf16>
    %9 = vector.extract_strided_slice %4 {offsets = [0, 0], sizes = [16, 16], strides = [1, 1]} : vector<16x128xbf16> to vector<16x16xbf16>
    %10 = vector.extract_strided_slice %6 {offsets = [0, 0], sizes = [16, 16], strides = [1, 1]} : vector<16x128xbf16> to vector<16x16xbf16>
    %11 = vector.extract_strided_slice %8 {offsets = [0, 0], sizes = [16, 16], strides = [1, 1]} : vector<16x128xbf16> to vector<16x16xbf16>
    %cst = arith.constant dense<0.000000e+00> : vector<16x16xf32>
    %12 = tpu.matmul %9, %10, %cst {dimension_numbers = #tpu.dot_dimension_numbers<[1], [1], [0], [0], [0, 0, 1, 0], [], []>} : vector<16x16xbf16>, vector<16x16xbf16>, vector<16x16xf32> -> vector<16x16xf32>
    %cst_9 = arith.constant 2.500000e-01 : f32
    %13 = vector.broadcast %cst_9 : f32 to vector<16x16xf32>
    %14 = arith.mulf %12, %13 : vector<16x16xf32>
    %c0_10 = arith.constant 0 : index
    %c0_11 = arith.constant 0 : index
    %c0_12 = arith.constant 0 : index
    %15 = vector.load %arg7[%c0_10, %c0_11, %c0_12] : memref<8x16x1xf32, #tpu.memory_space<vmem>>, vector<1x16x1xf32>
    %16 = vector.shape_cast %15 : vector<1x16x1xf32> to vector<16x1xf32>
    %c0_13 = arith.constant 0 : index
    %c0_14 = arith.constant 0 : index
    %c0_15 = arith.constant 0 : index
    %17 = vector.load %arg8[%c0_13, %c0_14, %c0_15] : memref<8x16x1xf32, #tpu.memory_space<vmem>>, vector<1x16x1xf32>
    %18 = vector.shape_cast %17 : vector<1x16x1xf32> to vector<16x1xf32>
    %cst_16 = arith.constant dense<0xFF800000> : vector<16xf32>
    %19 = vector.multi_reduction <maximumf>, %14, %cst_16 [1] : vector<16x16xf32> to vector<16xf32>
    %20 = vector.shape_cast %19 : vector<16xf32> to vector<16x1xf32>
    %21 = arith.maximumf %16, %20 : vector<16x1xf32>
    %22 = arith.subf %16, %21 : vector<16x1xf32>
    %23 = math.exp %22 : vector<16x1xf32>
    %24 = vector.broadcast %21 : vector<16x1xf32> to vector<16x16xf32>
    %25 = arith.subf %14, %24 : vector<16x16xf32>
    %26 = math.exp %25 : vector<16x16xf32>
    %27 = arith.mulf %23, %18 : vector<16x1xf32>
    %cst_17 = arith.constant dense<0.000000e+00> : vector<16xf32>
    %28 = vector.multi_reduction <add>, %26, %cst_17 [1] : vector<16x16xf32> to vector<16xf32>
    %29 = vector.shape_cast %28 : vector<16xf32> to vector<16x1xf32>
    %30 = arith.addf %27, %29 : vector<16x1xf32>
    %c0_18 = arith.constant 0 : index
    %c0_19 = arith.constant 0 : index
    %c0_20 = arith.constant 0 : index
    %31 = vector.load %arg8[%c0_18, %c0_19, %c0_20] : memref<8x16x1xf32, #tpu.memory_space<vmem>>, vector<1x16x1xf32>
    %32 = vector.shape_cast %31 : vector<1x16x1xf32> to vector<16x1xf32>
    %33 = vector.shape_cast %30 : vector<16x1xf32> to vector<1x16x1xf32>
    tpu.vector_store %arg8[%c0_18, %c0_19, %c0_20], %33 {strides = array<i32>} : memref<8x16x1xf32, #tpu.memory_space<vmem>>, vector<1x16x1xf32>,
    %c0_21 = arith.constant 0 : index
    %c0_22 = arith.constant 0 : index
    %c0_23 = arith.constant 0 : index
    %34 = vector.load %arg7[%c0_21, %c0_22, %c0_23] : memref<8x16x1xf32, #tpu.memory_space<vmem>>, vector<1x16x1xf32>
    %35 = vector.shape_cast %34 : vector<1x16x1xf32> to vector<16x1xf32>
    %36 = vector.shape_cast %21 : vector<16x1xf32> to vector<1x16x1xf32>
    tpu.vector_store %arg7[%c0_21, %c0_22, %c0_23], %36 {strides = array<i32>} : memref<8x16x1xf32, #tpu.memory_space<vmem>>, vector<1x16x1xf32>,
    %37 = arith.truncf %26 : vector<16x16xf32> to vector<16x16xbf16>
    %cst_24 = arith.constant dense<0.000000e+00> : vector<16x16xf32>
    %38 = tpu.matmul %37, %11, %cst_24 {dimension_numbers = #tpu.dot_dimension_numbers<[1], [0], [0], [1], [0, 0, 1, 1], [], []>} : vector<16x16xbf16>, vector<16x16xbf16>, vector<16x16xf32> -> vector<16x16xf32>
    %c0_25 = arith.constant 0 : index
    %c0_26 = arith.constant 0 : index
    %39 = vector.load %arg9[%c0_25, %c0_26] : memref<16x128xf32, #tpu.memory_space<vmem>>, vector<16x16xf32>
    %40 = vector.broadcast %23 : vector<16x1xf32> to vector<16x16xf32>
    %41 = arith.mulf %40, %39 : vector<16x16xf32>
    %42 = arith.addf %41, %38 : vector<16x16xf32>
    %c0_27 = arith.constant 0 : index
    %c0_28 = arith.constant 0 : index
    %43 = vector.load %arg9[%c0_27, %c0_28] : memref<16x128xf32, #tpu.memory_space<vmem>>, vector<16x16xf32>
    tpu.vector_store %arg9[%c0_27, %c0_28], %42 {strides = array<i32>} : memref<16x128xf32, #tpu.memory_space<vmem>>, vector<16x16xf32>,
    %44 = vector.extract_strided_slice %4 {offsets = [0, 16], sizes = [16, 16], strides = [1, 1]} : vector<16x128xbf16> to vector<16x16xbf16>
    %45 = vector.extract_strided_slice %6 {offsets = [0, 16], sizes = [16, 16], strides = [1, 1]} : vector<16x128xbf16> to vector<16x16xbf16>
    %46 = vector.extract_strided_slice %8 {offsets = [0, 16], sizes = [16, 16], strides = [1, 1]} : vector<16x128xbf16> to vector<16x16xbf16>
    %cst_29 = arith.constant dense<0.000000e+00> : vector<16x16xf32>
    %47 = tpu.matmul %44, %45, %cst_29 {dimension_numbers = #tpu.dot_dimension_numbers<[1], [1], [0], [0], [0, 0, 1, 0], [], []>} : vector<16x16xbf16>, vector<16x16xbf16>, vector<16x16xf32> -> vector<16x16xf32>
    %cst_30 = arith.constant 2.500000e-01 : f32
    %48 = vector.broadcast %cst_30 : f32 to vector<16x16xf32>
    %49 = arith.mulf %47, %48 : vector<16x16xf32>
    %c1 = arith.constant 1 : index
    %c0_31 = arith.constant 0 : index
    %c0_32 = arith.constant 0 : index
    %50 = vector.load %arg7[%c1, %c0_31, %c0_32] : memref<8x16x1xf32, #tpu.memory_space<vmem>>, vector<1x16x1xf32>
    %51 = vector.shape_cast %50 : vector<1x16x1xf32> to vector<16x1xf32>
    %c1_33 = arith.constant 1 : index
    %c0_34 = arith.constant 0 : index
    %c0_35 = arith.constant 0 : index
    %52 = vector.load %arg8[%c1_33, %c0_34, %c0_35] : memref<8x16x1xf32, #tpu.memory_space<vmem>>, vector<1x16x1xf32>
    %53 = vector.shape_cast %52 : vector<1x16x1xf32> to vector<16x1xf32>
    %cst_36 = arith.constant dense<0xFF800000> : vector<16xf32>
    %54 = vector.multi_reduction <maximumf>, %49, %cst_36 [1] : vector<16x16xf32> to vector<16xf32>
    %55 = vector.shape_cast %54 : vector<16xf32> to vector<16x1xf32>
    %56 = arith.maximumf %51, %55 : vector<16x1xf32>
    %57 = arith.subf %51, %56 : vector<16x1xf32>
    %58 = math.exp %57 : vector<16x1xf32>
    %59 = vector.broadcast %56 : vector<16x1xf32> to vector<16x16xf32>
    %60 = arith.subf %49, %59 : vector<16x16xf32>
    %61 = math.exp %60 : vector<16x16xf32>
    %62 = arith.mulf %58, %53 : vector<16x1xf32>
    %cst_37 = arith.constant dense<0.000000e+00> : vector<16xf32>
    %63 = vector.multi_reduction <add>, %61, %cst_37 [1] : vector<16x16xf32> to vector<16xf32>
    %64 = vector.shape_cast %63 : vector<16xf32> to vector<16x1xf32>
    %65 = arith.addf %62, %64 : vector<16x1xf32>
    %c1_38 = arith.constant 1 : index
    %c0_39 = arith.constant 0 : index
    %c0_40 = arith.constant 0 : index
    %66 = vector.load %arg8[%c1_38, %c0_39, %c0_40] : memref<8x16x1xf32, #tpu.memory_space<vmem>>, vector<1x16x1xf32>
    %67 = vector.shape_cast %66 : vector<1x16x1xf32> to vector<16x1xf32>
    %68 = vector.shape_cast %65 : vector<16x1xf32> to vector<1x16x1xf32>
    tpu.vector_store %arg8[%c1_38, %c0_39, %c0_40], %68 {strides = array<i32>} : memref<8x16x1xf32, #tpu.memory_space<vmem>>, vector<1x16x1xf32>,
    %c1_41 = arith.constant 1 : index
    %c0_42 = arith.constant 0 : index
    %c0_43 = arith.constant 0 : index
    %69 = vector.load %arg7[%c1_41, %c0_42, %c0_43] : memref<8x16x1xf32, #tpu.memory_space<vmem>>, vector<1x16x1xf32>
    %70 = vector.shape_cast %69 : vector<1x16x1xf32> to vector<16x1xf32>
    %71 = vector.shape_cast %56 : vector<16x1xf32> to vector<1x16x1xf32>
    tpu.vector_store %arg7[%c1_41, %c0_42, %c0_43], %71 {strides = array<i32>} : memref<8x16x1xf32, #tpu.memory_space<vmem>>, vector<1x16x1xf32>,
    %72 = arith.truncf %61 : vector<16x16xf32> to vector<16x16xbf16>
    %cst_44 = arith.constant dense<0.000000e+00> : vector<16x16xf32>
    %73 = tpu.matmul %72, %46, %cst_44 {dimension_numbers = #tpu.dot_dimension_numbers<[1], [0], [0], [1], [0, 0, 1, 1], [], []>} : vector<16x16xbf16>, vector<16x16xbf16>, vector<16x16xf32> -> vector<16x16xf32>
    %c0_45 = arith.constant 0 : index
    %c16 = arith.constant 16 : index
    %74 = vector.load %arg9[%c0_45, %c16] : memref<16x128xf32, #tpu.memory_space<vmem>>, vector<16x16xf32>
    %75 = vector.broadcast %58 : vector<16x1xf32> to vector<16x16xf32>
    %76 = arith.mulf %75, %74 : vector<16x16xf32>
    %77 = arith.addf %76, %73 : vector<16x16xf32>
    %c0_46 = arith.constant 0 : index
    %c16_47 = arith.constant 16 : index
    %78 = vector.load %arg9[%c0_46, %c16_47] : memref<16x128xf32, #tpu.memory_space<vmem>>, vector<16x16xf32>
    tpu.vector_store %arg9[%c0_46, %c16_47], %77 {strides = array<i32>} : memref<16x128xf32, #tpu.memory_space<vmem>>, vector<16x16xf32>,
    %79 = vector.extract_strided_slice %4 {offsets = [0, 32], sizes = [16, 16], strides = [1, 1]} : vector<16x128xbf16> to vector<16x16xbf16>
    %80 = vector.extract_strided_slice %6 {offsets = [0, 32], sizes = [16, 16], strides = [1, 1]} : vector<16x128xbf16> to vector<16x16xbf16>
    %81 = vector.extract_strided_slice %8 {offsets = [0, 32], sizes = [16, 16], strides = [1, 1]} : vector<16x128xbf16> to vector<16x16xbf16>
    %cst_48 = arith.constant dense<0.000000e+00> : vector<16x16xf32>
    %82 = tpu.matmul %79, %80, %cst_48 {dimension_numbers = #tpu.dot_dimension_numbers<[1], [1], [0], [0], [0, 0, 1, 0], [], []>} : vector<16x16xbf16>, vector<16x16xbf16>, vector<16x16xf32> -> vector<16x16xf32>
    %cst_49 = arith.constant 2.500000e-01 : f32
    %83 = vector.broadcast %cst_49 : f32 to vector<16x16xf32>
    %84 = arith.mulf %82, %83 : vector<16x16xf32>
    %c2 = arith.constant 2 : index
    %c0_50 = arith.constant 0 : index
    %c0_51 = arith.constant 0 : index
    %85 = vector.load %arg7[%c2, %c0_50, %c0_51] : memref<8x16x1xf32, #tpu.memory_space<vmem>>, vector<1x16x1xf32>
    %86 = vector.shape_cast %85 : vector<1x16x1xf32> to vector<16x1xf32>
    %c2_52 = arith.constant 2 : index
    %c0_53 = arith.constant 0 : index
    %c0_54 = arith.constant 0 : index
    %87 = vector.load %arg8[%c2_52, %c0_53, %c0_54] : memref<8x16x1xf32, #tpu.memory_space<vmem>>, vector<1x16x1xf32>
    %88 = vector.shape_cast %87 : vector<1x16x1xf32> to vector<16x1xf32>
    %cst_55 = arith.constant dense<0xFF800000> : vector<16xf32>
    %89 = vector.multi_reduction <maximumf>, %84, %cst_55 [1] : vector<16x16xf32> to vector<16xf32>
    %90 = vector.shape_cast %89 : vector<16xf32> to vector<16x1xf32>
    %91 = arith.maximumf %86, %90 : vector<16x1xf32>
    %92 = arith.subf %86, %91 : vector<16x1xf32>
    %93 = math.exp %92 : vector<16x1xf32>
    %94 = vector.broadcast %91 : vector<16x1xf32> to vector<16x16xf32>
    %95 = arith.subf %84, %94 : vector<16x16xf32>
    %96 = math.exp %95 : vector<16x16xf32>
    %97 = arith.mulf %93, %88 : vector<16x1xf32>
    %cst_56 = arith.constant dense<0.000000e+00> : vector<16xf32>
    %98 = vector.multi_reduction <add>, %96, %cst_56 [1] : vector<16x16xf32> to vector<16xf32>
    %99 = vector.shape_cast %98 : vector<16xf32> to vector<16x1xf32>
    %100 = arith.addf %97, %99 : vector<16x1xf32>
    %c2_57 = arith.constant 2 : index
    %c0_58 = arith.constant 0 : index
    %c0_59 = arith.constant 0 : index
    %101 = vector.load %arg8[%c2_57, %c0_58, %c0_59] : memref<8x16x1xf32, #tpu.memory_space<vmem>>, vector<1x16x1xf32>
    %102 = vector.shape_cast %101 : vector<1x16x1xf32> to vector<16x1xf32>
    %103 = vector.shape_cast %100 : vector<16x1xf32> to vector<1x16x1xf32>
    tpu.vector_store %arg8[%c2_57, %c0_58, %c0_59], %103 {strides = array<i32>} : memref<8x16x1xf32, #tpu.memory_space<vmem>>, vector<1x16x1xf32>,
    %c2_60 = arith.constant 2 : index
    %c0_61 = arith.constant 0 : index
    %c0_62 = arith.constant 0 : index
    %104 = vector.load %arg7[%c2_60, %c0_61, %c0_62] : memref<8x16x1xf32, #tpu.memory_space<vmem>>, vector<1x16x1xf32>
    %105 = vector.shape_cast %104 : vector<1x16x1xf32> to vector<16x1xf32>
    %106 = vector.shape_cast %91 : vector<16x1xf32> to vector<1x16x1xf32>
    tpu.vector_store %arg7[%c2_60, %c0_61, %c0_62], %106 {strides = array<i32>} : memref<8x16x1xf32, #tpu.memory_space<vmem>>, vector<1x16x1xf32>,
    %107 = arith.truncf %96 : vector<16x16xf32> to vector<16x16xbf16>
    %cst_63 = arith.constant dense<0.000000e+00> : vector<16x16xf32>
    %108 = tpu.matmul %107, %81, %cst_63 {dimension_numbers = #tpu.dot_dimension_numbers<[1], [0], [0], [1], [0, 0, 1, 1], [], []>} : vector<16x16xbf16>, vector<16x16xbf16>, vector<16x16xf32> -> vector<16x16xf32>
    %c0_64 = arith.constant 0 : index
    %c32 = arith.constant 32 : index
    %109 = vector.load %arg9[%c0_64, %c32] : memref<16x128xf32, #tpu.memory_space<vmem>>, vector<16x16xf32>
    %110 = vector.broadcast %93 : vector<16x1xf32> to vector<16x16xf32>
    %111 = arith.mulf %110, %109 : vector<16x16xf32>
    %112 = arith.addf %111, %108 : vector<16x16xf32>
    %c0_65 = arith.constant 0 : index
    %c32_66 = arith.constant 32 : index
    %113 = vector.load %arg9[%c0_65, %c32_66] : memref<16x128xf32, #tpu.memory_space<vmem>>, vector<16x16xf32>
    tpu.vector_store %arg9[%c0_65, %c32_66], %112 {strides = array<i32>} : memref<16x128xf32, #tpu.memory_space<vmem>>, vector<16x16xf32>,
    %114 = vector.extract_strided_slice %4 {offsets = [0, 48], sizes = [16, 16], strides = [1, 1]} : vector<16x128xbf16> to vector<16x16xbf16>
    %115 = vector.extract_strided_slice %6 {offsets = [0, 48], sizes = [16, 16], strides = [1, 1]} : vector<16x128xbf16> to vector<16x16xbf16>
    %116 = vector.extract_strided_slice %8 {offsets = [0, 48], sizes = [16, 16], strides = [1, 1]} : vector<16x128xbf16> to vector<16x16xbf16>
    %cst_67 = arith.constant dense<0.000000e+00> : vector<16x16xf32>
    %117 = tpu.matmul %114, %115, %cst_67 {dimension_numbers = #tpu.dot_dimension_numbers<[1], [1], [0], [0], [0, 0, 1, 0], [], []>} : vector<16x16xbf16>, vector<16x16xbf16>, vector<16x16xf32> -> vector<16x16xf32>
    %cst_68 = arith.constant 2.500000e-01 : f32
    %118 = vector.broadcast %cst_68 : f32 to vector<16x16xf32>
    %119 = arith.mulf %117, %118 : vector<16x16xf32>
    %c3 = arith.constant 3 : index
    %c0_69 = arith.constant 0 : index
    %c0_70 = arith.constant 0 : index
    %120 = vector.load %arg7[%c3, %c0_69, %c0_70] : memref<8x16x1xf32, #tpu.memory_space<vmem>>, vector<1x16x1xf32>
    %121 = vector.shape_cast %120 : vector<1x16x1xf32> to vector<16x1xf32>
    %c3_71 = arith.constant 3 : index
    %c0_72 = arith.constant 0 : index
    %c0_73 = arith.constant 0 : index
    %122 = vector.load %arg8[%c3_71, %c0_72, %c0_73] : memref<8x16x1xf32, #tpu.memory_space<vmem>>, vector<1x16x1xf32>
    %123 = vector.shape_cast %122 : vector<1x16x1xf32> to vector<16x1xf32>
    %cst_74 = arith.constant dense<0xFF800000> : vector<16xf32>
    %124 = vector.multi_reduction <maximumf>, %119, %cst_74 [1] : vector<16x16xf32> to vector<16xf32>
    %125 = vector.shape_cast %124 : vector<16xf32> to vector<16x1xf32>
    %126 = arith.maximumf %121, %125 : vector<16x1xf32>
    %127 = arith.subf %121, %126 : vector<16x1xf32>
    %128 = math.exp %127 : vector<16x1xf32>
    %129 = vector.broadcast %126 : vector<16x1xf32> to vector<16x16xf32>
    %130 = arith.subf %119, %129 : vector<16x16xf32>
    %131 = math.exp %130 : vector<16x16xf32>
    %132 = arith.mulf %128, %123 : vector<16x1xf32>
    %cst_75 = arith.constant dense<0.000000e+00> : vector<16xf32>
    %133 = vector.multi_reduction <add>, %131, %cst_75 [1] : vector<16x16xf32> to vector<16xf32>
    %134 = vector.shape_cast %133 : vector<16xf32> to vector<16x1xf32>
    %135 = arith.addf %132, %134 : vector<16x1xf32>
    %c3_76 = arith.constant 3 : index
    %c0_77 = arith.constant 0 : index
    %c0_78 = arith.constant 0 : index
    %136 = vector.load %arg8[%c3_76, %c0_77, %c0_78] : memref<8x16x1xf32, #tpu.memory_space<vmem>>, vector<1x16x1xf32>
    %137 = vector.shape_cast %136 : vector<1x16x1xf32> to vector<16x1xf32>
    %138 = vector.shape_cast %135 : vector<16x1xf32> to vector<1x16x1xf32>
    tpu.vector_store %arg8[%c3_76, %c0_77, %c0_78], %138 {strides = array<i32>} : memref<8x16x1xf32, #tpu.memory_space<vmem>>, vector<1x16x1xf32>,
    %c3_79 = arith.constant 3 : index
    %c0_80 = arith.constant 0 : index
    %c0_81 = arith.constant 0 : index
    %139 = vector.load %arg7[%c3_79, %c0_80, %c0_81] : memref<8x16x1xf32, #tpu.memory_space<vmem>>, vector<1x16x1xf32>
    %140 = vector.shape_cast %139 : vector<1x16x1xf32> to vector<16x1xf32>
    %141 = vector.shape_cast %126 : vector<16x1xf32> to vector<1x16x1xf32>
    tpu.vector_store %arg7[%c3_79, %c0_80, %c0_81], %141 {strides = array<i32>} : memref<8x16x1xf32, #tpu.memory_space<vmem>>, vector<1x16x1xf32>,
    %142 = arith.truncf %131 : vector<16x16xf32> to vector<16x16xbf16>
    %cst_82 = arith.constant dense<0.000000e+00> : vector<16x16xf32>
    %143 = tpu.matmul %142, %116, %cst_82 {dimension_numbers = #tpu.dot_dimension_numbers<[1], [0], [0], [1], [0, 0, 1, 1], [], []>} : vector<16x16xbf16>, vector<16x16xbf16>, vector<16x16xf32> -> vector<16x16xf32>
    %c0_83 = arith.constant 0 : index
    %c48 = arith.constant 48 : index
    %144 = vector.load %arg9[%c0_83, %c48] : memref<16x128xf32, #tpu.memory_space<vmem>>, vector<16x16xf32>
    %145 = vector.broadcast %128 : vector<16x1xf32> to vector<16x16xf32>
    %146 = arith.mulf %145, %144 : vector<16x16xf32>
    %147 = arith.addf %146, %143 : vector<16x16xf32>
    %c0_84 = arith.constant 0 : index
    %c48_85 = arith.constant 48 : index
    %148 = vector.load %arg9[%c0_84, %c48_85] : memref<16x128xf32, #tpu.memory_space<vmem>>, vector<16x16xf32>
    tpu.vector_store %arg9[%c0_84, %c48_85], %147 {strides = array<i32>} : memref<16x128xf32, #tpu.memory_space<vmem>>, vector<16x16xf32>,
    %149 = vector.extract_strided_slice %4 {offsets = [0, 64], sizes = [16, 16], strides = [1, 1]} : vector<16x128xbf16> to vector<16x16xbf16>
    %150 = vector.extract_strided_slice %6 {offsets = [0, 64], sizes = [16, 16], strides = [1, 1]} : vector<16x128xbf16> to vector<16x16xbf16>
    %151 = vector.extract_strided_slice %8 {offsets = [0, 64], sizes = [16, 16], strides = [1, 1]} : vector<16x128xbf16> to vector<16x16xbf16>
    %cst_86 = arith.constant dense<0.000000e+00> : vector<16x16xf32>
    %152 = tpu.matmul %149, %150, %cst_86 {dimension_numbers = #tpu.dot_dimension_numbers<[1], [1], [0], [0], [0, 0, 1, 0], [], []>} : vector<16x16xbf16>, vector<16x16xbf16>, vector<16x16xf32> -> vector<16x16xf32>
    %cst_87 = arith.constant 2.500000e-01 : f32
    %153 = vector.broadcast %cst_87 : f32 to vector<16x16xf32>
    %154 = arith.mulf %152, %153 : vector<16x16xf32>
    %c4 = arith.constant 4 : index
    %c0_88 = arith.constant 0 : index
    %c0_89 = arith.constant 0 : index
    %155 = vector.load %arg7[%c4, %c0_88, %c0_89] : memref<8x16x1xf32, #tpu.memory_space<vmem>>, vector<1x16x1xf32>
    %156 = vector.shape_cast %155 : vector<1x16x1xf32> to vector<16x1xf32>
    %c4_90 = arith.constant 4 : index
    %c0_91 = arith.constant 0 : index
    %c0_92 = arith.constant 0 : index
    %157 = vector.load %arg8[%c4_90, %c0_91, %c0_92] : memref<8x16x1xf32, #tpu.memory_space<vmem>>, vector<1x16x1xf32>
    %158 = vector.shape_cast %157 : vector<1x16x1xf32> to vector<16x1xf32>
    %cst_93 = arith.constant dense<0xFF800000> : vector<16xf32>
    %159 = vector.multi_reduction <maximumf>, %154, %cst_93 [1] : vector<16x16xf32> to vector<16xf32>
    %160 = vector.shape_cast %159 : vector<16xf32> to vector<16x1xf32>
    %161 = arith.maximumf %156, %160 : vector<16x1xf32>
    %162 = arith.subf %156, %161 : vector<16x1xf32>
    %163 = math.exp %162 : vector<16x1xf32>
    %164 = vector.broadcast %161 : vector<16x1xf32> to vector<16x16xf32>
    %165 = arith.subf %154, %164 : vector<16x16xf32>
    %166 = math.exp %165 : vector<16x16xf32>
    %167 = arith.mulf %163, %158 : vector<16x1xf32>
    %cst_94 = arith.constant dense<0.000000e+00> : vector<16xf32>
    %168 = vector.multi_reduction <add>, %166, %cst_94 [1] : vector<16x16xf32> to vector<16xf32>
    %169 = vector.shape_cast %168 : vector<16xf32> to vector<16x1xf32>
    %170 = arith.addf %167, %169 : vector<16x1xf32>
    %c4_95 = arith.constant 4 : index
    %c0_96 = arith.constant 0 : index
    %c0_97 = arith.constant 0 : index
    %171 = vector.load %arg8[%c4_95, %c0_96, %c0_97] : memref<8x16x1xf32, #tpu.memory_space<vmem>>, vector<1x16x1xf32>
    %172 = vector.shape_cast %171 : vector<1x16x1xf32> to vector<16x1xf32>
    %173 = vector.shape_cast %170 : vector<16x1xf32> to vector<1x16x1xf32>
    tpu.vector_store %arg8[%c4_95, %c0_96, %c0_97], %173 {strides = array<i32>} : memref<8x16x1xf32, #tpu.memory_space<vmem>>, vector<1x16x1xf32>,
    %c4_98 = arith.constant 4 : index
    %c0_99 = arith.constant 0 : index
    %c0_100 = arith.constant 0 : index
    %174 = vector.load %arg7[%c4_98, %c0_99, %c0_100] : memref<8x16x1xf32, #tpu.memory_space<vmem>>, vector<1x16x1xf32>
    %175 = vector.shape_cast %174 : vector<1x16x1xf32> to vector<16x1xf32>
    %176 = vector.shape_cast %161 : vector<16x1xf32> to vector<1x16x1xf32>
    tpu.vector_store %arg7[%c4_98, %c0_99, %c0_100], %176 {strides = array<i32>} : memref<8x16x1xf32, #tpu.memory_space<vmem>>, vector<1x16x1xf32>,
    %177 = arith.truncf %166 : vector<16x16xf32> to vector<16x16xbf16>
    %cst_101 = arith.constant dense<0.000000e+00> : vector<16x16xf32>
    %178 = tpu.matmul %177, %151, %cst_101 {dimension_numbers = #tpu.dot_dimension_numbers<[1], [0], [0], [1], [0, 0, 1, 1], [], []>} : vector<16x16xbf16>, vector<16x16xbf16>, vector<16x16xf32> -> vector<16x16xf32>
    %c0_102 = arith.constant 0 : index
    %c64 = arith.constant 64 : index
    %179 = vector.load %arg9[%c0_102, %c64] : memref<16x128xf32, #tpu.memory_space<vmem>>, vector<16x16xf32>
    %180 = vector.broadcast %163 : vector<16x1xf32> to vector<16x16xf32>
    %181 = arith.mulf %180, %179 : vector<16x16xf32>
    %182 = arith.addf %181, %178 : vector<16x16xf32>
    %c0_103 = arith.constant 0 : index
    %c64_104 = arith.constant 64 : index
    %183 = vector.load %arg9[%c0_103, %c64_104] : memref<16x128xf32, #tpu.memory_space<vmem>>, vector<16x16xf32>
    tpu.vector_store %arg9[%c0_103, %c64_104], %182 {strides = array<i32>} : memref<16x128xf32, #tpu.memory_space<vmem>>, vector<16x16xf32>,
    %184 = vector.extract_strided_slice %4 {offsets = [0, 80], sizes = [16, 16], strides = [1, 1]} : vector<16x128xbf16> to vector<16x16xbf16>
    %185 = vector.extract_strided_slice %6 {offsets = [0, 80], sizes = [16, 16], strides = [1, 1]} : vector<16x128xbf16> to vector<16x16xbf16>
    %186 = vector.extract_strided_slice %8 {offsets = [0, 80], sizes = [16, 16], strides = [1, 1]} : vector<16x128xbf16> to vector<16x16xbf16>
    %cst_105 = arith.constant dense<0.000000e+00> : vector<16x16xf32>
    %187 = tpu.matmul %184, %185, %cst_105 {dimension_numbers = #tpu.dot_dimension_numbers<[1], [1], [0], [0], [0, 0, 1, 0], [], []>} : vector<16x16xbf16>, vector<16x16xbf16>, vector<16x16xf32> -> vector<16x16xf32>
    %cst_106 = arith.constant 2.500000e-01 : f32
    %188 = vector.broadcast %cst_106 : f32 to vector<16x16xf32>
    %189 = arith.mulf %187, %188 : vector<16x16xf32>
    %c5 = arith.constant 5 : index
    %c0_107 = arith.constant 0 : index
    %c0_108 = arith.constant 0 : index
    %190 = vector.load %arg7[%c5, %c0_107, %c0_108] : memref<8x16x1xf32, #tpu.memory_space<vmem>>, vector<1x16x1xf32>
    %191 = vector.shape_cast %190 : vector<1x16x1xf32> to vector<16x1xf32>
    %c5_109 = arith.constant 5 : index
    %c0_110 = arith.constant 0 : index
    %c0_111 = arith.constant 0 : index
    %192 = vector.load %arg8[%c5_109, %c0_110, %c0_111] : memref<8x16x1xf32, #tpu.memory_space<vmem>>, vector<1x16x1xf32>
    %193 = vector.shape_cast %192 : vector<1x16x1xf32> to vector<16x1xf32>
    %cst_112 = arith.constant dense<0xFF800000> : vector<16xf32>
    %194 = vector.multi_reduction <maximumf>, %189, %cst_112 [1] : vector<16x16xf32> to vector<16xf32>
    %195 = vector.shape_cast %194 : vector<16xf32> to vector<16x1xf32>
    %196 = arith.maximumf %191, %195 : vector<16x1xf32>
    %197 = arith.subf %191, %196 : vector<16x1xf32>
    %198 = math.exp %197 : vector<16x1xf32>
    %199 = vector.broadcast %196 : vector<16x1xf32> to vector<16x16xf32>
    %200 = arith.subf %189, %199 : vector<16x16xf32>
    %201 = math.exp %200 : vector<16x16xf32>
    %202 = arith.mulf %198, %193 : vector<16x1xf32>
    %cst_113 = arith.constant dense<0.000000e+00> : vector<16xf32>
    %203 = vector.multi_reduction <add>, %201, %cst_113 [1] : vector<16x16xf32> to vector<16xf32>
    %204 = vector.shape_cast %203 : vector<16xf32> to vector<16x1xf32>
    %205 = arith.addf %202, %204 : vector<16x1xf32>
    %c5_114 = arith.constant 5 : index
    %c0_115 = arith.constant 0 : index
    %c0_116 = arith.constant 0 : index
    %206 = vector.load %arg8[%c5_114, %c0_115, %c0_116] : memref<8x16x1xf32, #tpu.memory_space<vmem>>, vector<1x16x1xf32>
    %207 = vector.shape_cast %206 : vector<1x16x1xf32> to vector<16x1xf32>
    %208 = vector.shape_cast %205 : vector<16x1xf32> to vector<1x16x1xf32>
    tpu.vector_store %arg8[%c5_114, %c0_115, %c0_116], %208 {strides = array<i32>} : memref<8x16x1xf32, #tpu.memory_space<vmem>>, vector<1x16x1xf32>,
    %c5_117 = arith.constant 5 : index
    %c0_118 = arith.constant 0 : index
    %c0_119 = arith.constant 0 : index
    %209 = vector.load %arg7[%c5_117, %c0_118, %c0_119] : memref<8x16x1xf32, #tpu.memory_space<vmem>>, vector<1x16x1xf32>
    %210 = vector.shape_cast %209 : vector<1x16x1xf32> to vector<16x1xf32>
    %211 = vector.shape_cast %196 : vector<16x1xf32> to vector<1x16x1xf32>
    tpu.vector_store %arg7[%c5_117, %c0_118, %c0_119], %211 {strides = array<i32>} : memref<8x16x1xf32, #tpu.memory_space<vmem>>, vector<1x16x1xf32>,
    %212 = arith.truncf %201 : vector<16x16xf32> to vector<16x16xbf16>
    %cst_120 = arith.constant dense<0.000000e+00> : vector<16x16xf32>
    %213 = tpu.matmul %212, %186, %cst_120 {dimension_numbers = #tpu.dot_dimension_numbers<[1], [0], [0], [1], [0, 0, 1, 1], [], []>} : vector<16x16xbf16>, vector<16x16xbf16>, vector<16x16xf32> -> vector<16x16xf32>
    %c0_121 = arith.constant 0 : index
    %c80 = arith.constant 80 : index
    %214 = vector.load %arg9[%c0_121, %c80] : memref<16x128xf32, #tpu.memory_space<vmem>>, vector<16x16xf32>
    %215 = vector.broadcast %198 : vector<16x1xf32> to vector<16x16xf32>
    %216 = arith.mulf %215, %214 : vector<16x16xf32>
    %217 = arith.addf %216, %213 : vector<16x16xf32>
    %c0_122 = arith.constant 0 : index
    %c80_123 = arith.constant 80 : index
    %218 = vector.load %arg9[%c0_122, %c80_123] : memref<16x128xf32, #tpu.memory_space<vmem>>, vector<16x16xf32>
    tpu.vector_store %arg9[%c0_122, %c80_123], %217 {strides = array<i32>} : memref<16x128xf32, #tpu.memory_space<vmem>>, vector<16x16xf32>,
    %219 = vector.extract_strided_slice %4 {offsets = [0, 96], sizes = [16, 16], strides = [1, 1]} : vector<16x128xbf16> to vector<16x16xbf16>
    %220 = vector.extract_strided_slice %6 {offsets = [0, 96], sizes = [16, 16], strides = [1, 1]} : vector<16x128xbf16> to vector<16x16xbf16>
    %221 = vector.extract_strided_slice %8 {offsets = [0, 96], sizes = [16, 16], strides = [1, 1]} : vector<16x128xbf16> to vector<16x16xbf16>
    %cst_124 = arith.constant dense<0.000000e+00> : vector<16x16xf32>
    %222 = tpu.matmul %219, %220, %cst_124 {dimension_numbers = #tpu.dot_dimension_numbers<[1], [1], [0], [0], [0, 0, 1, 0], [], []>} : vector<16x16xbf16>, vector<16x16xbf16>, vector<16x16xf32> -> vector<16x16xf32>
    %cst_125 = arith.constant 2.500000e-01 : f32
    %223 = vector.broadcast %cst_125 : f32 to vector<16x16xf32>
    %224 = arith.mulf %222, %223 : vector<16x16xf32>
    %c6 = arith.constant 6 : index
    %c0_126 = arith.constant 0 : index
    %c0_127 = arith.constant 0 : index
    %225 = vector.load %arg7[%c6, %c0_126, %c0_127] : memref<8x16x1xf32, #tpu.memory_space<vmem>>, vector<1x16x1xf32>
    %226 = vector.shape_cast %225 : vector<1x16x1xf32> to vector<16x1xf32>
    %c6_128 = arith.constant 6 : index
    %c0_129 = arith.constant 0 : index
    %c0_130 = arith.constant 0 : index
    %227 = vector.load %arg8[%c6_128, %c0_129, %c0_130] : memref<8x16x1xf32, #tpu.memory_space<vmem>>, vector<1x16x1xf32>
    %228 = vector.shape_cast %227 : vector<1x16x1xf32> to vector<16x1xf32>
    %cst_131 = arith.constant dense<0xFF800000> : vector<16xf32>
    %229 = vector.multi_reduction <maximumf>, %224, %cst_131 [1] : vector<16x16xf32> to vector<16xf32>
    %230 = vector.shape_cast %229 : vector<16xf32> to vector<16x1xf32>
    %231 = arith.maximumf %226, %230 : vector<16x1xf32>
    %232 = arith.subf %226, %231 : vector<16x1xf32>
    %233 = math.exp %232 : vector<16x1xf32>
    %234 = vector.broadcast %231 : vector<16x1xf32> to vector<16x16xf32>
    %235 = arith.subf %224, %234 : vector<16x16xf32>
    %236 = math.exp %235 : vector<16x16xf32>
    %237 = arith.mulf %233, %228 : vector<16x1xf32>
    %cst_132 = arith.constant dense<0.000000e+00> : vector<16xf32>
    %238 = vector.multi_reduction <add>, %236, %cst_132 [1] : vector<16x16xf32> to vector<16xf32>
    %239 = vector.shape_cast %238 : vector<16xf32> to vector<16x1xf32>
    %240 = arith.addf %237, %239 : vector<16x1xf32>
    %c6_133 = arith.constant 6 : index
    %c0_134 = arith.constant 0 : index
    %c0_135 = arith.constant 0 : index
    %241 = vector.load %arg8[%c6_133, %c0_134, %c0_135] : memref<8x16x1xf32, #tpu.memory_space<vmem>>, vector<1x16x1xf32>
    %242 = vector.shape_cast %241 : vector<1x16x1xf32> to vector<16x1xf32>
    %243 = vector.shape_cast %240 : vector<16x1xf32> to vector<1x16x1xf32>
    tpu.vector_store %arg8[%c6_133, %c0_134, %c0_135], %243 {strides = array<i32>} : memref<8x16x1xf32, #tpu.memory_space<vmem>>, vector<1x16x1xf32>,
    %c6_136 = arith.constant 6 : index
    %c0_137 = arith.constant 0 : index
    %c0_138 = arith.constant 0 : index
    %244 = vector.load %arg7[%c6_136, %c0_137, %c0_138] : memref<8x16x1xf32, #tpu.memory_space<vmem>>, vector<1x16x1xf32>
    %245 = vector.shape_cast %244 : vector<1x16x1xf32> to vector<16x1xf32>
    %246 = vector.shape_cast %231 : vector<16x1xf32> to vector<1x16x1xf32>
    tpu.vector_store %arg7[%c6_136, %c0_137, %c0_138], %246 {strides = array<i32>} : memref<8x16x1xf32, #tpu.memory_space<vmem>>, vector<1x16x1xf32>,
    %247 = arith.truncf %236 : vector<16x16xf32> to vector<16x16xbf16>
    %cst_139 = arith.constant dense<0.000000e+00> : vector<16x16xf32>
    %248 = tpu.matmul %247, %221, %cst_139 {dimension_numbers = #tpu.dot_dimension_numbers<[1], [0], [0], [1], [0, 0, 1, 1], [], []>} : vector<16x16xbf16>, vector<16x16xbf16>, vector<16x16xf32> -> vector<16x16xf32>
    %c0_140 = arith.constant 0 : index
    %c96 = arith.constant 96 : index
    %249 = vector.load %arg9[%c0_140, %c96] : memref<16x128xf32, #tpu.memory_space<vmem>>, vector<16x16xf32>
    %250 = vector.broadcast %233 : vector<16x1xf32> to vector<16x16xf32>
    %251 = arith.mulf %250, %249 : vector<16x16xf32>
    %252 = arith.addf %251, %248 : vector<16x16xf32>
    %c0_141 = arith.constant 0 : index
    %c96_142 = arith.constant 96 : index
    %253 = vector.load %arg9[%c0_141, %c96_142] : memref<16x128xf32, #tpu.memory_space<vmem>>, vector<16x16xf32>
    tpu.vector_store %arg9[%c0_141, %c96_142], %252 {strides = array<i32>} : memref<16x128xf32, #tpu.memory_space<vmem>>, vector<16x16xf32>,
    %254 = vector.extract_strided_slice %4 {offsets = [0, 112], sizes = [16, 16], strides = [1, 1]} : vector<16x128xbf16> to vector<16x16xbf16>
    %255 = vector.extract_strided_slice %6 {offsets = [0, 112], sizes = [16, 16], strides = [1, 1]} : vector<16x128xbf16> to vector<16x16xbf16>
    %256 = vector.extract_strided_slice %8 {offsets = [0, 112], sizes = [16, 16], strides = [1, 1]} : vector<16x128xbf16> to vector<16x16xbf16>
    %cst_143 = arith.constant dense<0.000000e+00> : vector<16x16xf32>
    %257 = tpu.matmul %254, %255, %cst_143 {dimension_numbers = #tpu.dot_dimension_numbers<[1], [1], [0], [0], [0, 0, 1, 0], [], []>} : vector<16x16xbf16>, vector<16x16xbf16>, vector<16x16xf32> -> vector<16x16xf32>
    %cst_144 = arith.constant 2.500000e-01 : f32
    %258 = vector.broadcast %cst_144 : f32 to vector<16x16xf32>
    %259 = arith.mulf %257, %258 : vector<16x16xf32>
    %c7 = arith.constant 7 : index
    %c0_145 = arith.constant 0 : index
    %c0_146 = arith.constant 0 : index
    %260 = vector.load %arg7[%c7, %c0_145, %c0_146] : memref<8x16x1xf32, #tpu.memory_space<vmem>>, vector<1x16x1xf32>
    %261 = vector.shape_cast %260 : vector<1x16x1xf32> to vector<16x1xf32>
    %c7_147 = arith.constant 7 : index
    %c0_148 = arith.constant 0 : index
    %c0_149 = arith.constant 0 : index
    %262 = vector.load %arg8[%c7_147, %c0_148, %c0_149] : memref<8x16x1xf32, #tpu.memory_space<vmem>>, vector<1x16x1xf32>
    %263 = vector.shape_cast %262 : vector<1x16x1xf32> to vector<16x1xf32>
    %cst_150 = arith.constant dense<0xFF800000> : vector<16xf32>
    %264 = vector.multi_reduction <maximumf>, %259, %cst_150 [1] : vector<16x16xf32> to vector<16xf32>
    %265 = vector.shape_cast %264 : vector<16xf32> to vector<16x1xf32>
    %266 = arith.maximumf %261, %265 : vector<16x1xf32>
    %267 = arith.subf %261, %266 : vector<16x1xf32>
    %268 = math.exp %267 : vector<16x1xf32>
    %269 = vector.broadcast %266 : vector<16x1xf32> to vector<16x16xf32>
    %270 = arith.subf %259, %269 : vector<16x16xf32>
    %271 = math.exp %270 : vector<16x16xf32>
    %272 = arith.mulf %268, %263 : vector<16x1xf32>
    %cst_151 = arith.constant dense<0.000000e+00> : vector<16xf32>
    %273 = vector.multi_reduction <add>, %271, %cst_151 [1] : vector<16x16xf32> to vector<16xf32>
    %274 = vector.shape_cast %273 : vector<16xf32> to vector<16x1xf32>
    %275 = arith.addf %272, %274 : vector<16x1xf32>
    %c7_152 = arith.constant 7 : index
    %c0_153 = arith.constant 0 : index
    %c0_154 = arith.constant 0 : index
    %276 = vector.load %arg8[%c7_152, %c0_153, %c0_154] : memref<8x16x1xf32, #tpu.memory_space<vmem>>, vector<1x16x1xf32>
    %277 = vector.shape_cast %276 : vector<1x16x1xf32> to vector<16x1xf32>
    %278 = vector.shape_cast %275 : vector<16x1xf32> to vector<1x16x1xf32>
    tpu.vector_store %arg8[%c7_152, %c0_153, %c0_154], %278 {strides = array<i32>} : memref<8x16x1xf32, #tpu.memory_space<vmem>>, vector<1x16x1xf32>,
    %c7_155 = arith.constant 7 : index
    %c0_156 = arith.constant 0 : index
    %c0_157 = arith.constant 0 : index
    %279 = vector.load %arg7[%c7_155, %c0_156, %c0_157] : memref<8x16x1xf32, #tpu.memory_space<vmem>>, vector<1x16x1xf32>
    %280 = vector.shape_cast %279 : vector<1x16x1xf32> to vector<16x1xf32>
    %281 = vector.shape_cast %266 : vector<16x1xf32> to vector<1x16x1xf32>
    tpu.vector_store %arg7[%c7_155, %c0_156, %c0_157], %281 {strides = array<i32>} : memref<8x16x1xf32, #tpu.memory_space<vmem>>, vector<1x16x1xf32>,
    %282 = arith.truncf %271 : vector<16x16xf32> to vector<16x16xbf16>
    %cst_158 = arith.constant dense<0.000000e+00> : vector<16x16xf32>
    %283 = tpu.matmul %282, %256, %cst_158 {dimension_numbers = #tpu.dot_dimension_numbers<[1], [0], [0], [1], [0, 0, 1, 1], [], []>} : vector<16x16xbf16>, vector<16x16xbf16>, vector<16x16xf32> -> vector<16x16xf32>
    %c0_159 = arith.constant 0 : index
    %c112 = arith.constant 112 : index
    %284 = vector.load %arg9[%c0_159, %c112] : memref<16x128xf32, #tpu.memory_space<vmem>>, vector<16x16xf32>
    %285 = vector.broadcast %268 : vector<16x1xf32> to vector<16x16xf32>
    %286 = arith.mulf %285, %284 : vector<16x16xf32>
    %287 = arith.addf %286, %283 : vector<16x16xf32>
    %c0_160 = arith.constant 0 : index
    %c112_161 = arith.constant 112 : index
    %288 = vector.load %arg9[%c0_160, %c112_161] : memref<16x128xf32, #tpu.memory_space<vmem>>, vector<16x16xf32>
    tpu.vector_store %arg9[%c0_160, %c112_161], %287 {strides = array<i32>} : memref<16x128xf32, #tpu.memory_space<vmem>>, vector<16x16xf32>,
    %c0_i32_162 = arith.constant 0 : i32
    %289 = arith.cmpi eq, %arg2, %c0_i32_162 : i32
    %290 = arith.extui %289 : i1 to i32
    %c0_i32_163 = arith.constant 0 : i32
    %291 = arith.cmpi ne, %290, %c0_i32_163 : i32
    scf.if %291 {
      %c0_164 = arith.constant 0 : index
      %c0_165 = arith.constant 0 : index
      %292 = vector.load %arg9[%c0_164, %c0_165] : memref<16x128xf32, #tpu.memory_space<vmem>>, vector<16x16xf32>
      %c0_166 = arith.constant 0 : index
      %c0_167 = arith.constant 0 : index
      %c0_168 = arith.constant 0 : index
      %293 = vector.load %arg8[%c0_166, %c0_167, %c0_168] : memref<8x16x1xf32, #tpu.memory_space<vmem>>, vector<1x16x1xf32>
      %294 = vector.shape_cast %293 : vector<1x16x1xf32> to vector<16x1xf32>
      %295 = tpu.reciprocal %294 {approx = true} : vector<16x1xf32> -> vector<16x1xf32>
      %296 = vector.broadcast %295 : vector<16x1xf32> to vector<16x16xf32>
      %297 = arith.mulf %292, %296 : vector<16x16xf32>
      %c0_169 = arith.constant 0 : index
      %c0_170 = arith.constant 0 : index
      %298 = vector.load %arg9[%c0_169, %c0_170] : memref<16x128xf32, #tpu.memory_space<vmem>>, vector<16x16xf32>
      tpu.vector_store %arg9[%c0_169, %c0_170], %297 {strides = array<i32>} : memref<16x128xf32, #tpu.memory_space<vmem>>, vector<16x16xf32>,
      %c0_171 = arith.constant 0 : index
      %c16_172 = arith.constant 16 : index
      %299 = vector.load %arg9[%c0_171, %c16_172] : memref<16x128xf32, #tpu.memory_space<vmem>>, vector<16x16xf32>
      %c1_173 = arith.constant 1 : index
      %c0_174 = arith.constant 0 : index
      %c0_175 = arith.constant 0 : index
      %300 = vector.load %arg8[%c1_173, %c0_174, %c0_175] : memref<8x16x1xf32, #tpu.memory_space<vmem>>, vector<1x16x1xf32>
      %301 = vector.shape_cast %300 : vector<1x16x1xf32> to vector<16x1xf32>
      %302 = tpu.reciprocal %301 {approx = true} : vector<16x1xf32> -> vector<16x1xf32>
      %303 = vector.broadcast %302 : vector<16x1xf32> to vector<16x16xf32>
      %304 = arith.mulf %299, %303 : vector<16x16xf32>
      %c0_176 = arith.constant 0 : index
      %c16_177 = arith.constant 16 : index
      %305 = vector.load %arg9[%c0_176, %c16_177] : memref<16x128xf32, #tpu.memory_space<vmem>>, vector<16x16xf32>
      tpu.vector_store %arg9[%c0_176, %c16_177], %304 {strides = array<i32>} : memref<16x128xf32, #tpu.memory_space<vmem>>, vector<16x16xf32>,
      %c0_178 = arith.constant 0 : index
      %c32_179 = arith.constant 32 : index
      %306 = vector.load %arg9[%c0_178, %c32_179] : memref<16x128xf32, #tpu.memory_space<vmem>>, vector<16x16xf32>
      %c2_180 = arith.constant 2 : index
      %c0_181 = arith.constant 0 : index
      %c0_182 = arith.constant 0 : index
      %307 = vector.load %arg8[%c2_180, %c0_181, %c0_182] : memref<8x16x1xf32, #tpu.memory_space<vmem>>, vector<1x16x1xf32>
      %308 = vector.shape_cast %307 : vector<1x16x1xf32> to vector<16x1xf32>
      %309 = tpu.reciprocal %308 {approx = true} : vector<16x1xf32> -> vector<16x1xf32>
      %310 = vector.broadcast %309 : vector<16x1xf32> to vector<16x16xf32>
      %311 = arith.mulf %306, %310 : vector<16x16xf32>
      %c0_183 = arith.constant 0 : index
      %c32_184 = arith.constant 32 : index
      %312 = vector.load %arg9[%c0_183, %c32_184] : memref<16x128xf32, #tpu.memory_space<vmem>>, vector<16x16xf32>
      tpu.vector_store %arg9[%c0_183, %c32_184], %311 {strides = array<i32>} : memref<16x128xf32, #tpu.memory_space<vmem>>, vector<16x16xf32>,
      %c0_185 = arith.constant 0 : index
      %c48_186 = arith.constant 48 : index
      %313 = vector.load %arg9[%c0_185, %c48_186] : memref<16x128xf32, #tpu.memory_space<vmem>>, vector<16x16xf32>
      %c3_187 = arith.constant 3 : index
      %c0_188 = arith.constant 0 : index
      %c0_189 = arith.constant 0 : index
      %314 = vector.load %arg8[%c3_187, %c0_188, %c0_189] : memref<8x16x1xf32, #tpu.memory_space<vmem>>, vector<1x16x1xf32>
      %315 = vector.shape_cast %314 : vector<1x16x1xf32> to vector<16x1xf32>
      %316 = tpu.reciprocal %315 {approx = true} : vector<16x1xf32> -> vector<16x1xf32>
      %317 = vector.broadcast %316 : vector<16x1xf32> to vector<16x16xf32>
      %318 = arith.mulf %313, %317 : vector<16x16xf32>
      %c0_190 = arith.constant 0 : index
      %c48_191 = arith.constant 48 : index
      %319 = vector.load %arg9[%c0_190, %c48_191] : memref<16x128xf32, #tpu.memory_space<vmem>>, vector<16x16xf32>
      tpu.vector_store %arg9[%c0_190, %c48_191], %318 {strides = array<i32>} : memref<16x128xf32, #tpu.memory_space<vmem>>, vector<16x16xf32>,
      %c0_192 = arith.constant 0 : index
      %c64_193 = arith.constant 64 : index
      %320 = vector.load %arg9[%c0_192, %c64_193] : memref<16x128xf32, #tpu.memory_space<vmem>>, vector<16x16xf32>
      %c4_194 = arith.constant 4 : index
      %c0_195 = arith.constant 0 : index
      %c0_196 = arith.constant 0 : index
      %321 = vector.load %arg8[%c4_194, %c0_195, %c0_196] : memref<8x16x1xf32, #tpu.memory_space<vmem>>, vector<1x16x1xf32>
      %322 = vector.shape_cast %321 : vector<1x16x1xf32> to vector<16x1xf32>
      %323 = tpu.reciprocal %322 {approx = true} : vector<16x1xf32> -> vector<16x1xf32>
      %324 = vector.broadcast %323 : vector<16x1xf32> to vector<16x16xf32>
      %325 = arith.mulf %320, %324 : vector<16x16xf32>
      %c0_197 = arith.constant 0 : index
      %c64_198 = arith.constant 64 : index
      %326 = vector.load %arg9[%c0_197, %c64_198] : memref<16x128xf32, #tpu.memory_space<vmem>>, vector<16x16xf32>
      tpu.vector_store %arg9[%c0_197, %c64_198], %325 {strides = array<i32>} : memref<16x128xf32, #tpu.memory_space<vmem>>, vector<16x16xf32>,
      %c0_199 = arith.constant 0 : index
      %c80_200 = arith.constant 80 : index
      %327 = vector.load %arg9[%c0_199, %c80_200] : memref<16x128xf32, #tpu.memory_space<vmem>>, vector<16x16xf32>
      %c5_201 = arith.constant 5 : index
      %c0_202 = arith.constant 0 : index
      %c0_203 = arith.constant 0 : index
      %328 = vector.load %arg8[%c5_201, %c0_202, %c0_203] : memref<8x16x1xf32, #tpu.memory_space<vmem>>, vector<1x16x1xf32>
      %329 = vector.shape_cast %328 : vector<1x16x1xf32> to vector<16x1xf32>
      %330 = tpu.reciprocal %329 {approx = true} : vector<16x1xf32> -> vector<16x1xf32>
      %331 = vector.broadcast %330 : vector<16x1xf32> to vector<16x16xf32>
      %332 = arith.mulf %327, %331 : vector<16x16xf32>
      %c0_204 = arith.constant 0 : index
      %c80_205 = arith.constant 80 : index
      %333 = vector.load %arg9[%c0_204, %c80_205] : memref<16x128xf32, #tpu.memory_space<vmem>>, vector<16x16xf32>
      tpu.vector_store %arg9[%c0_204, %c80_205], %332 {strides = array<i32>} : memref<16x128xf32, #tpu.memory_space<vmem>>, vector<16x16xf32>,
      %c0_206 = arith.constant 0 : index
      %c96_207 = arith.constant 96 : index
      %334 = vector.load %arg9[%c0_206, %c96_207] : memref<16x128xf32, #tpu.memory_space<vmem>>, vector<16x16xf32>
      %c6_208 = arith.constant 6 : index
      %c0_209 = arith.constant 0 : index
      %c0_210 = arith.constant 0 : index
      %335 = vector.load %arg8[%c6_208, %c0_209, %c0_210] : memref<8x16x1xf32, #tpu.memory_space<vmem>>, vector<1x16x1xf32>
      %336 = vector.shape_cast %335 : vector<1x16x1xf32> to vector<16x1xf32>
      %337 = tpu.reciprocal %336 {approx = true} : vector<16x1xf32> -> vector<16x1xf32>
      %338 = vector.broadcast %337 : vector<16x1xf32> to vector<16x16xf32>
      %339 = arith.mulf %334, %338 : vector<16x16xf32>
      %c0_211 = arith.constant 0 : index
      %c96_212 = arith.constant 96 : index
      %340 = vector.load %arg9[%c0_211, %c96_212] : memref<16x128xf32, #tpu.memory_space<vmem>>, vector<16x16xf32>
      tpu.vector_store %arg9[%c0_211, %c96_212], %339 {strides = array<i32>} : memref<16x128xf32, #tpu.memory_space<vmem>>, vector<16x16xf32>,
      %c0_213 = arith.constant 0 : index
      %c112_214 = arith.constant 112 : index
      %341 = vector.load %arg9[%c0_213, %c112_214] : memref<16x128xf32, #tpu.memory_space<vmem>>, vector<16x16xf32>
      %c7_215 = arith.constant 7 : index
      %c0_216 = arith.constant 0 : index
      %c0_217 = arith.constant 0 : index
      %342 = vector.load %arg8[%c7_215, %c0_216, %c0_217] : memref<8x16x1xf32, #tpu.memory_space<vmem>>, vector<1x16x1xf32>
      %343 = vector.shape_cast %342 : vector<1x16x1xf32> to vector<16x1xf32>
      %344 = tpu.reciprocal %343 {approx = true} : vector<16x1xf32> -> vector<16x1xf32>
      %345 = vector.broadcast %344 : vector<16x1xf32> to vector<16x16xf32>
      %346 = arith.mulf %341, %345 : vector<16x16xf32>
      %c0_218 = arith.constant 0 : index
      %c112_219 = arith.constant 112 : index
      %347 = vector.load %arg9[%c0_218, %c112_219] : memref<16x128xf32, #tpu.memory_space<vmem>>, vector<16x16xf32>
      tpu.vector_store %arg9[%c0_218, %c112_219], %346 {strides = array<i32>} : memref<16x128xf32, #tpu.memory_space<vmem>>, vector<16x16xf32>,
      %c0_220 = arith.constant 0 : index
      %c0_221 = arith.constant 0 : index
      %348 = vector.load %arg9[%c0_220, %c0_221] : memref<16x128xf32, #tpu.memory_space<vmem>>, vector<16x128xf32>
      %349 = arith.truncf %348 : vector<16x128xf32> to vector<16x128xbf16>
      %c0_222 = arith.constant 0 : index
      %c0_223 = arith.constant 0 : index
      %c0_224 = arith.constant 0 : index
      %350 = vector.load %arg6[%c0_222, %c0_223, %c0_224] : memref<1x16x128xbf16, #tpu.memory_space<vmem>>, vector<1x16x128xbf16>
      %351 = vector.shape_cast %350 : vector<1x16x128xbf16> to vector<16x128xbf16>
      %352 = vector.shape_cast %349 : vector<16x128xbf16> to vector<1x16x128xbf16>
      tpu.vector_store %arg6[%c0_222, %c0_223, %c0_224], %352 {strides = array<i32>} : memref<1x16x128xbf16, #tpu.memory_space<vmem>>, vector<1x16x128xbf16>,
    } else {
    }
    return
  }
  func.func @transform_0(%arg0: i32, %arg1: i32, %arg2: i32) -> (i32, i32, i32) {
    %c0_i32 = arith.constant 0 : i32
    %c0_i32_0 = arith.constant 0 : i32
    return %arg0, %arg1, %c0_i32 : i32, i32, i32
  }
  func.func @transform_1(%arg0: i32, %arg1: i32, %arg2: i32) -> (i32, i32, i32) {
    %c0_i32 = arith.constant 0 : i32
    %c0_i32_0 = arith.constant 0 : i32
    return %arg0, %arg2, %c0_i32 : i32, i32, i32
  }
  func.func @transform_2(%arg0: i32, %arg1: i32, %arg2: i32) -> (i32, i32, i32) {
    %c0_i32 = arith.constant 0 : i32
    %c0_i32_0 = arith.constant 0 : i32
    return %arg0, %arg2, %c0_i32 : i32, i32, i32
  }
  func.func @transform_3(%arg0: i32, %arg1: i32, %arg2: i32) -> (i32, i32, i32) {
    %c0_i32 = arith.constant 0 : i32
    %c0_i32_0 = arith.constant 0 : i32
    return %arg0, %arg1, %c0_i32 : i32, i32, i32
  }
}

module attributes {stable_mosaic.version = 11 : i64} {
  func.func @_wo_ln_kernel(%arg0: i32, %arg1: memref<16x128xbf16, #tpu.memory_space<vmem>>, %arg2: memref<128x128xbf16, #tpu.memory_space<vmem>>, %arg3: memref<1x128xf32, #tpu.memory_space<vmem>>, %arg4: memref<16x128xf32, #tpu.memory_space<vmem>>, %arg5: memref<1x128xf32, #tpu.memory_space<vmem>>, %arg6: memref<1x128xf32, #tpu.memory_space<vmem>>, %arg7: memref<16x128xf32, #tpu.memory_space<vmem>>) attributes {dimension_semantics = [#tpu.dimension_semantics<parallel>], iteration_bounds = array<i64: 2>, scalar_prefetch = 0 : i64, scratch_operands = 0 : i64, tpu.core_type = #tpu.core_type<tc>, window_params = [{transform_indices = @transform_0, window_bounds = array<i64: 16, 128>}, {pipeline_mode = #tpu.pipeline_mode<synchronous>, transform_indices = @transform_1, window_bounds = array<i64: 128, 128>}, {pipeline_mode = #tpu.pipeline_mode<synchronous>, transform_indices = @transform_2, window_bounds = array<i64: 1, 128>}, {transform_indices = @transform_3, window_bounds = array<i64: 16, 128>}, {pipeline_mode = #tpu.pipeline_mode<synchronous>, transform_indices = @transform_4, window_bounds = array<i64: 1, 128>}, {pipeline_mode = #tpu.pipeline_mode<synchronous>, transform_indices = @transform_5, window_bounds = array<i64: 1, 128>}, {transform_indices = @transform_6, window_bounds = array<i64: 16, 128>}]} {
    %c0 = arith.constant 0 : index
    %c0_0 = arith.constant 0 : index
    %0 = vector.load %arg1[%c0, %c0_0] : memref<16x128xbf16, #tpu.memory_space<vmem>>, vector<16x128xbf16>
    %c0_1 = arith.constant 0 : index
    %c0_2 = arith.constant 0 : index
    %1 = vector.load %arg2[%c0_1, %c0_2] : memref<128x128xbf16, #tpu.memory_space<vmem>>, vector<128x128xbf16>
    %cst = arith.constant dense<0.000000e+00> : vector<16x128xf32>
    %2 = tpu.matmul %0, %1, %cst {dimension_numbers = #tpu.dot_dimension_numbers<[1], [0], [0], [1], [0, 0, 1, 1], [], []>} : vector<16x128xbf16>, vector<128x128xbf16>, vector<16x128xf32> -> vector<16x128xf32>
    %c0_3 = arith.constant 0 : index
    %c0_4 = arith.constant 0 : index
    %3 = vector.load %arg3[%c0_3, %c0_4] : memref<1x128xf32, #tpu.memory_space<vmem>>, vector<1x128xf32>
    %4 = vector.broadcast %3 : vector<1x128xf32> to vector<16x128xf32>
    %5 = arith.addf %2, %4 : vector<16x128xf32>
    %c0_5 = arith.constant 0 : index
    %c0_6 = arith.constant 0 : index
    %6 = vector.load %arg4[%c0_5, %c0_6] : memref<16x128xf32, #tpu.memory_space<vmem>>, vector<16x128xf32>
    %7 = arith.addf %5, %6 : vector<16x128xf32>
    %cst_7 = arith.constant dense<0.000000e+00> : vector<16xf32>
    %8 = vector.multi_reduction <add>, %7, %cst_7 [1] : vector<16x128xf32> to vector<16xf32>
    %9 = vector.shape_cast %8 : vector<16xf32> to vector<16x1xf32>
    %cst_8 = arith.constant 1.280000e+02 : f32
    %10 = vector.broadcast %cst_8 : f32 to vector<16x1xf32>
    %11 = arith.divf %9, %10 : vector<16x1xf32>
    %12 = vector.broadcast %11 : vector<16x1xf32> to vector<16x128xf32>
    %13 = arith.subf %7, %12 : vector<16x128xf32>
    %14 = arith.mulf %13, %13 : vector<16x128xf32>
    %cst_9 = arith.constant dense<0.000000e+00> : vector<16xf32>
    %15 = vector.multi_reduction <add>, %14, %cst_9 [1] : vector<16x128xf32> to vector<16xf32>
    %16 = vector.shape_cast %15 : vector<16xf32> to vector<16x1xf32>
    %cst_10 = arith.constant 1.280000e+02 : f32
    %17 = vector.broadcast %cst_10 : f32 to vector<16x1xf32>
    %18 = arith.divf %16, %17 : vector<16x1xf32>
    %19 = vector.broadcast %11 : vector<16x1xf32> to vector<16x128xf32>
    %20 = arith.subf %7, %19 : vector<16x128xf32>
    %cst_11 = arith.constant 9.99999974E-6 : f32
    %21 = vector.broadcast %cst_11 : f32 to vector<16x1xf32>
    %22 = arith.addf %18, %21 : vector<16x1xf32>
    %23 = math.rsqrt %22 : vector<16x1xf32>
    %24 = vector.broadcast %23 : vector<16x1xf32> to vector<16x128xf32>
    %25 = arith.mulf %20, %24 : vector<16x128xf32>
    %c0_12 = arith.constant 0 : index
    %c0_13 = arith.constant 0 : index
    %26 = vector.load %arg5[%c0_12, %c0_13] : memref<1x128xf32, #tpu.memory_space<vmem>>, vector<1x128xf32>
    %27 = vector.broadcast %26 : vector<1x128xf32> to vector<16x128xf32>
    %28 = arith.mulf %25, %27 : vector<16x128xf32>
    %c0_14 = arith.constant 0 : index
    %c0_15 = arith.constant 0 : index
    %29 = vector.load %arg6[%c0_14, %c0_15] : memref<1x128xf32, #tpu.memory_space<vmem>>, vector<1x128xf32>
    %30 = vector.broadcast %29 : vector<1x128xf32> to vector<16x128xf32>
    %31 = arith.addf %28, %30 : vector<16x128xf32>
    %c0_16 = arith.constant 0 : index
    %c0_17 = arith.constant 0 : index
    %32 = vector.load %arg7[%c0_16, %c0_17] : memref<16x128xf32, #tpu.memory_space<vmem>>, vector<16x128xf32>
    tpu.vector_store %arg7[%c0_16, %c0_17], %31 {strides = array<i32>} : memref<16x128xf32, #tpu.memory_space<vmem>>, vector<16x128xf32>,
    return
  }
  func.func @transform_0(%arg0: i32) -> (i32, i32) {
    %c0_i32 = arith.constant 0 : i32
    %c0_i32_0 = arith.constant 0 : i32
    return %arg0, %c0_i32 : i32, i32
  }
  func.func @transform_1(%arg0: i32) -> (i32, i32) {
    %c0_i32 = arith.constant 0 : i32
    %c0_i32_0 = arith.constant 0 : i32
    %c0_i32_1 = arith.constant 0 : i32
    return %c0_i32, %c0_i32_0 : i32, i32
  }
  func.func @transform_2(%arg0: i32) -> (i32, i32) {
    %c0_i32 = arith.constant 0 : i32
    %c0_i32_0 = arith.constant 0 : i32
    %c0_i32_1 = arith.constant 0 : i32
    return %c0_i32, %c0_i32_0 : i32, i32
  }
  func.func @transform_3(%arg0: i32) -> (i32, i32) {
    %c0_i32 = arith.constant 0 : i32
    %c0_i32_0 = arith.constant 0 : i32
    return %arg0, %c0_i32 : i32, i32
  }
  func.func @transform_4(%arg0: i32) -> (i32, i32) {
    %c0_i32 = arith.constant 0 : i32
    %c0_i32_0 = arith.constant 0 : i32
    %c0_i32_1 = arith.constant 0 : i32
    return %c0_i32, %c0_i32_0 : i32, i32
  }
  func.func @transform_5(%arg0: i32) -> (i32, i32) {
    %c0_i32 = arith.constant 0 : i32
    %c0_i32_0 = arith.constant 0 : i32
    %c0_i32_1 = arith.constant 0 : i32
    return %c0_i32, %c0_i32_0 : i32, i32
  }
  func.func @transform_6(%arg0: i32) -> (i32, i32) {
    %c0_i32 = arith.constant 0 : i32
    %c0_i32_0 = arith.constant 0 : i32
    return %arg0, %c0_i32 : i32, i32
  }
}

module attributes {stable_mosaic.version = 11 : i64} {
  func.func @_ffn_kernel(%arg0: i32, %arg1: i32, %arg2: memref<16x128xf32, #tpu.memory_space<vmem>>, %arg3: memref<128x256xbf16, #tpu.memory_space<vmem>>, %arg4: memref<1x256xf32, #tpu.memory_space<vmem>>, %arg5: memref<256x128xbf16, #tpu.memory_space<vmem>>, %arg6: memref<1x128xf32, #tpu.memory_space<vmem>>, %arg7: memref<1x128xf32, #tpu.memory_space<vmem>>, %arg8: memref<1x128xf32, #tpu.memory_space<vmem>>, %arg9: memref<16x128xf32, #tpu.memory_space<vmem>>, %arg10: memref<16x128xf32, #tpu.memory_space<vmem>>) attributes {dimension_semantics = [#tpu.dimension_semantics<parallel>, #tpu.dimension_semantics<arbitrary>], iteration_bounds = array<i64: 2, 1>, scalar_prefetch = 0 : i64, scratch_operands = 1 : i64, tpu.core_type = #tpu.core_type<tc>, window_params = [{transform_indices = @transform_0, window_bounds = array<i64: 16, 128>}, {transform_indices = @transform_1, window_bounds = array<i64: 128, 256>}, {transform_indices = @transform_2, window_bounds = array<i64: 1, 256>}, {transform_indices = @transform_3, window_bounds = array<i64: 256, 128>}, {pipeline_mode = #tpu.pipeline_mode<synchronous>, transform_indices = @transform_4, window_bounds = array<i64: 1, 128>}, {pipeline_mode = #tpu.pipeline_mode<synchronous>, transform_indices = @transform_5, window_bounds = array<i64: 1, 128>}, {pipeline_mode = #tpu.pipeline_mode<synchronous>, transform_indices = @transform_6, window_bounds = array<i64: 1, 128>}, {transform_indices = @transform_7, window_bounds = array<i64: 16, 128>}]} {
    %c0_i32 = arith.constant 0 : i32
    %0 = arith.cmpi eq, %arg1, %c0_i32 : i32
    %1 = arith.extui %0 : i1 to i32
    %c0_i32_0 = arith.constant 0 : i32
    %2 = arith.cmpi ne, %1, %c0_i32_0 : i32
    scf.if %2 {
      %cst_16 = arith.constant 0.000000e+00 : f32
      %21 = vector.broadcast %cst_16 : f32 to vector<16x128xf32>
      %c0_17 = arith.constant 0 : index
      %c0_18 = arith.constant 0 : index
      %22 = vector.load %arg10[%c0_17, %c0_18] : memref<16x128xf32, #tpu.memory_space<vmem>>, vector<16x128xf32>
      tpu.vector_store %arg10[%c0_17, %c0_18], %21 {strides = array<i32>} : memref<16x128xf32, #tpu.memory_space<vmem>>, vector<16x128xf32>,
    } else {
    }
    %c0 = arith.constant 0 : index
    %c0_1 = arith.constant 0 : index
    %3 = vector.load %arg2[%c0, %c0_1] : memref<16x128xf32, #tpu.memory_space<vmem>>, vector<16x128xf32>
    %4 = arith.truncf %3 : vector<16x128xf32> to vector<16x128xbf16>
    %c0_2 = arith.constant 0 : index
    %c0_3 = arith.constant 0 : index
    %5 = vector.load %arg3[%c0_2, %c0_3] : memref<128x256xbf16, #tpu.memory_space<vmem>>, vector<128x256xbf16>
    %cst = arith.constant dense<0.000000e+00> : vector<16x256xf32>
    %6 = tpu.matmul %4, %5, %cst {dimension_numbers = #tpu.dot_dimension_numbers<[1], [0], [0], [1], [0, 0, 1, 1], [], []>} : vector<16x128xbf16>, vector<128x256xbf16>, vector<16x256xf32> -> vector<16x256xf32>
    %c0_4 = arith.constant 0 : index
    %c0_5 = arith.constant 0 : index
    %7 = vector.load %arg4[%c0_4, %c0_5] : memref<1x256xf32, #tpu.memory_space<vmem>>, vector<1x256xf32>
    %8 = vector.broadcast %7 : vector<1x256xf32> to vector<16x256xf32>
    %9 = arith.addf %6, %8 : vector<16x256xf32>
    %cst_6 = arith.constant 0.000000e+00 : f32
    %10 = vector.broadcast %cst_6 : f32 to vector<16x256xf32>
    %11 = arith.maximumf %9, %10 : vector<16x256xf32>
    %c0_7 = arith.constant 0 : index
    %c0_8 = arith.constant 0 : index
    %12 = vector.load %arg10[%c0_7, %c0_8] : memref<16x128xf32, #tpu.memory_space<vmem>>, vector<16x128xf32>
    %13 = arith.truncf %11 : vector<16x256xf32> to vector<16x256xbf16>
    %c0_9 = arith.constant 0 : index
    %c0_10 = arith.constant 0 : index
    %14 = vector.load %arg5[%c0_9, %c0_10] : memref<256x128xbf16, #tpu.memory_space<vmem>>, vector<256x128xbf16>
    %cst_11 = arith.constant dense<0.000000e+00> : vector<16x128xf32>
    %15 = tpu.matmul %13, %14, %cst_11 {dimension_numbers = #tpu.dot_dimension_numbers<[1], [0], [0], [1], [0, 0, 1, 1], [], []>} : vector<16x256xbf16>, vector<256x128xbf16>, vector<16x128xf32> -> vector<16x128xf32>
    %16 = arith.addf %12, %15 : vector<16x128xf32>
    %c0_12 = arith.constant 0 : index
    %c0_13 = arith.constant 0 : index
    %17 = vector.load %arg10[%c0_12, %c0_13] : memref<16x128xf32, #tpu.memory_space<vmem>>, vector<16x128xf32>
    tpu.vector_store %arg10[%c0_12, %c0_13], %16 {strides = array<i32>} : memref<16x128xf32, #tpu.memory_space<vmem>>, vector<16x128xf32>,
    %c0_i32_14 = arith.constant 0 : i32
    %18 = arith.cmpi eq, %arg1, %c0_i32_14 : i32
    %19 = arith.extui %18 : i1 to i32
    %c0_i32_15 = arith.constant 0 : i32
    %20 = arith.cmpi ne, %19, %c0_i32_15 : i32
    scf.if %20 {
      %c0_16 = arith.constant 0 : index
      %c0_17 = arith.constant 0 : index
      %21 = vector.load %arg10[%c0_16, %c0_17] : memref<16x128xf32, #tpu.memory_space<vmem>>, vector<16x128xf32>
      %c0_18 = arith.constant 0 : index
      %c0_19 = arith.constant 0 : index
      %22 = vector.load %arg6[%c0_18, %c0_19] : memref<1x128xf32, #tpu.memory_space<vmem>>, vector<1x128xf32>
      %23 = vector.broadcast %22 : vector<1x128xf32> to vector<16x128xf32>
      %24 = arith.addf %21, %23 : vector<16x128xf32>
      %25 = arith.addf %24, %3 : vector<16x128xf32>
      %cst_20 = arith.constant dense<0.000000e+00> : vector<16xf32>
      %26 = vector.multi_reduction <add>, %25, %cst_20 [1] : vector<16x128xf32> to vector<16xf32>
      %27 = vector.shape_cast %26 : vector<16xf32> to vector<16x1xf32>
      %cst_21 = arith.constant 1.280000e+02 : f32
      %28 = vector.broadcast %cst_21 : f32 to vector<16x1xf32>
      %29 = arith.divf %27, %28 : vector<16x1xf32>
      %30 = vector.broadcast %29 : vector<16x1xf32> to vector<16x128xf32>
      %31 = arith.subf %25, %30 : vector<16x128xf32>
      %32 = arith.mulf %31, %31 : vector<16x128xf32>
      %cst_22 = arith.constant dense<0.000000e+00> : vector<16xf32>
      %33 = vector.multi_reduction <add>, %32, %cst_22 [1] : vector<16x128xf32> to vector<16xf32>
      %34 = vector.shape_cast %33 : vector<16xf32> to vector<16x1xf32>
      %cst_23 = arith.constant 1.280000e+02 : f32
      %35 = vector.broadcast %cst_23 : f32 to vector<16x1xf32>
      %36 = arith.divf %34, %35 : vector<16x1xf32>
      %37 = vector.broadcast %29 : vector<16x1xf32> to vector<16x128xf32>
      %38 = arith.subf %25, %37 : vector<16x128xf32>
      %cst_24 = arith.constant 9.99999974E-6 : f32
      %39 = vector.broadcast %cst_24 : f32 to vector<16x1xf32>
      %40 = arith.addf %36, %39 : vector<16x1xf32>
      %41 = math.rsqrt %40 : vector<16x1xf32>
      %42 = vector.broadcast %41 : vector<16x1xf32> to vector<16x128xf32>
      %43 = arith.mulf %38, %42 : vector<16x128xf32>
      %c0_25 = arith.constant 0 : index
      %c0_26 = arith.constant 0 : index
      %44 = vector.load %arg7[%c0_25, %c0_26] : memref<1x128xf32, #tpu.memory_space<vmem>>, vector<1x128xf32>
      %45 = vector.broadcast %44 : vector<1x128xf32> to vector<16x128xf32>
      %46 = arith.mulf %43, %45 : vector<16x128xf32>
      %c0_27 = arith.constant 0 : index
      %c0_28 = arith.constant 0 : index
      %47 = vector.load %arg8[%c0_27, %c0_28] : memref<1x128xf32, #tpu.memory_space<vmem>>, vector<1x128xf32>
      %48 = vector.broadcast %47 : vector<1x128xf32> to vector<16x128xf32>
      %49 = arith.addf %46, %48 : vector<16x128xf32>
      %c0_29 = arith.constant 0 : index
      %c0_30 = arith.constant 0 : index
      %50 = vector.load %arg9[%c0_29, %c0_30] : memref<16x128xf32, #tpu.memory_space<vmem>>, vector<16x128xf32>
      tpu.vector_store %arg9[%c0_29, %c0_30], %49 {strides = array<i32>} : memref<16x128xf32, #tpu.memory_space<vmem>>, vector<16x128xf32>,
    } else {
    }
    return
  }
  func.func @transform_0(%arg0: i32, %arg1: i32) -> (i32, i32) {
    %c0_i32 = arith.constant 0 : i32
    %c0_i32_0 = arith.constant 0 : i32
    return %arg0, %c0_i32 : i32, i32
  }
  func.func @transform_1(%arg0: i32, %arg1: i32) -> (i32, i32) {
    %c0_i32 = arith.constant 0 : i32
    %c0_i32_0 = arith.constant 0 : i32
    return %c0_i32, %arg1 : i32, i32
  }
  func.func @transform_2(%arg0: i32, %arg1: i32) -> (i32, i32) {
    %c0_i32 = arith.constant 0 : i32
    %c0_i32_0 = arith.constant 0 : i32
    return %c0_i32, %arg1 : i32, i32
  }
  func.func @transform_3(%arg0: i32, %arg1: i32) -> (i32, i32) {
    %c0_i32 = arith.constant 0 : i32
    %c0_i32_0 = arith.constant 0 : i32
    return %arg1, %c0_i32 : i32, i32
  }
  func.func @transform_4(%arg0: i32, %arg1: i32) -> (i32, i32) {
    %c0_i32 = arith.constant 0 : i32
    %c0_i32_0 = arith.constant 0 : i32
    %c0_i32_1 = arith.constant 0 : i32
    return %c0_i32, %c0_i32_0 : i32, i32
  }
  func.func @transform_5(%arg0: i32, %arg1: i32) -> (i32, i32) {
    %c0_i32 = arith.constant 0 : i32
    %c0_i32_0 = arith.constant 0 : i32
    %c0_i32_1 = arith.constant 0 : i32
    return %c0_i32, %c0_i32_0 : i32, i32
  }
  func.func @transform_6(%arg0: i32, %arg1: i32) -> (i32, i32) {
    %c0_i32 = arith.constant 0 : i32
    %c0_i32_0 = arith.constant 0 : i32
    %c0_i32_1 = arith.constant 0 : i32
    return %c0_i32, %c0_i32_0 : i32, i32
  }
  func.func @transform_7(%arg0: i32, %arg1: i32) -> (i32, i32) {
    %c0_i32 = arith.constant 0 : i32
    %c0_i32_0 = arith.constant 0 : i32
    return %arg0, %c0_i32 : i32, i32
  }
}

module attributes {stable_mosaic.version = 11 : i64} {
  func.func @_logit_stats_kernel(%arg0: i32, %arg1: i32, %arg2: memref<16x128xf32, #tpu.memory_space<vmem>>, %arg3: memref<128x256xbf16, #tpu.memory_space<vmem>>, %arg4: memref<1x256xf32, #tpu.memory_space<vmem>>, %arg5: memref<16x1xf32, #tpu.memory_space<vmem>>, %arg6: memref<16x1xf32, #tpu.memory_space<vmem>>, %arg7: memref<16x1xf32, #tpu.memory_space<vmem>>, %arg8: memref<16x1xf32, #tpu.memory_space<vmem>>) attributes {dimension_semantics = [#tpu.dimension_semantics<parallel>, #tpu.dimension_semantics<arbitrary>], iteration_bounds = array<i64: 2, 1>, scalar_prefetch = 0 : i64, scratch_operands = 2 : i64, tpu.core_type = #tpu.core_type<tc>, window_params = [{transform_indices = @transform_0, window_bounds = array<i64: 16, 128>}, {transform_indices = @transform_1, window_bounds = array<i64: 128, 256>}, {transform_indices = @transform_2, window_bounds = array<i64: 1, 256>}, {transform_indices = @transform_3, window_bounds = array<i64: 16, 1>}, {transform_indices = @transform_4, window_bounds = array<i64: 16, 1>}]} {
    %c0_i32 = arith.constant 0 : i32
    %0 = arith.cmpi eq, %arg1, %c0_i32 : i32
    %1 = arith.extui %0 : i1 to i32
    %c0_i32_0 = arith.constant 0 : i32
    %2 = arith.cmpi ne, %1, %c0_i32_0 : i32
    scf.if %2 {
      %cst_18 = arith.constant -1.000000e+30 : f32
      %29 = vector.broadcast %cst_18 : f32 to vector<16x1xf32>
      %c0_19 = arith.constant 0 : index
      %c0_20 = arith.constant 0 : index
      %30 = vector.load %arg7[%c0_19, %c0_20] : memref<16x1xf32, #tpu.memory_space<vmem>>, vector<16x1xf32>
      tpu.vector_store %arg7[%c0_19, %c0_20], %29 {strides = array<i32>} : memref<16x1xf32, #tpu.memory_space<vmem>>, vector<16x1xf32>,
      %cst_21 = arith.constant 0.000000e+00 : f32
      %31 = vector.broadcast %cst_21 : f32 to vector<16x1xf32>
      %c0_22 = arith.constant 0 : index
      %c0_23 = arith.constant 0 : index
      %32 = vector.load %arg8[%c0_22, %c0_23] : memref<16x1xf32, #tpu.memory_space<vmem>>, vector<16x1xf32>
      tpu.vector_store %arg8[%c0_22, %c0_23], %31 {strides = array<i32>} : memref<16x1xf32, #tpu.memory_space<vmem>>, vector<16x1xf32>,
    } else {
    }
    %c0 = arith.constant 0 : index
    %c0_1 = arith.constant 0 : index
    %3 = vector.load %arg2[%c0, %c0_1] : memref<16x128xf32, #tpu.memory_space<vmem>>, vector<16x128xf32>
    %4 = arith.truncf %3 : vector<16x128xf32> to vector<16x128xbf16>
    %c0_2 = arith.constant 0 : index
    %c0_3 = arith.constant 0 : index
    %5 = vector.load %arg3[%c0_2, %c0_3] : memref<128x256xbf16, #tpu.memory_space<vmem>>, vector<128x256xbf16>
    %cst = arith.constant dense<0.000000e+00> : vector<16x256xf32>
    %6 = tpu.matmul %4, %5, %cst {dimension_numbers = #tpu.dot_dimension_numbers<[1], [0], [0], [1], [0, 0, 1, 1], [], []>} : vector<16x128xbf16>, vector<128x256xbf16>, vector<16x256xf32> -> vector<16x256xf32>
    %c0_4 = arith.constant 0 : index
    %c0_5 = arith.constant 0 : index
    %7 = vector.load %arg4[%c0_4, %c0_5] : memref<1x256xf32, #tpu.memory_space<vmem>>, vector<1x256xf32>
    %8 = vector.broadcast %7 : vector<1x256xf32> to vector<16x256xf32>
    %9 = arith.addf %6, %8 : vector<16x256xf32>
    %c0_6 = arith.constant 0 : index
    %c0_7 = arith.constant 0 : index
    %10 = vector.load %arg7[%c0_6, %c0_7] : memref<16x1xf32, #tpu.memory_space<vmem>>, vector<16x1xf32>
    %cst_8 = arith.constant dense<0xFF800000> : vector<16xf32>
    %11 = vector.multi_reduction <maximumf>, %9, %cst_8 [1] : vector<16x256xf32> to vector<16xf32>
    %12 = vector.shape_cast %11 : vector<16xf32> to vector<16x1xf32>
    %13 = arith.maximumf %10, %12 : vector<16x1xf32>
    %c0_9 = arith.constant 0 : index
    %c0_10 = arith.constant 0 : index
    %14 = vector.load %arg8[%c0_9, %c0_10] : memref<16x1xf32, #tpu.memory_space<vmem>>, vector<16x1xf32>
    %15 = arith.subf %10, %13 : vector<16x1xf32>
    %16 = math.exp %15 : vector<16x1xf32>
    %17 = arith.mulf %14, %16 : vector<16x1xf32>
    %18 = vector.broadcast %13 : vector<16x1xf32> to vector<16x256xf32>
    %19 = arith.subf %9, %18 : vector<16x256xf32>
    %20 = math.exp %19 : vector<16x256xf32>
    %cst_11 = arith.constant dense<0.000000e+00> : vector<16xf32>
    %21 = vector.multi_reduction <add>, %20, %cst_11 [1] : vector<16x256xf32> to vector<16xf32>
    %22 = vector.shape_cast %21 : vector<16xf32> to vector<16x1xf32>
    %23 = arith.addf %17, %22 : vector<16x1xf32>
    %c0_12 = arith.constant 0 : index
    %c0_13 = arith.constant 0 : index
    %24 = vector.load %arg8[%c0_12, %c0_13] : memref<16x1xf32, #tpu.memory_space<vmem>>, vector<16x1xf32>
    tpu.vector_store %arg8[%c0_12, %c0_13], %23 {strides = array<i32>} : memref<16x1xf32, #tpu.memory_space<vmem>>, vector<16x1xf32>,
    %c0_14 = arith.constant 0 : index
    %c0_15 = arith.constant 0 : index
    %25 = vector.load %arg7[%c0_14, %c0_15] : memref<16x1xf32, #tpu.memory_space<vmem>>, vector<16x1xf32>
    tpu.vector_store %arg7[%c0_14, %c0_15], %13 {strides = array<i32>} : memref<16x1xf32, #tpu.memory_space<vmem>>, vector<16x1xf32>,
    %c0_i32_16 = arith.constant 0 : i32
    %26 = arith.cmpi eq, %arg1, %c0_i32_16 : i32
    %27 = arith.extui %26 : i1 to i32
    %c0_i32_17 = arith.constant 0 : i32
    %28 = arith.cmpi ne, %27, %c0_i32_17 : i32
    scf.if %28 {
      %c0_18 = arith.constant 0 : index
      %c0_19 = arith.constant 0 : index
      %29 = vector.load %arg7[%c0_18, %c0_19] : memref<16x1xf32, #tpu.memory_space<vmem>>, vector<16x1xf32>
      %c0_20 = arith.constant 0 : index
      %c0_21 = arith.constant 0 : index
      %30 = vector.load %arg5[%c0_20, %c0_21] : memref<16x1xf32, #tpu.memory_space<vmem>>, vector<16x1xf32>
      tpu.vector_store %arg5[%c0_20, %c0_21], %29 {strides = array<i32>} : memref<16x1xf32, #tpu.memory_space<vmem>>, vector<16x1xf32>,
      %c0_22 = arith.constant 0 : index
      %c0_23 = arith.constant 0 : index
      %31 = vector.load %arg8[%c0_22, %c0_23] : memref<16x1xf32, #tpu.memory_space<vmem>>, vector<16x1xf32>
      %c0_24 = arith.constant 0 : index
      %c0_25 = arith.constant 0 : index
      %32 = vector.load %arg6[%c0_24, %c0_25] : memref<16x1xf32, #tpu.memory_space<vmem>>, vector<16x1xf32>
      tpu.vector_store %arg6[%c0_24, %c0_25], %31 {strides = array<i32>} : memref<16x1xf32, #tpu.memory_space<vmem>>, vector<16x1xf32>,
    } else {
    }
    return
  }
  func.func @transform_0(%arg0: i32, %arg1: i32) -> (i32, i32) {
    %c0_i32 = arith.constant 0 : i32
    %c0_i32_0 = arith.constant 0 : i32
    return %arg0, %c0_i32 : i32, i32
  }
  func.func @transform_1(%arg0: i32, %arg1: i32) -> (i32, i32) {
    %c0_i32 = arith.constant 0 : i32
    %c0_i32_0 = arith.constant 0 : i32
    return %c0_i32, %arg1 : i32, i32
  }
  func.func @transform_2(%arg0: i32, %arg1: i32) -> (i32, i32) {
    %c0_i32 = arith.constant 0 : i32
    %c0_i32_0 = arith.constant 0 : i32
    return %c0_i32, %arg1 : i32, i32
  }
  func.func @transform_3(%arg0: i32, %arg1: i32) -> (i32, i32) {
    %c0_i32 = arith.constant 0 : i32
    %c0_i32_0 = arith.constant 0 : i32
    return %arg0, %c0_i32 : i32, i32
  }
  func.func @transform_4(%arg0: i32, %arg1: i32) -> (i32, i32) {
    %c0_i32 = arith.constant 0 : i32
    %c0_i32_0 = arith.constant 0 : i32
    return %arg0, %c0_i32 : i32, i32
  }
}

module attributes {stable_mosaic.version = 11 : i64} {
  func.func @_softmax_norm_kernel(%arg0: i32, %arg1: i32, %arg2: memref<16x128xf32, #tpu.memory_space<vmem>>, %arg3: memref<128x256xbf16, #tpu.memory_space<vmem>>, %arg4: memref<1x256xf32, #tpu.memory_space<vmem>>, %arg5: memref<16x1xf32, #tpu.memory_space<vmem>>, %arg6: memref<16x1xf32, #tpu.memory_space<vmem>>, %arg7: memref<16x256xf32, #tpu.memory_space<vmem>>) attributes {dimension_semantics = [#tpu.dimension_semantics<parallel>, #tpu.dimension_semantics<parallel>], iteration_bounds = array<i64: 2, 1>, scalar_prefetch = 0 : i64, scratch_operands = 0 : i64, tpu.core_type = #tpu.core_type<tc>, window_params = [{transform_indices = @transform_0, window_bounds = array<i64: 16, 128>}, {transform_indices = @transform_1, window_bounds = array<i64: 128, 256>}, {transform_indices = @transform_2, window_bounds = array<i64: 1, 256>}, {transform_indices = @transform_3, window_bounds = array<i64: 16, 1>}, {transform_indices = @transform_4, window_bounds = array<i64: 16, 1>}, {transform_indices = @transform_5, window_bounds = array<i64: 16, 256>}]} {
    %c0 = arith.constant 0 : index
    %c0_0 = arith.constant 0 : index
    %0 = vector.load %arg2[%c0, %c0_0] : memref<16x128xf32, #tpu.memory_space<vmem>>, vector<16x128xf32>
    %1 = arith.truncf %0 : vector<16x128xf32> to vector<16x128xbf16>
    %c0_1 = arith.constant 0 : index
    %c0_2 = arith.constant 0 : index
    %2 = vector.load %arg3[%c0_1, %c0_2] : memref<128x256xbf16, #tpu.memory_space<vmem>>, vector<128x256xbf16>
    %cst = arith.constant dense<0.000000e+00> : vector<16x256xf32>
    %3 = tpu.matmul %1, %2, %cst {dimension_numbers = #tpu.dot_dimension_numbers<[1], [0], [0], [1], [0, 0, 1, 1], [], []>} : vector<16x128xbf16>, vector<128x256xbf16>, vector<16x256xf32> -> vector<16x256xf32>
    %c0_3 = arith.constant 0 : index
    %c0_4 = arith.constant 0 : index
    %4 = vector.load %arg4[%c0_3, %c0_4] : memref<1x256xf32, #tpu.memory_space<vmem>>, vector<1x256xf32>
    %5 = vector.broadcast %4 : vector<1x256xf32> to vector<16x256xf32>
    %6 = arith.addf %3, %5 : vector<16x256xf32>
    %c0_5 = arith.constant 0 : index
    %c0_6 = arith.constant 0 : index
    %7 = vector.load %arg5[%c0_5, %c0_6] : memref<16x1xf32, #tpu.memory_space<vmem>>, vector<16x1xf32>
    %8 = vector.broadcast %7 : vector<16x1xf32> to vector<16x256xf32>
    %9 = arith.subf %6, %8 : vector<16x256xf32>
    %10 = math.exp %9 : vector<16x256xf32>
    %c0_7 = arith.constant 0 : index
    %c0_8 = arith.constant 0 : index
    %11 = vector.load %arg6[%c0_7, %c0_8] : memref<16x1xf32, #tpu.memory_space<vmem>>, vector<16x1xf32>
    %12 = vector.broadcast %11 : vector<16x1xf32> to vector<16x256xf32>
    %13 = arith.divf %10, %12 : vector<16x256xf32>
    %c0_9 = arith.constant 0 : index
    %c0_10 = arith.constant 0 : index
    %14 = vector.load %arg7[%c0_9, %c0_10] : memref<16x256xf32, #tpu.memory_space<vmem>>, vector<16x256xf32>
    tpu.vector_store %arg7[%c0_9, %c0_10], %13 {strides = array<i32>} : memref<16x256xf32, #tpu.memory_space<vmem>>, vector<16x256xf32>,
    return
  }
  func.func @transform_0(%arg0: i32, %arg1: i32) -> (i32, i32) {
    %c0_i32 = arith.constant 0 : i32
    %c0_i32_0 = arith.constant 0 : i32
    return %arg0, %c0_i32 : i32, i32
  }
  func.func @transform_1(%arg0: i32, %arg1: i32) -> (i32, i32) {
    %c0_i32 = arith.constant 0 : i32
    %c0_i32_0 = arith.constant 0 : i32
    return %c0_i32, %arg1 : i32, i32
  }
  func.func @transform_2(%arg0: i32, %arg1: i32) -> (i32, i32) {
    %c0_i32 = arith.constant 0 : i32
    %c0_i32_0 = arith.constant 0 : i32
    return %c0_i32, %arg1 : i32, i32
  }
  func.func @transform_3(%arg0: i32, %arg1: i32) -> (i32, i32) {
    %c0_i32 = arith.constant 0 : i32
    %c0_i32_0 = arith.constant 0 : i32
    return %arg0, %c0_i32 : i32, i32
  }
  func.func @transform_4(%arg0: i32, %arg1: i32) -> (i32, i32) {
    %c0_i32 = arith.constant 0 : i32
    %c0_i32_0 = arith.constant 0 : i32
    return %arg0, %c0_i32 : i32, i32
  }
  func.func @transform_5(%arg0: i32, %arg1: i32) -> (i32, i32) {
    %c0_i32 = arith.constant 0 : i32
    return %arg0, %arg1 : i32, i32
  }
}

</mosaic_0001>

<bundles_post_ra>
// kernel: tpu_custom_call.1
= control target key start
LH: loop header
LB: loop body
LE: loop exit
PB: predicated region body
PF: predicated region fallthrough
CT: control target
= control target key end

     0   :  { %7 = vsyncpa [#allocation3], 0  ;;  %s591_s0 = inlined_call_operand.hbm [shape: f32[16,128], index: 0, kind: input, shape index: {}]   ;;  %s592_s1 = inlined_call_operand.vmem [shape: f32[1,128], index: 1, kind: input, shape index: {}]   ;;  %s593_s2 = inlined_call_operand.hbm [shape: f32[16,128], index: 2, kind: output, shape index: {}]  }
   0x1   :  { %9 = vsyncpa [#allocation3 + $0x1], 0 }
   0x2   :  { %10 = vsyncpa [#allocation4], 0 }
   0x3   :  { %12 = vsyncpa [#allocation4 + $0x1], 0  ;;  %s427_s9 = smov 0   ;;  %s429_s10 = smov 0  }
   0x4   :  { %s431_s11 = smov 0   ;;  %s433_s12 = smov 0  }
   0x5 LB: > { %s448_s13 = sadd.s32 4294967295, %s408_s12   ;;  %s253_s14 = sadd.s32 4294967294, %s408_s12   ;;  %s408_s12 = sphi %s433_s12, %s608_s12   ;;  %s404_s11 = sphi %s431_s11, %s607_s11   ;;  %s400_s10 = sphi %s429_s10, %s606_s10   ;;  %s396_s9 = sphi %s427_s9, %s605_s9  }
   0x6   : > { %s452_s15 = sadd.s32 1, %s408_s12   ;;  %s25_s16 = sadd.s32 1, %s404_s11 }
   0x7   : > { %s22_s17 = ssub.s32 %s408_s12, %s452_s15  ;;  %p32_p0 = scmp.ne.s32.totalorder %s404_s11, %s400_s10 }
   0x8   : > { %p23_p1 = scmp.eq.s32.totalorder %s22_s17, 0  ;;  %p33_p2 = scmp.eq.s32.totalorder %s408_s12, 0 }
   0x9   : > { %p38_p3 = scmp.ne.s32.totalorder %s400_s10, %s396_s9  ;;  %p39_p4 = scmp.eq.s32.totalorder %s448_s13, 0 }
   0xa   : > { %s464_s18 = scalar_select %p23_p1, %s404_s11, %s25_s16  }
   0xb   : > { %p466_p5 = por %p33_p2, %p32_p0  ;;  %p470_p6 = por %p39_p4, %p38_p3 }
   0xc   : > { %p83_p7 = scmp.eq.s32.totalorder %s448_s13, 1  ;;  %p89_p8 = scmp.eq.s32.totalorder %s253_s14, 1 }
   0xd   : > { %p278_p10 = scmp.lt.s32.totalorder %s408_s12, 2  ;;  %s112_s23 = sand.u32 1, %s404_s11  }
   0xe   : > { %p477_p11 = por %p83_p7, %p32_p0  ;;  %p481_p12 = por %p89_p8, %p38_p3 }
   0xf   : > { %s257_s24 = sshll.u32 %s408_s12, 7  ;;  %s256_s25 = sshll.u32 %s112_s23, 3 }
  0x10   : > { %s597_s21 = scalar_select %p477_p11, 1, 0 }
  0x11   : > { %s598_s22 = scalar_select %p481_p12, 1, 0 }
  0x12   : > { %s490_s28 = scalar_lea.hbm %s591_s0, %s257_s24  ;;  %s116_s29 = scalar_lea.vmem [#allocation2], %s256_s25 }
  0x13   : > { %s123_s30 = sshll.u32 %s116_s29, 4  ;;  %p494_p13 = pnand %p278_p10, %p466_p5  ;;  %s498_s30 = int_to_ptr.vmem [resolvable:$true] %s123_s30 }
  0x14   : > { %s113_s4 = scalar_lea.sflag [#allocation3], %s112_s23  ;;  %s312_s5 = scalar_lea.hbm %s490_s28, 128 }
  0x15   : > { %p313_p2 = scmp.ne.s32.totalorder %s490_s28, %s312_s5  ;;  %p314_p3 = pneg %p494_p13 }
  0x16   : > { %s317_s8 = scalar_lea.hbm %s591_s0, 256  ;;  %p318_p5 = scmp.lt.u32.totalorder %s490_s28, %s591_s0 }
  0x17   : > { %p315_p4 = pnand %p314_p3, %p313_p2  ;;  %p319_p8 = scmp.lt.u32.totalorder %s317_s8, %s312_s5 }
  0x18   : > { %p321_p9 = scmp.lt.u32.totalorder %s312_s5, %s490_s28 }
  0x19   : > { %p316_p7 = pneg %p315_p4  ;;  %p320_p10 = por %p319_p8, %p318_p5 }
  0x1b   : > { %p322_p0 = por %p321_p9, %p320_p10 }
  0x1d   : > { %p323_p1 = pnand %p322_p0, %p316_p7 }
  0x1f   : > { %326 = shalt.err (!%p323_p1)
}
  0x20   : > { %s327_s17 = scalar_lea.vmem %s498_s30, 128  ;;  %s410_s19 = smov [#allocation2]  }
  0x21   : > { %p328_p2 = scmp.ne.s32.totalorder %s498_s30, %s327_s17  ;;  %s332_s23 = sshll.u32 %s410_s19, 4  ;;  %s333_s23 = int_to_ptr.vmem [resolvable:$false] %s332_s23 }
  0x22   : > { %s334_s24 = scalar_lea.vmem %s333_s23, 256  ;;  %p335_p11 = scmp.lt.s32.totalorder %s498_s30, %s333_s23 }
  0x23   : > { %p330_p4 = pnand %p328_p2, %p314_p3  ;;  %p336_p5 = scmp.lt.s32.totalorder %s334_s24, %s327_s17 }
  0x25   : > { %p331_p12 = pneg %p330_p4  ;;  %p337_p8 = por %p336_p5, %p335_p11 }
  0x27   : > { %p338_p9 = pnand %p337_p8, %p331_p12 }
  0x29   : > { %341 = shalt.err (!%p338_p9)
}
  0x2a   : > { %273 = dma.hbm_to_vmem [thread:$0]  (!%p494_p13), %s490_s28, 128, %s498_s30, %s113_s4  }
  0x2b   : > { %p600_p0 = scmp.lt.s32.totalorder %s408_s12, 3  ;;  %p601_p1 = scmp.ge.s32.totalorder %s408_s12, 1 }
  0x2d   : > { %p129_p3 = pnand %p601_p1, %p600_p0 }
  0x2e   : > { %s532_s25 = sand.u32 (!%p129_p3), 1, %s400_s10  }
  0x2f   : > { %132 = sbr.rel (%p129_p3) target bundleno = 81 (0x51), region = 28  ;;  %s259_s26 = sshll.u32 (!%p129_p3), %s532_s25, 3 }
  0x30   : > { %s135_s27 = scalar_lea.sflag (!%p129_p3), [#allocation3], %s532_s25  ;;  %s138_s29 = scalar_lea.vmem (!%p129_p3), [#allocation2], %s259_s26 }
  0x36   : > { %387 = dma.done.wait (%p470_p6), %s135_s27, 128  }
  0x37   : > { %389 = vsyncadd (%p470_p6), %s135_s27, 4294967168  ;;  %s158_s28 = scalar_lea.vmem [#allocation5], %s259_s26  ;;  %s263_s3 = sshll.u32 %s448_s13, 7  ;;  %v159_v0 = vld [vmem:[%s138_s29] sm:$0xff] }
  0x38   : > { %s183_s30 = sshll.u32 %s158_s28, 4  ;;  %v261_v1 = vld [vmem:[%s592_s1] ss:$0 sm:$0xff]  ;;  %s549_s20 = scalar_lea.hbm %s593_s2, %s263_s3  ;;  %s544_s30 = int_to_ptr.vmem [resolvable:$true] %s183_s30 }
  0x39   : > { %v167_v2 = vadd.f32 %v261_v1, %v159_v0  ;;  %s170_s8 = scalar_lea.sflag [#allocation4], %s532_s25  ;;  %s342_s14 = scalar_lea.vmem %s544_s30, 128 }
  0x3a   : > { %p343_p6 = scmp.ne.s32.totalorder %s544_s30, %s342_s14  ;;  %p602_p11 = scmp.ne.s32.totalorder %s597_s21, 0 }
  0x3b   : > { %168 = vst [vmem:[%s158_s28] sm:$0xff] %v167_v2  ;;  %s411_s13 = smov [#allocation5]  }
  0x3c   : > { %p344_p12 = pnand %p343_p6, %p602_p11  ;;  %s346_s16 = sshll.u32 %s411_s13, 4  ;;  %s347_s16 = int_to_ptr.vmem [resolvable:$false] %s346_s16 }
  0x3d   : > { %s348_s17 = scalar_lea.vmem %s347_s16, 256  ;;  %p349_p7 = scmp.lt.s32.totalorder %s544_s30, %s347_s16 }
  0x3e   : > { %p345_p13 = pneg %p344_p12  ;;  %p350_p10 = scmp.lt.s32.totalorder %s348_s17, %s342_s14 }
  0x40   : > { %p351_p2 = por %p350_p10, %p349_p7 }
  0x42   : > { %p352_p4 = pnand %p351_p2, %p345_p13 }
  0x44   : > { %355 = shalt.err (!%p352_p4)
}
  0x45   : > { %s356_s19 = scalar_lea.hbm %s549_s20, 128  ;;  %s360_s25 = scalar_lea.hbm %s593_s2, 256 }
  0x46   : > { %p357_p5 = scmp.ne.s32.totalorder %s549_s20, %s356_s19  ;;  %p361_p0 = scmp.lt.u32.totalorder %s549_s20, %s593_s2 }
  0x47   : > { %p362_p1 = scmp.lt.u32.totalorder %s360_s25, %s356_s19  ;;  %p364_p6 = scmp.lt.u32.totalorder %s356_s19, %s549_s20 }
  0x48   : > { %p358_p8 = pnand %p357_p5, %p602_p11 }
  0x49   : > { %p363_p3 = por %p362_p1, %p361_p0 }
  0x4a   : > { %p359_p9 = pneg %p358_p8 }
  0x4b   : > { %p365_p12 = por %p364_p6, %p363_p3 }
  0x4d   : > { %p366_p13 = pnand %p365_p12, %p359_p9 }
  0x4f   : > { %369 = shalt.err (!%p366_p13)
}
  0x50   : > { %268 = dma.vmem_to_hbm [thread:$0]  (%p602_p11), %s544_s30, 128, %s549_s20, %s170_s8  }
  0x51 PF: > { %s195_s29 = sand.u32 1, %s396_s9   ;;  %p603_p7 = scmp.ne.s32.totalorder %s598_s22, 0 }
  0x52   : > { %p604_p10 = scmp.ge.s32.totalorder %s408_s12, 2  ;;  %s196_s28 = scalar_lea.sflag [#allocation4], %s195_s29 }
  0x54   : > { %p275_p2 = pnand %p604_p10, %p603_p7 }
  0x56   : > { %391 = dma.done.wait (!%p275_p2), %s196_s28, 128  }
  0x57   : > { %393 = vsyncadd (!%p275_p2), %s196_s28, 4294967168  ;;  %p15_p4 = scmp.ge.s32.totalorder %s452_s15, 4   ;;  %s605_s9 = smov %s400_s10 }
  0x58   : > { %s606_s10 = smov %s404_s11  ;;  %s607_s11 = smov %s464_s18 }
  0x59   : > { %s608_s12 = smov %s452_s15  ;;  %17 = sbr.rel (!%p15_p4) target bundleno = 5 (0x5), region = 73 }
  0x60   :  { %201 = vsyncpa [#allocation3], 1 }
  0x61   :  { %203 = vsyncpa [#allocation3 + $0x1], 1 }
  0x62   :  { %204 = vsyncpa [#allocation4], 1 }
  0x63   :  { %206 = vsyncpa [#allocation4 + $0x1], 1 }

// kernel: decoder_forward.16
= control target key start
LH: loop header
LB: loop body
LE: loop exit
PB: predicated region body
PF: predicated region fallthrough
CT: control target
= control target key end

     0   :  { %s853_s18 = smov 0   ;;  %s957_s0 = inlined_call_operand.vmem [shape: f32[32,128], index: 0, kind: input, shape index: {}]   ;;  %s958_s1 = inlined_call_operand.vmem [shape: bf16[128,384], index: 1, kind: input, shape index: {}]   ;;  %s959_s2 = inlined_call_operand.vmem [shape: f32[1,384], index: 2, kind: input, shape index: {}]   ;;  %s960_s3 = inlined_call_operand.vmem [shape: bf16[32,128], index: 3, kind: output, shape index: {0}]   ;;  %s961_s4 = inlined_call_operand.vmem [shape: bf16[32,128], index: 4, kind: output, shape index: {1}]   ;;  %s962_s5 = inlined_call_operand.vmem [shape: bf16[32,128], index: 5, kind: output, shape index: {2}]  }
   0x1 LB: > { %s674_s19 = sadd.s32 4294967295, %s818_s18   ;;  %p678_p0 = scmp.ge.s32.totalorder %s818_s18, 1  ;;  %s818_s18 = sphi %s853_s18, %s16_s18  }
   0x2   : > { %p193_p1 = scmp.lt.s32.totalorder %s818_s18, 3 }
   0x4   : > { %p194_p2 = pnand %p678_p0, %p193_p1 }
   0x5   : > { %v780_v0 = vld [vmem:[%s958_s1 + $0x4] ss:$12 sps:$4 sm:$0xff] (!%p194_p2)   ;;  %v820_v1 = vmov (!%p194_p2), 0.0   ;;  %v782_v2 = vld [vmem:[%s958_s1 + $0x8] ss:$12 sps:$4 sm:$0xff] (!%p194_p2)   ;;  %vm821_vm0 = vmmov (!%p194_p2), 0   ;;  %v293_v29 = vlaneseq (!%p194_p2) }
   0x6   : > { %197 = sbr.rel (%p194_p2) target bundleno = 259 (0x103), region = 32  ;;  %749 = vmatprep.subr.bf16.mxu1 (!%p194_p2), %v820_v1  ;;  %765 = vmatprep.mubr.msk.bf16.mxu1 (!%p194_p2), %vm821_vm0, %v820_v1  ;;  %v783_v3 = vld [vmem:[%s958_s1] ss:$12 sps:$4 sm:$0xff] (!%p194_p2)   ;;  %v784_v4 = vld [vmem:[%s958_s1 + $0x1c] ss:$12 sps:$4 sm:$0xff] (!%p194_p2)   ;;  %v822_v5 = vmov (!%p194_p2), 0  }
   0x7   : > { %436 = vmatprep.subr.bf16.mxu0 (!%p194_p2), %v780_v0  ;;  %750 = vmatpush3.bf16.msra.mxu1 (!%p194_p2), %v782_v2  ;;  %v786_v6 = vld [vmem:[%s958_s1 + $0x20] ss:$12 sps:$4 sm:$0xff] (!%p194_p2)   ;;  %v787_v7 = vld [vmem:[%s958_s1 + $0x18] ss:$12 sps:$4 sm:$0xff] (!%p194_p2)   ;;  %v791_v10 = vld [vmem:[%s958_s1 + $0x30] ss:$12 sps:$4 sm:$0xff] (!%p194_p2)  }
   0x8   : > { %468 = vmatprep.mubr.bf16.mxu0 (!%p194_p2), %v822_v5  ;;  %437 = vmatpush1.bf16.msra.mxu0 (!%p194_p2), %v783_v3  ;;  %v788_v8 = vld [vmem:[%s958_s1 + $0x34] ss:$12 sps:$4 sm:$0xff] (!%p194_p2)   ;;  %v790_v9 = vld [vmem:[%s958_s1 + $0x38] ss:$12 sps:$4 sm:$0xff] (!%p194_p2)   ;;  %s679_s15 = sshll.u32 (!%p194_p2), %s674_s19, 1  ;;  %v294_v30 = vshrl.u32 (!%p194_p2), %v293_v29, 7 }
   0x9   : > { %751 = vmatprep.subr.bf16.mxu1 (!%p194_p2), %v820_v1  ;;  %438 = vmatprep.subr.bf16.mxu0 (!%p194_p2), %v784_v4  ;;  %v792_v11 = vld [vmem:[%s958_s1 + $0x4c] ss:$12 sps:$4 sm:$0xff] (!%p194_p2)   ;;  %v794_v12 = vld [vmem:[%s958_s1 + $0x50] ss:$12 sps:$4 sm:$0xff] (!%p194_p2)   ;;  %v795_v13 = vld [vmem:[%s958_s1 + $0x48] ss:$12 sps:$4 sm:$0xff] (!%p194_p2)  }
   0xa   : > { %p232_p3 = scmp.lt.s32.totalorder (!%p194_p2), %s679_s15, 3  ;;  %v796_v14 = vld [vmem:[%s958_s1 + $0x64] ss:$12 sps:$4 sm:$0xff] (!%p194_p2)   ;;  %v798_v15 = vld [vmem:[%s958_s1 + $0x68] ss:$12 sps:$4 sm:$0xff] (!%p194_p2)   ;;  %v303_v31 = vsub.s32 (!%p194_p2), 2, %v294_v30 }
   0xb   : > { %752 = vmatpush3.bf16.msra.mxu1 (!%p194_p2), %v786_v6  ;;  %v799_v16 = vld [vmem:[%s958_s1 + $0x60] ss:$12 sps:$4 sm:$0xff] (!%p194_p2)   ;;  %v800_v17 = vld [vmem:[%s958_s1 + $0x7c] ss:$12 sps:$4 sm:$0xff] (!%p194_p2)   ;;  %v803_v19 = vld [vmem:[%s958_s1 + $0x78] ss:$12 sps:$4 sm:$0xff] (!%p194_p2)  }
   0xc   : > { %439 = vmatpush1.bf16.msra.mxu0 (!%p194_p2), %v787_v7  ;;  %753 = vmatprep.subr.bf16.mxu1 (!%p194_p2), %v820_v1  ;;  %v802_v18 = vld [vmem:[%s958_s1 + $0x80] ss:$12 sps:$4 sm:$0xff] (!%p194_p2)   ;;  %v806_v21 = vld [vmem:[%s958_s1 + $0x98] ss:$12 sps:$4 sm:$0xff] (!%p194_p2)   ;;  %v807_v22 = vld [vmem:[%s958_s1 + $0x90] ss:$12 sps:$4 sm:$0xff] (!%p194_p2)  }
   0xd   : > { %440 = vmatprep.subr.bf16.mxu0 %v788_v8  ;;  %s964_s15 = smov (!%p232_p3, %s679_s15), 3  ;;  %v804_v20 = vld [vmem:[%s958_s1 + $0x94] ss:$12 sps:$4 sm:$0xff]   ;;  %v808_v23 = vld [vmem:[%s958_s1 + $0xac] ss:$12 sps:$4 sm:$0xff]   ;;  %v295_v33 = vsub.s32 0, %v294_v30 }
   0xe   : > { %s680_s10 = sshll.u32 %s964_s15, 3  ;;  %v810_v24 = vld [vmem:[%s958_s1 + $0xb0] ss:$12 sps:$4 sm:$0xff]   ;;  %v811_v27 = vld [vmem:[%s958_s1 + $0xa8] ss:$12 sps:$4 sm:$0xff]   ;;  %v299_v35 = vsub.s32 1, %v294_v30 }
   0xf   : > { %754 = vmatpush3.bf16.msra.mxu1 %v790_v9  ;;  %s235_s20 = scalar_lea.vmem %s957_s0, %s680_s10  ;;  %v291_v32 = vld [vmem:[%s959_s2] sm:$0x7]  ;;  %s682_s28 = sshll.u32 %s964_s15, 2 }
  0x10   : > { %441 = vmatpush1.bf16.msra.mxu0 %v791_v10  ;;  %755 = vmatprep.subr.bf16.mxu1 %v820_v1  ;;  %v256_v25 = vld [vmem:[%s235_s20] sm:$0xff]  ;;  %v257_v26 = vld [vmem:[%s235_s20 + $0x8] sm:$0xff]  ;;  %v304_v34 = vrot.slane %v291_v32, %v303_v31  ;;  %v296_v37 = vrot.slane %v291_v32, %v295_v33  ;;  %v300_v41 = vrot.slane %v291_v32, %v299_v35  ;;  %s253_s6 = scalar_lea.vmem %s962_s5, %s682_s28  ;;  %s241_s9 = scalar_lea.vmem %s960_s3, %s682_s28 }
  0x11   : > { %442 = vmatprep.subr.bf16.mxu0 %v792_v11  ;;  %v258_v28 = vpack.c.bf16 %v257_v26, %v256_v25  ;;  %s247_s11 = scalar_lea.vmem %s961_s4, %s682_s28 }
  0x13   : > { %756 = vmatpush3.bf16.msra.mxu1 %v794_v12 }
  0x14   : > { %443 = vmatpush1.bf16.msra.mxu0 %v795_v13  ;;  %757 = vmatprep.subr.bf16.mxu1 %v820_v1 }
  0x15   : > { %444 = vmatprep.subr.bf16.mxu0 %v796_v14 }
  0x17   : > { %758 = vmatpush3.bf16.msra.mxu1 %v798_v15 }
  0x18   : > { %445 = vmatpush1.bf16.msra.mxu0 %v799_v16  ;;  %759 = vmatprep.subr.bf16.mxu1 %v820_v1 }
  0x19   : > { %446 = vmatprep.subr.bf16.mxu0 %v800_v17 }
  0x1b   : > { %760 = vmatpush3.bf16.msra.mxu1 %v802_v18 }
  0x1c   : > { %447 = vmatpush1.bf16.msra.mxu0 %v803_v19  ;;  %761 = vmatprep.subr.bf16.mxu1 %v820_v1 }
  0x1d   : > { %448 = vmatprep.subr.bf16.mxu0 %v804_v20 }
  0x1f   : > { %762 = vmatpush3.bf16.msra.mxu1 %v806_v21 }
  0x20   : > { %449 = vmatpush1.bf16.msra.mxu0 %v807_v22  ;;  %763 = vmatprep.subr.bf16.mxu1 %v820_v1 }
  0x21   : > { %450 = vmatprep.subr.bf16.mxu0 %v808_v23 }
  0x23   : > { %764 = vmatpush3.bf16.msra.mxu1 %v810_v24 }
  0x24   : > { %451 = vmatpush1.bf16.msra.mxu0 %v811_v27 }
  0x26   : > { %766 = vmatmul.mubr.bf16.vlgmr.msra.gmra.mrb[0].mxu1 %v258_v28 }
  0x27   : > { %469 = vmatmul.mubr.bf16.vlgmr.msra.gmra.mrb[0].mxu0 %v258_v28 }
  0xf9   : > { %v513_v36 = vpop.f32.mrb[0].mxu1 }
  0xfa   : > { %v514_v38 = vadd.f32 %v513_v36, %v304_v34  ;;  %v470_v39 = vpop.f32.mrb[0].mxu0  ;;  %v767_v40 = vpop.f32.mrb[1].mxu1 }
  0xfb   : > { %v472_v42 = vpop.f32.mrb[1].mxu0  ;;  %v516_v43 = vpop.f32.mrb[2].mxu1  ;;  %v471_v47 = vadd.f32 %v470_v39, %v296_v37 }
  0xfc   : > { %v517_v44 = vadd.f32 %v516_v43, %v304_v34  ;;  %v474_v45 = vpop.f32.mrb[2].mxu0  ;;  %v768_v46 = vpop.f32.mrb[3].mxu1  ;;  %v473_v50 = vadd.f32 %v472_v42, %v300_v41 }
  0xfd   : > { %v475_v48 = vadd.f32 %v474_v45, %v296_v37  ;;  %v476_v49 = vpop.f32.mrb[3].mxu0 }
  0xfe   : > { %v738_v51 = vpack.c.bf16 %v517_v44, %v514_v38  ;;  %v477_v52 = vadd.f32 %v476_v49, %v300_v41 }
  0xff   : > { %v728_v53 = vpack.c.bf16 %v475_v48, %v471_v47 }
 0x100   : > { %739 = vst [vmem:[%s253_s6] sm:$0xff] %v738_v51   ;;  %v733_v54 = vpack.c.bf16 %v477_v52, %v473_v50 }
 0x101   : > { %729 = vst [vmem:[%s241_s9] sm:$0xff] %v728_v53  }
 0x102   : > { %734 = vst [vmem:[%s247_s11] sm:$0xff] %v733_v54  }
 0x103 PF: > { %s16_s18 = sadd.s32 1, %s818_s18  }
 0x104   : > { %p13_p4 = scmp.ge.s32.totalorder %s16_s18, 4  }
 0x106   :  { %15 = sbr.rel (!%p13_p4) target bundleno = 1 (0x1), region = 86 }

// kernel: decoder_forward.18
= control target key start
LH: loop header
LB: loop body
LE: loop exit
PB: predicated region body
PF: predicated region fallthrough
CT: control target
= control target key end

     0   :  { %s959_s30 = smov 0   ;;  %s1072_s0 = inlined_call_operand.vmem [shape: bf16[32,128], index: 0, kind: input, shape index: {}]   ;;  %s1073_s1 = inlined_call_operand.vmem [shape: bf16[128,128], index: 1, kind: input, shape index: {}]   ;;  %s1074_s2 = inlined_call_operand.vmem [shape: f32[1,128], index: 2, kind: input, shape index: {}]   ;;  %s1075_s3 = inlined_call_operand.vmem [shape: f32[32,128], index: 3, kind: input, shape index: {}]   ;;  %s1076_s4 = inlined_call_operand.vmem [shape: f32[1,128], index: 4, kind: input, shape index: {}]   ;;  %s1077_s5 = inlined_call_operand.vmem [shape: f32[1,128], index: 5, kind: input, shape index: {}]   ;;  %s1078_s6 = inlined_call_operand.vmem [shape: bf16[128,128], index: 6, kind: input, shape index: {}]   ;;  %s1079_s7 = inlined_call_operand.vmem [shape: f32[1,128], index: 7, kind: input, shape index: {}]   ;;  %s1080_s8 = inlined_call_operand.vmem [shape: f32[32,128], index: 8, kind: output, shape index: {0}]   ;;  %s1081_s9 = inlined_call_operand.vmem [shape: bf16[32,128], index: 9, kind: output, shape index: {1}]  }
   0x1 LB: > { %s765_s10 = sadd.s32 4294967295, %s905_s30   ;;  %p769_p0 = scmp.ge.s32.totalorder %s905_s30, 1  ;;  %s905_s30 = sphi %s959_s30, %s20_s30  }
   0x2   : > { %p302_p1 = scmp.lt.s32.totalorder %s905_s30, 3 }
   0x4   : > { %p303_p2 = pnand %p769_p0, %p302_p1 }
   0x5   : > { %v878_v0 = vld [vmem:[%s1073_s1] sm:$0xff] (!%p303_p2)   ;;  %v907_v1 = vmov (!%p303_p2), 0.0   ;;  %v879_v2 = vld [vmem:[%s1073_s1 + $0x8] sm:$0xff] (!%p303_p2)   ;;  %vm908_vm0 = vmmov (!%p303_p2), 0   ;;  %s770_s15 = sshll.u32 (!%p303_p2), %s765_s10, 1  ;;  %v880_v3 = vld [vmem:[%s1073_s1 + $0x10] sm:$0xff] (!%p303_p2)  }
   0x6   : > { %306 = sbr.rel (%p303_p2) target bundleno = 790 (0x316), region = 52  ;;  %828 = vmatprep.subr.bf16.mxu0 (!%p303_p2), %v907_v1  ;;  %848 = vmatprep.subr.bf16.mxu1 (!%p303_p2), %v907_v1  ;;  %p349_p3 = scmp.lt.s32.totalorder (!%p303_p2), %s770_s15, 3  ;;  %v881_v4 = vld [vmem:[%s1073_s1 + $0x18] sm:$0xff] (!%p303_p2)   ;;  %v882_v5 = vld [vmem:[%s1073_s1 + $0x20] sm:$0xff] (!%p303_p2)   ;;  %v883_v6 = vld [vmem:[%s1073_s1 + $0x28] sm:$0xff] (!%p303_p2)  }
   0x7   : > { %829 = vmatpush3.bf16.msra.mxu0 (!%p303_p2), %v878_v0  ;;  %844 = vmatprep.mubr.msk.bf16.mxu0 (!%p303_p2), %vm908_vm0, %v907_v1  ;;  %v884_v7 = vld [vmem:[%s1073_s1 + $0x30] sm:$0xff] (!%p303_p2)   ;;  %v885_v8 = vld [vmem:[%s1073_s1 + $0x38] sm:$0xff] (!%p303_p2)   ;;  %v778_v10 = vld [vmem:[%s1074_s2] ss:$0 sm:$0xff] (!%p303_p2) }
   0x8   : > { %830 = vmatprep.subr.bf16.mxu0 (!%p303_p2), %v907_v1  ;;  %864 = vmatprep.mubr.msk.bf16.mxu1 (!%p303_p2), %vm908_vm0, %v907_v1  ;;  %v887_v21 = vld [vmem:[%s1078_s6] sm:$0xff] (!%p303_p2)   ;;  %v888_v30 = vld [vmem:[%s1078_s6 + $0x8] sm:$0xff] (!%p303_p2)   ;;  %v889_v31 = vld [vmem:[%s1078_s6 + $0x10] sm:$0xff] (!%p303_p2)  }
   0x9   : > { %849 = vmatpush3.bf16.msra.mxu1 (!%p303_p2), %v887_v21  ;;  %v890_v32 = vld [vmem:[%s1078_s6 + $0x18] sm:$0xff] (!%p303_p2)   ;;  %v891_v33 = vld [vmem:[%s1078_s6 + $0x20] sm:$0xff] (!%p303_p2)   ;;  %v892_v34 = vld [vmem:[%s1078_s6 + $0x28] sm:$0xff] (!%p303_p2)  }
   0xa   : > { %850 = vmatprep.subr.bf16.mxu1 (!%p303_p2), %v907_v1  ;;  %v893_v35 = vld [vmem:[%s1078_s6 + $0x30] sm:$0xff] (!%p303_p2)   ;;  %v894_v36 = vld [vmem:[%s1078_s6 + $0x38] sm:$0xff] (!%p303_p2)   ;;  %v788_v44 = vld [vmem:[%s1076_s4] ss:$0 sm:$0xff] (!%p303_p2) }
   0xb   : > { %831 = vmatpush3.bf16.msra.mxu0 (!%p303_p2), %v879_v2  ;;  %v789_v46 = vld [vmem:[%s1077_s5] ss:$0 sm:$0xff] (!%p303_p2) }
   0xc   : > { %832 = vmatprep.subr.bf16.mxu0 (!%p303_p2), %v907_v1  ;;  %v790_v54 = vld [vmem:[%s1079_s7] ss:$0 sm:$0xff] (!%p303_p2) }
   0xd   : > { %s1083_s15 = smov (!%p349_p3, %s770_s15), 3  ;;  %851 = vmatpush3.bf16.msra.mxu1 %v888_v30 }
   0xe   : > { %s771_s18 = sshll.u32 %s1083_s15, 2  ;;  %s773_s12 = sshll.u32 %s1083_s15, 3  ;;  %852 = vmatprep.subr.bf16.mxu1 %v907_v1 }
   0xf   : > { %s352_s21 = scalar_lea.vmem %s1072_s0, %s771_s18  ;;  %833 = vmatpush3.bf16.msra.mxu0 %v880_v3  ;;  %s358_s16 = scalar_lea.vmem %s1075_s3, %s773_s12 }
  0x10   : > { %834 = vmatprep.subr.bf16.mxu0 %v907_v1  ;;  %v886_v9 = vld [vmem:[%s352_s21] sm:$0xff]   ;;  %v494_v19 = vld [vmem:[%s358_s16 + $0x8] sm:$0xff]  ;;  %s364_s25 = scalar_lea.vmem %s1080_s8, %s773_s12  ;;  %s370_s29 = scalar_lea.vmem %s1081_s9, %s771_s18 }
  0x11   : > { %v493_v12 = vld [vmem:[%s358_s16] sm:$0xff]  ;;  %853 = vmatpush3.bf16.msra.mxu1 %v889_v31 }
  0x12   : > { %854 = vmatprep.subr.bf16.mxu1 %v907_v1 }
  0x13   : > { %835 = vmatpush3.bf16.msra.mxu0 %v881_v4 }
  0x14   : > { %836 = vmatprep.subr.bf16.mxu0 %v907_v1 }
  0x15   : > { %855 = vmatpush3.bf16.msra.mxu1 %v890_v32 }
  0x16   : > { %856 = vmatprep.subr.bf16.mxu1 %v907_v1 }
  0x17   : > { %837 = vmatpush3.bf16.msra.mxu0 %v882_v5 }
  0x18   : > { %838 = vmatprep.subr.bf16.mxu0 %v907_v1 }
  0x19   : > { %857 = vmatpush3.bf16.msra.mxu1 %v891_v33 }
  0x1a   : > { %858 = vmatprep.subr.bf16.mxu1 %v907_v1 }
  0x1b   : > { %839 = vmatpush3.bf16.msra.mxu0 %v883_v6 }
  0x1c   : > { %840 = vmatprep.subr.bf16.mxu0 %v907_v1 }
  0x1d   : > { %859 = vmatpush3.bf16.msra.mxu1 %v892_v34 }
  0x1e   : > { %860 = vmatprep.subr.bf16.mxu1 %v907_v1 }
  0x1f   : > { %841 = vmatpush3.bf16.msra.mxu0 %v884_v7 }
  0x20   : > { %842 = vmatprep.subr.bf16.mxu0 %v907_v1 }
  0x21   : > { %861 = vmatpush3.bf16.msra.mxu1 %v893_v35 }
  0x22   : > { %862 = vmatprep.subr.bf16.mxu1 %v907_v1 }
  0x23   : > { %843 = vmatpush3.bf16.msra.mxu0 %v885_v8 }
  0x25   : > { %863 = vmatpush3.bf16.msra.mxu1 %v894_v36 }
  0x26   : > { %845 = vmatmul.mubr.bf16.vlgmr.msra.gmra.mrb[0].mxu0 %v886_v9 }
  0xf9   : > { %v486_v11 = vpop.f32.mrb[0].mxu0 }
  0xfa   : > { %v487_v13 = vadd.f32 %v778_v10, %v486_v11  ;;  %v846_v14 = vpop.f32.mrb[1].mxu0 }
  0xfb   : > { %v489_v15 = vpop.f32.mrb[2].mxu0 }
  0xfc   : > { %v490_v16 = vadd.f32 %v778_v10, %v489_v15  ;;  %v847_v17 = vpop.f32.mrb[3].mxu0  ;;  %v495_v18 = vadd.f32 %v493_v12, %v487_v13 }
  0xfe   : > { %497 = vadd.xlane.f32.xlu0 %v495_v18  ;;  %v496_v20 = vadd.f32 %v494_v19, %v490_v16 }
 0x102   : > { %499 = vadd.xlane.f32.xlu0 %v496_v20 }
 0x18b   : > { %v498_v22 = vpop.xlane.xlu0 %497 }
 0x18c   : > { %v502_v23 = vmul.f32 0.0078125, %v498_v22 }
 0x18e   : > { %v504_v24 = vsub.f32 %v495_v18, %v502_v23 }
 0x18f   : > { %v500_v25 = vpop.xlane.xlu0 %499 }
 0x190   : > { %v503_v26 = vmul.f32 0.0078125, %v500_v25  ;;  %v506_v27 = vmul.f32 %v504_v24, %v504_v24 }
 0x192   : > { %v505_v28 = vsub.f32 %v496_v20, %v503_v26  ;;  %508 = vadd.xlane.f32.xlu1 %v506_v27 }
 0x194   : > { %v507_v29 = vmul.f32 %v505_v28, %v505_v28 }
 0x196   : > { %510 = vadd.xlane.f32.xlu1 %v507_v29 }
 0x21f   : > { %v509_v37 = vpop.xlane.xlu1 %508 }
 0x220   : > { %v512_v38 = vmul.f32 0.0078125, %v509_v37 }
 0x222   : > { %v514_v39 = vadd.f32 1e-05, %v512_v38 }
 0x223   : > { %v511_v40 = vpop.xlane.xlu1 %510 }
 0x224   : > { %895 = vrsqrt.f32 %v514_v39  ;;  %v513_v41 = vmul.f32 0.0078125, %v511_v40 }
 0x226   : > { %v515_v42 = vadd.f32 1e-05, %v513_v41 }
 0x228   : > { %897 = vrsqrt.f32 %v515_v42 }
 0x22e   : > { %v896_v43 = vpop.eup %895 }
 0x22f   : > { %v518_v45 = vmul.f32 %v896_v43, %v504_v24 }
 0x231   : > { %v527_v47 = vmul.f32 %v788_v44, %v518_v45 }
 0x232   : > { %v898_v48 = vpop.eup %897 }
 0x233   : > { %v519_v49 = vmul.f32 %v898_v48, %v505_v28  ;;  %v536_v50 = vadd.f32 %v789_v46, %v527_v47 }
 0x235   : > { %v528_v51 = vmul.f32 %v788_v44, %v519_v49  ;;  %538 = vst [vmem:[%s364_s25] sm:$0xff] %v536_v50 }
 0x237   : > { %v537_v52 = vadd.f32 %v789_v46, %v528_v51 }
 0x239   : > { %539 = vst [vmem:[%s364_s25 + $0x8] sm:$0xff] %v537_v52  ;;  %v540_v53 = vpack.c.bf16 %v537_v52, %v536_v50 }
 0x23b   : > { %865 = vmatmul.mubr.bf16.vlgmr.msra.gmra.mrb[0].mxu1 %v540_v53 }
 0x30e   : > { %v646_v55 = vpop.f32.mrb[0].mxu1 }
 0x30f   : > { %v866_v56 = vpop.f32.mrb[1].mxu1  ;;  %v647_v58 = vadd.f32 %v790_v54, %v646_v55 }
 0x310   : > { %v649_v57 = vpop.f32.mrb[2].mxu1 }
 0x311   : > { %v650_v59 = vadd.f32 %v790_v54, %v649_v57  ;;  %v867_v60 = vpop.f32.mrb[3].mxu1 }
 0x313   : > { %v808_v61 = vpack.c.bf16 %v650_v59, %v647_v58 }
 0x315   : > { %809 = vst [vmem:[%s370_s29] sm:$0xff] %v808_v61  }
 0x316 PF: > { %s20_s30 = sadd.s32 1, %s905_s30  }
 0x317   : > { %p17_p4 = scmp.ge.s32.totalorder %s20_s30, 4  }
 0x319   :  { %19 = sbr.rel (!%p17_p4) target bundleno = 1 (0x1), region = 97 }

// kernel: decoder_forward.19
= control target key start
LH: loop header
LB: loop body
LE: loop exit
PB: predicated region body
PF: predicated region fallthrough
CT: control target
= control target key end

     0   :  { %s594_s15 = smov 0   ;;  %s669_s0 = inlined_call_operand.vmem [shape: f32[32,128], index: 0, kind: input, shape index: {}]   ;;  %s670_s1 = inlined_call_operand.vmem [shape: bf16[128,256], index: 1, kind: input, shape index: {}]   ;;  %s671_s2 = inlined_call_operand.vmem [shape: f32[1,256], index: 2, kind: input, shape index: {}]   ;;  %s672_s3 = inlined_call_operand.vmem [shape: bf16[32,128], index: 3, kind: output, shape index: {0}]   ;;  %s673_s4 = inlined_call_operand.vmem [shape: bf16[32,128], index: 4, kind: output, shape index: {1}]  }
   0x1 LB: > { %s480_s16 = sadd.s32 4294967295, %s566_s15   ;;  %p484_p0 = scmp.ge.s32.totalorder %s566_s15, 1  ;;  %s566_s15 = sphi %s594_s15, %s15_s15  }
   0x2   : > { %p166_p1 = scmp.lt.s32.totalorder %s566_s15, 3 }
   0x4   : > { %p167_p2 = pnand %p484_p0, %p166_p1 }
   0x5   : > { %v536_v0 = vld [vmem:[%s670_s1 + $0x4] ss:$8 sps:$4 sm:$0xff] (!%p167_p2)   ;;  %v538_v1 = vld [vmem:[%s670_s1] ss:$8 sps:$4 sm:$0xff] (!%p167_p2)   ;;  %v568_v2 = vmov (!%p167_p2), 0   ;;  %s485_s5 = sshll.u32 (!%p167_p2), %s480_s16, 1  ;;  %v237_v20 = vlaneseq (!%p167_p2) }
   0x6   : > { %170 = sbr.rel (%p167_p2) target bundleno = 258 (0x102), region = 32  ;;  %359 = vmatprep.mubr.bf16.mxu0 (!%p167_p2), %v568_v2  ;;  %327 = vmatprep.subr.bf16.mxu0 (!%p167_p2), %v536_v0  ;;  %v539_v3 = vld [vmem:[%s670_s1 + $0x14] ss:$8 sps:$4 sm:$0xff] (!%p167_p2)   ;;  %v541_v4 = vld [vmem:[%s670_s1 + $0x10] ss:$8 sps:$4 sm:$0xff] (!%p167_p2)   ;;  %p198_p3 = scmp.lt.s32.totalorder (!%p167_p2), %s485_s5, 3 }
   0x7   : > { %328 = vmatpush1.bf16.msra.mxu0 (!%p167_p2), %v538_v1  ;;  %v542_v5 = vld [vmem:[%s670_s1 + $0x24] ss:$8 sps:$4 sm:$0xff] (!%p167_p2)   ;;  %v544_v6 = vld [vmem:[%s670_s1 + $0x20] ss:$8 sps:$4 sm:$0xff] (!%p167_p2)   ;;  %v545_v7 = vld [vmem:[%s670_s1 + $0x34] ss:$8 sps:$4 sm:$0xff] (!%p167_p2)  }
   0x8   : > { %329 = vmatprep.subr.bf16.mxu0 (!%p167_p2), %v539_v3  ;;  %v547_v8 = vld [vmem:[%s670_s1 + $0x30] ss:$8 sps:$4 sm:$0xff] (!%p167_p2)   ;;  %v548_v9 = vld [vmem:[%s670_s1 + $0x44] ss:$8 sps:$4 sm:$0xff] (!%p167_p2)   ;;  %v550_v10 = vld [vmem:[%s670_s1 + $0x40] ss:$8 sps:$4 sm:$0xff] (!%p167_p2)  }
   0x9   : > { %v551_v11 = vld [vmem:[%s670_s1 + $0x54] ss:$8 sps:$4 sm:$0xff] (!%p167_p2)   ;;  %v553_v12 = vld [vmem:[%s670_s1 + $0x50] ss:$8 sps:$4 sm:$0xff] (!%p167_p2)   ;;  %v554_v13 = vld [vmem:[%s670_s1 + $0x64] ss:$8 sps:$4 sm:$0xff] (!%p167_p2)  }
   0xa   : > { %v556_v14 = vld [vmem:[%s670_s1 + $0x60] ss:$8 sps:$4 sm:$0xff] (!%p167_p2)   ;;  %v557_v15 = vld [vmem:[%s670_s1 + $0x74] ss:$8 sps:$4 sm:$0xff] (!%p167_p2)   ;;  %v559_v16 = vld [vmem:[%s670_s1 + $0x70] ss:$8 sps:$4 sm:$0xff] (!%p167_p2)  }
   0xb   : > { %330 = vmatpush1.bf16.msra.mxu0 (!%p167_p2), %v541_v4  ;;  %v238_v21 = vshrl.u32 (!%p167_p2), %v237_v20, 7  ;;  %v235_v23 = vld [vmem:[%s671_s2] sm:$0x3] (!%p167_p2) }
   0xc   : > { %331 = vmatprep.subr.bf16.mxu0 (!%p167_p2), %v542_v5 }
   0xd   : > { %s675_s5 = smov (!%p198_p3, %s485_s5), 3  ;;  %v239_v22 = vsub.s32 0, %v238_v21  ;;  %v243_v24 = vsub.s32 1, %v238_v21 }
   0xe   : > { %s486_s19 = sshll.u32 %s675_s5, 3  ;;  %s488_s6 = sshll.u32 %s675_s5, 2 }
   0xf   : > { %332 = vmatpush1.bf16.msra.mxu0 %v544_v6  ;;  %s201_s26 = scalar_lea.vmem %s669_s0, %s486_s19  ;;  %v240_v25 = vrot.slane %v235_v23, %v239_v22  ;;  %v244_v27 = vrot.slane %v235_v23, %v243_v24  ;;  %s207_s9 = scalar_lea.vmem %s672_s3, %s488_s6 }
  0x10   : > { %333 = vmatprep.subr.bf16.mxu0 %v545_v7  ;;  %v216_v17 = vld [vmem:[%s201_s26] sm:$0xff]  ;;  %v217_v18 = vld [vmem:[%s201_s26 + $0x8] sm:$0xff]  ;;  %s213_s12 = scalar_lea.vmem %s673_s4, %s488_s6 }
  0x11   : > { %v218_v19 = vpack.c.bf16 %v217_v18, %v216_v17 }
  0x13   : > { %334 = vmatpush1.bf16.msra.mxu0 %v547_v8 }
  0x14   : > { %335 = vmatprep.subr.bf16.mxu0 %v548_v9 }
  0x17   : > { %336 = vmatpush1.bf16.msra.mxu0 %v550_v10 }
  0x18   : > { %337 = vmatprep.subr.bf16.mxu0 %v551_v11 }
  0x1b   : > { %338 = vmatpush1.bf16.msra.mxu0 %v553_v12 }
  0x1c   : > { %339 = vmatprep.subr.bf16.mxu0 %v554_v13 }
  0x1f   : > { %340 = vmatpush1.bf16.msra.mxu0 %v556_v14 }
  0x20   : > { %341 = vmatprep.subr.bf16.mxu0 %v557_v15 }
  0x23   : > { %342 = vmatpush1.bf16.msra.mxu0 %v559_v16 }
  0x26   : > { %360 = vmatmul.mubr.bf16.vlgmr.msra.gmra.mrb[0].mxu0 %v218_v19 }
  0xf9   : > { %v361_v26 = vpop.f32.mrb[0].mxu0 }
  0xfa   : > { %v363_v28 = vpop.f32.mrb[1].mxu0  ;;  %v362_v30 = vadd.f32 %v361_v26, %v240_v25 }
  0xfb   : > { %v365_v29 = vpop.f32.mrb[2].mxu0  ;;  %v364_v33 = vadd.f32 %v363_v28, %v244_v27 }
  0xfc   : > { %v366_v31 = vadd.f32 %v365_v29, %v240_v25  ;;  %v367_v32 = vpop.f32.mrb[3].mxu0 }
  0xfd   : > { %v368_v34 = vadd.f32 %v367_v32, %v244_v27 }
  0xfe   : > { %v520_v35 = vpack.c.bf16 %v366_v31, %v362_v30 }
  0xff   : > { %v525_v36 = vpack.c.bf16 %v368_v34, %v364_v33 }
 0x100   : > { %521 = vst [vmem:[%s207_s9] sm:$0xff] %v520_v35  }
 0x101   : > { %526 = vst [vmem:[%s213_s12] sm:$0xff] %v525_v36  }
 0x102 PF: > { %s15_s15 = sadd.s32 1, %s566_s15  }
 0x103   : > { %p12_p4 = scmp.ge.s32.totalorder %s15_s15, 4  }
 0x105   :  { %14 = sbr.rel (!%p12_p4) target bundleno = 1 (0x1), region = 74 }

// kernel: decoder_forward.21
= control target key start
LH: loop header
LB: loop body
LE: loop exit
PB: predicated region body
PF: predicated region fallthrough
CT: control target
= control target key end

     0   :  { %s635_s21 = smov 0   ;;  %s696_s0 = inlined_call_operand.vmem [shape: bf16[32,128], index: 0, kind: input, shape index: {}]   ;;  %s697_s1 = inlined_call_operand.vmem [shape: bf16[128,128], index: 1, kind: input, shape index: {}]   ;;  %s698_s2 = inlined_call_operand.vmem [shape: f32[1,128], index: 2, kind: input, shape index: {}]   ;;  %s699_s3 = inlined_call_operand.vmem [shape: f32[32,128], index: 3, kind: input, shape index: {}]   ;;  %s700_s4 = inlined_call_operand.vmem [shape: f32[1,128], index: 4, kind: input, shape index: {}]   ;;  %s701_s5 = inlined_call_operand.vmem [shape: f32[1,128], index: 5, kind: input, shape index: {}]   ;;  %s702_s6 = inlined_call_operand.vmem [shape: f32[32,128], index: 6, kind: output, shape index: {}]  }
   0x1 LB: > { %s513_s22 = sadd.s32 4294967295, %s596_s21   ;;  %p517_p0 = scmp.ge.s32.totalorder %s596_s21, 1  ;;  %s596_s21 = sphi %s635_s21, %s16_s21  }
   0x2   : > { %p224_p1 = scmp.lt.s32.totalorder %s596_s21, 3 }
   0x4   : > { %p225_p2 = pnand %p517_p0, %p224_p1 }
   0x5   : > { %v577_v0 = vld [vmem:[%s697_s1] sm:$0xff] (!%p225_p2)   ;;  %v598_v1 = vmov (!%p225_p2), 0.0   ;;  %v578_v2 = vld [vmem:[%s697_s1 + $0x8] sm:$0xff] (!%p225_p2)   ;;  %vm599_vm0 = vmmov (!%p225_p2), 0   ;;  %s518_s27 = sshll.u32 (!%p225_p2), %s513_s22, 1  ;;  %v579_v3 = vld [vmem:[%s697_s1 + $0x10] sm:$0xff] (!%p225_p2)  }
   0x6   : > { %228 = sbr.rel (%p225_p2) target bundleno = 570 (0x23a), region = 44  ;;  %547 = vmatprep.subr.bf16.mxu0 (!%p225_p2), %v598_v1  ;;  %563 = vmatprep.mubr.msk.bf16.mxu0 (!%p225_p2), %vm599_vm0, %v598_v1  ;;  %p260_p3 = scmp.lt.s32.totalorder (!%p225_p2), %s518_s27, 3  ;;  %v580_v4 = vld [vmem:[%s697_s1 + $0x18] sm:$0xff] (!%p225_p2)   ;;  %v581_v5 = vld [vmem:[%s697_s1 + $0x20] sm:$0xff] (!%p225_p2)   ;;  %v582_v6 = vld [vmem:[%s697_s1 + $0x28] sm:$0xff] (!%p225_p2)  }
   0x7   : > { %548 = vmatpush3.bf16.msra.mxu0 (!%p225_p2), %v577_v0  ;;  %v583_v7 = vld [vmem:[%s697_s1 + $0x30] sm:$0xff] (!%p225_p2)   ;;  %v584_v8 = vld [vmem:[%s697_s1 + $0x38] sm:$0xff] (!%p225_p2)   ;;  %v524_v10 = vld [vmem:[%s698_s2] ss:$0 sm:$0xff] (!%p225_p2) }
   0x8   : > { %549 = vmatprep.subr.bf16.mxu0 (!%p225_p2), %v598_v1  ;;  %v534_v36 = vld [vmem:[%s700_s4] ss:$0 sm:$0xff] (!%p225_p2) }
   0x9   : > { %v535_v38 = vld [vmem:[%s701_s5] ss:$0 sm:$0xff] (!%p225_p2) }
   0xb   : > { %550 = vmatpush3.bf16.msra.mxu0 (!%p225_p2), %v578_v2 }
   0xc   : > { %551 = vmatprep.subr.bf16.mxu0 (!%p225_p2), %v598_v1 }
   0xd   : > { %s704_s27 = smov (!%p260_p3, %s518_s27), 3 }
   0xe   : > { %s519_s30 = sshll.u32 %s704_s27, 2  ;;  %s521_s20 = sshll.u32 %s704_s27, 3 }
   0xf   : > { %s263_s9 = scalar_lea.vmem %s696_s0, %s519_s30  ;;  %552 = vmatpush3.bf16.msra.mxu0 %v579_v3  ;;  %s269_s24 = scalar_lea.vmem %s699_s3, %s521_s20 }
  0x10   : > { %553 = vmatprep.subr.bf16.mxu0 %v598_v1  ;;  %v585_v9 = vld [vmem:[%s263_s9] sm:$0xff]   ;;  %v399_v19 = vld [vmem:[%s269_s24 + $0x8] sm:$0xff]  ;;  %s275_s10 = scalar_lea.vmem %s702_s6, %s521_s20 }
  0x11   : > { %v398_v12 = vld [vmem:[%s269_s24] sm:$0xff] }
  0x13   : > { %554 = vmatpush3.bf16.msra.mxu0 %v580_v4 }
  0x14   : > { %555 = vmatprep.subr.bf16.mxu0 %v598_v1 }
  0x17   : > { %556 = vmatpush3.bf16.msra.mxu0 %v581_v5 }
  0x18   : > { %557 = vmatprep.subr.bf16.mxu0 %v598_v1 }
  0x1b   : > { %558 = vmatpush3.bf16.msra.mxu0 %v582_v6 }
  0x1c   : > { %559 = vmatprep.subr.bf16.mxu0 %v598_v1 }
  0x1f   : > { %560 = vmatpush3.bf16.msra.mxu0 %v583_v7 }
  0x20   : > { %561 = vmatprep.subr.bf16.mxu0 %v598_v1 }
  0x23   : > { %562 = vmatpush3.bf16.msra.mxu0 %v584_v8 }
  0x26   : > { %564 = vmatmul.mubr.bf16.vlgmr.msra.gmra.mrb[0].mxu0 %v585_v9 }
  0xf9   : > { %v391_v11 = vpop.f32.mrb[0].mxu0 }
  0xfa   : > { %v392_v13 = vadd.f32 %v524_v10, %v391_v11  ;;  %v565_v14 = vpop.f32.mrb[1].mxu0 }
  0xfb   : > { %v394_v15 = vpop.f32.mrb[2].mxu0 }
  0xfc   : > { %v395_v16 = vadd.f32 %v524_v10, %v394_v15  ;;  %v566_v17 = vpop.f32.mrb[3].mxu0  ;;  %v400_v18 = vadd.f32 %v398_v12, %v392_v13 }
  0xfe   : > { %402 = vadd.xlane.f32.xlu0 %v400_v18  ;;  %v401_v20 = vadd.f32 %v399_v19, %v395_v16 }
 0x102   : > { %404 = vadd.xlane.f32.xlu0 %v401_v20 }
 0x18b   : > { %v403_v21 = vpop.xlane.xlu0 %402 }
 0x18c   : > { %v407_v22 = vmul.f32 0.0078125, %v403_v21 }
 0x18e   : > { %v409_v23 = vsub.f32 %v400_v18, %v407_v22 }
 0x18f   : > { %v405_v24 = vpop.xlane.xlu0 %404 }
 0x190   : > { %v408_v25 = vmul.f32 0.0078125, %v405_v24  ;;  %v411_v26 = vmul.f32 %v409_v23, %v409_v23 }
 0x192   : > { %v410_v27 = vsub.f32 %v401_v20, %v408_v25  ;;  %413 = vadd.xlane.f32.xlu1 %v411_v26 }
 0x194   : > { %v412_v28 = vmul.f32 %v410_v27, %v410_v27 }
 0x196   : > { %415 = vadd.xlane.f32.xlu1 %v412_v28 }
 0x21f   : > { %v414_v29 = vpop.xlane.xlu1 %413 }
 0x220   : > { %v417_v30 = vmul.f32 0.0078125, %v414_v29 }
 0x222   : > { %v419_v31 = vadd.f32 1e-05, %v417_v30 }
 0x223   : > { %v416_v32 = vpop.xlane.xlu1 %415 }
 0x224   : > { %586 = vrsqrt.f32 %v419_v31  ;;  %v418_v33 = vmul.f32 0.0078125, %v416_v32 }
 0x226   : > { %v420_v34 = vadd.f32 1e-05, %v418_v33 }
 0x228   : > { %588 = vrsqrt.f32 %v420_v34 }
 0x22e   : > { %v587_v35 = vpop.eup %586 }
 0x22f   : > { %v423_v37 = vmul.f32 %v587_v35, %v409_v23 }
 0x231   : > { %v432_v39 = vmul.f32 %v534_v36, %v423_v37 }
 0x232   : > { %v589_v40 = vpop.eup %588 }
 0x233   : > { %v441_v41 = vadd.f32 %v535_v38, %v432_v39  ;;  %v424_v42 = vmul.f32 %v589_v40, %v410_v27 }
 0x235   : > { %443 = vst [vmem:[%s275_s10] sm:$0xff] %v441_v41  ;;  %v433_v43 = vmul.f32 %v534_v36, %v424_v42 }
 0x237   : > { %v442_v44 = vadd.f32 %v535_v38, %v433_v43 }
 0x239   : > { %444 = vst [vmem:[%s275_s10 + $0x8] sm:$0xff] %v442_v44 }
 0x23a PF: > { %s16_s21 = sadd.s32 1, %s596_s21  }
 0x23b   : > { %p13_p4 = scmp.ge.s32.totalorder %s16_s21, 4  }
 0x23d   :  { %15 = sbr.rel (!%p13_p4) target bundleno = 1 (0x1), region = 77 }

// kernel: decoder_forward.22
= control target key start
LH: loop header
LB: loop body
LE: loop exit
PB: predicated region body
PF: predicated region fallthrough
CT: control target
= control target key end

     0   :  { %s1070_s24 = smov 0   ;;  %s1072_s25 = smov 0   ;;  %s1221_s0 = inlined_call_operand.vmem [shape: f32[32,128], index: 0, kind: input, shape index: {}]   ;;  %s1222_s1 = inlined_call_operand.vmem [shape: bf16[128,256], index: 1, kind: input, shape index: {}]   ;;  %s1223_s2 = inlined_call_operand.vmem [shape: f32[1,256], index: 2, kind: input, shape index: {}]   ;;  %s1224_s3 = inlined_call_operand.vmem [shape: bf16[256,128], index: 3, kind: input, shape index: {}]   ;;  %s1225_s4 = inlined_call_operand.vmem [shape: f32[1,128], index: 4, kind: input, shape index: {}]   ;;  %s1226_s5 = inlined_call_operand.vmem [shape: f32[1,128], index: 5, kind: input, shape index: {}]   ;;  %s1227_s6 = inlined_call_operand.vmem [shape: f32[1,128], index: 6, kind: input, shape index: {}]   ;;  %s1228_s7 = inlined_call_operand.vmem [shape: f32[32,128], index: 7, kind: output, shape index: {}]  }
   0x1   :  { %s1074_s26 = smov 0  }
   0x2 LB: > { %s29_s27 = sadd.s32 1, %s1023_s25  ;;  %p872_p0 = scmp.ge.s32.totalorder %s1027_s26, 1  ;;  %s1027_s26 = sphi %s1074_s26, %s17_s26   ;;  %s1023_s25 = sphi %s1072_s25, %s1230_s25   ;;  %s1019_s24 = sphi %s1070_s24, %s1229_s24  }
   0x3   : > { %p31_p1 = scmp.ge.s32.totalorder %s29_s27, 2  ;;  %p282_p2 = scmp.lt.s32.totalorder %s1027_s26, 3 }
   0x5   : > { %s1232_s27 = smov (%p31_p1, %s29_s27), 0  ;;  %p283_p3 = pnand %p872_p0, %p282_p2 }
   0x6   : > { %v961_v0 = vld [vmem:[%s1222_s1 + $0x4] ss:$8 sps:$4 sm:$0xff] (!%p283_p3)   ;;  %v963_v1 = vld [vmem:[%s1222_s1] ss:$8 sps:$4 sm:$0xff] (!%p283_p3)   ;;  %v1029_v2 = vmov (!%p283_p3), 0   ;;  %s873_s19 = sshll.u32 (!%p283_p3), %s1019_s24, 1  ;;  %v385_v36 = vlaneseq (!%p283_p3) }
   0x7   : > { %286 = sbr.rel (%p283_p3) target bundleno = 796 (0x31c), region = 48  ;;  %507 = vmatprep.mubr.bf16.mxu0 (!%p283_p3), %v1029_v2  ;;  %475 = vmatprep.subr.bf16.mxu0 (!%p283_p3), %v961_v0  ;;  %v964_v3 = vld [vmem:[%s1222_s1 + $0x14] ss:$8 sps:$4 sm:$0xff] (!%p283_p3)   ;;  %v966_v4 = vld [vmem:[%s1222_s1 + $0x10] ss:$8 sps:$4 sm:$0xff] (!%p283_p3)   ;;  %p329_p4 = scmp.lt.s32.totalorder (!%p283_p3), %s873_s19, 3 }
   0x8   : > { %476 = vmatpush1.bf16.msra.mxu0 (!%p283_p3), %v963_v1  ;;  %v967_v5 = vld [vmem:[%s1222_s1 + $0x24] ss:$8 sps:$4 sm:$0xff] (!%p283_p3)   ;;  %v969_v6 = vld [vmem:[%s1222_s1 + $0x20] ss:$8 sps:$4 sm:$0xff] (!%p283_p3)   ;;  %v970_v7 = vld [vmem:[%s1222_s1 + $0x34] ss:$8 sps:$4 sm:$0xff] (!%p283_p3)  }
   0x9   : > { %477 = vmatprep.subr.bf16.mxu0 (!%p283_p3), %v964_v3  ;;  %v972_v8 = vld [vmem:[%s1222_s1 + $0x30] ss:$8 sps:$4 sm:$0xff] (!%p283_p3)   ;;  %v973_v9 = vld [vmem:[%s1222_s1 + $0x44] ss:$8 sps:$4 sm:$0xff] (!%p283_p3)   ;;  %v975_v11 = vld [vmem:[%s1222_s1 + $0x40] ss:$8 sps:$4 sm:$0xff] (!%p283_p3)  }
   0xa   : > { %v985_v10 = vld [vmem:[%s1224_s3 + $0x40] sm:$0xff] (!%p283_p3)   ;;  %v976_v13 = vld [vmem:[%s1222_s1 + $0x54] ss:$8 sps:$4 sm:$0xff] (!%p283_p3)   ;;  %v987_v14 = vld [vmem:[%s1224_s3 + $0x48] sm:$0xff] (!%p283_p3)   ;;  %v386_v37 = vshrl.u32 (!%p283_p3), %v385_v36, 7 }
   0xb   : > { %v986_v12 = vld [vmem:[%s1224_s3] sm:$0xff] (!%p283_p3)   ;;  %914 = vmatprep.subr.bf16.mxu1 (!%p283_p3), %v985_v10  ;;  %v988_v15 = vld [vmem:[%s1224_s3 + $0x8] sm:$0xff] (!%p283_p3)   ;;  %v989_v16 = vld [vmem:[%s1224_s3 + $0x50] sm:$0xff] (!%p283_p3)  }
   0xc   : > { %478 = vmatpush1.bf16.msra.mxu0 (!%p283_p3), %v966_v4  ;;  %915 = vmatpush3.bf16.msra.mxu1 (!%p283_p3), %v986_v12  ;;  %v978_v17 = vld [vmem:[%s1222_s1 + $0x50] ss:$8 sps:$4 sm:$0xff] (!%p283_p3)   ;;  %v979_v18 = vld [vmem:[%s1222_s1 + $0x64] ss:$8 sps:$4 sm:$0xff] (!%p283_p3)   ;;  %v981_v21 = vld [vmem:[%s1222_s1 + $0x60] ss:$8 sps:$4 sm:$0xff] (!%p283_p3)  }
   0xd   : > { %479 = vmatprep.subr.bf16.mxu0 (!%p283_p3), %v967_v5  ;;  %916 = vmatprep.subr.bf16.mxu1 (!%p283_p3), %v987_v14  ;;  %v990_v19 = vld [vmem:[%s1224_s3 + $0x10] sm:$0xff] (!%p283_p3)   ;;  %v991_v20 = vld [vmem:[%s1224_s3 + $0x58] sm:$0xff] (!%p283_p3)   ;;  %v993_v24 = vld [vmem:[%s1224_s3 + $0x60] sm:$0xff] (!%p283_p3)   ;;  %v387_v38 = vsub.s32 (!%p283_p3), 0, %v386_v37  ;;  %v391_v40 = vsub.s32 (!%p283_p3), 1, %v386_v37 }
   0xe   : > { %s1234_s19 = smov (!%p329_p4, %s873_s19), 3  ;;  %v982_v22 = vld [vmem:[%s1222_s1 + $0x74] ss:$8 sps:$4 sm:$0xff]   ;;  %v984_v25 = vld [vmem:[%s1222_s1 + $0x70] ss:$8 sps:$4 sm:$0xff]   ;;  %v994_v28 = vld [vmem:[%s1224_s3 + $0x20] sm:$0xff]  }
   0xf   : > { %s874_s29 = sshll.u32 %s1234_s19, 3  ;;  %v992_v23 = vld [vmem:[%s1224_s3 + $0x18] sm:$0xff]   ;;  %v995_v29 = vld [vmem:[%s1224_s3 + $0x68] sm:$0xff]   ;;  %v997_v32 = vld [vmem:[%s1224_s3 + $0x70] sm:$0xff]  }
  0x10   : > { %480 = vmatpush1.bf16.msra.mxu0 %v969_v6  ;;  %917 = vmatpush3.bf16.msra.mxu1 %v988_v15  ;;  %s332_s18 = scalar_lea.vmem %s1221_s0, %s874_s29  ;;  %v996_v31 = vld [vmem:[%s1224_s3 + $0x28] sm:$0xff]   ;;  %v998_v33 = vld [vmem:[%s1224_s3 + $0x30] sm:$0xff]   ;;  %v999_v34 = vld [vmem:[%s1224_s3 + $0x78] sm:$0xff]   ;;  %s355_s9 = scalar_lea.vmem %s1228_s7, %s874_s29 }
  0x11   : > { %481 = vmatprep.subr.bf16.mxu0 %v970_v7  ;;  %918 = vmatprep.subr.bf16.mxu1 %v989_v16  ;;  %v364_v26 = vld [vmem:[%s332_s18] sm:$0xff]  ;;  %v365_v27 = vld [vmem:[%s332_s18 + $0x8] sm:$0xff]  ;;  %v1000_v35 = vld [vmem:[%s1224_s3 + $0x38] sm:$0xff]  }
  0x12   : > { %v366_v30 = vpack.c.bf16 %v365_v27, %v364_v26  ;;  %v383_v39 = vld [vmem:[%s1223_s2] sm:$0x3] }
  0x13   : > { %v388_v41 = vrot.slane %v383_v39, %v387_v38  ;;  %v392_v42 = vrot.slane %v383_v39, %v391_v40  ;;  %v909_v59 = vld [vmem:[%s1225_s4] ss:$0 sm:$0xff] }
  0x14   : > { %482 = vmatpush1.bf16.msra.mxu0 %v972_v8  ;;  %919 = vmatpush3.bf16.msra.mxu1 %v990_v19  ;;  %v910_v19 = vld [vmem:[%s1226_s5] ss:$0 sm:$0xff] }
  0x15   : > { %483 = vmatprep.subr.bf16.mxu0 %v973_v9  ;;  %920 = vmatprep.subr.bf16.mxu1 %v991_v20 }
  0x18   : > { %484 = vmatpush1.bf16.msra.mxu0 %v975_v11  ;;  %921 = vmatpush3.bf16.msra.mxu1 %v992_v23 }
  0x19   : > { %485 = vmatprep.subr.bf16.mxu0 %v976_v13  ;;  %922 = vmatprep.subr.bf16.mxu1 %v993_v24 }
  0x1c   : > { %486 = vmatpush1.bf16.msra.mxu0 %v978_v17  ;;  %923 = vmatpush3.bf16.msra.mxu1 %v994_v28 }
  0x1d   : > { %487 = vmatprep.subr.bf16.mxu0 %v979_v18  ;;  %924 = vmatprep.subr.bf16.mxu1 %v995_v29 }
  0x20   : > { %488 = vmatpush1.bf16.msra.mxu0 %v981_v21  ;;  %925 = vmatpush3.bf16.msra.mxu1 %v996_v31  ;;  %v911_v21 = vld [vmem:[%s1227_s6] ss:$0 sm:$0xff] }
  0x21   : > { %489 = vmatprep.subr.bf16.mxu0 %v982_v22  ;;  %926 = vmatprep.subr.bf16.mxu1 %v997_v32 }
  0x24   : > { %490 = vmatpush1.bf16.msra.mxu0 %v984_v25  ;;  %927 = vmatpush3.bf16.msra.mxu1 %v998_v33 }
  0x25   : > { %928 = vmatprep.subr.bf16.mxu1 %v999_v34 }
  0x27   : > { %508 = vmatmul.mubr.bf16.vlgmr.msra.gmra.mrb[0].mxu0 %v366_v30 }
  0x28   : > { %929 = vmatpush3.bf16.msra.mxu1 %v1000_v35 }
  0xfa   : > { %v509_v43 = vpop.f32.mrb[0].mxu0 }
  0xfb   : > { %v510_v44 = vadd.f32 %v509_v43, %v388_v41  ;;  %v511_v45 = vpop.f32.mrb[1].mxu0 }
  0xfc   : > { %v512_v46 = vadd.f32 %v511_v45, %v392_v42  ;;  %v513_v47 = vpop.f32.mrb[2].mxu0 }
  0xfd   : > { %v514_v48 = vadd.f32 %v513_v47, %v388_v41  ;;  %v515_v49 = vpop.f32.mrb[3].mxu0  ;;  %v518_v51 = vmax.f32 %v510_v44, 0.0 }
  0xfe   : > { %v516_v50 = vadd.f32 %v515_v49, %v392_v42  ;;  %v519_v53 = vmax.f32 %v512_v46, 0.0 }
  0xff   : > { %v520_v52 = vmax.f32 %v514_v48, 0.0 }
 0x100   : > { %v521_v54 = vmax.f32 %v516_v50, 0.0 }
 0x101   : > { %v524_v55 = vpack.c.bf16 %v520_v52, %v518_v51 }
 0x102   : > { %v525_v56 = vpack.c.bf16 %v521_v54, %v519_v53 }
 0x104   : > { %686 = vmatprep.mubr.bf16.mxu1 %v525_v56 }
 0x105   : > { %687 = vmatmul.mubr.bf16.vlgmr.msra.gmra.mrb[0].mxu1 %v524_v55 }
 0x1d8   : > { %v930_v57 = vpop.f32.mrb[0].mxu1 }
 0x1d9   : > { %v931_v58 = vpop.f32.mrb[1].mxu1 }
 0x1da   : > { %v932_v60 = vadd.f32 %v931_v58, %v930_v57  ;;  %v933_v61 = vpop.f32.mrb[2].mxu1 }
 0x1db   : > { %v934_v62 = vpop.f32.mrb[3].mxu1 }
 0x1dc   : > { %v711_v63 = vadd.f32 %v932_v60, %v909_v59  ;;  %v935_v0 = vadd.f32 %v934_v62, %v933_v61 }
 0x1de   : > { %v712_v1 = vadd.f32 %v935_v0, %v909_v59  ;;  %v713_v2 = vadd.f32 %v711_v63, %v364_v26 }
 0x1e0   : > { %715 = vadd.xlane.f32.xlu0 %v713_v2  ;;  %v714_v3 = vadd.f32 %v712_v1, %v365_v27 }
 0x1e4   : > { %717 = vadd.xlane.f32.xlu0 %v714_v3 }
 0x26d   : > { %v716_v4 = vpop.xlane.xlu0 %715 }
 0x26e   : > { %v720_v5 = vmul.f32 0.0078125, %v716_v4 }
 0x270   : > { %v722_v6 = vsub.f32 %v713_v2, %v720_v5 }
 0x271   : > { %v718_v7 = vpop.xlane.xlu0 %717 }
 0x272   : > { %v721_v8 = vmul.f32 0.0078125, %v718_v7  ;;  %v724_v9 = vmul.f32 %v722_v6, %v722_v6 }
 0x274   : > { %v723_v10 = vsub.f32 %v714_v3, %v721_v8  ;;  %726 = vadd.xlane.f32.xlu1 %v724_v9 }
 0x276   : > { %v725_v11 = vmul.f32 %v723_v10, %v723_v10 }
 0x278   : > { %728 = vadd.xlane.f32.xlu1 %v725_v11 }
 0x301   : > { %v727_v12 = vpop.xlane.xlu1 %726 }
 0x302   : > { %v730_v13 = vmul.f32 0.0078125, %v727_v12 }
 0x304   : > { %v732_v14 = vadd.f32 1e-05, %v730_v13 }
 0x305   : > { %v729_v15 = vpop.xlane.xlu1 %728 }
 0x306   : > { %1001 = vrsqrt.f32 %v732_v14  ;;  %v731_v16 = vmul.f32 0.0078125, %v729_v15 }
 0x308   : > { %v733_v17 = vadd.f32 1e-05, %v731_v16 }
 0x30a   : > { %1003 = vrsqrt.f32 %v733_v17 }
 0x310   : > { %v1002_v18 = vpop.eup %1001 }
 0x311   : > { %v736_v20 = vmul.f32 %v1002_v18, %v722_v6 }
 0x313   : > { %v745_v22 = vmul.f32 %v910_v19, %v736_v20 }
 0x314   : > { %v1004_v23 = vpop.eup %1003 }
 0x315   : > { %v754_v24 = vadd.f32 %v911_v21, %v745_v22  ;;  %v737_v25 = vmul.f32 %v1004_v23, %v723_v10 }
 0x317   : > { %756 = vst [vmem:[%s355_s9] sm:$0xff] %v754_v24  ;;  %v746_v26 = vmul.f32 %v910_v19, %v737_v25 }
 0x319   : > { %v755_v27 = vadd.f32 %v911_v21, %v746_v26 }
 0x31b   : > { %757 = vst [vmem:[%s355_s9 + $0x8] sm:$0xff] %v755_v27 }
 0x31c PF: > { %s17_s26 = sadd.s32 1, %s1027_s26   ;;  %s1229_s24 = smov %s1023_s25 }
 0x31d   : > { %p14_p5 = scmp.ge.s32.totalorder %s17_s26, 4   ;;  %s1230_s25 = smov %s1232_s27 }
 0x31f   :  { %16 = sbr.rel (!%p14_p5) target bundleno = 2 (0x2), region = 95 }

// kernel: decoder_forward.17
= control target key start
LH: loop header
LB: loop body
LE: loop exit
PB: predicated region body
PF: predicated region fallthrough
CT: control target
= control target key end

     0   :  { %s2476_s12 = smov 0   ;;  %s2478_s13 = smov 0   ;;  %s3131_s0 = inlined_call_operand.vmem [shape: bf16[2,16,128], index: 0, kind: input, shape index: {}]   ;;  %s3132_s1 = inlined_call_operand.vmem [shape: bf16[2,16,128], index: 1, kind: input, shape index: {}]   ;;  %s3133_s2 = inlined_call_operand.vmem [shape: bf16[2,16,128], index: 2, kind: input, shape index: {}]   ;;  %s3134_s3 = inlined_call_operand.vmem [shape: bf16[2,16,128], index: 3, kind: output, shape index: {}]  }
   0x1   :  { %s2480_s14 = smov 0  }
   0x2 LB: > { %s32_s15 = sadd.s32 1, %s2439_s13  ;;  %p2114_p0 = scmp.ge.s32.totalorder %s2443_s14, 1  ;;  %s2443_s14 = sphi %s2480_s14, %s13_s14   ;;  %s2439_s13 = sphi %s2478_s13, %s3140_s13   ;;  %s2435_s12 = sphi %s2476_s12, %s3139_s12  }
   0x3   : > { %p34_p1 = scmp.ge.s32.totalorder %s32_s15, 2  ;;  %p199_p2 = scmp.lt.s32.totalorder %s2443_s14, 3 }
   0x5   : > { %s3142_s15 = smov (%p34_p1, %s32_s15), 0  ;;  %p200_p3 = pnand %p2114_p0, %p199_p2 }
   0x6   : > { %p250_p4 = scmp.lt.s32.totalorder (!%p200_p3), %s2435_s12, 1  ;;  %v2445_v0 = vmov (!%p200_p3), 0.0   ;;  %vm2446_vm0 = vmmov (!%p200_p3), 0   ;;  %vm364_vm1 = vcmask (!%p200_p3), 130048   ;;  %vm294_vm2 = vcmask (!%p200_p3), 7168   ;;  %s2449_s23 = smov (!%p200_p3), 112  }
   0x7   : > { %203 = sbr.rel (%p200_p3) target bundleno = 1693 (0x69d), region = 32  ;;  %2189 = vmatprep.subr.bf16.mxu0 (!%p200_p3), %v2445_v0  ;;  %327 = vst [vmem:[#allocation4] sm:$0xff] (!%p200_p3), %v2445_v0  ;;  %328 = vst [vmem:[#allocation4 + $0x8] sm:$0xff] (!%p200_p3), %v2445_v0  ;;  %2191 = vmatprep.mubr.msk.bf16.mxu0 (!%p200_p3), %vm2446_vm0, %v2445_v0  ;;  %v2447_v4 = vmov (!%p200_p3), -1e+30   ;;  %v336_v5 = vlaneseq (!%p200_p3)  ;;  %v2448_v21 = vmov (!%p200_p3), 0  }
   0x8   : > { %2195 = vmatprep.subr.bf16.mxu1 (!%p200_p3), %v2445_v0  ;;  %2197 = vmatprep.mubr.msk.bf16.mxu1 (!%p200_p3), %vm2446_vm0, %v2445_v0  ;;  %295 = vst.msk [vmem:[#allocation2] sm:$0xff] (!%p200_p3), %vm294_vm2, %v2447_v4  ;;  %296 = vst.msk [vmem:[#allocation2 + $0x8] sm:$0xff] (!%p200_p3), %vm294_vm2, %v2447_v4  ;;  %s2450_s24 = smov (!%p200_p3), 64   ;;  %s2451_s25 = smov (!%p200_p3), 48   ;;  %vm711_vm5 = vcmask (!%p200_p3), 261248   ;;  %vm891_vm6 = vcmask (!%p200_p3), 392448  }
   0x9   : > { %297 = vst.msk [vmem:[#allocation2 + $0x10] sm:$0xff] (!%p200_p3), %vm294_vm2, %v2447_v4  ;;  %298 = vst.msk [vmem:[#allocation2 + $0x18] sm:$0xff] (!%p200_p3), %vm294_vm2, %v2447_v4  ;;  %v337_v6 = vshrl.u32 (!%p200_p3), %v336_v5, 7  ;;  %v344_v7 = vand.u32 (!%p200_p3), 127, %v336_v5  ;;  %2320 = vset.pattern.permute.xlu1 (!%p200_p3), %v2448_v21  ;;  %2321 = vset.pattern.permute.xlu0 (!%p200_p3), %v2448_v21  ;;  %s2452_s26 = smov (!%p200_p3), 32   ;;  %s2453_s27 = smov (!%p200_p3), 16  }
   0xa   : > { %299 = vst.msk [vmem:[#allocation2 + $0x20] sm:$0xff] (!%p200_p3), %vm294_vm2, %v2447_v4  ;;  %300 = vst.msk [vmem:[#allocation2 + $0x28] sm:$0xff] (!%p200_p3), %vm294_vm2, %v2447_v4  ;;  %s2454_s4 = smov (!%p200_p3), 96   ;;  %s2455_s5 = smov (!%p200_p3), 80   ;;  %vm1071_vm7 = vcmask (!%p200_p3), 523648   ;;  %vm1251_vm8 = vcmask (!%p200_p3), 654848  }
   0xb   : > { %301 = vst.msk [vmem:[#allocation2 + $0x30] sm:$0xff] (!%p200_p3), %vm294_vm2, %v2447_v4  ;;  %302 = vst.msk [vmem:[#allocation2 + $0x38] sm:$0xff] (!%p200_p3), %vm294_vm2, %v2447_v4  ;;  %v338_v8 = vadd.s32 (!%p200_p3), 8, %v337_v6  ;;  %vm2571_vm3 = vcmp.le.s32.totalorder (!%p200_p3), %v344_v7, %v337_v6  ;;  %vm1431_vm9 = vcmask (!%p200_p3), 786048   ;;  %vm1611_vm10 = vcmask (!%p200_p3), 917248  }
   0xc   : > { %303 = vst.msk [vmem:[#allocation2 + $0x40] sm:$0xff] (!%p200_p3), %vm294_vm2, %v2447_v4  ;;  %304 = vst.msk [vmem:[#allocation2 + $0x48] sm:$0xff] (!%p200_p3), %vm294_vm2, %v2447_v4  ;;  %vm1791_vm11 = vcmask (!%p200_p3), 1048448  }
   0xd   : > { %305 = vst.msk [vmem:[#allocation2 + $0x50] sm:$0xff] (!%p200_p3), %vm294_vm2, %v2447_v4  ;;  %306 = vst.msk [vmem:[#allocation2 + $0x58] sm:$0xff] (!%p200_p3), %vm294_vm2, %v2447_v4  ;;  %vm2575_vm4 = vcmp.le.s32.totalorder (!%p200_p3), %v344_v7, %v338_v8 }
   0xe   : > { %s3144_s12 = smov (!%p250_p4, %s2435_s12), 1  ;;  %307 = vst.msk [vmem:[#allocation2 + $0x60] sm:$0xff] %vm294_vm2, %v2447_v4  ;;  %308 = vst.msk [vmem:[#allocation2 + $0x68] sm:$0xff] %vm294_vm2, %v2447_v4 }
   0xf   : > { %s2502_s16 = sshll.u32 %s3144_s12, 3  ;;  %309 = vst.msk [vmem:[#allocation2 + $0x70] sm:$0xff] %vm294_vm2, %v2447_v4  ;;  %310 = vst.msk [vmem:[#allocation2 + $0x78] sm:$0xff] %vm294_vm2, %v2447_v4  ;;  %v2595_v22 = vld [vmem:[#allocation2] sm:$0xff]  ;;  %v417_v25 = vld [vmem:[#allocation2 + $0x8] sm:$0xff] }
  0x10   : > { %s267_s19 = scalar_lea.vmem %s3132_s1, %s2502_s16  ;;  %s257_s22 = scalar_lea.vmem %s3131_s0, %s2502_s16  ;;  %311 = vst.msk [vmem:[#allocation3] sm:$0xff] %vm294_vm2, %v2445_v0  ;;  %312 = vst.msk [vmem:[#allocation3 + $0x8] sm:$0xff] %vm294_vm2, %v2445_v0  ;;  %v591_v10 = vld [vmem:[#allocation2 + $0x18] sm:$0xff] }
  0x11   : > { %v2508_v1 = vld [vmem:[%s267_s19] sm:$0xff]   ;;  %313 = vst.msk [vmem:[#allocation3 + $0x10] sm:$0xff] %vm294_vm2, %v2445_v0  ;;  %314 = vst.msk [vmem:[#allocation3 + $0x18] sm:$0xff] %vm294_vm2, %v2445_v0  ;;  %s277_s30 = scalar_lea.vmem %s3133_s2, %s2502_s16  ;;  %s287_s8 = scalar_lea.vmem %s3134_s3, %s2502_s16 }
  0x12   : > { %v369_v2 = vsel %vm364_vm1, %v2508_v1, 0  ;;  %v2517_v3 = vld [vmem:[%s257_s22] sm:$0xff]   ;;  %315 = vst.msk [vmem:[#allocation3 + $0x20] sm:$0xff] %vm294_vm2, %v2445_v0  ;;  %316 = vst.msk [vmem:[#allocation3 + $0x28] sm:$0xff] %vm294_vm2, %v2445_v0 }
  0x13   : > { %2190 = vmatpush3.bf16.xpose.msra.mxu0 %v369_v2  ;;  %317 = vst.msk [vmem:[#allocation3 + $0x30] sm:$0xff] %vm294_vm2, %v2445_v0  ;;  %318 = vst.msk [vmem:[#allocation3 + $0x38] sm:$0xff] %vm294_vm2, %v2445_v0  ;;  %v2612_v29 = vld [vmem:[%s277_s30] sm:$0xff]  }
  0x14   : > { %2207 = vmatprep.subr.bf16.mxu0 %v2445_v0  ;;  %319 = vst.msk [vmem:[#allocation3 + $0x40] sm:$0xff] %vm294_vm2, %v2445_v0  ;;  %320 = vst.msk [vmem:[#allocation3 + $0x48] sm:$0xff] %vm294_vm2, %v2445_v0  ;;  %2196 = vmatpush3.bf16.msra.mxu1 %v2612_v29 }
  0x15   : > { %321 = vst.msk [vmem:[#allocation3 + $0x50] sm:$0xff] %vm294_vm2, %v2445_v0  ;;  %322 = vst.msk [vmem:[#allocation3 + $0x58] sm:$0xff] %vm294_vm2, %v2445_v0  ;;  %2201 = vmatprep.subr.bf16.mxu1 %v2445_v0 }
  0x16   : > { %323 = vst.msk [vmem:[#allocation3 + $0x60] sm:$0xff] %vm294_vm2, %v2445_v0  ;;  %324 = vst.msk [vmem:[#allocation3 + $0x68] sm:$0xff] %vm294_vm2, %v2445_v0 }
  0x17   : > { %325 = vst.msk [vmem:[#allocation3 + $0x70] sm:$0xff] %vm294_vm2, %v2445_v0  ;;  %326 = vst.msk [vmem:[#allocation3 + $0x78] sm:$0xff] %vm294_vm2, %v2445_v0  ;;  %v418_v5 = vld [vmem:[#allocation3] sm:$0xff]  ;;  %v419_v8 = vld [vmem:[#allocation3 + $0x8] sm:$0xff] }
  0x1a   : > { %2192 = vmatmul.mubr.msk.bf16.vlgmr.msra.gmra.mrb[0].mxu0 %vm364_vm1, %v2517_v3 }
  0x1b   : > { %2209 = vmatprep.mubr.msk.bf16.mxu0 %vm2446_vm0, %v2445_v0 }
  0xed   : > { %v405_v9 = vpop.f32.mrb[0].mxu0 }
  0xee   : > { %v412_v11 = vmul.f32 0.25, %v405_v9  ;;  %v2193_v12 = vpop.f32.mrb[1].mxu0 }
  0xef   : > { %v408_v13 = vpop.f32.mrb[2].mxu0 }
  0xf0   : > { %v413_v15 = vmul.f32 0.25, %v408_v13  ;;  %v2194_v16 = vpop.f32.mrb[3].mxu0  ;;  %v414_v17 = vsel %vm2571_vm3, %v412_v11, -1e+30 }
  0xf1   : > { %v420_v18 = vsel %vm364_vm1, %v414_v17, -inf }
  0xf2   : > { %421 = vmax.xlane.f32.xlu0 %v420_v18  ;;  %v415_v19 = vsel %vm2575_vm4, %v413_v15, -1e+30 }
  0xf3   : > { %v423_v20 = vsel %vm364_vm1, %v415_v19, -inf }
  0xf6   : > { %424 = vmax.xlane.f32.xlu0 %v423_v20 }
 0x10c   : > { %536 = vrot.lane.b32.xlu0 %v2508_v1, %s2449_s23 }
 0x110   : > { %1074 = vrot.lane.b32.xlu0 %v2517_v3, %s2450_s24 }
 0x114   : > { %1254 = vrot.lane.b32.xlu0 %v2517_v3, %s2451_s25 }
 0x118   : > { %1434 = vrot.lane.b32.xlu0 %v2517_v3, %s2452_s26 }
 0x11c   : > { %1614 = vrot.lane.b32.xlu0 %v2517_v3, %s2453_s27 }
 0x17f   : > { %v422_v23 = vpop.xlane.xlu0 %421 }
 0x180   : > { %v2598_v24 = vmax.f32 %v2595_v22, %v422_v23 }
 0x182   : > { %v428_v26 = vsub.f32 %v2595_v22, %v2598_v24  ;;  %463 = vst.msk [vmem:[#allocation2] sm:$0xff] %vm294_vm2, %v2598_v24  ;;  %436 = vperm.xlu1 %2320, %v2598_v24  }
 0x183   : > { %v425_v27 = vpop.xlane.xlu0 %424 }
 0x184   : > { %v427_v28 = vmax.f32 %v417_v25, %v425_v27  ;;  %v430_v2 = vmul.f32 1.442695, %v428_v26 }
 0x186   : > { %464 = vst.msk [vmem:[#allocation2 + $0x8] sm:$0xff] %vm294_vm2, %v427_v28  ;;  %441 = vperm.xlu1 %2320, %v427_v28   ;;  %v429_v30 = vsub.f32 %v417_v25, %v427_v28 }
 0x187   : > { %v537_v42 = vpop.permute.xlu0 %536 }
 0x188   : > { %v432_v31 = vmul.f32 1.442695, %v429_v30  ;;  %v542_v46 = vsel %vm364_vm1, %v537_v42, 0 }
 0x18a   : > { %534 = vrot.lane.b32.xlu1 %v2517_v3, %s2449_s23  ;;  %2325 = vpow2.f32 %v432_v31 }
 0x18b   : > { %v1075_v56 = vpop.permute.xlu0 %1074 }
 0x18e   : > { %716 = vrot.lane.b32.xlu1 %v2508_v1, %s2454_s4 }
 0x18f   : > { %v1255_v59 = vpop.permute.xlu0 %1254 }
 0x192   : > { %714 = vrot.lane.b32.xlu1 %v2517_v3, %s2454_s4 }
 0x193   : > { %v1435_v62 = vpop.permute.xlu0 %1434 }
 0x194   : > { %v2632_v32 = vpop.eup %2325 }
 0x195   : > { %v451_v11 = vmul.f32 %v2632_v32, %v419_v8 }
 0x196   : > { %896 = vrot.lane.b32.xlu1 %v2508_v1, %s2455_s5 }
 0x19a   : > { %894 = vrot.lane.b32.xlu1 %v2517_v3, %s2455_s5 }
 0x19e   : > { %1076 = vrot.lane.b32.xlu1 %v2508_v1, %s2450_s24 }
 0x1a2   : > { %1256 = vrot.lane.b32.xlu1 %v2508_v1, %s2451_s25 }
 0x1a6   : > { %1436 = vrot.lane.b32.xlu1 %v2508_v1, %s2452_s26 }
 0x1aa   : > { %1616 = vrot.lane.b32.xlu1 %v2508_v1, %s2453_s27  ;;  %v1615_v1 = vpop.permute.xlu0 %1614 }
 0x1ae   : > { %525 = vperm.xlu1 %2320, %v2632_v32  }
 0x201   : > { %v437_v33 = vpop.permute.xlu1 %436 }
 0x202   : > { %v444_v34 = vsub.f32 %v414_v17, %v437_v33 }
 0x204   : > { %v446_v35 = vmul.f32 1.442695, %v444_v34 }
 0x205   : > { %v442_v36 = vpop.permute.xlu1 %441 }
 0x206   : > { %2327 = vpow2.f32 %v446_v35  ;;  %v445_v37 = vsub.f32 %v415_v19, %v442_v36 }
 0x208   : > { %v448_v38 = vmul.f32 1.442695, %v445_v37 }
 0x209   : > { %v535_v39 = vpop.permute.xlu1 %534 }
 0x20a   : > { %2329 = vpow2.f32 %v448_v38 }
 0x20b   : > { %2331 = vpow2.f32 %v430_v2 }
 0x20d   : > { %v717_v44 = vpop.permute.xlu1 %716 }
 0x20e   : > { %v722_v49 = vsel %vm364_vm1, %v717_v44, 0 }
 0x210   : > { %v2328_v40 = vpop.eup %2327 }
 0x211   : > { %v452_v41 = vsel %vm364_vm1, %v2328_v40, 0.0  ;;  %v715_v48 = vpop.permute.xlu1 %714 }
 0x212   : > { %453 = vadd.xlane.f32.xlu1 %v452_v41 }
 0x214   : > { %v2330_v43 = vpop.eup %2329 }
 0x215   : > { %v455_v45 = vsel %vm364_vm1, %v2330_v43, 0.0  ;;  %v465_v47 = vpack.c.bf16 %v2330_v43, %v2328_v40  ;;  %v897_v50 = vpop.permute.xlu1 %896  ;;  %v2675_v3 = vpop.eup %2331 }
 0x216   : > { %456 = vadd.xlane.f32.xlu0 %v455_v45  ;;  %v902_v51 = vsel %vm364_vm1, %v897_v50, 0  ;;  %v450_v6 = vmul.f32 %v2675_v3, %v418_v5 }
 0x217   : > { %2198 = vmatmul.mubr.msk.bf16.vlgmr.msra.gmra.mrb[0].mxu1 %vm364_vm1, %v465_v47 }
 0x218   : > { %2202 = vmatpush3.bf16.xpose.msra.mxu1 %v542_v46  ;;  %2203 = vmatprep.mubr.msk.bf16.mxu1 %vm2446_vm0, %v2445_v0 }
 0x219   : > { %2213 = vmatprep.subr.bf16.mxu1 %v2445_v0  ;;  %v895_v52 = vpop.permute.xlu1 %894 }
 0x21d   : > { %v1077_v53 = vpop.permute.xlu1 %1076 }
 0x21e   : > { %v1082_v54 = vsel %vm364_vm1, %v1077_v53, 0 }
 0x21f   : > { %2204 = vmatmul.mubr.msk.bf16.vlgmr.msra.gmra.mrb[4].mxu1 %vm364_vm1, %v535_v39 }
 0x220   : > { %2214 = vmatpush3.bf16.xpose.msra.mxu1 %v722_v49  ;;  %2215 = vmatprep.mubr.msk.bf16.mxu1 %vm2446_vm0, %v2445_v0 }
 0x221   : > { %2225 = vmatprep.subr.bf16.mxu1 %v2445_v0  ;;  %v1257_v55 = vpop.permute.xlu1 %1256 }
 0x222   : > { %v1262_v57 = vsel %vm364_vm1, %v1257_v55, 0 }
 0x225   : > { %v1437_v58 = vpop.permute.xlu1 %1436 }
 0x226   : > { %v1442_v60 = vsel %vm364_vm1, %v1437_v58, 0 }
 0x227   : > { %2216 = vmatmul.mubr.msk.bf16.vlgmr.msra.gmra.mrb[8].mxu1 %vm364_vm1, %v715_v48 }
 0x228   : > { %2226 = vmatpush3.bf16.xpose.msra.mxu1 %v902_v51  ;;  %2227 = vmatprep.mubr.msk.bf16.mxu1 %vm2446_vm0, %v2445_v0 }
 0x229   : > { %2237 = vmatprep.subr.bf16.mxu1 %v2445_v0  ;;  %v1617_v61 = vpop.permute.xlu1 %1616 }
 0x22a   : > { %v1622_v63 = vsel %vm364_vm1, %v1617_v61, 0 }
 0x22d   : > { %v526_v4 = vpop.permute.xlu1 %525 }
 0x22e   : > { %v529_v16 = vmul.f32 0.0, %v526_v4 }
 0x22f   : > { %2228 = vmatmul.mubr.msk.bf16.vlgmr.msra.gmra.mrb[12].mxu1 %vm364_vm1, %v895_v52 }
 0x230   : > { %2238 = vmatpush3.bf16.xpose.msra.mxu1 %v1082_v54  ;;  %2239 = vmatprep.mubr.msk.bf16.mxu1 %vm2446_vm0, %v2445_v0 }
 0x231   : > { %2249 = vmatprep.subr.bf16.mxu1 %v2445_v0 }
 0x237   : > { %2240 = vmatmul.mubr.msk.bf16.vlgmr.msra.gmra.mrb[16].mxu1 %vm364_vm1, %v1075_v56 }
 0x238   : > { %2250 = vmatpush3.bf16.xpose.msra.mxu1 %v1262_v57  ;;  %2251 = vmatprep.mubr.msk.bf16.mxu1 %vm2446_vm0, %v2445_v0 }
 0x239   : > { %2261 = vmatprep.subr.bf16.mxu1 %v2445_v0 }
 0x23f   : > { %2252 = vmatmul.mubr.msk.bf16.vlgmr.msra.gmra.mrb[20].mxu1 %vm364_vm1, %v1255_v59 }
 0x240   : > { %2262 = vmatpush3.bf16.xpose.msra.mxu1 %v1442_v60  ;;  %2263 = vmatprep.mubr.msk.bf16.mxu1 %vm2446_vm0, %v2445_v0 }
 0x241   : > { %2273 = vmatprep.subr.bf16.mxu1 %v2445_v0 }
 0x247   : > { %2264 = vmatmul.mubr.msk.bf16.vlgmr.msra.gmra.mrb[24].mxu1 %vm364_vm1, %v1435_v62 }
 0x248   : > { %2274 = vmatpush3.bf16.xpose.msra.mxu1 %v1622_v63  ;;  %2275 = vmatprep.mubr.msk.bf16.mxu1 %vm2446_vm0, %v2445_v0 }
 0x24f   : > { %2276 = vmatmul.mubr.msk.bf16.vlgmr.msra.gmra.mrb[28].mxu1 %vm364_vm1, %v1615_v1 }
 0x29f   : > { %v454_v7 = vpop.xlane.xlu1 %453 }
 0x2a0   : > { %v458_v9 = vadd.f32 %v454_v7, %v450_v6 }
 0x2a2   : > { %461 = vst.msk [vmem:[#allocation3] sm:$0xff] %vm294_vm2, %v458_v9 }
 0x2a3   : > { %v457_v12 = vpop.xlane.xlu0 %456 }
 0x2a4   : > { %v459_v13 = vadd.f32 %v457_v12, %v451_v11 }
 0x2a6   : > { %462 = vst.msk [vmem:[#allocation3 + $0x8] sm:$0xff] %vm294_vm2, %v459_v13 }
 0x2ea   : > { %v2681_v15 = vpop.f32.mrb[0].mxu1 }
 0x2eb   : > { %v2199_v17 = vpop.f32.mrb[1].mxu1 }
 0x2ec   : > { %v512_v18 = vpop.f32.mrb[2].mxu1 }
 0x2ed   : > { %v531_v19 = vadd.f32 %v529_v16, %v512_v18  ;;  %v2200_v20 = vpop.f32.mrb[3].mxu1 }
 0x2ef   : > { %533 = vst.msk [vmem:[#allocation4 + $0x8] sm:$0xff] %vm364_vm1, %v531_v19 }
 0x2f2   : > { %v578_v21 = vpop.f32.mrb[4].mxu1 }
 0x2f3   : > { %v585_v22 = vmul.f32 0.25, %v578_v21  ;;  %v2205_v23 = vpop.f32.mrb[5].mxu1 }
 0x2f4   : > { %v581_v24 = vpop.f32.mrb[6].mxu1 }
 0x2f5   : > { %v586_v25 = vmul.f32 0.25, %v581_v24  ;;  %v2206_v26 = vpop.f32.mrb[7].mxu1  ;;  %v2686_v27 = vsel %vm2571_vm3, %v585_v22, -1e+30 }
 0x2f6   : > { %v595_v28 = vsel %vm364_vm1, %v2686_v27, -inf }
 0x2f7   : > { %596 = vmax.xlane.f32.xlu1 %v595_v28  ;;  %v2692_v30 = vsel %vm2575_vm4, %v586_v25, -1e+30 }
 0x2f8   : > { %v598_v31 = vsel %vm364_vm1, %v2692_v30, -inf }
 0x2f9   : > { %599 = vmax.xlane.f32.xlu0 %v598_v31 }
 0x2fa   : > { %v758_v32 = vpop.f32.mrb[8].mxu1 }
 0x2fb   : > { %v2217_v33 = vpop.f32.mrb[9].mxu1  ;;  %v765_v7 = vmul.f32 0.25, %v758_v32 }
 0x2fc   : > { %v761_v34 = vpop.f32.mrb[10].mxu1  ;;  %v590_v33 = vld [vmem:[#allocation2 + $0x10] sm:$0xff] }
 0x2fd   : > { %v766_v35 = vmul.f32 0.25, %v761_v34  ;;  %v2218_v36 = vpop.f32.mrb[11].mxu1  ;;  %v2732_v12 = vsel %vm2571_vm3, %v765_v7, -1e+30  ;;  %v770_v7 = vld [vmem:[#allocation2 + $0x20] sm:$0xff] }
 0x2fe   : > { %v775_v13 = vsel %vm364_vm1, %v2732_v12, -inf }
 0x2ff   : > { %v2698_v37 = vsel %vm2575_vm4, %v766_v35, -1e+30 }
 0x300   : > { %v778_v38 = vsel %vm364_vm1, %v2698_v37, -inf }
 0x301   : > { %779 = vmax.xlane.f32.xlu1 %v778_v38 }
 0x302   : > { %v938_v39 = vpop.f32.mrb[12].mxu1 }
 0x303   : > { %v945_v40 = vmul.f32 0.25, %v938_v39  ;;  %v2229_v41 = vpop.f32.mrb[13].mxu1 }
 0x304   : > { %v941_v42 = vpop.f32.mrb[14].mxu1 }
 0x305   : > { %v946_v43 = vmul.f32 0.25, %v941_v42  ;;  %v2230_v44 = vpop.f32.mrb[15].mxu1  ;;  %v2704_v45 = vsel %vm2571_vm3, %v945_v40, -1e+30  ;;  %v2769_v40 = vld [vmem:[#allocation2 + $0x28] sm:$0xff] }
 0x306   : > { %v955_v46 = vsel %vm364_vm1, %v2704_v45, -inf }
 0x307   : > { %956 = vmax.xlane.f32.xlu1 %v955_v46  ;;  %v2710_v47 = vsel %vm2575_vm4, %v946_v43, -1e+30  ;;  %v2779_v43 = vld [vmem:[#allocation2 + $0x30] sm:$0xff] }
 0x308   : > { %v958_v48 = vsel %vm364_vm1, %v2710_v47, -inf }
 0x30a   : > { %v1118_v49 = vpop.f32.mrb[16].mxu1 }
 0x30b   : > { %v1125_v50 = vmul.f32 0.25, %v1118_v49  ;;  %v2241_v51 = vpop.f32.mrb[17].mxu1  ;;  %959 = vmax.xlane.f32.xlu1 %v958_v48  ;;  %v2784_v48 = vld [vmem:[#allocation2 + $0x38] sm:$0xff] }
 0x30c   : > { %v1121_v52 = vpop.f32.mrb[18].mxu1 }
 0x30d   : > { %v1126_v53 = vmul.f32 0.25, %v1121_v52  ;;  %v2242_v54 = vpop.f32.mrb[19].mxu1  ;;  %v2716_v55 = vsel %vm2571_vm3, %v1125_v50, -1e+30  ;;  %v2793_v52 = vld [vmem:[#allocation2 + $0x40] sm:$0xff] }
 0x30e   : > { %v1135_v56 = vsel %vm364_vm1, %v2716_v55, -inf }
 0x30f   : > { %640 = vrot.lane.b32.xlu0 %v2612_v29, %s2449_s23  ;;  %1136 = vmax.xlane.f32.xlu1 %v1135_v56  ;;  %v2724_v57 = vsel %vm2575_vm4, %v1126_v53, -1e+30 }
 0x310   : > { %v1138_v58 = vsel %vm364_vm1, %v2724_v57, -inf }
 0x312   : > { %v1298_v59 = vpop.f32.mrb[20].mxu1 }
 0x313   : > { %v2253_v60 = vpop.f32.mrb[21].mxu1  ;;  %1139 = vmax.xlane.f32.xlu1 %v1138_v58  ;;  %v1305_v11 = vmul.f32 0.25, %v1298_v59  ;;  %v2802_v58 = vld [vmem:[#allocation2 + $0x48] sm:$0xff] }
 0x314   : > { %v1301_v61 = vpop.f32.mrb[22].mxu1 }
 0x315   : > { %v2254_v62 = vpop.f32.mrb[23].mxu1  ;;  %v1306_v16 = vmul.f32 0.25, %v1301_v61  ;;  %v2738_v17 = vsel %vm2571_vm3, %v1305_v11, -1e+30 }
 0x316   : > { %v1315_v18 = vsel %vm364_vm1, %v2738_v17, -inf }
 0x317   : > { %v2744_v20 = vsel %vm2575_vm4, %v1306_v16, -1e+30 }
 0x318   : > { %v1318_v21 = vsel %vm364_vm1, %v2744_v20, -inf }
 0x31a   : > { %v1478_v63 = vpop.f32.mrb[24].mxu1 }
 0x31b   : > { %v2265_v1 = vpop.f32.mrb[25].mxu1  ;;  %v1485_v19 = vmul.f32 0.25, %v1478_v63 }
 0x31c   : > { %v2728_v2 = vpop.f32.mrb[26].mxu1 }
 0x31d   : > { %v2266_v4 = vpop.f32.mrb[27].mxu1  ;;  %v2750_v23 = vsel %vm2571_vm3, %v1485_v19, -1e+30  ;;  %v1486_v63 = vmul.f32 0.25, %v2728_v2 }
 0x31e   : > { %v1495_v24 = vsel %vm364_vm1, %v2750_v23, -inf }
 0x31f   : > { %v2818_v1 = vsel %vm2575_vm4, %v1486_v63, -1e+30 }
 0x320   : > { %v1498_v4 = vsel %vm364_vm1, %v2818_v1, -inf }
 0x322   : > { %v1658_v5 = vpop.f32.mrb[28].mxu1 }
 0x323   : > { %v2277_v6 = vpop.f32.mrb[29].mxu1  ;;  %v1665_v22 = vmul.f32 0.25, %v1658_v5 }
 0x324   : > { %v1661_v8 = vpop.f32.mrb[30].mxu1 }
 0x325   : > { %v2278_v9 = vpop.f32.mrb[31].mxu1  ;;  %v1666_v25 = vmul.f32 0.25, %v1661_v8  ;;  %v2756_v26 = vsel %vm2571_vm3, %v1665_v22, -1e+30 }
 0x326   : > { %v1675_v28 = vsel %vm364_vm1, %v2756_v26, -inf }
 0x327   : > { %v2762_v31 = vsel %vm2575_vm4, %v1666_v25, -1e+30 }
 0x328   : > { %v1678_v32 = vsel %vm364_vm1, %v2762_v31, -inf }
 0x32e   : > { %776 = vmax.xlane.f32.xlu0 %v775_v13  ;;  %v1310_v13 = vld [vmem:[#allocation2 + $0x50] sm:$0xff] }
 0x332   : > { %1316 = vmax.xlane.f32.xlu0 %v1315_v18  ;;  %v2824_v18 = vld [vmem:[#allocation2 + $0x58] sm:$0xff] }
 0x336   : > { %1319 = vmax.xlane.f32.xlu0 %v1318_v21 }
 0x33a   : > { %1496 = vmax.xlane.f32.xlu0 %v1495_v24  ;;  %v1490_v24 = vld [vmem:[#allocation2 + $0x60] sm:$0xff] }
 0x33e   : > { %1676 = vmax.xlane.f32.xlu0 %v1675_v28 }
 0x342   : > { %1679 = vmax.xlane.f32.xlu0 %v1678_v32 }
 0x358   : > { %520 = vperm.xlu0 %2321, %v2675_v3  }
 0x384   : > { %v597_v34 = vpop.xlane.xlu1 %596 }
 0x385   : > { %v601_v35 = vmax.f32 %v590_v33, %v597_v34 }
 0x386   : > { %v600_v36 = vpop.xlane.xlu0 %599 }
 0x387   : > { %637 = vst.msk [vmem:[#allocation2 + $0x10] sm:$0xff] %vm294_vm2, %v601_v35  ;;  %v602_v38 = vmax.f32 %v591_v10, %v600_v36  ;;  %611 = vperm.xlu1 %2320, %v601_v35   ;;  %v603_v5 = vsub.f32 %v590_v33, %v601_v35  ;;  %v2840_v33 = vld [vmem:[#allocation2 + $0x70] sm:$0xff]  ;;  %v2849_v36 = vld [vmem:[#allocation2 + $0x78] sm:$0xff] }
 0x389   : > { %638 = vst.msk [vmem:[#allocation2 + $0x18] sm:$0xff] %vm294_vm2, %v602_v38  ;;  %v605_v6 = vmul.f32 1.442695, %v603_v5  ;;  %v604_v8 = vsub.f32 %v591_v10, %v602_v38 }
 0x38a   : > { %v641_v39 = vpop.permute.xlu0 %640 }
 0x38b   : > { %616 = vperm.xlu1 %2320, %v602_v38   ;;  %2208 = vmatpush3.bf16.msra.mxu0 %v641_v39  ;;  %2333 = vpow2.f32 %v605_v6  ;;  %v607_v2 = vmul.f32 1.442695, %v604_v8 }
 0x38c   : > { %2219 = vmatprep.subr.bf16.mxu0 %v2445_v0 }
 0x38d   : > { %2335 = vpow2.f32 %v607_v2 }
 0x38e   : > { %v780_v41 = vpop.xlane.xlu1 %779 }
 0x38f   : > { %v2773_v3 = vmax.f32 %v2769_v40, %v780_v41 }
 0x391   : > { %v784_v42 = vsub.f32 %v2769_v40, %v2773_v3  ;;  %818 = vst.msk [vmem:[#allocation2 + $0x28] sm:$0xff] %vm294_vm2, %v2773_v3 }
 0x394   : > { %v957_v44 = vpop.xlane.xlu1 %956 }
 0x395   : > { %v2782_v46 = vmax.f32 %v2779_v43, %v957_v44  ;;  %v2831_v22 = vpop.eup %2333 }
 0x397   : > { %v963_v49 = vsub.f32 %v2779_v43, %v2782_v46  ;;  %997 = vst.msk [vmem:[#allocation2 + $0x30] sm:$0xff] %vm294_vm2, %v2782_v46  ;;  %v2847_v35 = vpop.eup %2335 }
 0x398   : > { %v960_v50 = vpop.xlane.xlu1 %959 }
 0x399   : > { %v2791_v51 = vmax.f32 %v2784_v48, %v960_v50 }
 0x39b   : > { %v964_v53 = vsub.f32 %v2784_v48, %v2791_v51  ;;  %998 = vst.msk [vmem:[#allocation2 + $0x38] sm:$0xff] %vm294_vm2, %v2791_v51 }
 0x39c   : > { %v1137_v54 = vpop.xlane.xlu1 %1136 }
 0x39d   : > { %v2800_v56 = vmax.f32 %v2793_v52, %v1137_v54 }
 0x39f   : > { %v1143_v59 = vsub.f32 %v2793_v52, %v2800_v56  ;;  %1177 = vst.msk [vmem:[#allocation2 + $0x40] sm:$0xff] %vm294_vm2, %v2800_v56 }
 0x3a0   : > { %v1140_v60 = vpop.xlane.xlu1 %1139 }
 0x3a1   : > { %v2809_v61 = vmax.f32 %v2802_v58, %v1140_v60 }
 0x3a3   : > { %v1144_v62 = vsub.f32 %v2802_v58, %v2809_v61  ;;  %1178 = vst.msk [vmem:[#allocation2 + $0x48] sm:$0xff] %vm294_vm2, %v2809_v61 }
 0x3a5   : > { %v1147_v6 = vmul.f32 1.442695, %v1144_v62 }
 0x3af   : > { %1499 = vmax.xlane.f32.xlu1 %v1498_v4  ;;  %v787_v4 = vmul.f32 1.442695, %v784_v42 }
 0x3bb   : > { %v777_v9 = vpop.xlane.xlu0 %776 }
 0x3bc   : > { %v781_v11 = vmax.f32 %v770_v7, %v777_v9 }
 0x3be   : > { %817 = vst.msk [vmem:[#allocation2 + $0x20] sm:$0xff] %vm294_vm2, %v781_v11  ;;  %791 = vperm.xlu0 %2321, %v781_v11   ;;  %v783_v60 = vsub.f32 %v770_v7, %v781_v11 }
 0x3bf   : > { %v1317_v16 = vpop.xlane.xlu0 %1316 }
 0x3c0   : > { %976 = vperm.xlu1 %2320, %v2791_v51   ;;  %v1321_v14 = vmax.f32 %v1310_v13, %v1317_v16  ;;  %v785_v63 = vmul.f32 1.442695, %v783_v60 }
 0x3c2   : > { %1357 = vst.msk [vmem:[#allocation2 + $0x50] sm:$0xff] %vm294_vm2, %v1321_v14  ;;  %796 = vperm.xlu0 %2321, %v2773_v3   ;;  %2337 = vpow2.f32 %v785_v63  ;;  %v1323_v5 = vsub.f32 %v1310_v13, %v1321_v14 }
 0x3c3   : > { %v1320_v19 = vpop.xlane.xlu0 %1319  ;;  %2339 = vpow2.f32 %v787_v4 }
 0x3c4   : > { %1331 = vperm.xlu1 %2320, %v1321_v14   ;;  %v2829_v21 = vmax.f32 %v2824_v18, %v1320_v19  ;;  %v1325_v40 = vmul.f32 1.442695, %v1323_v5 }
 0x3c6   : > { %691 = vperm.xlu0 %2321, %v2831_v22   ;;  %v1324_v25 = vsub.f32 %v2824_v18, %v2829_v21  ;;  %1358 = vst.msk [vmem:[#allocation2 + $0x58] sm:$0xff] %vm294_vm2, %v2829_v21 }
 0x3c7   : > { %v1497_v28 = vpop.xlane.xlu0 %1496 }
 0x3c8   : > { %v1501_v32 = vmax.f32 %v1490_v24, %v1497_v28  ;;  %1180 = vrot.lane.b32.xlu1 %v2612_v29, %s2450_s24  ;;  %v1327_v43 = vmul.f32 1.442695, %v1324_v25 }
 0x3ca   : > { %971 = vperm.xlu0 %2321, %v2782_v46   ;;  %1537 = vst.msk [vmem:[#allocation2 + $0x60] sm:$0xff] %vm294_vm2, %v1501_v32  ;;  %v1503_v3 = vsub.f32 %v1490_v24, %v1501_v32  ;;  %v1491_v24 = vld [vmem:[#allocation2 + $0x68] sm:$0xff] }
 0x3cb   : > { %v1677_v34 = vpop.xlane.xlu0 %1676 }
 0x3cc   : > { %v2845_v10 = vmax.f32 %v2840_v33, %v1677_v34  ;;  %v2884_v7 = vpop.eup %2337  ;;  %v1505_v48 = vmul.f32 1.442695, %v1503_v3 }
 0x3cd   : > { %v2887_v42 = vpop.eup %2339 }
 0x3ce   : > { %696 = vperm.xlu0 %2321, %v2847_v35   ;;  %1717 = vst.msk [vmem:[#allocation2 + $0x70] sm:$0xff] %vm294_vm2, %v2845_v10 }
 0x3cf   : > { %v1680_v38 = vpop.xlane.xlu0 %1679 }
 0x3d0   : > { %v2855_v39 = vmax.f32 %v2849_v36, %v1680_v38  ;;  %v1145_v38 = vmul.f32 1.442695, %v1143_v59 }
 0x3d2   : > { %820 = vrot.lane.b32.xlu0 %v2612_v29, %s2454_s4  ;;  %v1684_v41 = vsub.f32 %v2849_v36, %v2855_v39  ;;  %1718 = vst.msk [vmem:[#allocation2 + $0x78] sm:$0xff] %vm294_vm2, %v2855_v39 }
 0x3d6   : > { %1151 = vperm.xlu0 %2321, %v2800_v56  }
 0x3d7   : > { %v521_v44 = vpop.permute.xlu0 %520 }
 0x3d8   : > { %v528_v50 = vmul.f32 0.0, %v521_v44 }
 0x3da   : > { %v530_v54 = vadd.f32 %v528_v50, %v2681_v15  ;;  %1156 = vperm.xlu0 %2321, %v2809_v61   ;;  %v967_v15 = vmul.f32 1.442695, %v964_v53 }
 0x3dc   : > { %532 = vst.msk [vmem:[#allocation4] sm:$0xff] %vm364_vm1, %v530_v54  ;;  %2341 = vpow2.f32 %v967_v15 }
 0x3dd   : > { %2343 = vpow2.f32 %v1147_v6 }
 0x3de   : > { %1000 = vrot.lane.b32.xlu0 %v2612_v29, %s2455_s5  ;;  %2345 = vpow2.f32 %v1325_v40 }
 0x3df   : > { %2347 = vpow2.f32 %v1505_v48 }
 0x3e2   : > { %1336 = vperm.xlu0 %2321, %v2829_v21  }
 0x3e6   : > { %1511 = vperm.xlu0 %2321, %v1501_v32   ;;  %v2890_v51 = vpop.eup %2341 }
 0x3e7   : > { %v2893_v53 = vpop.eup %2343 }
 0x3e8   : > { %v2896_v58 = vpop.eup %2345 }
 0x3e9   : > { %v2900_v8 = vpop.eup %2347 }
 0x3ea   : > { %1360 = vrot.lane.b32.xlu0 %v2612_v29, %s2451_s25 }
 0x3ee   : > { %1696 = vperm.xlu0 %2321, %v2855_v39  }
 0x3f2   : > { %1720 = vrot.lane.b32.xlu0 %v2612_v29, %s2453_s27 }
 0x3f6   : > { %871 = vperm.xlu0 %2321, %v2884_v7  }
 0x3fa   : > { %876 = vperm.xlu0 %2321, %v2887_v42  }
 0x3fe   : > { %1056 = vperm.xlu0 %2321, %v2890_v51  }
 0x402   : > { %1236 = vperm.xlu0 %2321, %v2893_v53  }
 0x406   : > { %v612_v61 = vpop.permute.xlu1 %611  ;;  %1411 = vperm.xlu0 %2321, %v2896_v58  }
 0x407   : > { %v619_v62 = vsub.f32 %v2686_v27, %v612_v61 }
 0x409   : > { %v621_v9 = vmul.f32 1.442695, %v619_v62 }
 0x40a   : > { %v617_v11 = vpop.permute.xlu1 %616  ;;  %1591 = vperm.xlu0 %2321, %v2900_v8  }
 0x40b   : > { %v620_v13 = vsub.f32 %v2692_v30, %v617_v11  ;;  %2349 = vpow2.f32 %v621_v9  ;;  %v965_v30 = vmul.f32 1.442695, %v963_v49 }
 0x40d   : > { %v623_v2 = vmul.f32 1.442695, %v620_v13 }
 0x40f   : > { %2351 = vpow2.f32 %v623_v2 }
 0x410   : > { %2353 = vpow2.f32 %v965_v30 }
 0x411   : > { %2355 = vpow2.f32 %v1145_v38 }
 0x415   : > { %v2350_v16 = vpop.eup %2349 }
 0x416   : > { %v627_v27 = vsel %vm364_vm1, %v2350_v16, 0.0 }
 0x419   : > { %v2904_v14 = vpop.eup %2351 }
 0x41a   : > { %v639_v19 = vpack.c.bf16 %v2904_v14, %v2350_v16  ;;  %v2928_v56 = vpop.eup %2353 }
 0x41b   : > { %v2935_v4 = vpop.eup %2355 }
 0x41c   : > { %2210 = vmatmul.mubr.msk.bf16.vlgmr.msra.gmra.mrb[4].mxu0 %vm364_vm1, %v639_v19 }
 0x41d   : > { %2221 = vmatprep.mubr.msk.bf16.mxu0 %vm2446_vm0, %v2445_v0 }
 0x429   : > { %628 = vadd.xlane.f32.xlu0 %v627_v27 }
 0x43c   : > { %v1500_v28 = vpop.xlane.xlu1 %1499 }
 0x43d   : > { %v1502_v32 = vmax.f32 %v1491_v24, %v1500_v28  ;;  %v792_v34 = vpop.permute.xlu0 %791 }
 0x43e   : > { %v799_v44 = vsub.f32 %v2732_v12, %v792_v34 }
 0x43f   : > { %1538 = vst.msk [vmem:[#allocation2 + $0x68] sm:$0xff] %vm294_vm2, %v1502_v32  ;;  %1516 = vperm.xlu1 %2320, %v1502_v32   ;;  %v1504_v46 = vsub.f32 %v1491_v24, %v1502_v32 }
 0x440   : > { %v801_v49 = vmul.f32 1.442695, %v799_v44 }
 0x441   : > { %v797_v50 = vpop.permute.xlu0 %796  ;;  %v1507_v12 = vmul.f32 1.442695, %v1504_v46 }
 0x442   : > { %v800_v54 = vsub.f32 %v2698_v37, %v797_v50  ;;  %v977_v37 = vpop.permute.xlu1 %976 }
 0x443   : > { %1691 = vperm.xlu1 %2320, %v2845_v10   ;;  %v980_v18 = vsub.f32 %v2710_v47, %v977_v37 }
 0x444   : > { %v803_v60 = vmul.f32 1.442695, %v800_v54 }
 0x445   : > { %v2924_v63 = vpop.permute.xlu0 %691  ;;  %v983_v15 = vmul.f32 1.442695, %v980_v18 }
 0x446   : > { %2357 = vpow2.f32 %v803_v60  ;;  %v1332_v40 = vpop.permute.xlu1 %1331 }
 0x447   : > { %2359 = vpow2.f32 %v1327_v43  ;;  %1540 = vrot.lane.b32.xlu1 %v2612_v29, %s2452_s26  ;;  %v1339_v9 = vsub.f32 %v2738_v17, %v1332_v40 }
 0x448   : > { %2361 = vpow2.f32 %v801_v49 }
 0x449   : > { %v972_v52 = vpop.permute.xlu0 %971  ;;  %2363 = vpow2.f32 %v1507_v12  ;;  %v1341_v19 = vmul.f32 1.442695, %v1339_v9 }
 0x44a   : > { %v979_v59 = vsub.f32 %v2704_v45, %v972_v52  ;;  %v1181_v28 = vpop.permute.xlu1 %1180 }
 0x44b   : > { %1051 = vperm.xlu1 %2320, %v2928_v56  }
 0x44c   : > { %v981_v21 = vmul.f32 1.442695, %v979_v59  ;;  %v630_v59 = vsel %vm364_vm1, %v2904_v14, 0.0 }
 0x44d   : > { %v2933_v25 = vpop.permute.xlu0 %696 }
 0x44e   : > { %2365 = vpow2.f32 %v981_v21 }
 0x44f   : > { %1231 = vperm.xlu1 %2320, %v2935_v4   ;;  %2367 = vpow2.f32 %v983_v15 }
 0x450   : > { %v2938_v29 = vpop.eup %2357 }
 0x451   : > { %v2940_v5 = vpop.eup %2359  ;;  %v821_v6 = vpop.permute.xlu0 %820  ;;  %v810_v21 = vsel %vm364_vm1, %v2938_v29, 0.0 }
 0x452   : > { %v2942_v45 = vpop.eup %2361  ;;  %2220 = vmatpush3.bf16.msra.mxu0 %v821_v6 }
 0x453   : > { %1416 = vperm.xlu1 %2320, %v2940_v5   ;;  %v819_v47 = vpack.c.bf16 %v2938_v29, %v2942_v45  ;;  %2231 = vmatprep.subr.bf16.mxu0 %v2445_v0  ;;  %v2949_v48 = vpop.eup %2363  ;;  %v807_v18 = vsel %vm364_vm1, %v2942_v45, 0.0 }
 0x455   : > { %2222 = vmatmul.mubr.msk.bf16.vlgmr.msra.gmra.mrb[8].mxu0 %vm364_vm1, %v819_v47  ;;  %v1152_v3 = vpop.permute.xlu0 %1151 }
 0x456   : > { %v1159_v61 = vsub.f32 %v2716_v55, %v1152_v3  ;;  %2233 = vmatprep.mubr.msk.bf16.mxu0 %vm2446_vm0, %v2445_v0 }
 0x457   : > { %1596 = vperm.xlu1 %2320, %v2949_v48  }
 0x458   : > { %v2366_v62 = vpop.eup %2365  ;;  %v1161_v11 = vmul.f32 1.442695, %v1159_v61 }
 0x459   : > { %v1157_v13 = vpop.permute.xlu0 %1156  ;;  %v987_v2 = vsel %vm364_vm1, %v2366_v62, 0.0  ;;  %v2368_v55 = vpop.eup %2367 }
 0x45a   : > { %v1160_v16 = vsub.f32 %v2724_v57, %v1157_v13  ;;  %988 = vadd.xlane.f32.xlu0 %v987_v2  ;;  %2369 = vpow2.f32 %v1161_v11  ;;  %v999_v30 = vpack.c.bf16 %v2368_v55, %v2366_v62  ;;  %v990_v15 = vsel %vm364_vm1, %v2368_v55, 0.0  ;;  %v593_v11 = vld [vmem:[#allocation3 + $0x10] sm:$0xff] }
 0x45b   : > { %v625_v13 = vmul.f32 %v2831_v22, %v593_v11 }
 0x45c   : > { %v1163_v27 = vmul.f32 1.442695, %v1160_v16 }
 0x45d   : > { %v1001_v24 = vpop.permute.xlu0 %1000 }
 0x45e   : > { %2371 = vpow2.f32 %v1163_v27  ;;  %2232 = vmatpush3.bf16.msra.mxu0 %v1001_v24 }
 0x45f   : > { %2243 = vmatprep.subr.bf16.mxu0 %v2445_v0  ;;  %2373 = vpow2.f32 %v1341_v19 }
 0x461   : > { %2234 = vmatmul.mubr.msk.bf16.vlgmr.msra.gmra.mrb[12].mxu0 %vm364_vm1, %v999_v30  ;;  %v1337_v17 = vpop.permute.xlu0 %1336 }
 0x462   : > { %v1340_v32 = vsub.f32 %v2744_v20, %v1337_v17  ;;  %2244 = vmatpush3.bf16.msra.mxu0 %v1181_v28  ;;  %2245 = vmatprep.mubr.msk.bf16.mxu0 %vm2446_vm0, %v2445_v0 }
 0x463   : > { %2255 = vmatprep.subr.bf16.mxu0 %v2445_v0 }
 0x464   : > { %v1343_v57 = vmul.f32 1.442695, %v1340_v32  ;;  %v2370_v44 = vpop.eup %2369 }
 0x465   : > { %v1512_v34 = vpop.permute.xlu0 %1511  ;;  %v1167_v47 = vsel %vm364_vm1, %v2370_v44, 0.0 }
 0x466   : > { %2375 = vpow2.f32 %v1343_v57  ;;  %v1519_v38 = vsub.f32 %v2750_v23, %v1512_v34 }
 0x468   : > { %v2372_v50 = vpop.eup %2371  ;;  %v1521_v54 = vmul.f32 1.442695, %v1519_v38 }
 0x469   : > { %v1170_v43 = vsel %vm364_vm1, %v2372_v50, 0.0  ;;  %v1179_v46 = vpack.c.bf16 %v2372_v50, %v2370_v44  ;;  %v2374_v49 = vpop.eup %2373  ;;  %v1361_v20 = vpop.permute.xlu0 %1360  ;;  %v953_v44 = vld [vmem:[#allocation3 + $0x30] sm:$0xff] }
 0x46a   : > { %2377 = vpow2.f32 %v1521_v54  ;;  %1171 = vadd.xlane.f32.xlu0 %v1170_v43  ;;  %v1347_v60 = vsel %vm364_vm1, %v2374_v49, 0.0  ;;  %v985_v50 = vmul.f32 %v2928_v56, %v953_v44 }
 0x46b   : > { %2246 = vmatmul.mubr.msk.bf16.vlgmr.msra.gmra.mrb[16].mxu0 %vm364_vm1, %v1179_v46 }
 0x46c   : > { %2256 = vmatpush3.bf16.msra.mxu0 %v1361_v20  ;;  %2257 = vmatprep.mubr.msk.bf16.mxu0 %vm2446_vm0, %v2445_v0 }
 0x46d   : > { %2267 = vmatprep.subr.bf16.mxu0 %v2445_v0  ;;  %v1697_v6 = vpop.permute.xlu0 %1696 }
 0x46e   : > { %1348 = vadd.xlane.f32.xlu0 %v1347_v60  ;;  %v1700_v30 = vsub.f32 %v2762_v31, %v1697_v6 }
 0x470   : > { %v2376_v23 = vpop.eup %2375  ;;  %v1703_v57 = vmul.f32 1.442695, %v1700_v30 }
 0x471   : > { %v1359_v12 = vpack.c.bf16 %v2376_v23, %v2374_v49  ;;  %v1721_v40 = vpop.permute.xlu0 %1720  ;;  %v1350_v3 = vsel %vm364_vm1, %v2376_v23, 0.0  ;;  %v1134_v23 = vld [vmem:[#allocation3 + $0x48] sm:$0xff] }
 0x473   : > { %2258 = vmatmul.mubr.msk.bf16.vlgmr.msra.gmra.mrb[20].mxu0 %vm364_vm1, %v1359_v12  ;;  %v1166_v12 = vmul.f32 %v2893_v53, %v1134_v23 }
 0x474   : > { %v2378_v37 = vpop.eup %2377  ;;  %2269 = vmatprep.mubr.msk.bf16.mxu0 %vm2446_vm0, %v2445_v0 }
 0x475   : > { %v1527_v52 = vsel %vm364_vm1, %v2378_v37, 0.0  ;;  %v2984_v14 = vpop.permute.xlu0 %871 }
 0x476   : > { %1528 = vadd.xlane.f32.xlu0 %v1527_v52  ;;  %v1313_v52 = vld [vmem:[#allocation3 + $0x50] sm:$0xff] }
 0x479   : > { %v2986_v61 = vpop.permute.xlu0 %876 }
 0x47b   : > { %631 = vadd.xlane.f32.xlu1 %v630_v59 }
 0x47d   : > { %v2988_v45 = vpop.permute.xlu0 %1056 }
 0x47f   : > { %808 = vadd.xlane.f32.xlu1 %v807_v18  ;;  %v1345_v18 = vmul.f32 %v2896_v58, %v1313_v52  ;;  %v773_v58 = vld [vmem:[#allocation3 + $0x20] sm:$0xff] }
 0x481   : > { %v2990_v62 = vpop.permute.xlu0 %1236 }
 0x483   : > { %811 = vadd.xlane.f32.xlu1 %v810_v21 }
 0x485   : > { %v2992_v29 = vpop.permute.xlu0 %1411 }
 0x487   : > { %991 = vadd.xlane.f32.xlu1 %v990_v15 }
 0x489   : > { %v2994_v9 = vpop.permute.xlu0 %1591 }
 0x48b   : > { %1168 = vadd.xlane.f32.xlu1 %v1167_v47  ;;  %v1493_v47 = vld [vmem:[#allocation3 + $0x60] sm:$0xff] }
 0x48f   : > { %1351 = vadd.xlane.f32.xlu1 %v1350_v3 }
 0x4b6   : > { %v629_v2 = vpop.xlane.xlu0 %628 }
 0x4b7   : > { %v633_v16 = vadd.f32 %v629_v2, %v625_v13  ;;  %v594_v13 = vld [vmem:[#allocation3 + $0x18] sm:$0xff] }
 0x4b8   : > { %v626_v2 = vmul.f32 %v2847_v35, %v594_v13  ;;  %v687_v13 = vld [vmem:[#allocation4] sm:$0xff] }
 0x4b9   : > { %635 = vst.msk [vmem:[#allocation3 + $0x10] sm:$0xff] %vm294_vm2, %v633_v16 }
 0x4be   : > { %v1517_v19 = vpop.permute.xlu1 %1516 }
 0x4bf   : > { %v1520_v27 = vsub.f32 %v2818_v1, %v1517_v19 }
 0x4c1   : > { %v1523_v24 = vmul.f32 1.442695, %v1520_v27  ;;  %v805_v27 = vmul.f32 %v2884_v7, %v773_v58 }
 0x4c2   : > { %v1692_v55 = vpop.permute.xlu1 %1691 }
 0x4c3   : > { %2379 = vpow2.f32 %v1523_v24  ;;  %v1699_v28 = vsub.f32 %v2756_v26, %v1692_v55  ;;  %v774_v55 = vld [vmem:[#allocation3 + $0x28] sm:$0xff] }
 0x4c5   : > { %v1701_v17 = vmul.f32 1.442695, %v1699_v28 }
 0x4c6   : > { %v1541_v32 = vpop.permute.xlu1 %1540 }
 0x4c7   : > { %2268 = vmatpush3.bf16.msra.mxu0 %v1541_v32  ;;  %2381 = vpow2.f32 %v1701_v17  ;;  %v954_v17 = vld [vmem:[#allocation3 + $0x38] sm:$0xff] }
 0x4c8   : > { %2279 = vmatprep.subr.bf16.mxu0 %v2445_v0  ;;  %2383 = vpow2.f32 %v1703_v57  ;;  %v986_v35 = vmul.f32 %v2890_v51, %v954_v17  ;;  %v1687_v17 = vmul.f32 1.442695, %v1684_v41 }
 0x4ca   : > { %v3016_v20 = vpop.permute.xlu1 %1051 }
 0x4cd   : > { %v2380_v22 = vpop.eup %2379 }
 0x4ce   : > { %v1530_v34 = vsel %vm364_vm1, %v2380_v22, 0.0  ;;  %v1539_v38 = vpack.c.bf16 %v2380_v22, %v2378_v37  ;;  %v3020_v56 = vpop.permute.xlu1 %1231  ;;  %v1133_v22 = vld [vmem:[#allocation3 + $0x40] sm:$0xff] }
 0x4cf   : > { %1531 = vadd.xlane.f32.xlu1 %v1530_v34  ;;  %v1165_v7 = vmul.f32 %v2935_v4, %v1133_v22  ;;  %v1800_v22 = vld [vmem:[#allocation3 + $0x8] sm:$0xff] }
 0x4d0   : > { %2270 = vmatmul.mubr.msk.bf16.vlgmr.msra.gmra.mrb[24].mxu0 %vm364_vm1, %v1539_v38 }
 0x4d1   : > { %2280 = vmatpush3.bf16.msra.mxu0 %v1721_v40  ;;  %2281 = vmatprep.mubr.msk.bf16.mxu0 %vm2446_vm0, %v2445_v0  ;;  %v3006_v26 = vpop.eup %2381  ;;  %v1525_v40 = vmul.f32 %v2900_v8, %v1493_v47  ;;  %v806_v8 = vmul.f32 %v2887_v42, %v774_v55  ;;  %v1494_v47 = vld [vmem:[#allocation3 + $0x68] sm:$0xff] }
 0x4d2   : > { %v3008_v31 = vpop.eup %2383  ;;  %v3024_v6 = vpop.permute.xlu1 %1416 }
 0x4d3   : > { %v1719_v1 = vpack.c.bf16 %v3008_v31, %v3006_v26 }
 0x4d6   : > { %v3028_v53 = vpop.permute.xlu1 %1596 }
 0x4d8   : > { %2282 = vmatmul.mubr.msk.bf16.vlgmr.msra.gmra.mrb[28].mxu0 %vm364_vm1, %v1719_v1  ;;  %v1314_v1 = vld [vmem:[#allocation3 + $0x58] sm:$0xff] }
 0x4d9   : > { %v1346_v42 = vmul.f32 %v2940_v5, %v1314_v1 }
 0x4e7   : > { %v989_v54 = vpop.xlane.xlu0 %988 }
 0x4e8   : > { %v993_v43 = vadd.f32 %v989_v54, %v985_v50 }
 0x4ea   : > { %995 = vst.msk [vmem:[#allocation3 + $0x30] sm:$0xff] %vm294_vm2, %v993_v43 }
 0x4ef   : > { %v680_v46 = vpop.f32.mrb[4].mxu0 }
 0x4f0   : > { %703 = vrot.lane.b32.xlu1 %v680_v46, %s2453_s27  ;;  %v2211_v0 = vpop.f32.mrb[5].mxu0 }
 0x4f1   : > { %v683_v49 = vpop.f32.mrb[6].mxu0 }
 0x4f2   : > { %705 = vrot.lane.b32.xlu0 %v683_v49, %s2453_s27  ;;  %v2212_v60 = vpop.f32.mrb[7].mxu0 }
 0x4f7   : > { %v1172_v37 = vpop.xlane.xlu0 %1171 }
 0x4f8   : > { %v1174_v59 = vadd.f32 %v1172_v37, %v1166_v12 }
 0x4fa   : > { %1176 = vst.msk [vmem:[#allocation3 + $0x48] sm:$0xff] %vm294_vm2, %v1174_v59 }
 0x4fb   : > { %v1349_v21 = vpop.xlane.xlu0 %1348 }
 0x4fc   : > { %v1353_v15 = vadd.f32 %v1349_v21, %v1345_v18 }
 0x4fe   : > { %1355 = vst.msk [vmem:[#allocation3 + $0x50] sm:$0xff] %vm294_vm2, %v1353_v15 }
 0x503   : > { %v1529_v3 = vpop.xlane.xlu0 %1528 }
 0x504   : > { %v1533_v11 = vadd.f32 %v1529_v3, %v1525_v40  ;;  %v1526_v40 = vmul.f32 %v2949_v48, %v1494_v47  ;;  %v1707_v48 = vsel %vm364_vm1, %v3006_v26, 0.0  ;;  %v1888_v47 = vld [vmem:[#allocation3 + $0x48] sm:$0xff] }
 0x506   : > { %1535 = vst.msk [vmem:[#allocation3 + $0x60] sm:$0xff] %vm294_vm2, %v1533_v11 }
 0x508   : > { %v632_v16 = vpop.xlane.xlu1 %631 }
 0x509   : > { %v634_v19 = vadd.f32 %v632_v16, %v626_v2  ;;  %v699_v2 = vmul.f32 %v2924_v63, %v687_v13  ;;  %v688_v16 = vld [vmem:[#allocation4 + $0x8] sm:$0xff]  ;;  %v1683_v63 = vsub.f32 %v2840_v33, %v2845_v10  ;;  %v1799_v10 = vld [vmem:[#allocation3] sm:$0xff]  ;;  %v1909_v13 = vld [vmem:[#allocation3 + $0x50] sm:$0xff] }
 0x50b   : > { %636 = vst.msk [vmem:[#allocation3 + $0x18] sm:$0xff] %vm294_vm2, %v634_v19  ;;  %v700_v19 = vmul.f32 %v2933_v25, %v688_v16  ;;  %v1685_v25 = vmul.f32 1.442695, %v1683_v63 }
 0x50c   : > { %v809_v24 = vpop.xlane.xlu1 %808 }
 0x50d   : > { %v813_v30 = vadd.f32 %v809_v24, %v805_v27  ;;  %2385 = vpow2.f32 %v1685_v25 }
 0x50e   : > { %2387 = vpow2.f32 %v1687_v17 }
 0x50f   : > { %815 = vst.msk [vmem:[#allocation3 + $0x20] sm:$0xff] %vm294_vm2, %v813_v30  ;;  %v1710_v30 = vsel %vm364_vm1, %v3008_v31, 0.0  ;;  %2389 = vrcp.f32 %v1799_v10 }
 0x510   : > { %v812_v28 = vpop.xlane.xlu1 %811  ;;  %2391 = vrcp.f32 %v1800_v22 }
 0x511   : > { %v814_v32 = vadd.f32 %v812_v28, %v806_v8 }
 0x513   : > { %816 = vst.msk [vmem:[#allocation3 + $0x28] sm:$0xff] %vm294_vm2, %v814_v32 }
 0x514   : > { %v992_v57 = vpop.xlane.xlu1 %991 }
 0x515   : > { %v994_v34 = vadd.f32 %v992_v57, %v986_v35 }
 0x517   : > { %996 = vst.msk [vmem:[#allocation3 + $0x38] sm:$0xff] %vm294_vm2, %v994_v34  ;;  %v1821_v34 = vld [vmem:[#allocation3 + $0x10] sm:$0xff] }
 0x518   : > { %v1169_v38 = vpop.xlane.xlu1 %1168  ;;  %2393 = vrcp.f32 %v1821_v34 }
 0x519   : > { %v1173_v44 = vadd.f32 %v1169_v38, %v1165_v7  ;;  %v3073_v38 = vpop.eup %2385 }
 0x51b   : > { %1175 = vst.msk [vmem:[#allocation3 + $0x40] sm:$0xff] %vm294_vm2, %v1173_v44  ;;  %v1822_v44 = vld [vmem:[#allocation3 + $0x18] sm:$0xff] }
 0x51c   : > { %v1352_v50 = vpop.xlane.xlu1 %1351  ;;  %2395 = vrcp.f32 %v1822_v44 }
 0x51d   : > { %v1354_v54 = vadd.f32 %v1352_v50, %v1346_v42  ;;  %v3076_v50 = vpop.eup %2387 }
 0x51f   : > { %1356 = vst.msk [vmem:[#allocation3 + $0x58] sm:$0xff] %vm294_vm2, %v1354_v54 }
 0x528   : > { %v860_v43 = vpop.f32.mrb[8].mxu0 }
 0x529   : > { %883 = vrot.lane.b32.xlu0 %v860_v43, %s2452_s26  ;;  %v2223_v51 = vpop.f32.mrb[9].mxu0  ;;  %v1843_v43 = vld [vmem:[#allocation3 + $0x20] sm:$0xff] }
 0x52a   : > { %v863_v46 = vpop.f32.mrb[10].mxu0  ;;  %2397 = vrcp.f32 %v1843_v43 }
 0x52b   : > { %v2224_v0 = vpop.f32.mrb[11].mxu0 }
 0x52c   : > { %v1844_v0 = vld [vmem:[#allocation3 + $0x28] sm:$0xff] }
 0x52d   : > { %885 = vrot.lane.b32.xlu0 %v863_v46, %s2452_s26  ;;  %2399 = vrcp.f32 %v1844_v0 }
 0x534   : > { %v1040_v4 = vpop.f32.mrb[12].mxu0 }
 0x535   : > { %1063 = vrot.lane.b32.xlu1 %v1040_v4, %s2451_s25  ;;  %v2235_v49 = vpop.f32.mrb[13].mxu0 }
 0x536   : > { %v1043_v60 = vpop.f32.mrb[14].mxu0 }
 0x537   : > { %v2236_v23 = vpop.f32.mrb[15].mxu0 }
 0x538   : > { %v1865_v23 = vld [vmem:[#allocation3 + $0x30] sm:$0xff] }
 0x539   : > { %1065 = vrot.lane.b32.xlu1 %v1043_v60, %s2451_s25  ;;  %2401 = vrcp.f32 %v1865_v23 }
 0x53e   : > { %v1220_v5 = vpop.f32.mrb[16].mxu0 }
 0x53f   : > { %1243 = vrot.lane.b32.xlu1 %v1220_v5, %s2450_s24  ;;  %v2247_v12 = vpop.f32.mrb[17].mxu0 }
 0x540   : > { %v1223_v37 = vpop.f32.mrb[18].mxu0  ;;  %v2390_v12 = vpop.eup %2389 }
 0x541   : > { %v2248_v52 = vpop.f32.mrb[19].mxu0 }
 0x543   : > { %1245 = vrot.lane.b32.xlu1 %v1223_v37, %s2450_s24  ;;  %v1866_v37 = vld [vmem:[#allocation3 + $0x38] sm:$0xff] }
 0x544   : > { %2403 = vrcp.f32 %v1866_v37 }
 0x546   : > { %v1400_v59 = vpop.f32.mrb[20].mxu0 }
 0x547   : > { %1423 = vrot.lane.b32.xlu0 %v1400_v59, %s2455_s5  ;;  %v2259_v18 = vpop.f32.mrb[21].mxu0 }
 0x548   : > { %v1403_v21 = vpop.f32.mrb[22].mxu0  ;;  %v1887_v18 = vld [vmem:[#allocation3 + $0x40] sm:$0xff] }
 0x549   : > { %1425 = vrot.lane.b32.xlu1 %v1403_v21, %s2455_s5  ;;  %v2260_v15 = vpop.f32.mrb[23].mxu0  ;;  %2405 = vrcp.f32 %v1887_v18 }
 0x54a   : > { %2407 = vrcp.f32 %v1888_v47 }
 0x54b   : > { %2409 = vrcp.f32 %v1909_v13 }
 0x55c   : > { %v1532_v3 = vpop.xlane.xlu1 %1531 }
 0x55d   : > { %v1534_v11 = vadd.f32 %v1532_v3, %v1526_v40 }
 0x55f   : > { %1536 = vst.msk [vmem:[#allocation3 + $0x68] sm:$0xff] %vm294_vm2, %v1534_v11 }
 0x562   : > { %v704_v58 = vpop.permute.xlu1 %703 }
 0x563   : > { %v709_v27 = vadd.f32 %v704_v58, %v699_v2 }
 0x564   : > { %v706_v24 = vpop.permute.xlu0 %705 }
 0x565   : > { %712 = vst.msk [vmem:[#allocation4] sm:$0xff] %vm711_vm5, %v709_v27  ;;  %v710_v55 = vadd.f32 %v706_v24, %v700_v19  ;;  %v1931_v24 = vld [vmem:[#allocation3 + $0x60] sm:$0xff] }
 0x566   : > { %1708 = vadd.xlane.f32.xlu0 %v1707_v48  ;;  %v1932_v48 = vld [vmem:[#allocation3 + $0x68] sm:$0xff] }
 0x567   : > { %713 = vst.msk [vmem:[#allocation4 + $0x8] sm:$0xff] %vm711_vm5, %v710_v55 }
 0x56c   : > { %v867_v8 = vld [vmem:[#allocation4] sm:$0xff] }
 0x56d   : > { %1711 = vadd.xlane.f32.xlu1 %v1710_v30  ;;  %v879_v28 = vmul.f32 %v2984_v14, %v867_v8 }
 0x56e   : > { %v868_v32 = vld [vmem:[#allocation4 + $0x8] sm:$0xff] }
 0x56f   : > { %v880_v31 = vmul.f32 %v2986_v61, %v868_v32 }
 0x59b   : > { %v884_v26 = vpop.permute.xlu0 %883 }
 0x59c   : > { %v889_v35 = vadd.f32 %v884_v26, %v879_v28 }
 0x59e   : > { %892 = vst.msk [vmem:[#allocation4] sm:$0xff] %vm891_vm6, %v889_v35 }
 0x59f   : > { %v886_v57 = vpop.permute.xlu0 %885 }
 0x5a0   : > { %v890_v33 = vadd.f32 %v886_v57, %v880_v31 }
 0x5a2   : > { %893 = vst.msk [vmem:[#allocation4 + $0x8] sm:$0xff] %vm891_vm6, %v890_v33 }
 0x5a3   : > { %v1580_v14 = vpop.f32.mrb[24].mxu0 }
 0x5a4   : > { %1603 = vrot.lane.b32.xlu0 %v1580_v14, %s2454_s4  ;;  %v2271_v36 = vpop.f32.mrb[25].mxu0  ;;  %v1673_v14 = vld [vmem:[#allocation3 + $0x70] sm:$0xff] }
 0x5a5   : > { %v1583_v39 = vpop.f32.mrb[26].mxu0  ;;  %v1047_v41 = vld [vmem:[#allocation4] sm:$0xff]  ;;  %v1705_v22 = vmul.f32 %v3073_v38, %v1673_v14 }
 0x5a6   : > { %1605 = vrot.lane.b32.xlu1 %v1583_v39, %s2454_s4  ;;  %v2272_v7 = vpop.f32.mrb[27].mxu0  ;;  %v1059_v61 = vmul.f32 %v3016_v20, %v1047_v41 }
 0x5a7   : > { %v1064_v1 = vpop.permute.xlu1 %1063 }
 0x5a8   : > { %v1069_v42 = vadd.f32 %v1064_v1, %v1059_v61  ;;  %1771 = vperm.xlu0 %2321, %v3073_v38  }
 0x5a9   : > { %v1048_v54 = vld [vmem:[#allocation4 + $0x8] sm:$0xff] }
 0x5aa   : > { %1072 = vst.msk [vmem:[#allocation4] sm:$0xff] %vm1071_vm7, %v1069_v42  ;;  %1776 = vperm.xlu1 %2320, %v3076_v50   ;;  %v1060_v20 = vmul.f32 %v2988_v45, %v1048_v54  ;;  %v2392_v45 = vpop.eup %2391 }
 0x5ab   : > { %v1066_v51 = vpop.permute.xlu1 %1065  ;;  %v1760_v46 = vpop.f32.mrb[28].mxu0 }
 0x5ac   : > { %v1070_v4 = vadd.f32 %v1066_v51, %v1060_v20  ;;  %1783 = vrot.lane.b32.xlu0 %v1760_v46, %s2449_s23  ;;  %v2283_v49 = vpop.f32.mrb[29].mxu0  ;;  %v2394_v15 = vpop.eup %2393 }
 0x5ad   : > { %v1763_v60 = vpop.f32.mrb[30].mxu0  ;;  %v2396_v3 = vpop.eup %2395 }
 0x5ae   : > { %1073 = vst.msk [vmem:[#allocation4 + $0x8] sm:$0xff] %vm1071_vm7, %v1070_v4  ;;  %1785 = vrot.lane.b32.xlu1 %v1763_v60, %s2449_s23  ;;  %v2284_v5 = vpop.f32.mrb[31].mxu0  ;;  %v2398_v16 = vpop.eup %2397 }
 0x5af   : > { %v2400_v27 = vpop.eup %2399 }
 0x5b0   : > { %1805 = vperm.xlu0 %2321, %v2390_v12   ;;  %v2402_v55 = vpop.eup %2401 }
 0x5b1   : > { %v1227_v52 = vld [vmem:[#allocation4] sm:$0xff]  ;;  %v1244_v59 = vpop.permute.xlu1 %1243  ;;  %v2404_v30 = vpop.eup %2403 }
 0x5b2   : > { %v1239_v21 = vmul.f32 %v3020_v56, %v1227_v52  ;;  %1810 = vperm.xlu1 %2320, %v2392_v45   ;;  %v1910_v56 = vld [vmem:[#allocation3 + $0x58] sm:$0xff]  ;;  %v2406_v8 = vpop.eup %2405 }
 0x5b3   : > { %2411 = vrcp.f32 %v1910_v56  ;;  %v2408_v17 = vpop.eup %2407 }
 0x5b4   : > { %v1249_v40 = vadd.f32 %v1244_v59, %v1239_v21  ;;  %1827 = vperm.xlu0 %2321, %v2394_v15   ;;  %2413 = vrcp.f32 %v1931_v24  ;;  %v2410_v35 = vpop.eup %2409 }
 0x5b5   : > { %v1228_v11 = vld [vmem:[#allocation4 + $0x8] sm:$0xff]  ;;  %v1246_v58 = vpop.permute.xlu1 %1245  ;;  %2415 = vrcp.f32 %v1932_v48 }
 0x5b6   : > { %1252 = vst.msk [vmem:[#allocation4] sm:$0xff] %vm1251_vm8, %v1249_v40  ;;  %v1240_v2 = vmul.f32 %v2990_v62, %v1228_v11  ;;  %1832 = vperm.xlu1 %2320, %v2396_v3  }
 0x5b8   : > { %v1250_v19 = vadd.f32 %v1246_v58, %v1240_v2  ;;  %1849 = vperm.xlu0 %2321, %v2398_v16  }
 0x5b9   : > { %v1424_v25 = vpop.permute.xlu0 %1423 }
 0x5ba   : > { %1253 = vst.msk [vmem:[#allocation4 + $0x8] sm:$0xff] %vm1251_vm8, %v1250_v19  ;;  %1854 = vperm.xlu1 %2320, %v2400_v27  }
 0x5bb   : > { %v1426_v31 = vpop.permute.xlu1 %1425 }
 0x5bc   : > { %1871 = vperm.xlu0 %2321, %v2402_v55  }
 0x5bd   : > { %v1407_v62 = vld [vmem:[#allocation4] sm:$0xff]  ;;  %v2412_v33 = vpop.eup %2411 }
 0x5be   : > { %v1419_v63 = vmul.f32 %v2992_v29, %v1407_v62  ;;  %1876 = vperm.xlu1 %2320, %v2404_v30   ;;  %v2414_v29 = vpop.eup %2413 }
 0x5bf   : > { %v2416_v10 = vpop.eup %2415 }
 0x5c0   : > { %v1429_v28 = vadd.f32 %v1424_v25, %v1419_v63  ;;  %1893 = vperm.xlu0 %2321, %v2406_v8  }
 0x5c1   : > { %v1408_v26 = vld [vmem:[#allocation4 + $0x8] sm:$0xff] }
 0x5c2   : > { %1432 = vst.msk [vmem:[#allocation4] sm:$0xff] %vm1431_vm9, %v1429_v28  ;;  %v1420_v32 = vmul.f32 %v3024_v6, %v1408_v26  ;;  %1898 = vperm.xlu1 %2320, %v2408_v17   ;;  %v1674_v6 = vld [vmem:[#allocation3 + $0x78] sm:$0xff] }
 0x5c3   : > { %v1706_v41 = vmul.f32 %v3076_v50, %v1674_v6 }
 0x5c4   : > { %v1430_v57 = vadd.f32 %v1426_v31, %v1420_v32  ;;  %1915 = vperm.xlu0 %2321, %v2410_v35  }
 0x5c6   : > { %1433 = vst.msk [vmem:[#allocation4 + $0x8] sm:$0xff] %vm1431_vm9, %v1430_v57  ;;  %1920 = vperm.xlu1 %2320, %v2412_v33  }
 0x5c8   : > { %1937 = vperm.xlu0 %2321, %v2414_v29  }
 0x5c9   : > { %v1587_v38 = vld [vmem:[#allocation4] sm:$0xff] }
 0x5ca   : > { %1942 = vperm.xlu1 %2320, %v2416_v10   ;;  %v1599_v43 = vmul.f32 %v2994_v9, %v1587_v38 }
 0x5cd   : > { %v1588_v54 = vld [vmem:[#allocation4 + $0x8] sm:$0xff] }
 0x5ce   : > { %v1600_v50 = vmul.f32 %v3028_v53, %v1588_v54 }
 0x5f3   : > { %v1709_v36 = vpop.xlane.xlu0 %1708 }
 0x5f4   : > { %v1713_v39 = vadd.f32 %v1709_v36, %v1705_v22 }
 0x5f6   : > { %1715 = vst.msk [vmem:[#allocation3 + $0x70] sm:$0xff] %vm294_vm2, %v1713_v39 }
 0x5fa   : > { %v1712_v34 = vpop.xlane.xlu1 %1711 }
 0x5fb   : > { %v1714_v7 = vadd.f32 %v1712_v34, %v1706_v41 }
 0x5fd   : > { %v1953_v61 = vld [vmem:[#allocation3 + $0x70] sm:$0xff]  ;;  %1716 = vst.msk [vmem:[#allocation3 + $0x78] sm:$0xff] %vm294_vm2, %v1714_v7 }
 0x5fe   : > { %2417 = vrcp.f32 %v1953_v61 }
 0x604   : > { %v1954_v1 = vld [vmem:[#allocation3 + $0x78] sm:$0xff] }
 0x605   : > { %2419 = vrcp.f32 %v1954_v1 }
 0x608   : > { %v2418_v44 = vpop.eup %2417 }
 0x609   : > { %1959 = vperm.xlu0 %2321, %v2418_v44  }
 0x60f   : > { %v2420_v42 = vpop.eup %2419 }
 0x610   : > { %1964 = vperm.xlu1 %2320, %v2420_v42  }
 0x616   : > { %v1604_v20 = vpop.permute.xlu0 %1603 }
 0x617   : > { %v1609_v51 = vadd.f32 %v1604_v20, %v1599_v43 }
 0x618   : > { %v1606_v46 = vpop.permute.xlu1 %1605 }
 0x619   : > { %1612 = vst.msk [vmem:[#allocation4] sm:$0xff] %vm1611_vm10, %v1609_v51  ;;  %v1610_v0 = vadd.f32 %v1606_v46, %v1600_v50 }
 0x61b   : > { %1613 = vst.msk [vmem:[#allocation4 + $0x8] sm:$0xff] %vm1611_vm10, %v1610_v0 }
 0x620   : > { %v1767_v49 = vld [vmem:[#allocation4] sm:$0xff] }
 0x622   : > { %v1768_v5 = vld [vmem:[#allocation4 + $0x8] sm:$0xff] }
 0x627   : > { %v1772_v4 = vpop.permute.xlu0 %1771 }
 0x628   : > { %v1779_v23 = vmul.f32 %v1772_v4, %v1767_v49 }
 0x629   : > { %v1777_v60 = vpop.permute.xlu1 %1776 }
 0x62a   : > { %v1780_v37 = vmul.f32 %v1777_v60, %v1768_v5 }
 0x62b   : > { %v1784_v12 = vpop.permute.xlu0 %1783 }
 0x62c   : > { %v1789_v9 = vadd.f32 %v1784_v12, %v1779_v23 }
 0x62d   : > { %v1786_v45 = vpop.permute.xlu1 %1785 }
 0x62e   : > { %1792 = vst.msk [vmem:[#allocation4] sm:$0xff] %vm1791_vm11, %v1789_v9  ;;  %v1790_v52 = vadd.f32 %v1786_v45, %v1780_v37 }
 0x62f   : > { %v1806_v59 = vpop.permute.xlu0 %1805 }
 0x630   : > { %1793 = vst.msk [vmem:[#allocation4 + $0x8] sm:$0xff] %vm1791_vm11, %v1790_v52 }
 0x631   : > { %v1811_v15 = vpop.permute.xlu1 %1810 }
 0x633   : > { %v1828_v3 = vpop.permute.xlu0 %1827 }
 0x635   : > { %v1797_v53 = vld [vmem:[#allocation4] sm:$0xff]  ;;  %v1833_v2 = vpop.permute.xlu1 %1832 }
 0x636   : > { %v1813_v18 = vmul.f32 %v1806_v59, %v1797_v53 }
 0x637   : > { %v1798_v21 = vld [vmem:[#allocation4 + $0x8] sm:$0xff]  ;;  %v1850_v56 = vpop.permute.xlu0 %1849 }
 0x638   : > { %1816 = vst.msk [vmem:[#allocation4] sm:$0xff] %vm364_vm1, %v1813_v18  ;;  %v1814_v47 = vmul.f32 %v1811_v15, %v1798_v21 }
 0x639   : > { %v1855_v24 = vpop.permute.xlu1 %1854 }
 0x63a   : > { %1817 = vst.msk [vmem:[#allocation4 + $0x8] sm:$0xff] %vm364_vm1, %v1814_v47 }
 0x63b   : > { %v1872_v30 = vpop.permute.xlu0 %1871 }
 0x63d   : > { %v1877_v8 = vpop.permute.xlu1 %1876 }
 0x63f   : > { %v1818_v40 = vld [vmem:[#allocation4] sm:$0xff]  ;;  %v1894_v17 = vpop.permute.xlu0 %1893 }
 0x640   : > { %v1835_v11 = vmul.f32 %v1828_v3, %v1818_v40 }
 0x641   : > { %v1819_v13 = vld [vmem:[#allocation4 + $0x8] sm:$0xff]  ;;  %v1899_v35 = vpop.permute.xlu1 %1898 }
 0x642   : > { %1838 = vst.msk [vmem:[#allocation4] sm:$0xff] %vm711_vm5, %v1835_v11  ;;  %v1836_v16 = vmul.f32 %v1833_v2, %v1819_v13 }
 0x643   : > { %v1916_v33 = vpop.permute.xlu0 %1915 }
 0x644   : > { %1839 = vst.msk [vmem:[#allocation4 + $0x8] sm:$0xff] %vm711_vm5, %v1836_v16 }
 0x645   : > { %v1921_v14 = vpop.permute.xlu1 %1920 }
 0x647   : > { %v1938_v39 = vpop.permute.xlu0 %1937 }
 0x649   : > { %v1840_v58 = vld [vmem:[#allocation4] sm:$0xff]  ;;  %v1943_v34 = vpop.permute.xlu1 %1942 }
 0x64a   : > { %v1857_v19 = vmul.f32 %v1850_v56, %v1840_v58 }
 0x64b   : > { %v1841_v27 = vld [vmem:[#allocation4 + $0x8] sm:$0xff] }
 0x64c   : > { %1860 = vst.msk [vmem:[#allocation4] sm:$0xff] %vm891_vm6, %v1857_v19  ;;  %v1858_v55 = vmul.f32 %v1855_v24, %v1841_v27 }
 0x64e   : > { %1861 = vst.msk [vmem:[#allocation4 + $0x8] sm:$0xff] %vm891_vm6, %v1858_v55 }
 0x653   : > { %v1862_v48 = vld [vmem:[#allocation4] sm:$0xff] }
 0x654   : > { %v1879_v62 = vmul.f32 %v1872_v30, %v1862_v48 }
 0x655   : > { %v1863_v63 = vld [vmem:[#allocation4 + $0x8] sm:$0xff] }
 0x656   : > { %1882 = vst.msk [vmem:[#allocation4] sm:$0xff] %vm1071_vm7, %v1879_v62  ;;  %v1880_v25 = vmul.f32 %v1877_v8, %v1863_v63 }
 0x658   : > { %1883 = vst.msk [vmem:[#allocation4 + $0x8] sm:$0xff] %vm1071_vm7, %v1880_v25 }
 0x65d   : > { %v1884_v28 = vld [vmem:[#allocation4] sm:$0xff] }
 0x65e   : > { %v1901_v26 = vmul.f32 %v1894_v17, %v1884_v28 }
 0x65f   : > { %v1885_v32 = vld [vmem:[#allocation4 + $0x8] sm:$0xff] }
 0x660   : > { %1904 = vst.msk [vmem:[#allocation4] sm:$0xff] %vm1251_vm8, %v1901_v26  ;;  %v1902_v31 = vmul.f32 %v1899_v35, %v1885_v32 }
 0x662   : > { %1905 = vst.msk [vmem:[#allocation4 + $0x8] sm:$0xff] %vm1251_vm8, %v1902_v31 }
 0x667   : > { %v1906_v57 = vld [vmem:[#allocation4] sm:$0xff] }
 0x668   : > { %v1923_v29 = vmul.f32 %v1916_v33, %v1906_v57 }
 0x669   : > { %v1907_v10 = vld [vmem:[#allocation4 + $0x8] sm:$0xff] }
 0x66a   : > { %1926 = vst.msk [vmem:[#allocation4] sm:$0xff] %vm1431_vm9, %v1923_v29  ;;  %v1924_v22 = vmul.f32 %v1921_v14, %v1907_v10 }
 0x66c   : > { %1927 = vst.msk [vmem:[#allocation4 + $0x8] sm:$0xff] %vm1431_vm9, %v1924_v22 }
 0x671   : > { %v1928_v36 = vld [vmem:[#allocation4] sm:$0xff] }
 0x672   : > { %v1945_v6 = vmul.f32 %v1938_v39, %v1928_v36 }
 0x673   : > { %v1929_v41 = vld [vmem:[#allocation4 + $0x8] sm:$0xff] }
 0x674   : > { %1948 = vst.msk [vmem:[#allocation4] sm:$0xff] %vm1611_vm10, %v1945_v6  ;;  %v1946_v7 = vmul.f32 %v1943_v34, %v1929_v41 }
 0x676   : > { %1949 = vst.msk [vmem:[#allocation4 + $0x8] sm:$0xff] %vm1611_vm10, %v1946_v7 }
 0x67b   : > { %v1950_v61 = vld [vmem:[#allocation4] sm:$0xff] }
 0x67d   : > { %v1951_v42 = vld [vmem:[#allocation4 + $0x8] sm:$0xff] }
 0x688   : > { %v1960_v1 = vpop.permute.xlu0 %1959 }
 0x689   : > { %v1967_v44 = vmul.f32 %v1960_v1, %v1950_v61 }
 0x68b   : > { %1970 = vst.msk [vmem:[#allocation4] sm:$0xff] %vm1791_vm11, %v1967_v44 }
 0x68f   : > { %v1965_v38 = vpop.permute.xlu1 %1964 }
 0x690   : > { %v1968_v54 = vmul.f32 %v1965_v38, %v1951_v42 }
 0x692   : > { %1971 = vst.msk [vmem:[#allocation4 + $0x8] sm:$0xff] %vm1791_vm11, %v1968_v54  ;;  %v1972_v43 = vld [vmem:[#allocation4] sm:$0xff] }
 0x699   : > { %v1973_v20 = vld [vmem:[#allocation4 + $0x8] sm:$0xff] }
 0x69a   : > { %v2155_v51 = vpack.c.bf16 %v1973_v20, %v1972_v43 }
 0x69c   : > { %2156 = vst [vmem:[%s287_s8] sm:$0xff] %v2155_v51  }
 0x69d PF: > { %s13_s14 = sadd.s32 1, %s2443_s14   ;;  %s3139_s12 = smov %s2439_s13 }
 0x69e   : > { %p10_p5 = scmp.ge.s32.totalorder %s13_s14, 4   ;;  %s3140_s13 = smov %s3142_s15 }
 0x6a0   :  { %12 = sbr.rel (!%p10_p5) target bundleno = 2 (0x2), region = 101 }

// kernel: decoder_forward.30
= control target key start
LH: loop header
LB: loop body
LE: loop exit
PB: predicated region body
PF: predicated region fallthrough
CT: control target
= control target key end

     0   :  { %s772_s15 = smov 0   ;;  %s774_s16 = smov 0   ;;  %s879_s0 = inlined_call_operand.vmem [shape: f32[32,128], index: 0, kind: input, shape index: {}]   ;;  %s880_s1 = inlined_call_operand.vmem [shape: bf16[128,256], index: 1, kind: input, shape index: {}]   ;;  %s881_s2 = inlined_call_operand.vmem [shape: f32[1,256], index: 2, kind: input, shape index: {}]   ;;  %s882_s3 = inlined_call_operand.vmem [shape: f32[32,1], index: 3, kind: output, shape index: {0}]   ;;  %s883_s4 = inlined_call_operand.vmem [shape: f32[32,1], index: 4, kind: output, shape index: {1}]  }
   0x1   :  { %s776_s17 = smov 0  }
   0x2 LB: > { %s27_s18 = sadd.s32 1, %s738_s16  ;;  %p630_p0 = scmp.ge.s32.totalorder %s742_s17, 1  ;;  %s742_s17 = sphi %s776_s17, %s15_s17   ;;  %s738_s16 = sphi %s774_s16, %s885_s16   ;;  %s734_s15 = sphi %s772_s15, %s884_s15  }
   0x3   : > { %p29_p1 = scmp.ge.s32.totalorder %s27_s18, 2  ;;  %p199_p2 = scmp.lt.s32.totalorder %s742_s17, 3 }
   0x5   : > { %s887_s18 = smov (%p29_p1, %s27_s18), 0  ;;  %p200_p3 = pnand %p630_p0, %p199_p2 }
   0x6   : > { %v684_v0 = vld [vmem:[%s880_s1 + $0x4] ss:$8 sps:$4 sm:$0xff] (!%p200_p3)   ;;  %v686_v1 = vld [vmem:[%s880_s1] ss:$8 sps:$4 sm:$0xff] (!%p200_p3)   ;;  %v744_v2 = vmov (!%p200_p3), 0   ;;  %s631_s7 = sshll.u32 (!%p200_p3), %s734_s15, 1  ;;  %v299_v21 = vlaneseq (!%p200_p3) }
   0x7   : > { %203 = sbr.rel (%p200_p3) target bundleno = 704 (0x2c0), region = 32  ;;  %421 = vmatprep.mubr.bf16.mxu0 (!%p200_p3), %v744_v2  ;;  %682 = vset.pattern.permute.xlu1 (!%p200_p3), %v744_v2  ;;  %v687_v3 = vld [vmem:[%s880_s1 + $0x14] ss:$8 sps:$4 sm:$0xff] (!%p200_p3)   ;;  %v689_v4 = vld [vmem:[%s880_s1 + $0x10] ss:$8 sps:$4 sm:$0xff] (!%p200_p3)   ;;  %p240_p4 = scmp.lt.s32.totalorder (!%p200_p3), %s631_s7, 3 }
   0x8   : > { %389 = vmatprep.subr.bf16.mxu0 (!%p200_p3), %v684_v0  ;;  %683 = vset.pattern.permute.xlu0 (!%p200_p3), %v744_v2  ;;  %v690_v5 = vld [vmem:[%s880_s1 + $0x24] ss:$8 sps:$4 sm:$0xff] (!%p200_p3)   ;;  %v692_v6 = vld [vmem:[%s880_s1 + $0x20] ss:$8 sps:$4 sm:$0xff] (!%p200_p3)   ;;  %v693_v7 = vld [vmem:[%s880_s1 + $0x34] ss:$8 sps:$4 sm:$0xff] (!%p200_p3)  }
   0x9   : > { %390 = vmatpush1.bf16.msra.mxu0 (!%p200_p3), %v686_v1  ;;  %v695_v8 = vld [vmem:[%s880_s1 + $0x30] ss:$8 sps:$4 sm:$0xff] (!%p200_p3)   ;;  %v696_v9 = vld [vmem:[%s880_s1 + $0x44] ss:$8 sps:$4 sm:$0xff] (!%p200_p3)   ;;  %v698_v10 = vld [vmem:[%s880_s1 + $0x40] ss:$8 sps:$4 sm:$0xff] (!%p200_p3)  }
   0xa   : > { %391 = vmatprep.subr.bf16.mxu0 (!%p200_p3), %v687_v3  ;;  %v699_v11 = vld [vmem:[%s880_s1 + $0x54] ss:$8 sps:$4 sm:$0xff] (!%p200_p3)   ;;  %v701_v12 = vld [vmem:[%s880_s1 + $0x50] ss:$8 sps:$4 sm:$0xff] (!%p200_p3)   ;;  %v702_v13 = vld [vmem:[%s880_s1 + $0x64] ss:$8 sps:$4 sm:$0xff] (!%p200_p3)  }
   0xb   : > { %v704_v14 = vld [vmem:[%s880_s1 + $0x60] ss:$8 sps:$4 sm:$0xff] (!%p200_p3)   ;;  %v705_v15 = vld [vmem:[%s880_s1 + $0x74] ss:$8 sps:$4 sm:$0xff] (!%p200_p3)   ;;  %v707_v16 = vld [vmem:[%s880_s1 + $0x70] ss:$8 sps:$4 sm:$0xff] (!%p200_p3)  }
   0xc   : > { %vm273_vm0 = vcmask (!%p200_p3), 7168   ;;  %v745_v20 = vmov (!%p200_p3), -1e+30   ;;  %v300_v22 = vshrl.u32 (!%p200_p3), %v299_v21, 7  ;;  %v297_v24 = vld [vmem:[%s881_s2] sm:$0x3] (!%p200_p3) }
   0xd   : > { %392 = vmatpush1.bf16.msra.mxu0 (!%p200_p3), %v689_v4  ;;  %274 = vst.msk [vmem:[#allocation2] sm:$0xff] (!%p200_p3), %vm273_vm0, %v745_v20  ;;  %275 = vst.msk [vmem:[#allocation2 + $0x8] sm:$0xff] (!%p200_p3), %vm273_vm0, %v745_v20  ;;  %v746_v38 = vmov (!%p200_p3), 0.0  }
   0xe   : > { %393 = vmatprep.subr.bf16.mxu0 %v690_v5  ;;  %s889_s7 = smov (!%p240_p4, %s631_s7), 3  ;;  %v301_v23 = vsub.s32 0, %v300_v22  ;;  %v305_v25 = vsub.s32 1, %v300_v22  ;;  %276 = vst.msk [vmem:[#allocation3] sm:$0xff] %vm273_vm0, %v746_v38  ;;  %277 = vst.msk [vmem:[#allocation3 + $0x8] sm:$0xff] %vm273_vm0, %v746_v38 }
   0xf   : > { %s832_s23 = sshll.u32 %s889_s7, 3 }
  0x10   : > { %s243_s30 = scalar_lea.vmem %s879_s0, %s832_s23  ;;  %v302_v26 = vrot.slane %v297_v24, %v301_v23  ;;  %v306_v27 = vrot.slane %v297_v24, %v305_v25  ;;  %s260_s11 = scalar_lea.vmem %s882_s3, %s832_s23 }
  0x11   : > { %394 = vmatpush1.bf16.msra.mxu0 %v692_v6  ;;  %v278_v17 = vld [vmem:[%s243_s30] sm:$0xff]  ;;  %v279_v18 = vld [vmem:[%s243_s30 + $0x8] sm:$0xff]  ;;  %s266_s14 = scalar_lea.vmem %s883_s4, %s832_s23 }
  0x12   : > { %395 = vmatprep.subr.bf16.mxu0 %v693_v7  ;;  %v280_v19 = vpack.c.bf16 %v279_v18, %v278_v17 }
  0x14   : > { %v432_v39 = vld [vmem:[#allocation2] sm:$0xff]  ;;  %v433_v42 = vld [vmem:[#allocation2 + $0x8] sm:$0xff] }
  0x15   : > { %396 = vmatpush1.bf16.msra.mxu0 %v695_v8  ;;  %v442_v4 = vld [vmem:[#allocation3] sm:$0xff]  ;;  %v443_v8 = vld [vmem:[#allocation3 + $0x8] sm:$0xff] }
  0x16   : > { %397 = vmatprep.subr.bf16.mxu0 %v696_v9 }
  0x19   : > { %398 = vmatpush1.bf16.msra.mxu0 %v698_v10 }
  0x1a   : > { %399 = vmatprep.subr.bf16.mxu0 %v699_v11 }
  0x1d   : > { %400 = vmatpush1.bf16.msra.mxu0 %v701_v12 }
  0x1e   : > { %401 = vmatprep.subr.bf16.mxu0 %v702_v13 }
  0x21   : > { %402 = vmatpush1.bf16.msra.mxu0 %v704_v14 }
  0x22   : > { %403 = vmatprep.subr.bf16.mxu0 %v705_v15 }
  0x25   : > { %404 = vmatpush1.bf16.msra.mxu0 %v707_v16 }
  0x28   : > { %422 = vmatmul.mubr.bf16.vlgmr.msra.gmra.mrb[0].mxu0 %v280_v19 }
  0xfb   : > { %v423_v28 = vpop.f32.mrb[0].mxu0 }
  0xfc   : > { %v424_v29 = vadd.f32 %v423_v28, %v302_v26  ;;  %v425_v30 = vpop.f32.mrb[1].mxu0 }
  0xfd   : > { %v426_v31 = vadd.f32 %v425_v30, %v306_v27  ;;  %v427_v32 = vpop.f32.mrb[2].mxu0 }
  0xfe   : > { %v429_v33 = vpop.f32.mrb[3].mxu0  ;;  %v428_v34 = vadd.f32 %v427_v32, %v302_v26 }
  0xff   : > { %v430_v35 = vadd.f32 %v429_v33, %v306_v27  ;;  %v434_v36 = vmax.f32 %v424_v29, %v426_v31 }
 0x101   : > { %435 = vmax.xlane.f32.xlu0 %v434_v36  ;;  %v437_v37 = vmax.f32 %v428_v34, %v430_v35 }
 0x105   : > { %438 = vmax.xlane.f32.xlu0 %v437_v37 }
 0x18e   : > { %v436_v40 = vpop.xlane.xlu0 %435 }
 0x18f   : > { %v440_v41 = vmax.f32 %v432_v39, %v436_v40 }
 0x191   : > { %v444_v43 = vsub.f32 %v432_v39, %v440_v41  ;;  %485 = vst.msk [vmem:[#allocation2] sm:$0xff] %vm273_vm0, %v440_v41  ;;  %454 = vperm.xlu1 %682, %v440_v41  }
 0x192   : > { %v439_v44 = vpop.xlane.xlu0 %438 }
 0x193   : > { %v441_v45 = vmax.f32 %v433_v42, %v439_v44  ;;  %v446_v1 = vmul.f32 1.442695, %v444_v43 }
 0x195   : > { %v445_v46 = vsub.f32 %v433_v42, %v441_v45  ;;  %486 = vst.msk [vmem:[#allocation2 + $0x8] sm:$0xff] %vm273_vm0, %v441_v45  ;;  %459 = vperm.xlu1 %682, %v441_v45  }
 0x197   : > { %v448_v2 = vmul.f32 1.442695, %v445_v46 }
 0x198   : > { %v490_v47 = vld [vmem:[#allocation2] sm:$0xff] }
 0x199   : > { %492 = vst.msk [vmem:[%s260_s11] sm:$0xff] %vm273_vm0, %v490_v47 }
 0x19c   : > { %v491_v48 = vld [vmem:[#allocation2 + $0x8] sm:$0xff] }
 0x19d   : > { %493 = vst.msk [vmem:[%s260_s11 + $0x8] sm:$0xff] %vm273_vm0, %v491_v48 }
 0x210   : > { %v455_v49 = vpop.permute.xlu1 %454 }
 0x211   : > { %v462_v50 = vsub.f32 %v424_v29, %v455_v49  ;;  %v463_v51 = vsub.f32 %v426_v31, %v455_v49 }
 0x213   : > { %v466_v52 = vmul.f32 1.442695, %v462_v50  ;;  %v468_v53 = vmul.f32 1.442695, %v463_v51 }
 0x214   : > { %v460_v54 = vpop.permute.xlu1 %459 }
 0x215   : > { %708 = vpow2.f32 %v466_v52  ;;  %v464_v55 = vsub.f32 %v428_v34, %v460_v54  ;;  %v465_v56 = vsub.f32 %v430_v35, %v460_v54 }
 0x216   : > { %710 = vpow2.f32 %v468_v53 }
 0x217   : > { %v470_v57 = vmul.f32 1.442695, %v464_v55  ;;  %v472_v58 = vmul.f32 1.442695, %v465_v56 }
 0x219   : > { %712 = vpow2.f32 %v470_v57 }
 0x21a   : > { %714 = vpow2.f32 %v472_v58 }
 0x21b   : > { %716 = vpow2.f32 %v446_v1 }
 0x21c   : > { %718 = vpow2.f32 %v448_v2 }
 0x21f   : > { %v709_v59 = vpop.eup %708 }
 0x220   : > { %v711_v60 = vpop.eup %710 }
 0x221   : > { %v474_v61 = vadd.f32 %v711_v60, %v709_v59 }
 0x223   : > { %v713_v62 = vpop.eup %712  ;;  %475 = vadd.xlane.f32.xlu0 %v474_v61 }
 0x224   : > { %v715_v63 = vpop.eup %714 }
 0x225   : > { %v477_v0 = vadd.f32 %v715_v63, %v713_v62  ;;  %v717_v3 = vpop.eup %716 }
 0x226   : > { %v450_v5 = vmul.f32 %v717_v3, %v442_v4  ;;  %v719_v6 = vpop.eup %718 }
 0x227   : > { %478 = vadd.xlane.f32.xlu1 %v477_v0  ;;  %v451_v10 = vmul.f32 %v719_v6, %v443_v8 }
 0x2b0   : > { %v476_v7 = vpop.xlane.xlu0 %475 }
 0x2b1   : > { %v480_v9 = vadd.f32 %v476_v7, %v450_v5 }
 0x2b3   : > { %483 = vst.msk [vmem:[#allocation3] sm:$0xff] %vm273_vm0, %v480_v9 }
 0x2b4   : > { %v479_v11 = vpop.xlane.xlu1 %478 }
 0x2b5   : > { %v481_v12 = vadd.f32 %v479_v11, %v451_v10 }
 0x2b7   : > { %484 = vst.msk [vmem:[#allocation3 + $0x8] sm:$0xff] %vm273_vm0, %v481_v12 }
 0x2ba   : > { %v494_v13 = vld [vmem:[#allocation3] sm:$0xff] }
 0x2bb   : > { %496 = vst.msk [vmem:[%s266_s14] sm:$0xff] %vm273_vm0, %v494_v13 }
 0x2be   : > { %v495_v14 = vld [vmem:[#allocation3 + $0x8] sm:$0xff] }
 0x2bf   : > { %497 = vst.msk [vmem:[%s266_s14 + $0x8] sm:$0xff] %vm273_vm0, %v495_v14 }
 0x2c0 PF: > { %s15_s17 = sadd.s32 1, %s742_s17   ;;  %s884_s15 = smov %s738_s16 }
 0x2c1   : > { %p12_p5 = scmp.ge.s32.totalorder %s15_s17, 4   ;;  %s885_s16 = smov %s887_s18 }
 0x2c3   :  { %14 = sbr.rel (!%p12_p5) target bundleno = 2 (0x2), region = 88 }

// kernel: decoder_forward.31
= control target key start
LH: loop header
LB: loop body
LE: loop exit
PB: predicated region body
PF: predicated region fallthrough
CT: control target
= control target key end

     0   :  { %10 = vsyncpa [#allocation3], 0  ;;  %s1092_s0 = inlined_call_operand.vmem [shape: f32[32,128], index: 0, kind: input, shape index: {}]   ;;  %s1093_s1 = inlined_call_operand.vmem [shape: bf16[128,256], index: 1, kind: input, shape index: {}]   ;;  %s1094_s2 = inlined_call_operand.vmem [shape: f32[1,256], index: 2, kind: input, shape index: {}]   ;;  %s1095_s3 = inlined_call_operand.vmem [shape: f32[32,1], index: 3, kind: input, shape index: {}]   ;;  %s1096_s4 = inlined_call_operand.vmem [shape: f32[32,1], index: 4, kind: input, shape index: {}]   ;;  %s1097_s5 = inlined_call_operand.hbm [shape: f32[32,256], index: 5, kind: output, shape index: {}]  }
   0x1   :  { %12 = vsyncpa [#allocation3 + $0x1], 0  ;;  %s916_s18 = smov 0   ;;  %s918_s19 = smov 0  }
   0x2   :  { %s920_s20 = smov 0   ;;  %s922_s21 = smov 0  }
   0x3   :  { %s924_s22 = smov 0   ;;  %s926_s23 = smov 0  }
   0x4 LB: > { %s668_s24 = sadd.s32 4294967295, %s880_s23   ;;  %s669_s25 = sadd.s32 4294967294, %s880_s23   ;;  %s880_s23 = sphi %s926_s23, %s18_s23   ;;  %s876_s22 = sphi %s924_s22, %s1104_s22   ;;  %s872_s21 = sphi %s922_s21, %s1103_s21   ;;  %s868_s20 = sphi %s920_s20, %s1102_s20   ;;  %s864_s19 = sphi %s918_s19, %s1101_s19   ;;  %s860_s18 = sphi %s916_s18, %s1100_s18  }
   0x5   : > { %s30_s26 = sadd.s32 1, %s876_s22  ;;  %s169_s27 = sadd.s32 1, %s868_s20 }
   0x6   : > { %p32_p0 = scmp.ge.s32.totalorder %s30_s26, 2  ;;  %p179_p1 = scmp.ne.s32.totalorder %s868_s20, %s864_s19 }
   0x7   : > { %p180_p2 = scmp.eq.s32.totalorder %s668_s24, 1  ;;  %p185_p3 = scmp.ne.s32.totalorder %s864_s19, %s860_s18 }
   0x8   : > { %s1106_s26 = smov (%p32_p0, %s30_s26), 0  ;;  %p186_p5 = scmp.eq.s32.totalorder %s669_s25, 1 }
   0x9   : > { %p956_p4 = por %p180_p2, %p179_p1  ;;  %s164_s29 = ssub.s32 %s876_s22, %s1106_s26 }
   0xa   : > { %p674_p6 = scmp.ge.s32.totalorder %s880_s23, 1  ;;  %p167_p7 = scmp.eq.s32.totalorder %s164_s29, 0 }
   0xb   : > { %p963_p8 = por %p186_p5, %p185_p3  ;;  %p248_p9 = scmp.lt.s32.totalorder %s880_s23, 3 }
   0xc   : > { %s969_s6 = scalar_select %p167_p7, %s868_s20, %s169_s27  }
   0xd   : > { %p249_p10 = pnand %p674_p6, %p248_p9 }
   0xe   : > { %v766_v0 = vld [vmem:[%s1093_s1 + $0x4] ss:$8 sps:$4 sm:$0xff] (!%p249_p10)   ;;  %s676_s9 = sshll.u32 (!%p249_p10), %s872_s21, 1  ;;  %v768_v1 = vld [vmem:[%s1093_s1] ss:$8 sps:$4 sm:$0xff] (!%p249_p10)   ;;  %v882_v2 = vmov (!%p249_p10), 0   ;;  %v348_v24 = vlaneseq (!%p249_p10) }
   0xf   : > { %252 = sbr.rel (%p249_p10) target bundleno = 297 (0x129), region = 40  ;;  %470 = vmatprep.mubr.bf16.mxu0 (!%p249_p10), %v882_v2  ;;  %p296_p11 = scmp.lt.s32.totalorder (!%p249_p10), %s676_s9, 3  ;;  %764 = vset.pattern.permute.xlu0 (!%p249_p10), %v882_v2  ;;  %v769_v3 = vld [vmem:[%s1093_s1 + $0x14] ss:$8 sps:$4 sm:$0xff] (!%p249_p10)   ;;  %v771_v4 = vld [vmem:[%s1093_s1 + $0x10] ss:$8 sps:$4 sm:$0xff] (!%p249_p10)  }
  0x10   : > { %438 = vmatprep.subr.bf16.mxu0 (!%p249_p10), %v766_v0  ;;  %765 = vset.pattern.permute.xlu1 (!%p249_p10), %v882_v2  ;;  %v772_v5 = vld [vmem:[%s1093_s1 + $0x24] ss:$8 sps:$4 sm:$0xff] (!%p249_p10)   ;;  %v774_v6 = vld [vmem:[%s1093_s1 + $0x20] ss:$8 sps:$4 sm:$0xff] (!%p249_p10)   ;;  %v775_v7 = vld [vmem:[%s1093_s1 + $0x34] ss:$8 sps:$4 sm:$0xff] (!%p249_p10)  }
  0x11   : > { %439 = vmatpush1.bf16.msra.mxu0 (!%p249_p10), %v768_v1  ;;  %v777_v8 = vld [vmem:[%s1093_s1 + $0x30] ss:$8 sps:$4 sm:$0xff] (!%p249_p10)   ;;  %v778_v11 = vld [vmem:[%s1093_s1 + $0x44] ss:$8 sps:$4 sm:$0xff] (!%p249_p10)   ;;  %v780_v14 = vld [vmem:[%s1093_s1 + $0x40] ss:$8 sps:$4 sm:$0xff] (!%p249_p10)  }
  0x12   : > { %440 = vmatprep.subr.bf16.mxu0 (!%p249_p10), %v769_v3  ;;  %v781_v15 = vld [vmem:[%s1093_s1 + $0x54] ss:$8 sps:$4 sm:$0xff] (!%p249_p10)   ;;  %v783_v16 = vld [vmem:[%s1093_s1 + $0x50] ss:$8 sps:$4 sm:$0xff] (!%p249_p10)   ;;  %v784_v17 = vld [vmem:[%s1093_s1 + $0x64] ss:$8 sps:$4 sm:$0xff] (!%p249_p10)  }
  0x13   : > { %v786_v18 = vld [vmem:[%s1093_s1 + $0x60] ss:$8 sps:$4 sm:$0xff] (!%p249_p10)   ;;  %v787_v19 = vld [vmem:[%s1093_s1 + $0x74] ss:$8 sps:$4 sm:$0xff] (!%p249_p10)   ;;  %v789_v20 = vld [vmem:[%s1093_s1 + $0x70] ss:$8 sps:$4 sm:$0xff] (!%p249_p10)  }
  0x14   : > { %v349_v25 = vshrl.u32 (!%p249_p10), %v348_v24, 7  ;;  %v346_v27 = vld [vmem:[%s1094_s2] sm:$0x3] (!%p249_p10)  ;;  %s883_s17 = smov (!%p249_p10), [#allocation2]  }
  0x15   : > { %441 = vmatpush1.bf16.msra.mxu0 (!%p249_p10), %v771_v4 }
  0x16   : > { %s1108_s9 = smov (!%p296_p11, %s676_s9), 3  ;;  %442 = vmatprep.subr.bf16.mxu0 %v772_v5  ;;  %v350_v26 = vsub.s32 0, %v349_v25  ;;  %v354_v28 = vsub.s32 1, %v349_v25 }
  0x17   : > { %s990_s27 = sshll.u32 %s1108_s9, 3 }
  0x18   : > { %s316_s11 = scalar_lea.vmem %s1095_s3, %s990_s27  ;;  %s322_s14 = scalar_lea.vmem %s1096_s4, %s990_s27  ;;  %v351_v29 = vrot.slane %v346_v27, %v350_v26  ;;  %v355_v32 = vrot.slane %v346_v27, %v354_v28 }
  0x19   : > { %443 = vmatpush1.bf16.msra.mxu0 %v774_v6  ;;  %v481_v9 = vld [vmem:[%s316_s11] sm:$0xff]  ;;  %v482_v12 = vld [vmem:[%s316_s11 + $0x8] sm:$0xff]  ;;  %s299_s24 = scalar_lea.vmem %s1092_s0, %s990_s27  ;;  %s292_s27 = sand.u32 1, %s864_s19  }
  0x1a   : > { %v505_v10 = vld [vmem:[%s322_s14] sm:$0xff]  ;;  %444 = vmatprep.subr.bf16.mxu0 %v775_v7  ;;  %485 = vperm.xlu0 %764, %v481_v9   ;;  %v506_v13 = vld [vmem:[%s322_s14 + $0x8] sm:$0xff]  ;;  %s675_s10 = sshll.u32 %s292_s27, 5  ;;  %s705_s11 = sshll.u32 %s872_s21, 9 }
  0x1b   : > { %509 = vperm.xlu1 %765, %v505_v10   ;;  %v327_v21 = vld [vmem:[%s299_s24] sm:$0xff]  ;;  %v328_v22 = vld [vmem:[%s299_s24 + $0x8] sm:$0xff]  ;;  %s294_s12 = scalar_lea.vmem [#allocation2], %s675_s10  ;;  %s1042_s16 = scalar_lea.hbm %s1097_s5, %s705_s11 }
  0x1c   : > { %v329_v23 = vpack.c.bf16 %v328_v22, %v327_v21  ;;  %s544_s13 = sshll.u32 %s294_s12, 4  ;;  %s1046_s21 = scalar_lea.sflag [#allocation3], %s292_s27  ;;  %s1044_s13 = int_to_ptr.vmem [resolvable:$true] %s544_s13 }
  0x1d   : > { %445 = vmatpush1.bf16.msra.mxu0 %v777_v8  ;;  %s802_s9 = scalar_lea.vmem %s1044_s13, 512  ;;  %s806_s24 = sshll.u32 %s883_s17, 4  ;;  %s807_s24 = int_to_ptr.vmem [resolvable:$false] %s806_s24 }
  0x1e   : > { %446 = vmatprep.subr.bf16.mxu0 %v778_v11  ;;  %490 = vperm.xlu0 %764, %v482_v12   ;;  %p803_p12 = scmp.ne.s32.totalorder %s1044_s13, %s802_s9  ;;  %s808_s25 = scalar_lea.vmem %s807_s24, 1024 }
  0x1f   : > { %514 = vperm.xlu1 %765, %v506_v13   ;;  %p809_p1 = scmp.lt.s32.totalorder %s1044_s13, %s807_s24  ;;  %p810_p2 = scmp.lt.s32.totalorder %s808_s25, %s802_s9 }
  0x20   : > { %p804_p13 = pnand %p803_p12, %p956_p4 }
  0x21   : > { %447 = vmatpush1.bf16.msra.mxu0 %v780_v14  ;;  %p811_p3 = por %p810_p2, %p809_p1 }
  0x22   : > { %448 = vmatprep.subr.bf16.mxu0 %v781_v15  ;;  %p805_p0 = pneg %p804_p13 }
  0x24   : > { %p812_p5 = pnand %p811_p3, %p805_p0 }
  0x25   : > { %449 = vmatpush1.bf16.msra.mxu0 %v783_v16 }
  0x26   : > { %450 = vmatprep.subr.bf16.mxu0 %v784_v17 }
  0x29   : > { %451 = vmatpush1.bf16.msra.mxu0 %v786_v18 }
  0x2a   : > { %452 = vmatprep.subr.bf16.mxu0 %v787_v19 }
  0x2d   : > { %453 = vmatpush1.bf16.msra.mxu0 %v789_v20 }
  0x30   : > { %471 = vmatmul.mubr.bf16.vlgmr.msra.gmra.mrb[0].mxu0 %v329_v23 }
  0x99   : > { %v486_v31 = vpop.permute.xlu0 %485 }
  0x9a   : > { %v510_v30 = vpop.permute.xlu1 %509 }
  0x9b   : > { %790 = vrcp.f32 %v510_v30 }
  0x9d   : > { %v491_v42 = vpop.permute.xlu0 %490 }
  0x9e   : > { %v515_v41 = vpop.permute.xlu1 %514 }
  0x9f   : > { %792 = vrcp.f32 %v515_v41 }
  0xa5   : > { %v791_v51 = vpop.eup %790 }
  0xa9   : > { %v793_v52 = vpop.eup %792 }
 0x103   : > { %v472_v33 = vpop.f32.mrb[0].mxu0 }
 0x104   : > { %v473_v34 = vadd.f32 %v472_v33, %v351_v29  ;;  %v474_v35 = vpop.f32.mrb[1].mxu0 }
 0x105   : > { %v475_v36 = vadd.f32 %v474_v35, %v355_v32  ;;  %v476_v37 = vpop.f32.mrb[2].mxu0 }
 0x106   : > { %v493_v38 = vsub.f32 %v473_v34, %v486_v31  ;;  %v477_v39 = vadd.f32 %v476_v37, %v351_v29  ;;  %v478_v40 = vpop.f32.mrb[3].mxu0 }
 0x107   : > { %v494_v43 = vsub.f32 %v475_v36, %v486_v31  ;;  %v479_v44 = vadd.f32 %v478_v40, %v355_v32 }
 0x108   : > { %v497_v45 = vmul.f32 1.442695, %v493_v38  ;;  %v495_v46 = vsub.f32 %v477_v39, %v491_v42 }
 0x109   : > { %v499_v47 = vmul.f32 1.442695, %v494_v43  ;;  %v496_v48 = vsub.f32 %v479_v44, %v491_v42 }
 0x10a   : > { %794 = vpow2.f32 %v497_v45  ;;  %v501_v49 = vmul.f32 1.442695, %v495_v46 }
 0x10b   : > { %796 = vpow2.f32 %v499_v47  ;;  %v503_v50 = vmul.f32 1.442695, %v496_v48 }
 0x10c   : > { %798 = vpow2.f32 %v501_v49 }
 0x10d   : > { %800 = vpow2.f32 %v503_v50 }
 0x114   : > { %v795_v53 = vpop.eup %794 }
 0x115   : > { %v797_v54 = vpop.eup %796  ;;  %v518_v55 = vmul.f32 %v795_v53, %v791_v51 }
 0x116   : > { %v799_v56 = vpop.eup %798  ;;  %v519_v57 = vmul.f32 %v797_v54, %v791_v51 }
 0x117   : > { %v801_v58 = vpop.eup %800  ;;  %523 = vst [vmem:[%s294_s12] sm:$0xff] %v518_v55  ;;  %v521_v59 = vmul.f32 %v799_v56, %v793_v52 }
 0x118   : > { %524 = vst [vmem:[%s294_s12 + $0x8] sm:$0xff] %v519_v57  ;;  %v522_v60 = vmul.f32 %v801_v58, %v793_v52 }
 0x119   : > { %525 = vst [vmem:[%s294_s12 + $0x10] sm:$0xff] %v521_v59 }
 0x11a   : > { %526 = vst [vmem:[%s294_s12 + $0x18] sm:$0xff] %v522_v60 }
 0x11b   : > { %815 = shalt.err (!%p812_p5)
}
 0x11c   : > { %s816_s29 = scalar_lea.hbm %s1042_s16, 512  ;;  %s820_s27 = scalar_lea.hbm %s1097_s5, 1024 }
 0x11d   : > { %p817_p6 = scmp.ne.s32.totalorder %s1042_s16, %s816_s29  ;;  %p821_p10 = scmp.lt.u32.totalorder %s1042_s16, %s1097_s5 }
 0x11e   : > { %p822_p11 = scmp.lt.u32.totalorder %s820_s27, %s816_s29  ;;  %p824_p13 = scmp.lt.u32.totalorder %s816_s29, %s1042_s16 }
 0x11f   : > { %p818_p7 = pnand %p817_p6, %p956_p4 }
 0x120   : > { %p823_p12 = por %p822_p11, %p821_p10 }
 0x121   : > { %p819_p9 = pneg %p818_p7 }
 0x122   : > { %p825_p0 = por %p824_p13, %p823_p12 }
 0x124   : > { %p826_p1 = pnand %p825_p0, %p819_p9 }
 0x126   : > { %829 = shalt.err (!%p826_p1)
}
 0x127   : > { %s884_s12 = smov 256   ;;  %s885_s14 = smov 16  }
 0x128   : > { %706 = dma.vmem_to_hbm [thread:$0]  (%p956_p4), %s1044_s13, 512, %s1042_s16, %s1046_s21, %s884_s12, %s884_s12, %s885_s14  }
 0x129 PF: > { %p712_p2 = scmp.ge.s32.totalorder %s880_s23, 2  ;;  %s559_s15 = sand.u32 1, %s860_s18  }
 0x12a   : > { %s560_s9 = scalar_lea.sflag [#allocation3], %s559_s15 }
 0x12b   : > { %p709_p3 = pnand %p712_p2, %p963_p8 }
 0x12d   : > { %855 = dma.done.wait (!%p709_p3), %s560_s9, 512  }
 0x12e   : > { %857 = vsyncadd (!%p709_p3), %s560_s9, 4294966784  ;;  %s18_s23 = sadd.s32 1, %s880_s23   ;;  %s1100_s18 = smov %s864_s19 }
 0x12f   : > { %p15_p5 = scmp.ge.s32.totalorder %s18_s23, 4   ;;  %s1101_s19 = smov %s868_s20 }
 0x130   : > { %s1102_s20 = smov %s969_s6  ;;  %s1103_s21 = smov %s876_s22 }
 0x131   : > { %s1104_s22 = smov %s1106_s26  ;;  %17 = sbr.rel (!%p15_p5) target bundleno = 4 (0x4), region = 87 }
 0x138   :  { %565 = vsyncpa [#allocation3], 1 }
 0x139   :  { %567 = vsyncpa [#allocation3 + $0x1], 1 }

// kernel: decoder_forward.20
= control target key start
LH: loop header
LB: loop body
LE: loop exit
PB: predicated region body
PF: predicated region fallthrough
CT: control target
= control target key end

     0   :  { %s2426_s12 = smov 0   ;;  %s2428_s13 = smov 0   ;;  %s3041_s0 = inlined_call_operand.vmem [shape: bf16[2,16,128], index: 0, kind: input, shape index: {}]   ;;  %s3042_s1 = inlined_call_operand.vmem [shape: bf16[2,16,128], index: 1, kind: input, shape index: {}]   ;;  %s3043_s2 = inlined_call_operand.vmem [shape: bf16[2,16,128], index: 2, kind: input, shape index: {}]   ;;  %s3044_s3 = inlined_call_operand.vmem [shape: bf16[2,16,128], index: 3, kind: output, shape index: {}]  }
   0x1   :  { %s2430_s14 = smov 0  }
   0x2 LB: > { %s32_s15 = sadd.s32 1, %s2389_s13  ;;  %p2064_p0 = scmp.ge.s32.totalorder %s2393_s14, 1  ;;  %s2393_s14 = sphi %s2430_s14, %s13_s14   ;;  %s2389_s13 = sphi %s2428_s13, %s3046_s13   ;;  %s2385_s12 = sphi %s2426_s12, %s3045_s12  }
   0x3   : > { %p34_p1 = scmp.ge.s32.totalorder %s32_s15, 2  ;;  %p199_p2 = scmp.lt.s32.totalorder %s2393_s14, 3 }
   0x5   : > { %s3048_s15 = smov (%p34_p1, %s32_s15), 0  ;;  %p200_p3 = pnand %p2064_p0, %p199_p2 }
   0x6   : > { %p250_p4 = scmp.lt.s32.totalorder (!%p200_p3), %s2385_s12, 1  ;;  %v2395_v0 = vmov (!%p200_p3), 0.0   ;;  %vm2396_vm0 = vmmov (!%p200_p3), 0   ;;  %vm345_vm1 = vcmask (!%p200_p3), 130048   ;;  %vm294_vm2 = vcmask (!%p200_p3), 7168   ;;  %s2399_s23 = smov (!%p200_p3), 112  }
   0x7   : > { %203 = sbr.rel (%p200_p3) target bundleno = 1691 (0x69b), region = 32  ;;  %2139 = vmatprep.subr.bf16.mxu0 (!%p200_p3), %v2395_v0  ;;  %327 = vst [vmem:[#allocation4] sm:$0xff] (!%p200_p3), %v2395_v0  ;;  %328 = vst [vmem:[#allocation4 + $0x8] sm:$0xff] (!%p200_p3), %v2395_v0  ;;  %2141 = vmatprep.mubr.msk.bf16.mxu0 (!%p200_p3), %vm2396_vm0, %v2395_v0  ;;  %v2397_v4 = vmov (!%p200_p3), -1e+30   ;;  %v2398_v13 = vmov (!%p200_p3), 0  }
   0x8   : > { %2145 = vmatprep.subr.bf16.mxu1 (!%p200_p3), %v2395_v0  ;;  %2147 = vmatprep.mubr.msk.bf16.mxu1 (!%p200_p3), %vm2396_vm0, %v2395_v0  ;;  %295 = vst.msk [vmem:[#allocation2] sm:$0xff] (!%p200_p3), %vm294_vm2, %v2397_v4  ;;  %296 = vst.msk [vmem:[#allocation2 + $0x8] sm:$0xff] (!%p200_p3), %vm294_vm2, %v2397_v4  ;;  %s2400_s24 = smov (!%p200_p3), 64   ;;  %s2401_s25 = smov (!%p200_p3), 48   ;;  %vm688_vm3 = vcmask (!%p200_p3), 261248   ;;  %vm866_vm4 = vcmask (!%p200_p3), 392448  }
   0x9   : > { %297 = vst.msk [vmem:[#allocation2 + $0x10] sm:$0xff] (!%p200_p3), %vm294_vm2, %v2397_v4  ;;  %298 = vst.msk [vmem:[#allocation2 + $0x18] sm:$0xff] (!%p200_p3), %vm294_vm2, %v2397_v4  ;;  %2270 = vset.pattern.permute.xlu1 (!%p200_p3), %v2398_v13  ;;  %2271 = vset.pattern.permute.xlu0 (!%p200_p3), %v2398_v13  ;;  %s2402_s26 = smov (!%p200_p3), 32   ;;  %s2403_s27 = smov (!%p200_p3), 16   ;;  %vm1044_vm5 = vcmask (!%p200_p3), 523648   ;;  %vm1222_vm6 = vcmask (!%p200_p3), 654848  }
   0xa   : > { %299 = vst.msk [vmem:[#allocation2 + $0x20] sm:$0xff] (!%p200_p3), %vm294_vm2, %v2397_v4  ;;  %300 = vst.msk [vmem:[#allocation2 + $0x28] sm:$0xff] (!%p200_p3), %vm294_vm2, %v2397_v4  ;;  %s2404_s4 = smov (!%p200_p3), 96   ;;  %s2405_s5 = smov (!%p200_p3), 80   ;;  %vm1400_vm7 = vcmask (!%p200_p3), 786048   ;;  %vm1578_vm8 = vcmask (!%p200_p3), 917248  }
   0xb   : > { %301 = vst.msk [vmem:[#allocation2 + $0x30] sm:$0xff] (!%p200_p3), %vm294_vm2, %v2397_v4  ;;  %302 = vst.msk [vmem:[#allocation2 + $0x38] sm:$0xff] (!%p200_p3), %vm294_vm2, %v2397_v4  ;;  %vm1756_vm9 = vcmask (!%p200_p3), 1048448  }
   0xc   : > { %303 = vst.msk [vmem:[#allocation2 + $0x40] sm:$0xff] (!%p200_p3), %vm294_vm2, %v2397_v4  ;;  %304 = vst.msk [vmem:[#allocation2 + $0x48] sm:$0xff] (!%p200_p3), %vm294_vm2, %v2397_v4 }
   0xd   : > { %305 = vst.msk [vmem:[#allocation2 + $0x50] sm:$0xff] (!%p200_p3), %vm294_vm2, %v2397_v4  ;;  %306 = vst.msk [vmem:[#allocation2 + $0x58] sm:$0xff] (!%p200_p3), %vm294_vm2, %v2397_v4 }
   0xe   : > { %s3050_s12 = smov (!%p250_p4, %s2385_s12), 1  ;;  %307 = vst.msk [vmem:[#allocation2 + $0x60] sm:$0xff] %vm294_vm2, %v2397_v4  ;;  %308 = vst.msk [vmem:[#allocation2 + $0x68] sm:$0xff] %vm294_vm2, %v2397_v4 }
   0xf   : > { %s2452_s16 = sshll.u32 %s3050_s12, 3  ;;  %309 = vst.msk [vmem:[#allocation2 + $0x70] sm:$0xff] %vm294_vm2, %v2397_v4  ;;  %310 = vst.msk [vmem:[#allocation2 + $0x78] sm:$0xff] %vm294_vm2, %v2397_v4  ;;  %v2533_v14 = vld [vmem:[#allocation2] sm:$0xff]  ;;  %v396_v17 = vld [vmem:[#allocation2 + $0x8] sm:$0xff] }
  0x10   : > { %s267_s19 = scalar_lea.vmem %s3042_s1, %s2452_s16  ;;  %s257_s22 = scalar_lea.vmem %s3041_s0, %s2452_s16  ;;  %311 = vst.msk [vmem:[#allocation3] sm:$0xff] %vm294_vm2, %v2395_v0  ;;  %312 = vst.msk [vmem:[#allocation3 + $0x8] sm:$0xff] %vm294_vm2, %v2395_v0 }
  0x11   : > { %v2458_v1 = vld [vmem:[%s267_s19] sm:$0xff]   ;;  %313 = vst.msk [vmem:[#allocation3 + $0x10] sm:$0xff] %vm294_vm2, %v2395_v0  ;;  %314 = vst.msk [vmem:[#allocation3 + $0x18] sm:$0xff] %vm294_vm2, %v2395_v0  ;;  %s277_s30 = scalar_lea.vmem %s3043_s2, %s2452_s16  ;;  %s287_s8 = scalar_lea.vmem %s3044_s3, %s2452_s16 }
  0x12   : > { %v350_v2 = vsel %vm345_vm1, %v2458_v1, 0  ;;  %v2467_v3 = vld [vmem:[%s257_s22] sm:$0xff]   ;;  %315 = vst.msk [vmem:[#allocation3 + $0x20] sm:$0xff] %vm294_vm2, %v2395_v0  ;;  %316 = vst.msk [vmem:[#allocation3 + $0x28] sm:$0xff] %vm294_vm2, %v2395_v0 }
  0x13   : > { %2140 = vmatpush3.bf16.xpose.msra.mxu0 %v350_v2  ;;  %317 = vst.msk [vmem:[#allocation3 + $0x30] sm:$0xff] %vm294_vm2, %v2395_v0  ;;  %318 = vst.msk [vmem:[#allocation3 + $0x38] sm:$0xff] %vm294_vm2, %v2395_v0  ;;  %v2550_v21 = vld [vmem:[%s277_s30] sm:$0xff]  }
  0x14   : > { %2157 = vmatprep.subr.bf16.mxu0 %v2395_v0  ;;  %319 = vst.msk [vmem:[#allocation3 + $0x40] sm:$0xff] %vm294_vm2, %v2395_v0  ;;  %320 = vst.msk [vmem:[#allocation3 + $0x48] sm:$0xff] %vm294_vm2, %v2395_v0  ;;  %2146 = vmatpush3.bf16.msra.mxu1 %v2550_v21 }
  0x15   : > { %321 = vst.msk [vmem:[#allocation3 + $0x50] sm:$0xff] %vm294_vm2, %v2395_v0  ;;  %322 = vst.msk [vmem:[#allocation3 + $0x58] sm:$0xff] %vm294_vm2, %v2395_v0  ;;  %2151 = vmatprep.subr.bf16.mxu1 %v2395_v0 }
  0x16   : > { %323 = vst.msk [vmem:[#allocation3 + $0x60] sm:$0xff] %vm294_vm2, %v2395_v0  ;;  %324 = vst.msk [vmem:[#allocation3 + $0x68] sm:$0xff] %vm294_vm2, %v2395_v0 }
  0x17   : > { %325 = vst.msk [vmem:[#allocation3 + $0x70] sm:$0xff] %vm294_vm2, %v2395_v0  ;;  %326 = vst.msk [vmem:[#allocation3 + $0x78] sm:$0xff] %vm294_vm2, %v2395_v0  ;;  %v397_v60 = vld [vmem:[#allocation3] sm:$0xff]  ;;  %v398_v63 = vld [vmem:[#allocation3 + $0x8] sm:$0xff] }
  0x1a   : > { %2142 = vmatmul.mubr.msk.bf16.vlgmr.msra.gmra.mrb[0].mxu0 %vm345_vm1, %v2467_v3 }
  0x1b   : > { %2159 = vmatprep.mubr.msk.bf16.mxu0 %vm2396_vm0, %v2395_v0 }
  0xed   : > { %v386_v5 = vpop.f32.mrb[0].mxu0 }
  0xee   : > { %v393_v6 = vmul.f32 0.25, %v386_v5  ;;  %v2143_v7 = vpop.f32.mrb[1].mxu0 }
  0xef   : > { %v389_v8 = vpop.f32.mrb[2].mxu0 }
  0xf0   : > { %v394_v9 = vmul.f32 0.25, %v389_v8  ;;  %v2144_v10 = vpop.f32.mrb[3].mxu0  ;;  %v399_v11 = vsel %vm345_vm1, %v393_v6, -inf }
  0xf1   : > { %400 = vmax.xlane.f32.xlu0 %v399_v11 }
  0xf2   : > { %v402_v12 = vsel %vm345_vm1, %v394_v9, -inf }
  0xf5   : > { %403 = vmax.xlane.f32.xlu0 %v402_v12 }
 0x10b   : > { %515 = vrot.lane.b32.xlu0 %v2458_v1, %s2399_s23 }
 0x10f   : > { %1047 = vrot.lane.b32.xlu0 %v2467_v3, %s2400_s24 }
 0x113   : > { %1225 = vrot.lane.b32.xlu0 %v2467_v3, %s2401_s25 }
 0x117   : > { %1403 = vrot.lane.b32.xlu0 %v2467_v3, %s2402_s26 }
 0x11b   : > { %1581 = vrot.lane.b32.xlu0 %v2467_v3, %s2403_s27 }
 0x17e   : > { %v401_v15 = vpop.xlane.xlu0 %400 }
 0x17f   : > { %v2536_v16 = vmax.f32 %v2533_v14, %v401_v15 }
 0x181   : > { %v407_v18 = vsub.f32 %v2533_v14, %v2536_v16  ;;  %442 = vst.msk [vmem:[#allocation2] sm:$0xff] %vm294_vm2, %v2536_v16  ;;  %415 = vperm.xlu1 %2270, %v2536_v16  }
 0x182   : > { %v404_v19 = vpop.xlane.xlu0 %403 }
 0x183   : > { %v406_v20 = vmax.f32 %v396_v17, %v404_v19  ;;  %v409_v57 = vmul.f32 1.442695, %v407_v18 }
 0x185   : > { %443 = vst.msk [vmem:[#allocation2 + $0x8] sm:$0xff] %vm294_vm2, %v406_v20  ;;  %420 = vperm.xlu1 %2270, %v406_v20   ;;  %v408_v22 = vsub.f32 %v396_v17, %v406_v20 }
 0x186   : > { %v516_v34 = vpop.permute.xlu0 %515 }
 0x187   : > { %v411_v23 = vmul.f32 1.442695, %v408_v22  ;;  %v521_v38 = vsel %vm345_vm1, %v516_v34, 0 }
 0x189   : > { %513 = vrot.lane.b32.xlu1 %v2467_v3, %s2399_s23  ;;  %2275 = vpow2.f32 %v411_v23 }
 0x18a   : > { %v1048_v48 = vpop.permute.xlu0 %1047 }
 0x18d   : > { %693 = vrot.lane.b32.xlu1 %v2458_v1, %s2404_s4 }
 0x18e   : > { %v1226_v51 = vpop.permute.xlu0 %1225 }
 0x191   : > { %691 = vrot.lane.b32.xlu1 %v2467_v3, %s2404_s4 }
 0x192   : > { %v1404_v54 = vpop.permute.xlu0 %1403 }
 0x193   : > { %v2570_v24 = vpop.eup %2275 }
 0x194   : > { %v430_v2 = vmul.f32 %v2570_v24, %v398_v63 }
 0x195   : > { %871 = vrot.lane.b32.xlu1 %v2458_v1, %s2405_s5 }
 0x196   : > { %v1582_v56 = vpop.permute.xlu0 %1581 }
 0x199   : > { %869 = vrot.lane.b32.xlu1 %v2467_v3, %s2405_s5 }
 0x19d   : > { %1049 = vrot.lane.b32.xlu1 %v2458_v1, %s2400_s24 }
 0x1a1   : > { %1227 = vrot.lane.b32.xlu1 %v2458_v1, %s2401_s25 }
 0x1a5   : > { %1405 = vrot.lane.b32.xlu1 %v2458_v1, %s2402_s26 }
 0x1a9   : > { %1583 = vrot.lane.b32.xlu1 %v2458_v1, %s2403_s27 }
 0x1ad   : > { %504 = vperm.xlu1 %2270, %v2570_v24  }
 0x200   : > { %v416_v25 = vpop.permute.xlu1 %415 }
 0x201   : > { %v423_v26 = vsub.f32 %v393_v6, %v416_v25 }
 0x203   : > { %v425_v27 = vmul.f32 1.442695, %v423_v26 }
 0x204   : > { %v421_v28 = vpop.permute.xlu1 %420 }
 0x205   : > { %2277 = vpow2.f32 %v425_v27  ;;  %v424_v29 = vsub.f32 %v394_v9, %v421_v28 }
 0x207   : > { %v427_v30 = vmul.f32 1.442695, %v424_v29 }
 0x208   : > { %v514_v31 = vpop.permute.xlu1 %513 }
 0x209   : > { %2279 = vpow2.f32 %v427_v30 }
 0x20a   : > { %2281 = vpow2.f32 %v409_v57 }
 0x20c   : > { %v694_v36 = vpop.permute.xlu1 %693 }
 0x20d   : > { %v699_v41 = vsel %vm345_vm1, %v694_v36, 0 }
 0x20f   : > { %v2278_v32 = vpop.eup %2277 }
 0x210   : > { %v431_v33 = vsel %vm345_vm1, %v2278_v32, 0.0  ;;  %v692_v40 = vpop.permute.xlu1 %691 }
 0x211   : > { %432 = vadd.xlane.f32.xlu1 %v431_v33 }
 0x213   : > { %v2280_v35 = vpop.eup %2279 }
 0x214   : > { %v434_v37 = vsel %vm345_vm1, %v2280_v35, 0.0  ;;  %v444_v39 = vpack.c.bf16 %v2280_v35, %v2278_v32  ;;  %v872_v42 = vpop.permute.xlu1 %871  ;;  %v2613_v58 = vpop.eup %2281 }
 0x215   : > { %435 = vadd.xlane.f32.xlu0 %v434_v37  ;;  %v877_v43 = vsel %vm345_vm1, %v872_v42, 0  ;;  %v429_v61 = vmul.f32 %v2613_v58, %v397_v60 }
 0x216   : > { %2148 = vmatmul.mubr.msk.bf16.vlgmr.msra.gmra.mrb[0].mxu1 %vm345_vm1, %v444_v39 }
 0x217   : > { %2152 = vmatpush3.bf16.xpose.msra.mxu1 %v521_v38  ;;  %2153 = vmatprep.mubr.msk.bf16.mxu1 %vm2396_vm0, %v2395_v0 }
 0x218   : > { %2163 = vmatprep.subr.bf16.mxu1 %v2395_v0  ;;  %v870_v44 = vpop.permute.xlu1 %869 }
 0x21c   : > { %v1050_v45 = vpop.permute.xlu1 %1049 }
 0x21d   : > { %v1055_v46 = vsel %vm345_vm1, %v1050_v45, 0 }
 0x21e   : > { %2154 = vmatmul.mubr.msk.bf16.vlgmr.msra.gmra.mrb[4].mxu1 %vm345_vm1, %v514_v31 }
 0x21f   : > { %2164 = vmatpush3.bf16.xpose.msra.mxu1 %v699_v41  ;;  %2165 = vmatprep.mubr.msk.bf16.mxu1 %vm2396_vm0, %v2395_v0 }
 0x220   : > { %2175 = vmatprep.subr.bf16.mxu1 %v2395_v0  ;;  %v1228_v47 = vpop.permute.xlu1 %1227 }
 0x221   : > { %v1233_v49 = vsel %vm345_vm1, %v1228_v47, 0 }
 0x224   : > { %v1406_v50 = vpop.permute.xlu1 %1405 }
 0x225   : > { %v1411_v52 = vsel %vm345_vm1, %v1406_v50, 0 }
 0x226   : > { %2166 = vmatmul.mubr.msk.bf16.vlgmr.msra.gmra.mrb[8].mxu1 %vm345_vm1, %v692_v40 }
 0x227   : > { %2176 = vmatpush3.bf16.xpose.msra.mxu1 %v877_v43  ;;  %2177 = vmatprep.mubr.msk.bf16.mxu1 %vm2396_vm0, %v2395_v0 }
 0x228   : > { %2187 = vmatprep.subr.bf16.mxu1 %v2395_v0  ;;  %v1584_v53 = vpop.permute.xlu1 %1583 }
 0x229   : > { %v1589_v55 = vsel %vm345_vm1, %v1584_v53, 0 }
 0x22c   : > { %v505_v59 = vpop.permute.xlu1 %504 }
 0x22d   : > { %v508_v6 = vmul.f32 0.0, %v505_v59 }
 0x22e   : > { %2178 = vmatmul.mubr.msk.bf16.vlgmr.msra.gmra.mrb[12].mxu1 %vm345_vm1, %v870_v44 }
 0x22f   : > { %2188 = vmatpush3.bf16.xpose.msra.mxu1 %v1055_v46  ;;  %2189 = vmatprep.mubr.msk.bf16.mxu1 %vm2396_vm0, %v2395_v0 }
 0x230   : > { %2199 = vmatprep.subr.bf16.mxu1 %v2395_v0 }
 0x236   : > { %2190 = vmatmul.mubr.msk.bf16.vlgmr.msra.gmra.mrb[16].mxu1 %vm345_vm1, %v1048_v48 }
 0x237   : > { %2200 = vmatpush3.bf16.xpose.msra.mxu1 %v1233_v49  ;;  %2201 = vmatprep.mubr.msk.bf16.mxu1 %vm2396_vm0, %v2395_v0 }
 0x238   : > { %2211 = vmatprep.subr.bf16.mxu1 %v2395_v0 }
 0x23e   : > { %2202 = vmatmul.mubr.msk.bf16.vlgmr.msra.gmra.mrb[20].mxu1 %vm345_vm1, %v1226_v51 }
 0x23f   : > { %2212 = vmatpush3.bf16.xpose.msra.mxu1 %v1411_v52  ;;  %2213 = vmatprep.mubr.msk.bf16.mxu1 %vm2396_vm0, %v2395_v0 }
 0x240   : > { %2223 = vmatprep.subr.bf16.mxu1 %v2395_v0 }
 0x246   : > { %2214 = vmatmul.mubr.msk.bf16.vlgmr.msra.gmra.mrb[24].mxu1 %vm345_vm1, %v1404_v54 }
 0x247   : > { %2224 = vmatpush3.bf16.xpose.msra.mxu1 %v1589_v55  ;;  %2225 = vmatprep.mubr.msk.bf16.mxu1 %vm2396_vm0, %v2395_v0 }
 0x24e   : > { %2226 = vmatmul.mubr.msk.bf16.vlgmr.msra.gmra.mrb[28].mxu1 %vm345_vm1, %v1582_v56 }
 0x29e   : > { %v433_v62 = vpop.xlane.xlu1 %432 }
 0x29f   : > { %v437_v1 = vadd.f32 %v433_v62, %v429_v61 }
 0x2a1   : > { %440 = vst.msk [vmem:[#allocation3] sm:$0xff] %vm294_vm2, %v437_v1 }
 0x2a2   : > { %v436_v3 = vpop.xlane.xlu0 %435 }
 0x2a3   : > { %v438_v4 = vadd.f32 %v436_v3, %v430_v2 }
 0x2a5   : > { %441 = vst.msk [vmem:[#allocation3 + $0x8] sm:$0xff] %vm294_vm2, %v438_v4  ;;  %v567_v4 = vld [vmem:[#allocation2 + $0x10] sm:$0xff] }
 0x2e9   : > { %v2619_v5 = vpop.f32.mrb[0].mxu1 }
 0x2ea   : > { %v2149_v7 = vpop.f32.mrb[1].mxu1 }
 0x2eb   : > { %v491_v8 = vpop.f32.mrb[2].mxu1  ;;  %v568_v7 = vld [vmem:[#allocation2 + $0x18] sm:$0xff] }
 0x2ec   : > { %v510_v9 = vadd.f32 %v508_v6, %v491_v8  ;;  %v2150_v10 = vpop.f32.mrb[3].mxu1 }
 0x2ee   : > { %512 = vst.msk [vmem:[#allocation4 + $0x8] sm:$0xff] %vm345_vm1, %v510_v9 }
 0x2f1   : > { %v557_v11 = vpop.f32.mrb[4].mxu1 }
 0x2f2   : > { %v2622_v12 = vmul.f32 0.25, %v557_v11  ;;  %v2155_v13 = vpop.f32.mrb[5].mxu1 }
 0x2f3   : > { %v560_v14 = vpop.f32.mrb[6].mxu1  ;;  %v2681_v13 = vld [vmem:[#allocation2 + $0x28] sm:$0xff] }
 0x2f4   : > { %v2624_v15 = vmul.f32 0.25, %v560_v14  ;;  %v2156_v16 = vpop.f32.mrb[7].mxu1  ;;  %v572_v17 = vsel %vm345_vm1, %v2622_v12, -inf }
 0x2f5   : > { %573 = vmax.xlane.f32.xlu1 %v572_v17  ;;  %v2691_v17 = vld [vmem:[#allocation2 + $0x30] sm:$0xff] }
 0x2f6   : > { %v575_v18 = vsel %vm345_vm1, %v2624_v15, -inf }
 0x2f7   : > { %576 = vmax.xlane.f32.xlu0 %v575_v18 }
 0x2f9   : > { %v735_v19 = vpop.f32.mrb[8].mxu1 }
 0x2fa   : > { %v2167_v20 = vpop.f32.mrb[9].mxu1  ;;  %v2654_v54 = vmul.f32 0.25, %v735_v19 }
 0x2fb   : > { %v738_v22 = vpop.f32.mrb[10].mxu1  ;;  %v2696_v20 = vld [vmem:[#allocation2 + $0x38] sm:$0xff] }
 0x2fc   : > { %v2630_v23 = vmul.f32 0.25, %v738_v22  ;;  %v2168_v24 = vpop.f32.mrb[11].mxu1  ;;  %v750_v55 = vsel %vm345_vm1, %v2654_v54, -inf }
 0x2fe   : > { %v753_v25 = vsel %vm345_vm1, %v2630_v23, -inf }
 0x2ff   : > { %754 = vmax.xlane.f32.xlu1 %v753_v25 }
 0x301   : > { %v913_v26 = vpop.f32.mrb[12].mxu1 }
 0x302   : > { %v2634_v27 = vmul.f32 0.25, %v913_v26  ;;  %v2179_v28 = vpop.f32.mrb[13].mxu1  ;;  %v2705_v26 = vld [vmem:[#allocation2 + $0x40] sm:$0xff] }
 0x303   : > { %v916_v29 = vpop.f32.mrb[14].mxu1 }
 0x304   : > { %v2636_v30 = vmul.f32 0.25, %v916_v29  ;;  %v2180_v31 = vpop.f32.mrb[15].mxu1  ;;  %v928_v32 = vsel %vm345_vm1, %v2634_v27, -inf }
 0x305   : > { %929 = vmax.xlane.f32.xlu1 %v928_v32  ;;  %v2714_v32 = vld [vmem:[#allocation2 + $0x48] sm:$0xff] }
 0x306   : > { %v931_v33 = vsel %vm345_vm1, %v2636_v30, -inf }
 0x309   : > { %v1091_v34 = vpop.f32.mrb[16].mxu1  ;;  %932 = vmax.xlane.f32.xlu1 %v931_v33 }
 0x30a   : > { %v2642_v35 = vmul.f32 0.25, %v1091_v34  ;;  %v2191_v36 = vpop.f32.mrb[17].mxu1 }
 0x30b   : > { %v1094_v37 = vpop.f32.mrb[18].mxu1 }
 0x30c   : > { %v2644_v38 = vmul.f32 0.25, %v1094_v37  ;;  %v2192_v39 = vpop.f32.mrb[19].mxu1  ;;  %v1106_v40 = vsel %vm345_vm1, %v2642_v35, -inf }
 0x30d   : > { %617 = vrot.lane.b32.xlu0 %v2550_v21, %s2399_s23  ;;  %1107 = vmax.xlane.f32.xlu1 %v1106_v40 }
 0x30e   : > { %v1109_v41 = vsel %vm345_vm1, %v2644_v38, -inf }
 0x311   : > { %v1269_v42 = vpop.f32.mrb[20].mxu1  ;;  %1110 = vmax.xlane.f32.xlu1 %v1109_v41 }
 0x312   : > { %v2203_v43 = vpop.f32.mrb[21].mxu1  ;;  %v2658_v56 = vmul.f32 0.25, %v1269_v42 }
 0x313   : > { %v1272_v44 = vpop.f32.mrb[22].mxu1  ;;  %v745_v43 = vld [vmem:[#allocation2 + $0x20] sm:$0xff] }
 0x314   : > { %v2204_v45 = vpop.f32.mrb[23].mxu1  ;;  %v1284_v57 = vsel %vm345_vm1, %v2658_v56, -inf  ;;  %v2662_v59 = vmul.f32 0.25, %v1272_v44 }
 0x316   : > { %v1287_v60 = vsel %vm345_vm1, %v2662_v59, -inf }
 0x319   : > { %v1447_v46 = vpop.f32.mrb[24].mxu1 }
 0x31a   : > { %v2215_v47 = vpop.f32.mrb[25].mxu1  ;;  %v2666_v61 = vmul.f32 0.25, %v1447_v46 }
 0x31b   : > { %v2652_v48 = vpop.f32.mrb[26].mxu1  ;;  %v1279_v47 = vld [vmem:[#allocation2 + $0x50] sm:$0xff] }
 0x31c   : > { %v2216_v49 = vpop.f32.mrb[27].mxu1  ;;  %v1462_v62 = vsel %vm345_vm1, %v2666_v61, -inf  ;;  %v2728_v39 = vmul.f32 0.25, %v2652_v48 }
 0x31e   : > { %v1465_v40 = vsel %vm345_vm1, %v2728_v39, -inf }
 0x321   : > { %v1625_v50 = vpop.f32.mrb[28].mxu1 }
 0x322   : > { %v2227_v51 = vpop.f32.mrb[29].mxu1  ;;  %v2670_v63 = vmul.f32 0.25, %v1625_v50 }
 0x323   : > { %v1628_v52 = vpop.f32.mrb[30].mxu1  ;;  %v2734_v51 = vld [vmem:[#allocation2 + $0x58] sm:$0xff] }
 0x324   : > { %v2228_v53 = vpop.f32.mrb[31].mxu1  ;;  %v1640_v1 = vsel %vm345_vm1, %v2670_v63, -inf  ;;  %v2674_v2 = vmul.f32 0.25, %v1628_v52 }
 0x326   : > { %v1643_v3 = vsel %vm345_vm1, %v2674_v2, -inf }
 0x32c   : > { %751 = vmax.xlane.f32.xlu0 %v750_v55 }
 0x330   : > { %1285 = vmax.xlane.f32.xlu0 %v1284_v57  ;;  %v1457_v57 = vld [vmem:[#allocation2 + $0x60] sm:$0xff] }
 0x334   : > { %1288 = vmax.xlane.f32.xlu0 %v1287_v60 }
 0x338   : > { %1463 = vmax.xlane.f32.xlu0 %v1462_v62 }
 0x33c   : > { %1641 = vmax.xlane.f32.xlu0 %v1640_v1 }
 0x340   : > { %1644 = vmax.xlane.f32.xlu0 %v1643_v3  ;;  %v2750_v3 = vld [vmem:[#allocation2 + $0x70] sm:$0xff] }
 0x356   : > { %499 = vperm.xlu0 %2271, %v2613_v58  }
 0x382   : > { %v574_v6 = vpop.xlane.xlu1 %573 }
 0x383   : > { %v578_v8 = vmax.f32 %v567_v4, %v574_v6 }
 0x384   : > { %v577_v9 = vpop.xlane.xlu0 %576 }
 0x385   : > { %614 = vst.msk [vmem:[#allocation2 + $0x10] sm:$0xff] %vm294_vm2, %v578_v8  ;;  %v579_v10 = vmax.f32 %v568_v7, %v577_v9  ;;  %588 = vperm.xlu1 %2270, %v578_v8   ;;  %v580_v41 = vsub.f32 %v567_v4, %v578_v8  ;;  %v2759_v8 = vld [vmem:[#allocation2 + $0x78] sm:$0xff] }
 0x387   : > { %615 = vst.msk [vmem:[#allocation2 + $0x18] sm:$0xff] %vm294_vm2, %v579_v10  ;;  %v582_v42 = vmul.f32 1.442695, %v580_v41  ;;  %v581_v44 = vsub.f32 %v568_v7, %v579_v10 }
 0x388   : > { %v618_v11 = vpop.permute.xlu0 %617 }
 0x389   : > { %593 = vperm.xlu1 %2270, %v579_v10   ;;  %2158 = vmatpush3.bf16.msra.mxu0 %v618_v11  ;;  %2283 = vpow2.f32 %v582_v42  ;;  %v584_v49 = vmul.f32 1.442695, %v581_v44 }
 0x38a   : > { %2169 = vmatprep.subr.bf16.mxu0 %v2395_v0 }
 0x38b   : > { %2285 = vpow2.f32 %v584_v49 }
 0x38c   : > { %v755_v14 = vpop.xlane.xlu1 %754 }
 0x38d   : > { %v2685_v58 = vmax.f32 %v2681_v13, %v755_v14 }
 0x38f   : > { %v759_v16 = vsub.f32 %v2681_v13, %v2685_v58  ;;  %793 = vst.msk [vmem:[#allocation2 + $0x28] sm:$0xff] %vm294_vm2, %v2685_v58 }
 0x392   : > { %v930_v18 = vpop.xlane.xlu1 %929 }
 0x393   : > { %v2694_v19 = vmax.f32 %v2691_v17, %v930_v18  ;;  %v2741_v55 = vpop.eup %2283 }
 0x395   : > { %v936_v22 = vsub.f32 %v2691_v17, %v2694_v19  ;;  %970 = vst.msk [vmem:[#allocation2 + $0x30] sm:$0xff] %vm294_vm2, %v2694_v19  ;;  %v2757_v7 = vpop.eup %2285 }
 0x396   : > { %v933_v24 = vpop.xlane.xlu1 %932 }
 0x397   : > { %v2703_v25 = vmax.f32 %v2696_v20, %v933_v24 }
 0x399   : > { %v937_v28 = vsub.f32 %v2696_v20, %v2703_v25  ;;  %971 = vst.msk [vmem:[#allocation2 + $0x38] sm:$0xff] %vm294_vm2, %v2703_v25 }
 0x39a   : > { %v1108_v29 = vpop.xlane.xlu1 %1107 }
 0x39b   : > { %v2712_v31 = vmax.f32 %v2705_v26, %v1108_v29 }
 0x39d   : > { %v1114_v33 = vsub.f32 %v2705_v26, %v2712_v31  ;;  %1148 = vst.msk [vmem:[#allocation2 + $0x40] sm:$0xff] %vm294_vm2, %v2712_v31 }
 0x39e   : > { %v1111_v34 = vpop.xlane.xlu1 %1110 }
 0x39f   : > { %v2721_v36 = vmax.f32 %v2714_v32, %v1111_v34 }
 0x3a1   : > { %v1115_v37 = vsub.f32 %v2714_v32, %v2721_v36  ;;  %1149 = vst.msk [vmem:[#allocation2 + $0x48] sm:$0xff] %vm294_vm2, %v2721_v36 }
 0x3a3   : > { %v1118_v42 = vmul.f32 1.442695, %v1115_v37 }
 0x3ad   : > { %1466 = vmax.xlane.f32.xlu1 %v1465_v40  ;;  %v762_v40 = vmul.f32 1.442695, %v759_v16 }
 0x3b9   : > { %v752_v45 = vpop.xlane.xlu0 %751 }
 0x3ba   : > { %v756_v46 = vmax.f32 %v745_v43, %v752_v45 }
 0x3bc   : > { %792 = vst.msk [vmem:[#allocation2 + $0x20] sm:$0xff] %vm294_vm2, %v756_v46  ;;  %766 = vperm.xlu0 %2271, %v756_v46   ;;  %v758_v29 = vsub.f32 %v745_v43, %v756_v46 }
 0x3bd   : > { %v1286_v50 = vpop.xlane.xlu0 %1285 }
 0x3be   : > { %949 = vperm.xlu1 %2270, %v2703_v25   ;;  %v1290_v48 = vmax.f32 %v1279_v47, %v1286_v50  ;;  %v760_v34 = vmul.f32 1.442695, %v758_v29 }
 0x3c0   : > { %1326 = vst.msk [vmem:[#allocation2 + $0x50] sm:$0xff] %vm294_vm2, %v1290_v48  ;;  %771 = vperm.xlu0 %2271, %v2685_v58   ;;  %2287 = vpow2.f32 %v760_v34  ;;  %v1292_v41 = vsub.f32 %v1279_v47, %v1290_v48 }
 0x3c1   : > { %v1289_v52 = vpop.xlane.xlu0 %1288  ;;  %2289 = vpow2.f32 %v762_v40 }
 0x3c2   : > { %1300 = vperm.xlu1 %2270, %v1290_v48   ;;  %v2739_v53 = vmax.f32 %v2734_v51, %v1289_v52  ;;  %v1294_v13 = vmul.f32 1.442695, %v1292_v41 }
 0x3c4   : > { %668 = vperm.xlu0 %2271, %v2741_v55   ;;  %v1293_v60 = vsub.f32 %v2734_v51, %v2739_v53  ;;  %1327 = vst.msk [vmem:[#allocation2 + $0x58] sm:$0xff] %vm294_vm2, %v2739_v53 }
 0x3c5   : > { %v1464_v62 = vpop.xlane.xlu0 %1463 }
 0x3c6   : > { %v1468_v1 = vmax.f32 %v1457_v57, %v1464_v62  ;;  %1151 = vrot.lane.b32.xlu1 %v2550_v21, %s2400_s24  ;;  %v1296_v17 = vmul.f32 1.442695, %v1293_v60 }
 0x3c8   : > { %944 = vperm.xlu0 %2271, %v2694_v19   ;;  %1504 = vst.msk [vmem:[#allocation2 + $0x60] sm:$0xff] %vm294_vm2, %v1468_v1  ;;  %v1470_v58 = vsub.f32 %v1457_v57, %v1468_v1  ;;  %v1458_v57 = vld [vmem:[#allocation2 + $0x68] sm:$0xff] }
 0x3c9   : > { %v1642_v4 = vpop.xlane.xlu0 %1641 }
 0x3ca   : > { %v2755_v6 = vmax.f32 %v2750_v3, %v1642_v4  ;;  %v2794_v43 = vpop.eup %2287  ;;  %v1472_v20 = vmul.f32 1.442695, %v1470_v58 }
 0x3cb   : > { %v2797_v16 = vpop.eup %2289 }
 0x3cc   : > { %673 = vperm.xlu0 %2271, %v2757_v7   ;;  %1682 = vst.msk [vmem:[#allocation2 + $0x70] sm:$0xff] %vm294_vm2, %v2755_v6 }
 0x3cd   : > { %v1645_v9 = vpop.xlane.xlu0 %1644 }
 0x3ce   : > { %v2765_v10 = vmax.f32 %v2759_v8, %v1645_v9  ;;  %v1116_v9 = vmul.f32 1.442695, %v1114_v33 }
 0x3d0   : > { %795 = vrot.lane.b32.xlu0 %v2550_v21, %s2404_s4  ;;  %v1649_v11 = vsub.f32 %v2759_v8, %v2765_v10  ;;  %1683 = vst.msk [vmem:[#allocation2 + $0x78] sm:$0xff] %vm294_vm2, %v2765_v10 }
 0x3d4   : > { %1122 = vperm.xlu0 %2271, %v2712_v31  }
 0x3d5   : > { %v500_v14 = vpop.permute.xlu0 %499 }
 0x3d6   : > { %v507_v18 = vmul.f32 0.0, %v500_v14 }
 0x3d8   : > { %v509_v24 = vadd.f32 %v507_v18, %v2619_v5  ;;  %1127 = vperm.xlu0 %2271, %v2721_v36   ;;  %v940_v5 = vmul.f32 1.442695, %v937_v28 }
 0x3da   : > { %511 = vst.msk [vmem:[#allocation4] sm:$0xff] %vm345_vm1, %v509_v24  ;;  %2291 = vpow2.f32 %v940_v5 }
 0x3db   : > { %2293 = vpow2.f32 %v1118_v42 }
 0x3dc   : > { %973 = vrot.lane.b32.xlu0 %v2550_v21, %s2405_s5  ;;  %2295 = vpow2.f32 %v1294_v13 }
 0x3dd   : > { %2297 = vpow2.f32 %v1472_v20 }
 0x3e0   : > { %1305 = vperm.xlu0 %2271, %v2739_v53  }
 0x3e4   : > { %1478 = vperm.xlu0 %2271, %v1468_v1   ;;  %v2800_v25 = vpop.eup %2291 }
 0x3e5   : > { %v2803_v28 = vpop.eup %2293 }
 0x3e6   : > { %v2806_v32 = vpop.eup %2295 }
 0x3e7   : > { %v2810_v44 = vpop.eup %2297 }
 0x3e8   : > { %1329 = vrot.lane.b32.xlu0 %v2550_v21, %s2401_s25 }
 0x3ec   : > { %1661 = vperm.xlu0 %2271, %v2765_v10  }
 0x3f0   : > { %1685 = vrot.lane.b32.xlu0 %v2550_v21, %s2403_s27 }
 0x3f4   : > { %846 = vperm.xlu0 %2271, %v2794_v43  }
 0x3f8   : > { %851 = vperm.xlu0 %2271, %v2797_v16  }
 0x3fc   : > { %1029 = vperm.xlu0 %2271, %v2800_v25  }
 0x400   : > { %1207 = vperm.xlu0 %2271, %v2803_v28  }
 0x404   : > { %v589_v36 = vpop.permute.xlu1 %588  ;;  %1380 = vperm.xlu0 %2271, %v2806_v32  }
 0x405   : > { %v596_v37 = vsub.f32 %v2622_v12, %v589_v36 }
 0x407   : > { %v598_v45 = vmul.f32 1.442695, %v596_v37 }
 0x408   : > { %v594_v46 = vpop.permute.xlu1 %593  ;;  %1558 = vperm.xlu0 %2271, %v2810_v44  }
 0x409   : > { %v597_v47 = vsub.f32 %v2624_v15, %v594_v46  ;;  %2299 = vpow2.f32 %v598_v45  ;;  %v938_v15 = vmul.f32 1.442695, %v936_v22 }
 0x40b   : > { %v600_v49 = vmul.f32 1.442695, %v597_v47 }
 0x40d   : > { %2301 = vpow2.f32 %v600_v49 }
 0x40e   : > { %2303 = vpow2.f32 %v938_v15 }
 0x40f   : > { %2305 = vpow2.f32 %v1116_v9 }
 0x413   : > { %v2300_v50 = vpop.eup %2299 }
 0x414   : > { %v604_v12 = vsel %vm345_vm1, %v2300_v50, 0.0 }
 0x417   : > { %v2814_v48 = vpop.eup %2301 }
 0x418   : > { %v616_v52 = vpack.c.bf16 %v2814_v48, %v2300_v50  ;;  %v2838_v31 = vpop.eup %2303 }
 0x419   : > { %v2845_v40 = vpop.eup %2305 }
 0x41a   : > { %2160 = vmatmul.mubr.msk.bf16.vlgmr.msra.gmra.mrb[4].mxu0 %vm345_vm1, %v616_v52 }
 0x41b   : > { %2171 = vmatprep.mubr.msk.bf16.mxu0 %vm2396_vm0, %v2395_v0 }
 0x427   : > { %605 = vadd.xlane.f32.xlu0 %v604_v12 }
 0x43a   : > { %v1467_v62 = vpop.xlane.xlu1 %1466 }
 0x43b   : > { %v1469_v1 = vmax.f32 %v1458_v57, %v1467_v62  ;;  %v767_v4 = vpop.permute.xlu0 %766 }
 0x43c   : > { %v774_v14 = vsub.f32 %v2654_v54, %v767_v4 }
 0x43d   : > { %1505 = vst.msk [vmem:[#allocation2 + $0x68] sm:$0xff] %vm294_vm2, %v1469_v1  ;;  %1483 = vperm.xlu1 %2270, %v1469_v1   ;;  %v1471_v19 = vsub.f32 %v1458_v57, %v1469_v1 }
 0x43e   : > { %v776_v22 = vmul.f32 1.442695, %v774_v14 }
 0x43f   : > { %v772_v18 = vpop.permute.xlu0 %771  ;;  %v1474_v54 = vmul.f32 1.442695, %v1471_v19 }
 0x440   : > { %v775_v24 = vsub.f32 %v2630_v23, %v772_v18  ;;  %v950_v23 = vpop.permute.xlu1 %949 }
 0x441   : > { %1656 = vperm.xlu1 %2270, %v2755_v6   ;;  %v953_v51 = vsub.f32 %v2636_v30, %v950_v23 }
 0x442   : > { %v778_v29 = vmul.f32 1.442695, %v775_v24 }
 0x443   : > { %v2834_v34 = vpop.permute.xlu0 %668  ;;  %v956_v5 = vmul.f32 1.442695, %v953_v51 }
 0x444   : > { %2307 = vpow2.f32 %v778_v29  ;;  %v1301_v13 = vpop.permute.xlu1 %1300 }
 0x445   : > { %2309 = vpow2.f32 %v1296_v17  ;;  %1507 = vrot.lane.b32.xlu1 %v2550_v21, %s2402_s26  ;;  %v1308_v45 = vsub.f32 %v2658_v56, %v1301_v13 }
 0x446   : > { %2311 = vpow2.f32 %v776_v22 }
 0x447   : > { %v945_v26 = vpop.permute.xlu0 %944  ;;  %2313 = vpow2.f32 %v1474_v54  ;;  %v1310_v52 = vmul.f32 1.442695, %v1308_v45 }
 0x448   : > { %v952_v33 = vsub.f32 %v2634_v27, %v945_v26  ;;  %v1152_v62 = vpop.permute.xlu1 %1151 }
 0x449   : > { %1024 = vperm.xlu1 %2270, %v2838_v31  }
 0x44a   : > { %v954_v53 = vmul.f32 1.442695, %v952_v33  ;;  %v607_v33 = vsel %vm345_vm1, %v2814_v48, 0.0 }
 0x44b   : > { %v2843_v60 = vpop.permute.xlu0 %673 }
 0x44c   : > { %2315 = vpow2.f32 %v954_v53 }
 0x44d   : > { %1202 = vperm.xlu1 %2270, %v2845_v40   ;;  %2317 = vpow2.f32 %v956_v5 }
 0x44e   : > { %v2848_v21 = vpop.eup %2307 }
 0x44f   : > { %v2850_v41 = vpop.eup %2309  ;;  %v796_v42 = vpop.permute.xlu0 %795  ;;  %v785_v53 = vsel %vm345_vm1, %v2848_v21, 0.0 }
 0x450   : > { %v2852_v27 = vpop.eup %2311  ;;  %2170 = vmatpush3.bf16.msra.mxu0 %v796_v42 }
 0x451   : > { %1385 = vperm.xlu1 %2270, %v2850_v41   ;;  %v794_v30 = vpack.c.bf16 %v2848_v21, %v2852_v27  ;;  %2181 = vmatprep.subr.bf16.mxu0 %v2395_v0  ;;  %v2859_v20 = vpop.eup %2313  ;;  %v782_v51 = vsel %vm345_vm1, %v2852_v27, 0.0 }
 0x453   : > { %2172 = vmatmul.mubr.msk.bf16.vlgmr.msra.gmra.mrb[8].mxu0 %vm345_vm1, %v794_v30  ;;  %v1123_v58 = vpop.permute.xlu0 %1122 }
 0x454   : > { %v1130_v36 = vsub.f32 %v2642_v35, %v1123_v58  ;;  %2183 = vmatprep.mubr.msk.bf16.mxu0 %vm2396_vm0, %v2395_v0 }
 0x455   : > { %1563 = vperm.xlu1 %2270, %v2859_v20  }
 0x456   : > { %v2316_v37 = vpop.eup %2315  ;;  %v1132_v46 = vmul.f32 1.442695, %v1130_v36 }
 0x457   : > { %v1128_v47 = vpop.permute.xlu0 %1127  ;;  %v960_v49 = vsel %vm345_vm1, %v2316_v37, 0.0  ;;  %v2318_v35 = vpop.eup %2317 }
 0x458   : > { %v1131_v50 = vsub.f32 %v2644_v38, %v1128_v47  ;;  %961 = vadd.xlane.f32.xlu0 %v960_v49  ;;  %2319 = vpow2.f32 %v1132_v46  ;;  %v972_v15 = vpack.c.bf16 %v2318_v35, %v2316_v37  ;;  %v963_v5 = vsel %vm345_vm1, %v2318_v35, 0.0  ;;  %v570_v46 = vld [vmem:[#allocation3 + $0x10] sm:$0xff] }
 0x459   : > { %v602_v47 = vmul.f32 %v2741_v55, %v570_v46 }
 0x45a   : > { %v1134_v12 = vmul.f32 1.442695, %v1131_v50 }
 0x45b   : > { %v974_v57 = vpop.permute.xlu0 %973 }
 0x45c   : > { %2321 = vpow2.f32 %v1134_v12  ;;  %2182 = vmatpush3.bf16.msra.mxu0 %v974_v57 }
 0x45d   : > { %2193 = vmatprep.subr.bf16.mxu0 %v2395_v0  ;;  %2323 = vpow2.f32 %v1310_v52 }
 0x45f   : > { %2184 = vmatmul.mubr.msk.bf16.vlgmr.msra.gmra.mrb[12].mxu0 %vm345_vm1, %v972_v15  ;;  %v1306_v56 = vpop.permute.xlu0 %1305 }
 0x460   : > { %v1309_v1 = vsub.f32 %v2662_v59, %v1306_v56  ;;  %2194 = vmatpush3.bf16.msra.mxu0 %v1152_v62  ;;  %2195 = vmatprep.mubr.msk.bf16.mxu0 %vm2396_vm0, %v2395_v0 }
 0x461   : > { %2205 = vmatprep.subr.bf16.mxu0 %v2395_v0 }
 0x462   : > { %v1312_v38 = vmul.f32 1.442695, %v1309_v1  ;;  %v2320_v14 = vpop.eup %2319 }
 0x463   : > { %v1479_v4 = vpop.permute.xlu0 %1478  ;;  %v1138_v30 = vsel %vm345_vm1, %v2320_v14, 0.0 }
 0x464   : > { %2325 = vpow2.f32 %v1312_v38  ;;  %v1486_v9 = vsub.f32 %v2666_v61, %v1479_v4 }
 0x466   : > { %v2322_v18 = vpop.eup %2321  ;;  %v1488_v24 = vmul.f32 1.442695, %v1486_v9 }
 0x467   : > { %v1141_v17 = vsel %vm345_vm1, %v2322_v18, 0.0  ;;  %v1150_v19 = vpack.c.bf16 %v2322_v18, %v2320_v14  ;;  %v2324_v22 = vpop.eup %2323  ;;  %v1330_v59 = vpop.permute.xlu0 %1329  ;;  %v926_v14 = vld [vmem:[#allocation3 + $0x30] sm:$0xff] }
 0x468   : > { %2327 = vpow2.f32 %v1488_v24  ;;  %1142 = vadd.xlane.f32.xlu0 %v1141_v17  ;;  %v1316_v29 = vsel %vm345_vm1, %v2324_v22, 0.0  ;;  %v958_v18 = vmul.f32 %v2838_v31, %v926_v14 }
 0x469   : > { %2196 = vmatmul.mubr.msk.bf16.vlgmr.msra.gmra.mrb[16].mxu0 %vm345_vm1, %v1150_v19 }
 0x46a   : > { %2206 = vmatpush3.bf16.msra.mxu0 %v1330_v59  ;;  %2207 = vmatprep.mubr.msk.bf16.mxu0 %vm2396_vm0, %v2395_v0 }
 0x46b   : > { %2217 = vmatprep.subr.bf16.mxu0 %v2395_v0  ;;  %v1662_v42 = vpop.permute.xlu0 %1661 }
 0x46c   : > { %1317 = vadd.xlane.f32.xlu0 %v1316_v29  ;;  %v1665_v15 = vsub.f32 %v2674_v2, %v1662_v42 }
 0x46e   : > { %v2326_v61 = vpop.eup %2325  ;;  %v1668_v38 = vmul.f32 1.442695, %v1665_v15 }
 0x46f   : > { %v1328_v54 = vpack.c.bf16 %v2326_v61, %v2324_v22  ;;  %v1686_v13 = vpop.permute.xlu0 %1685  ;;  %v1319_v58 = vsel %vm345_vm1, %v2326_v61, 0.0  ;;  %v1105_v61 = vld [vmem:[#allocation3 + $0x48] sm:$0xff] }
 0x471   : > { %2208 = vmatmul.mubr.msk.bf16.vlgmr.msra.gmra.mrb[20].mxu0 %vm345_vm1, %v1328_v54  ;;  %v1137_v54 = vmul.f32 %v2803_v28, %v1105_v61 }
 0x472   : > { %v2328_v23 = vpop.eup %2327  ;;  %2219 = vmatprep.mubr.msk.bf16.mxu0 %vm2396_vm0, %v2395_v0 }
 0x473   : > { %v1494_v26 = vsel %vm345_vm1, %v2328_v23, 0.0  ;;  %v2894_v48 = vpop.permute.xlu0 %846 }
 0x474   : > { %1495 = vadd.xlane.f32.xlu0 %v1494_v26  ;;  %v1282_v26 = vld [vmem:[#allocation3 + $0x50] sm:$0xff] }
 0x477   : > { %v2896_v36 = vpop.permute.xlu0 %851 }
 0x479   : > { %608 = vadd.xlane.f32.xlu1 %v607_v33 }
 0x47b   : > { %v2898_v27 = vpop.permute.xlu0 %1029 }
 0x47d   : > { %783 = vadd.xlane.f32.xlu1 %v782_v51  ;;  %v1314_v51 = vmul.f32 %v2806_v32, %v1282_v26  ;;  %v748_v32 = vld [vmem:[#allocation3 + $0x20] sm:$0xff] }
 0x47f   : > { %v2900_v37 = vpop.permute.xlu0 %1207 }
 0x481   : > { %786 = vadd.xlane.f32.xlu1 %v785_v53 }
 0x483   : > { %v2902_v21 = vpop.permute.xlu0 %1380 }
 0x485   : > { %964 = vadd.xlane.f32.xlu1 %v963_v5 }
 0x487   : > { %v2904_v45 = vpop.permute.xlu0 %1558 }
 0x489   : > { %1139 = vadd.xlane.f32.xlu1 %v1138_v30  ;;  %v1460_v30 = vld [vmem:[#allocation3 + $0x60] sm:$0xff] }
 0x48d   : > { %1320 = vadd.xlane.f32.xlu1 %v1319_v58 }
 0x4b4   : > { %v606_v49 = vpop.xlane.xlu0 %605 }
 0x4b5   : > { %v610_v50 = vadd.f32 %v606_v49, %v602_v47  ;;  %v571_v47 = vld [vmem:[#allocation3 + $0x18] sm:$0xff] }
 0x4b6   : > { %v603_v49 = vmul.f32 %v2757_v7, %v571_v47  ;;  %v664_v47 = vld [vmem:[#allocation4] sm:$0xff] }
 0x4b7   : > { %612 = vst.msk [vmem:[#allocation3 + $0x10] sm:$0xff] %vm294_vm2, %v610_v50 }
 0x4bc   : > { %v1484_v52 = vpop.permute.xlu1 %1483 }
 0x4bd   : > { %v1487_v12 = vsub.f32 %v2728_v39, %v1484_v52 }
 0x4bf   : > { %v1490_v57 = vmul.f32 1.442695, %v1487_v12  ;;  %v780_v12 = vmul.f32 %v2794_v43, %v748_v32 }
 0x4c0   : > { %v1657_v35 = vpop.permute.xlu1 %1656 }
 0x4c1   : > { %2329 = vpow2.f32 %v1490_v57  ;;  %v1664_v62 = vsub.f32 %v2670_v63, %v1657_v35  ;;  %v749_v35 = vld [vmem:[#allocation3 + $0x28] sm:$0xff] }
 0x4c3   : > { %v1666_v56 = vmul.f32 1.442695, %v1664_v62 }
 0x4c4   : > { %v1508_v1 = vpop.permute.xlu1 %1507 }
 0x4c5   : > { %2218 = vmatpush3.bf16.msra.mxu0 %v1508_v1  ;;  %2331 = vpow2.f32 %v1666_v56  ;;  %v927_v56 = vld [vmem:[#allocation3 + $0x38] sm:$0xff] }
 0x4c6   : > { %2229 = vmatprep.subr.bf16.mxu0 %v2395_v0  ;;  %2333 = vpow2.f32 %v1668_v38  ;;  %v959_v7 = vmul.f32 %v2800_v25, %v927_v56  ;;  %v1652_v56 = vmul.f32 1.442695, %v1649_v11 }
 0x4c8   : > { %v2926_v59 = vpop.permute.xlu1 %1024 }
 0x4cb   : > { %v2330_v55 = vpop.eup %2329 }
 0x4cc   : > { %v1497_v4 = vsel %vm345_vm1, %v2330_v55, 0.0  ;;  %v1506_v9 = vpack.c.bf16 %v2330_v55, %v2328_v23  ;;  %v2930_v31 = vpop.permute.xlu1 %1202  ;;  %v1104_v55 = vld [vmem:[#allocation3 + $0x40] sm:$0xff] }
 0x4cd   : > { %1498 = vadd.xlane.f32.xlu1 %v1497_v4  ;;  %v1136_v43 = vmul.f32 %v2845_v40, %v1104_v55  ;;  %v1765_v55 = vld [vmem:[#allocation3 + $0x8] sm:$0xff] }
 0x4ce   : > { %2220 = vmatmul.mubr.msk.bf16.vlgmr.msra.gmra.mrb[24].mxu0 %vm345_vm1, %v1506_v9 }
 0x4cf   : > { %2230 = vmatpush3.bf16.msra.mxu0 %v1686_v13  ;;  %2231 = vmatprep.mubr.msk.bf16.mxu0 %vm2396_vm0, %v2395_v0  ;;  %v2916_v63 = vpop.eup %2331  ;;  %v1492_v13 = vmul.f32 %v2810_v44, %v1460_v30  ;;  %v781_v44 = vmul.f32 %v2797_v16, %v749_v35  ;;  %v1461_v30 = vld [vmem:[#allocation3 + $0x68] sm:$0xff] }
 0x4d0   : > { %v2918_v2 = vpop.eup %2333  ;;  %v2934_v42 = vpop.permute.xlu1 %1385 }
 0x4d1   : > { %v1684_v39 = vpack.c.bf16 %v2918_v2, %v2916_v63 }
 0x4d4   : > { %v2938_v28 = vpop.permute.xlu1 %1563 }
 0x4d6   : > { %2232 = vmatmul.mubr.msk.bf16.vlgmr.msra.gmra.mrb[28].mxu0 %vm345_vm1, %v1684_v39  ;;  %v1283_v39 = vld [vmem:[#allocation3 + $0x58] sm:$0xff] }
 0x4d7   : > { %v1315_v16 = vmul.f32 %v2850_v41, %v1283_v39 }
 0x4e5   : > { %v962_v24 = vpop.xlane.xlu0 %961 }
 0x4e6   : > { %v966_v17 = vadd.f32 %v962_v24, %v958_v18 }
 0x4e8   : > { %968 = vst.msk [vmem:[#allocation3 + $0x30] sm:$0xff] %vm294_vm2, %v966_v17 }
 0x4ed   : > { %v657_v19 = vpop.f32.mrb[4].mxu0 }
 0x4ee   : > { %680 = vrot.lane.b32.xlu1 %v657_v19, %s2403_s27  ;;  %v2161_v0 = vpop.f32.mrb[5].mxu0 }
 0x4ef   : > { %v660_v22 = vpop.f32.mrb[6].mxu0 }
 0x4f0   : > { %682 = vrot.lane.b32.xlu0 %v660_v22, %s2403_s27  ;;  %v2162_v29 = vpop.f32.mrb[7].mxu0 }
 0x4f5   : > { %v1143_v23 = vpop.xlane.xlu0 %1142 }
 0x4f6   : > { %v1145_v33 = vadd.f32 %v1143_v23, %v1137_v54 }
 0x4f8   : > { %1147 = vst.msk [vmem:[#allocation3 + $0x48] sm:$0xff] %vm294_vm2, %v1145_v33 }
 0x4f9   : > { %v1318_v53 = vpop.xlane.xlu0 %1317 }
 0x4fa   : > { %v1322_v5 = vadd.f32 %v1318_v53, %v1314_v51 }
 0x4fc   : > { %1324 = vst.msk [vmem:[#allocation3 + $0x50] sm:$0xff] %vm294_vm2, %v1322_v5 }
 0x501   : > { %v1496_v58 = vpop.xlane.xlu0 %1495 }
 0x502   : > { %v1500_v46 = vadd.f32 %v1496_v58, %v1492_v13  ;;  %v1493_v13 = vmul.f32 %v2859_v20, %v1461_v30  ;;  %v1672_v20 = vsel %vm345_vm1, %v2916_v63, 0.0  ;;  %v1845_v30 = vld [vmem:[#allocation3 + $0x48] sm:$0xff] }
 0x504   : > { %1502 = vst.msk [vmem:[#allocation3 + $0x60] sm:$0xff] %vm294_vm2, %v1500_v46 }
 0x506   : > { %v609_v50 = vpop.xlane.xlu1 %608 }
 0x507   : > { %v611_v52 = vadd.f32 %v609_v50, %v603_v49  ;;  %v676_v49 = vmul.f32 %v2834_v34, %v664_v47  ;;  %v665_v50 = vld [vmem:[#allocation4 + $0x8] sm:$0xff]  ;;  %v1648_v34 = vsub.f32 %v2750_v3, %v2755_v6  ;;  %v1764_v6 = vld [vmem:[#allocation3] sm:$0xff]  ;;  %v1864_v47 = vld [vmem:[#allocation3 + $0x50] sm:$0xff] }
 0x509   : > { %613 = vst.msk [vmem:[#allocation3 + $0x18] sm:$0xff] %vm294_vm2, %v611_v52  ;;  %v677_v52 = vmul.f32 %v2843_v60, %v665_v50  ;;  %v1650_v60 = vmul.f32 1.442695, %v1648_v34 }
 0x50a   : > { %v784_v57 = vpop.xlane.xlu1 %783 }
 0x50b   : > { %v788_v15 = vadd.f32 %v784_v57, %v780_v12  ;;  %2335 = vpow2.f32 %v1650_v60 }
 0x50c   : > { %2337 = vpow2.f32 %v1652_v56 }
 0x50d   : > { %790 = vst.msk [vmem:[#allocation3 + $0x20] sm:$0xff] %vm294_vm2, %v788_v15  ;;  %v1675_v15 = vsel %vm345_vm1, %v2918_v2, 0.0  ;;  %2339 = vrcp.f32 %v1764_v6 }
 0x50e   : > { %v787_v62 = vpop.xlane.xlu1 %786  ;;  %2341 = vrcp.f32 %v1765_v55 }
 0x50f   : > { %v789_v1 = vadd.f32 %v787_v62, %v781_v44 }
 0x511   : > { %791 = vst.msk [vmem:[#allocation3 + $0x28] sm:$0xff] %vm294_vm2, %v789_v1 }
 0x512   : > { %v965_v38 = vpop.xlane.xlu1 %964 }
 0x513   : > { %v967_v4 = vadd.f32 %v965_v38, %v959_v7 }
 0x515   : > { %969 = vst.msk [vmem:[#allocation3 + $0x38] sm:$0xff] %vm294_vm2, %v967_v4  ;;  %v1784_v4 = vld [vmem:[#allocation3 + $0x10] sm:$0xff] }
 0x516   : > { %v1140_v9 = vpop.xlane.xlu1 %1139  ;;  %2343 = vrcp.f32 %v1784_v4 }
 0x517   : > { %v1144_v14 = vadd.f32 %v1140_v9, %v1136_v43  ;;  %v2983_v9 = vpop.eup %2335 }
 0x519   : > { %1146 = vst.msk [vmem:[#allocation3 + $0x40] sm:$0xff] %vm294_vm2, %v1144_v14  ;;  %v1785_v14 = vld [vmem:[#allocation3 + $0x18] sm:$0xff] }
 0x51a   : > { %v1321_v18 = vpop.xlane.xlu1 %1320  ;;  %2345 = vrcp.f32 %v1785_v14 }
 0x51b   : > { %v1323_v24 = vadd.f32 %v1321_v18, %v1315_v16  ;;  %v2986_v18 = vpop.eup %2337 }
 0x51d   : > { %1325 = vst.msk [vmem:[#allocation3 + $0x58] sm:$0xff] %vm294_vm2, %v1323_v24 }
 0x526   : > { %v835_v17 = vpop.f32.mrb[8].mxu0 }
 0x527   : > { %858 = vrot.lane.b32.xlu0 %v835_v17, %s2402_s26  ;;  %v2173_v25 = vpop.f32.mrb[9].mxu0  ;;  %v1804_v17 = vld [vmem:[#allocation3 + $0x20] sm:$0xff] }
 0x528   : > { %v838_v19 = vpop.f32.mrb[10].mxu0  ;;  %2347 = vrcp.f32 %v1804_v17 }
 0x529   : > { %v2174_v0 = vpop.f32.mrb[11].mxu0 }
 0x52a   : > { %v1805_v0 = vld [vmem:[#allocation3 + $0x28] sm:$0xff] }
 0x52b   : > { %860 = vrot.lane.b32.xlu0 %v838_v19, %s2402_s26  ;;  %2349 = vrcp.f32 %v1805_v0 }
 0x532   : > { %v1013_v40 = vpop.f32.mrb[12].mxu0 }
 0x533   : > { %1036 = vrot.lane.b32.xlu1 %v1013_v40, %s2401_s25  ;;  %v2185_v22 = vpop.f32.mrb[13].mxu0 }
 0x534   : > { %v1016_v29 = vpop.f32.mrb[14].mxu0 }
 0x535   : > { %v2186_v61 = vpop.f32.mrb[15].mxu0 }
 0x536   : > { %v1824_v61 = vld [vmem:[#allocation3 + $0x30] sm:$0xff] }
 0x537   : > { %1038 = vrot.lane.b32.xlu1 %v1016_v29, %s2401_s25  ;;  %2351 = vrcp.f32 %v1824_v61 }
 0x53c   : > { %v1191_v41 = vpop.f32.mrb[16].mxu0 }
 0x53d   : > { %1214 = vrot.lane.b32.xlu1 %v1191_v41, %s2400_s24  ;;  %v2197_v54 = vpop.f32.mrb[17].mxu0 }
 0x53e   : > { %v1194_v23 = vpop.f32.mrb[18].mxu0  ;;  %v2340_v54 = vpop.eup %2339 }
 0x53f   : > { %v2198_v26 = vpop.f32.mrb[19].mxu0 }
 0x541   : > { %1216 = vrot.lane.b32.xlu1 %v1194_v23, %s2400_s24  ;;  %v1825_v23 = vld [vmem:[#allocation3 + $0x38] sm:$0xff] }
 0x542   : > { %2353 = vrcp.f32 %v1825_v23 }
 0x544   : > { %v1369_v33 = vpop.f32.mrb[20].mxu0 }
 0x545   : > { %1392 = vrot.lane.b32.xlu0 %v1369_v33, %s2405_s5  ;;  %v2209_v51 = vpop.f32.mrb[21].mxu0 }
 0x546   : > { %v1372_v53 = vpop.f32.mrb[22].mxu0  ;;  %v1844_v51 = vld [vmem:[#allocation3 + $0x40] sm:$0xff] }
 0x547   : > { %1394 = vrot.lane.b32.xlu1 %v1372_v53, %s2405_s5  ;;  %v2210_v5 = vpop.f32.mrb[23].mxu0  ;;  %2355 = vrcp.f32 %v1844_v51 }
 0x548   : > { %2357 = vrcp.f32 %v1845_v30 }
 0x549   : > { %2359 = vrcp.f32 %v1864_v47 }
 0x55a   : > { %v1499_v58 = vpop.xlane.xlu1 %1498 }
 0x55b   : > { %v1501_v46 = vadd.f32 %v1499_v58, %v1493_v13 }
 0x55d   : > { %1503 = vst.msk [vmem:[#allocation3 + $0x68] sm:$0xff] %vm294_vm2, %v1501_v46 }
 0x560   : > { %v681_v32 = vpop.permute.xlu1 %680 }
 0x561   : > { %v686_v12 = vadd.f32 %v681_v32, %v676_v49 }
 0x562   : > { %v683_v57 = vpop.permute.xlu0 %682 }
 0x563   : > { %689 = vst.msk [vmem:[#allocation4] sm:$0xff] %vm688_vm3, %v686_v12  ;;  %v687_v35 = vadd.f32 %v683_v57, %v677_v52  ;;  %v1884_v57 = vld [vmem:[#allocation3 + $0x60] sm:$0xff] }
 0x564   : > { %1673 = vadd.xlane.f32.xlu0 %v1672_v20  ;;  %v1885_v20 = vld [vmem:[#allocation3 + $0x68] sm:$0xff] }
 0x565   : > { %690 = vst.msk [vmem:[#allocation4 + $0x8] sm:$0xff] %vm688_vm3, %v687_v35 }
 0x56a   : > { %v842_v44 = vld [vmem:[#allocation4] sm:$0xff] }
 0x56b   : > { %1676 = vadd.xlane.f32.xlu1 %v1675_v15  ;;  %v854_v62 = vmul.f32 %v2894_v48, %v842_v44 }
 0x56c   : > { %v843_v1 = vld [vmem:[#allocation4 + $0x8] sm:$0xff] }
 0x56d   : > { %v855_v2 = vmul.f32 %v2896_v36, %v843_v1 }
 0x599   : > { %v859_v63 = vpop.permute.xlu0 %858 }
 0x59a   : > { %v864_v7 = vadd.f32 %v859_v63, %v854_v62 }
 0x59c   : > { %867 = vst.msk [vmem:[#allocation4] sm:$0xff] %vm866_vm4, %v864_v7 }
 0x59d   : > { %v861_v38 = vpop.permute.xlu0 %860 }
 0x59e   : > { %v865_v3 = vadd.f32 %v861_v38, %v855_v2 }
 0x5a0   : > { %868 = vst.msk [vmem:[#allocation4 + $0x8] sm:$0xff] %vm866_vm4, %v865_v3 }
 0x5a1   : > { %v1547_v48 = vpop.f32.mrb[24].mxu0 }
 0x5a2   : > { %1570 = vrot.lane.b32.xlu0 %v1547_v48, %s2404_s4  ;;  %v2221_v8 = vpop.f32.mrb[25].mxu0  ;;  %v1638_v48 = vld [vmem:[#allocation3 + $0x70] sm:$0xff] }
 0x5a3   : > { %v1550_v10 = vpop.f32.mrb[26].mxu0  ;;  %v1020_v11 = vld [vmem:[#allocation4] sm:$0xff]  ;;  %v1670_v55 = vmul.f32 %v2983_v9, %v1638_v48 }
 0x5a4   : > { %1572 = vrot.lane.b32.xlu1 %v1550_v10, %s2404_s4  ;;  %v2222_v43 = vpop.f32.mrb[27].mxu0  ;;  %v1032_v36 = vmul.f32 %v2926_v59, %v1020_v11 }
 0x5a5   : > { %v1037_v39 = vpop.permute.xlu1 %1036 }
 0x5a6   : > { %v1042_v16 = vadd.f32 %v1037_v39, %v1032_v36  ;;  %1736 = vperm.xlu0 %2271, %v2983_v9  }
 0x5a7   : > { %v1021_v24 = vld [vmem:[#allocation4 + $0x8] sm:$0xff] }
 0x5a8   : > { %1045 = vst.msk [vmem:[#allocation4] sm:$0xff] %vm1044_vm5, %v1042_v16  ;;  %1741 = vperm.xlu1 %2270, %v2986_v18   ;;  %v1033_v59 = vmul.f32 %v2898_v27, %v1021_v24  ;;  %v2342_v27 = vpop.eup %2341 }
 0x5a9   : > { %v1039_v25 = vpop.permute.xlu1 %1038  ;;  %v1725_v19 = vpop.f32.mrb[28].mxu0 }
 0x5aa   : > { %v1043_v40 = vadd.f32 %v1039_v25, %v1033_v59  ;;  %1748 = vrot.lane.b32.xlu0 %v1725_v19, %s2399_s23  ;;  %v2233_v22 = vpop.f32.mrb[29].mxu0  ;;  %v2344_v5 = vpop.eup %2343 }
 0x5ab   : > { %v1728_v29 = vpop.f32.mrb[30].mxu0  ;;  %v2346_v58 = vpop.eup %2345 }
 0x5ac   : > { %1046 = vst.msk [vmem:[#allocation4 + $0x8] sm:$0xff] %vm1044_vm5, %v1043_v40  ;;  %1750 = vrot.lane.b32.xlu1 %v1728_v29, %s2399_s23  ;;  %v2234_v41 = vpop.f32.mrb[31].mxu0  ;;  %v2348_v50 = vpop.eup %2347 }
 0x5ad   : > { %v2350_v12 = vpop.eup %2349 }
 0x5ae   : > { %1770 = vperm.xlu0 %2271, %v2340_v54   ;;  %v2352_v35 = vpop.eup %2351 }
 0x5af   : > { %v1198_v26 = vld [vmem:[#allocation4] sm:$0xff]  ;;  %v1215_v33 = vpop.permute.xlu1 %1214  ;;  %v2354_v15 = vpop.eup %2353 }
 0x5b0   : > { %v1210_v53 = vmul.f32 %v2930_v31, %v1198_v26  ;;  %1775 = vperm.xlu1 %2270, %v2342_v27   ;;  %v1865_v31 = vld [vmem:[#allocation3 + $0x58] sm:$0xff]  ;;  %v2356_v44 = vpop.eup %2355 }
 0x5b1   : > { %2361 = vrcp.f32 %v1865_v31  ;;  %v2358_v56 = vpop.eup %2357 }
 0x5b2   : > { %v1220_v13 = vadd.f32 %v1215_v33, %v1210_v53  ;;  %1790 = vperm.xlu0 %2271, %v2344_v5   ;;  %2363 = vrcp.f32 %v1884_v57  ;;  %v2360_v7 = vpop.eup %2359 }
 0x5b3   : > { %v1199_v46 = vld [vmem:[#allocation4 + $0x8] sm:$0xff]  ;;  %v1217_v32 = vpop.permute.xlu1 %1216  ;;  %2365 = vrcp.f32 %v1885_v20 }
 0x5b4   : > { %1223 = vst.msk [vmem:[#allocation4] sm:$0xff] %vm1222_vm6, %v1220_v13  ;;  %v1211_v49 = vmul.f32 %v2900_v37, %v1199_v46  ;;  %1795 = vperm.xlu1 %2270, %v2346_v58  }
 0x5b6   : > { %v1221_v52 = vadd.f32 %v1217_v32, %v1211_v49  ;;  %1810 = vperm.xlu0 %2271, %v2348_v50  }
 0x5b7   : > { %v1393_v60 = vpop.permute.xlu0 %1392 }
 0x5b8   : > { %1224 = vst.msk [vmem:[#allocation4 + $0x8] sm:$0xff] %vm1222_vm6, %v1221_v52  ;;  %1815 = vperm.xlu1 %2270, %v2350_v12  }
 0x5b9   : > { %v1395_v2 = vpop.permute.xlu1 %1394 }
 0x5ba   : > { %1830 = vperm.xlu0 %2271, %v2352_v35  }
 0x5bb   : > { %v1376_v37 = vld [vmem:[#allocation4] sm:$0xff]  ;;  %v2362_v3 = vpop.eup %2361 }
 0x5bc   : > { %v1388_v34 = vmul.f32 %v2902_v21, %v1376_v37  ;;  %1835 = vperm.xlu1 %2270, %v2354_v15   ;;  %v2364_v21 = vpop.eup %2363 }
 0x5bd   : > { %v2366_v6 = vpop.eup %2365 }
 0x5be   : > { %v1398_v62 = vadd.f32 %v1393_v60, %v1388_v34  ;;  %1850 = vperm.xlu0 %2271, %v2356_v44  }
 0x5bf   : > { %v1377_v63 = vld [vmem:[#allocation4 + $0x8] sm:$0xff] }
 0x5c0   : > { %1401 = vst.msk [vmem:[#allocation4] sm:$0xff] %vm1400_vm7, %v1398_v62  ;;  %v1389_v1 = vmul.f32 %v2934_v42, %v1377_v63  ;;  %1855 = vperm.xlu1 %2270, %v2358_v56   ;;  %v1639_v42 = vld [vmem:[#allocation3 + $0x78] sm:$0xff] }
 0x5c1   : > { %v1671_v11 = vmul.f32 %v2986_v18, %v1639_v42 }
 0x5c2   : > { %v1399_v38 = vadd.f32 %v1395_v2, %v1389_v1  ;;  %1870 = vperm.xlu0 %2271, %v2360_v7  }
 0x5c4   : > { %1402 = vst.msk [vmem:[#allocation4 + $0x8] sm:$0xff] %vm1400_vm7, %v1399_v38  ;;  %1875 = vperm.xlu1 %2270, %v2362_v3  }
 0x5c6   : > { %1890 = vperm.xlu0 %2271, %v2364_v21  }
 0x5c7   : > { %v1554_v9 = vld [vmem:[#allocation4] sm:$0xff] }
 0x5c8   : > { %1895 = vperm.xlu1 %2270, %v2366_v6   ;;  %v1566_v17 = vmul.f32 %v2904_v45, %v1554_v9 }
 0x5cb   : > { %v1555_v24 = vld [vmem:[#allocation4 + $0x8] sm:$0xff] }
 0x5cc   : > { %v1567_v18 = vmul.f32 %v2938_v28, %v1555_v24 }
 0x5f1   : > { %v1674_v8 = vpop.xlane.xlu0 %1673 }
 0x5f2   : > { %v1678_v10 = vadd.f32 %v1674_v8, %v1670_v55 }
 0x5f4   : > { %1680 = vst.msk [vmem:[#allocation3 + $0x70] sm:$0xff] %vm294_vm2, %v1678_v10 }
 0x5f8   : > { %v1677_v4 = vpop.xlane.xlu1 %1676 }
 0x5f9   : > { %v1679_v43 = vadd.f32 %v1677_v4, %v1671_v11 }
 0x5fb   : > { %v1904_v36 = vld [vmem:[#allocation3 + $0x70] sm:$0xff]  ;;  %1681 = vst.msk [vmem:[#allocation3 + $0x78] sm:$0xff] %vm294_vm2, %v1679_v43 }
 0x5fc   : > { %2367 = vrcp.f32 %v1904_v36 }
 0x602   : > { %v1905_v39 = vld [vmem:[#allocation3 + $0x78] sm:$0xff] }
 0x603   : > { %2369 = vrcp.f32 %v1905_v39 }
 0x606   : > { %v2368_v14 = vpop.eup %2367 }
 0x607   : > { %1910 = vperm.xlu0 %2271, %v2368_v14  }
 0x60d   : > { %v2370_v16 = vpop.eup %2369 }
 0x60e   : > { %1915 = vperm.xlu1 %2270, %v2370_v16  }
 0x614   : > { %v1571_v59 = vpop.permute.xlu0 %1570 }
 0x615   : > { %v1576_v25 = vadd.f32 %v1571_v59, %v1566_v17 }
 0x616   : > { %v1573_v19 = vpop.permute.xlu1 %1572 }
 0x617   : > { %1579 = vst.msk [vmem:[#allocation4] sm:$0xff] %vm1578_vm8, %v1576_v25  ;;  %v1577_v0 = vadd.f32 %v1573_v19, %v1567_v18 }
 0x619   : > { %1580 = vst.msk [vmem:[#allocation4 + $0x8] sm:$0xff] %vm1578_vm8, %v1577_v0 }
 0x61e   : > { %v1732_v22 = vld [vmem:[#allocation4] sm:$0xff] }
 0x620   : > { %v1733_v41 = vld [vmem:[#allocation4 + $0x8] sm:$0xff] }
 0x625   : > { %v1737_v40 = vpop.permute.xlu0 %1736 }
 0x626   : > { %v1744_v61 = vmul.f32 %v1737_v40, %v1732_v22 }
 0x627   : > { %v1742_v29 = vpop.permute.xlu1 %1741 }
 0x628   : > { %v1745_v23 = vmul.f32 %v1742_v29, %v1733_v41 }
 0x629   : > { %v1749_v54 = vpop.permute.xlu0 %1748 }
 0x62a   : > { %v1754_v45 = vadd.f32 %v1749_v54, %v1744_v61 }
 0x62b   : > { %v1751_v27 = vpop.permute.xlu1 %1750 }
 0x62c   : > { %1757 = vst.msk [vmem:[#allocation4] sm:$0xff] %vm1756_vm9, %v1754_v45  ;;  %v1755_v26 = vadd.f32 %v1751_v27, %v1745_v23 }
 0x62d   : > { %v1771_v33 = vpop.permute.xlu0 %1770 }
 0x62e   : > { %1758 = vst.msk [vmem:[#allocation4 + $0x8] sm:$0xff] %vm1756_vm9, %v1755_v26 }
 0x62f   : > { %v1776_v5 = vpop.permute.xlu1 %1775 }
 0x631   : > { %v1791_v58 = vpop.permute.xlu0 %1790 }
 0x633   : > { %v1762_v28 = vld [vmem:[#allocation4] sm:$0xff]  ;;  %v1796_v49 = vpop.permute.xlu1 %1795 }
 0x634   : > { %v1778_v51 = vmul.f32 %v1771_v33, %v1762_v28 }
 0x635   : > { %v1763_v53 = vld [vmem:[#allocation4 + $0x8] sm:$0xff]  ;;  %v1811_v31 = vpop.permute.xlu0 %1810 }
 0x636   : > { %1780 = vst.msk [vmem:[#allocation4] sm:$0xff] %vm345_vm1, %v1778_v51  ;;  %v1779_v30 = vmul.f32 %v1776_v5, %v1763_v53 }
 0x637   : > { %v1816_v57 = vpop.permute.xlu1 %1815 }
 0x638   : > { %1781 = vst.msk [vmem:[#allocation4 + $0x8] sm:$0xff] %vm345_vm1, %v1779_v30 }
 0x639   : > { %v1831_v15 = vpop.permute.xlu0 %1830 }
 0x63b   : > { %v1836_v44 = vpop.permute.xlu1 %1835 }
 0x63d   : > { %v1782_v13 = vld [vmem:[#allocation4] sm:$0xff]  ;;  %v1851_v56 = vpop.permute.xlu0 %1850 }
 0x63e   : > { %v1798_v46 = vmul.f32 %v1791_v58, %v1782_v13 }
 0x63f   : > { %v1783_v47 = vld [vmem:[#allocation4 + $0x8] sm:$0xff]  ;;  %v1856_v7 = vpop.permute.xlu1 %1855 }
 0x640   : > { %1800 = vst.msk [vmem:[#allocation4] sm:$0xff] %vm688_vm3, %v1798_v46  ;;  %v1799_v50 = vmul.f32 %v1796_v49, %v1783_v47 }
 0x641   : > { %v1871_v3 = vpop.permute.xlu0 %1870 }
 0x642   : > { %1801 = vst.msk [vmem:[#allocation4 + $0x8] sm:$0xff] %vm688_vm3, %v1799_v50 }
 0x643   : > { %v1876_v48 = vpop.permute.xlu1 %1875 }
 0x645   : > { %v1891_v10 = vpop.permute.xlu0 %1890 }
 0x647   : > { %v1802_v32 = vld [vmem:[#allocation4] sm:$0xff]  ;;  %v1896_v4 = vpop.permute.xlu1 %1895 }
 0x648   : > { %v1818_v52 = vmul.f32 %v1811_v31, %v1802_v32 }
 0x649   : > { %v1803_v12 = vld [vmem:[#allocation4 + $0x8] sm:$0xff] }
 0x64a   : > { %1820 = vst.msk [vmem:[#allocation4] sm:$0xff] %vm866_vm4, %v1818_v52  ;;  %v1819_v35 = vmul.f32 %v1816_v57, %v1803_v12 }
 0x64c   : > { %1821 = vst.msk [vmem:[#allocation4 + $0x8] sm:$0xff] %vm866_vm4, %v1819_v35 }
 0x651   : > { %v1822_v20 = vld [vmem:[#allocation4] sm:$0xff] }
 0x652   : > { %v1838_v37 = vmul.f32 %v1831_v15, %v1822_v20 }
 0x653   : > { %v1823_v34 = vld [vmem:[#allocation4 + $0x8] sm:$0xff] }
 0x654   : > { %1840 = vst.msk [vmem:[#allocation4] sm:$0xff] %vm1044_vm5, %v1838_v37  ;;  %v1839_v60 = vmul.f32 %v1836_v44, %v1823_v34 }
 0x656   : > { %1841 = vst.msk [vmem:[#allocation4 + $0x8] sm:$0xff] %vm1044_vm5, %v1839_v60 }
 0x65b   : > { %v1842_v62 = vld [vmem:[#allocation4] sm:$0xff] }
 0x65c   : > { %v1858_v63 = vmul.f32 %v1851_v56, %v1842_v62 }
 0x65d   : > { %v1843_v1 = vld [vmem:[#allocation4 + $0x8] sm:$0xff] }
 0x65e   : > { %1860 = vst.msk [vmem:[#allocation4] sm:$0xff] %vm1222_vm6, %v1858_v63  ;;  %v1859_v2 = vmul.f32 %v1856_v7, %v1843_v1 }
 0x660   : > { %1861 = vst.msk [vmem:[#allocation4 + $0x8] sm:$0xff] %vm1222_vm6, %v1859_v2 }
 0x665   : > { %v1862_v38 = vld [vmem:[#allocation4] sm:$0xff] }
 0x666   : > { %v1878_v21 = vmul.f32 %v1871_v3, %v1862_v38 }
 0x667   : > { %v1863_v6 = vld [vmem:[#allocation4 + $0x8] sm:$0xff] }
 0x668   : > { %1880 = vst.msk [vmem:[#allocation4] sm:$0xff] %vm1400_vm7, %v1878_v21  ;;  %v1879_v55 = vmul.f32 %v1876_v48, %v1863_v6 }
 0x66a   : > { %1881 = vst.msk [vmem:[#allocation4 + $0x8] sm:$0xff] %vm1400_vm7, %v1879_v55 }
 0x66f   : > { %v1882_v8 = vld [vmem:[#allocation4] sm:$0xff] }
 0x670   : > { %v1898_v42 = vmul.f32 %v1891_v10, %v1882_v8 }
 0x671   : > { %v1883_v11 = vld [vmem:[#allocation4 + $0x8] sm:$0xff] }
 0x672   : > { %1900 = vst.msk [vmem:[#allocation4] sm:$0xff] %vm1578_vm8, %v1898_v42  ;;  %v1899_v43 = vmul.f32 %v1896_v4, %v1883_v11 }
 0x674   : > { %1901 = vst.msk [vmem:[#allocation4 + $0x8] sm:$0xff] %vm1578_vm8, %v1899_v43 }
 0x679   : > { %v1902_v36 = vld [vmem:[#allocation4] sm:$0xff] }
 0x67b   : > { %v1903_v16 = vld [vmem:[#allocation4 + $0x8] sm:$0xff] }
 0x686   : > { %v1911_v39 = vpop.permute.xlu0 %1910 }
 0x687   : > { %v1918_v14 = vmul.f32 %v1911_v39, %v1902_v36 }
 0x689   : > { %1920 = vst.msk [vmem:[#allocation4] sm:$0xff] %vm1756_vm9, %v1918_v14 }
 0x68d   : > { %v1916_v9 = vpop.permute.xlu1 %1915 }
 0x68e   : > { %v1919_v24 = vmul.f32 %v1916_v9, %v1903_v16 }
 0x690   : > { %1921 = vst.msk [vmem:[#allocation4 + $0x8] sm:$0xff] %vm1756_vm9, %v1919_v24  ;;  %v1922_v17 = vld [vmem:[#allocation4] sm:$0xff] }
 0x697   : > { %v1923_v59 = vld [vmem:[#allocation4 + $0x8] sm:$0xff] }
 0x698   : > { %v2105_v25 = vpack.c.bf16 %v1923_v59, %v1922_v17 }
 0x69a   : > { %2106 = vst [vmem:[%s287_s8] sm:$0xff] %v2105_v25  }
 0x69b PF: > { %s13_s14 = sadd.s32 1, %s2393_s14   ;;  %s3045_s12 = smov %s2389_s13 }
 0x69c   : > { %p10_p5 = scmp.ge.s32.totalorder %s13_s14, 4   ;;  %s3046_s13 = smov %s3048_s15 }
 0x69e   :  { %12 = sbr.rel (!%p10_p5) target bundleno = 2 (0x2), region = 90 }

</bundles_post_ra>
